<compile_context>
chip_gen: v7x
topology: tpu7x:2x2x1
jax: 0.10.0
libtpu: 0.0.40
codegen_flags: <defaults>
</compile_context>

<pallas_src>
import jax
import jax.numpy as jnp
from jax.experimental import pallas as pl
from jax.experimental.pallas import tpu as pltpu


def _bottleneck_kernel(x_ref, w1_ref, s1_ref, b1_ref,
                       w2_ref, s2_ref, b2_ref,
                       w3_ref, s3_ref, b3_ref,
                       out_ref, pad_ref):
    """Fused conv1x1+bn+relu -> conv3x3+bn+relu -> conv1x1+bn -> +identity -> relu.

    One grid step processes one batch image (NHWC tile of shape (1, H, W, C)).
    """
    _, H, W, Cin = x_ref.shape
    planes = w1_ref.shape[1]
    Cout = w3_ref.shape[1]

    # --- conv1 (1x1) + bn1 + relu : bf16 MXU matmul over channels, f32 acc ---
    x2d = x_ref[...].reshape(H * W, Cin)                       # bf16
    h1 = jnp.dot(x2d, w1_ref[...], preferred_element_type=jnp.float32)
    h1 = jnp.maximum(h1 * s1_ref[...] + b1_ref[...], 0.0)      # (H*W, planes) f32

    # --- conv2 (3x3, pad=1, stride=1) + bn2 + relu ---
    # Fold the zero halo ring into the value and write the padded slab with a
    # single contiguous block store (no masked ring stores, megacore-safe).
    h1_3d = h1.reshape(H, W, planes).astype(jnp.bfloat16)
    zc = jnp.zeros((H, 1, planes), jnp.bfloat16)
    zr = jnp.zeros((1, W + 2, planes), jnp.bfloat16)
    pad_ref[...] = jnp.concatenate(
        [zr, jnp.concatenate([zc, h1_3d, zc], axis=1), zr], axis=0)

    # 9 accumulating MXU matmuls, one per 3x3 tap, reading straight from the
    # padded scratch (no lane-misaligned concat, no (H*W, 9*planes) buffer).
    # (Tap reshape is free when W % 8 == 0; larger odd widths cost a repack.)
    h2 = None
    for dy in range(3):
        for dx in range(3):
            tap = pad_ref[dy:dy + H, dx:dx + W, :].reshape(H * W, planes)
            part = jnp.dot(tap, w2_ref[dy * 3 + dx],
                           preferred_element_type=jnp.float32)
            h2 = part if h2 is None else h2 + part
    h2 = jnp.maximum(h2 * s2_ref[...] + b2_ref[...], 0.0)      # (H*W, planes) f32

    # --- conv3 (1x1, expand x4) + bn3 ---
    h3 = jnp.dot(h2.astype(jnp.bfloat16), w3_ref[...],
                 preferred_element_type=jnp.float32)
    h3 = h3 * s3_ref[...] + b3_ref[...]                        # (H*W, Cout) f32

    # --- residual add (f32) + relu; identity re-read from VMEM-resident x ---
    identity = x_ref[...].reshape(H * W, Cin).astype(jnp.float32)
    out = jnp.maximum(h3 + identity, 0.0)
    out_ref[...] = out.reshape(1, H, W, Cout).astype(out_ref.dtype)


def _vmem_limit_bytes():
    try:
        cap = int(pltpu.get_tpu_info().vmem_capacity_bytes)
    except Exception:
        cap = 64 * 1024 * 1024      # conservative fallback: fits every TPU gen
    return int(cap * 0.8)


def _build_call(N, H, W, Cin, planes, Cout, single_buffer_weights):
    if single_buffer_weights:
        # Constant-index weights/BN params: single VMEM buffer is enough.
        def const(shape):
            return pl.BlockSpec(shape, lambda b: (0,) * len(shape),
                                pipeline_mode=pl.Buffered(1))
    else:
        def const(shape):
            return pl.BlockSpec(shape, lambda b: (0,) * len(shape))

    return pl.pallas_call(
        _bottleneck_kernel,
        out_shape=jax.ShapeDtypeStruct((N, H, W, Cout), jnp.bfloat16),
        grid=(N,),
        in_specs=[
            pl.BlockSpec((1, H, W, Cin), lambda b: (b, 0, 0, 0)),  # x (per image)
            const((Cin, planes)),                                  # w1
            const((1, planes)), const((1, planes)),                # bn1 scale/bias
            const((9, planes, planes)),                            # w2 (per-tap)
            const((1, planes)), const((1, planes)),                # bn2 scale/bias
            const((planes, Cout)),                                 # w3
            const((1, Cout)), const((1, Cout)),                    # bn3 scale/bias
        ],
        out_specs=pl.BlockSpec((1, H, W, Cout), lambda b: (b, 0, 0, 0)),
        scratch_shapes=[pltpu.VMEM((H + 2, W + 2, planes), jnp.bfloat16)],
        compiler_params=pltpu.CompilerParams(
            dimension_semantics=("parallel",),       # batch independent -> megacore
            vmem_limit_bytes=_vmem_limit_bytes()),
    )


def bottleneck_forward(x_nhwc, params):
    """x_nhwc: (N, H, W, Cin), bf16 preferred.  Returns (N, H, W, Cout) bf16."""
    w1, s1, b1, w2, s2, b2, w3, s3, b3 = params
    N, H, W, Cin = x_nhwc.shape
    planes = w1.shape[1]
    Cout = w3.shape[1]
    assert Cin == Cout, "default Bottleneck (no downsample) needs inplanes == planes*4"

    x_bf = x_nhwc.astype(jnp.bfloat16)           # no-op if caller already uses bf16
    w1_bf = w1.astype(jnp.bfloat16)                              # (Cin, planes)
    w2_bf = w2.reshape(9, planes, planes).astype(jnp.bfloat16)   # per-tap weights
    w3_bf = w3.astype(jnp.bfloat16)                              # (planes, Cout)

    args = (x_bf, w1_bf, s1, b1, w2_bf, s2, b2, w3_bf, s3, b3)
    try:
        return _build_call(N, H, W, Cin, planes, Cout, True)(*args)
    except Exception:
        # Fallback for JAX versions without BlockSpec(pipeline_mode=...).
        return _build_call(N, H, W, Cin, planes, Cout, False)(*args)


def make_params(key, inplanes, planes):
    """Deterministic synthetic weights; BN folded to per-channel scale/bias."""
    eps = 1e-5
    ks = jax.random.split(key, 15)

    def fold_bn(kg, kb, km, kv, c):
        gamma = 1.0 + 0.1 * jax.random.normal(kg, (c,), jnp.float32)
        beta = 0.1 * jax.random.normal(kb, (c,), jnp.float32)
        mean = 0.1 * jax.random.normal(km, (c,), jnp.float32)
        var = jnp.abs(jax.random.normal(kv, (c,), jnp.float32)) + 0.5
        scale = gamma * jax.lax.rsqrt(var + eps)
        bias = beta - mean * scale
        return scale.reshape(1, c), bias.reshape(1, c)

    outplanes = planes * 4
    # conv weights stored pre-transposed for NHWC matmul form
    w1 = 0.1 * jax.random.normal(ks[0], (inplanes, planes), jnp.float32)
    w2 = 0.1 * jax.random.normal(ks[1], (3, 3, planes, planes), jnp.float32)
    w3 = 0.1 * jax.random.normal(ks[2], (planes, outplanes), jnp.float32)
    s1, b1 = fold_bn(ks[3], ks[4], ks[5], ks[6], planes)
    s2, b2 = fold_bn(ks[7], ks[8], ks[9], ks[10], planes)
    s3, b3 = fold_bn(ks[11], ks[12], ks[13], ks[14], outplanes)
    return (w1, s1, b1, w2, s2, b2, w3, s3, b3)


def reference_forward(x_nchw, params):
    """Pure-JAX f32 reference (lax convs, NCHW) for correctness checking."""
    w1, s1, b1, w2, s2, b2, w3, s3, b3 = params
    dn = ("NCHW", "OIHW", "NCHW")

    def conv(x, w_oihw, pad):
        return jax.lax.conv_general_dilated(x, w_oihw, (1, 1), pad,
                                            dimension_numbers=dn)

    def bn(x, s, b):  # s, b are (1, C)
        return x * s.reshape(1, -1, 1, 1) + b.reshape(1, -1, 1, 1)

    w1_o = jnp.transpose(w1, (1, 0))[:, :, None, None]           # (planes,Cin,1,1)
    w2_o = jnp.transpose(w2, (3, 2, 0, 1))                       # (planes,planes,3,3)
    w3_o = jnp.transpose(w3, (1, 0))[:, :, None, None]           # (Cout,planes,1,1)

    out = jax.nn.relu(bn(conv(x_nchw, w1_o, "VALID"), s1, b1))
    out = jax.nn.relu(bn(conv(out, w2_o, ((1, 1), (1, 1))), s2, b2))
    out = bn(conv(out, w3_o, "VALID"), s3, b3)
    return jax.nn.relu(out + x_nchw)


if __name__ == "__main__":
    key = jax.random.PRNGKey(0)
    k_x, k_p = jax.random.split(key)

    planes = 32
    inplanes = planes * 4          # 128 -> lane-dense channels, residual works
    N, H, W = 2, 16, 16

    x_nhwc = jax.random.normal(k_x, (N, H, W, inplanes), jnp.float32)
    params = make_params(k_p, inplanes, planes)

    out = bottleneck_forward(x_nhwc, params)
    out = jax.block_until_ready(out)
    assert out.shape == (N, H, W, inplanes)

    # Reference (test harness only): NCHW f32 lax convs fed the same
    # bf16-rounded input, so the check isolates kernel-internal bf16/MXU error.
    x_ref_nchw = jnp.transpose(
        x_nhwc.astype(jnp.bfloat16).astype(jnp.float32), (0, 3, 1, 2))
    ref_nhwc = jnp.transpose(reference_forward(x_ref_nchw, params), (0, 2, 3, 1))

    out_f32 = out.astype(jnp.float32)
    max_err = jnp.max(jnp.abs(out_f32 - ref_nhwc))
    assert jnp.allclose(out_f32, ref_nhwc, atol=5e-2, rtol=5e-2), \
        f"max err {max_err}"

    print("KERNEL_OK")
</pallas_src>

<mosaic_0001>
module attributes {stable_mosaic.version = 11 : i64} {
  func.func @_bottleneck_kernel(%arg0: i32, %arg1: memref<1x16x16x128xbf16, #tpu.memory_space<vmem>>, %arg2: memref<128x32xbf16, #tpu.memory_space<vmem>>, %arg3: memref<1x32xf32, #tpu.memory_space<vmem>>, %arg4: memref<1x32xf32, #tpu.memory_space<vmem>>, %arg5: memref<9x32x32xbf16, #tpu.memory_space<vmem>>, %arg6: memref<1x32xf32, #tpu.memory_space<vmem>>, %arg7: memref<1x32xf32, #tpu.memory_space<vmem>>, %arg8: memref<32x128xbf16, #tpu.memory_space<vmem>>, %arg9: memref<1x128xf32, #tpu.memory_space<vmem>>, %arg10: memref<1x128xf32, #tpu.memory_space<vmem>>, %arg11: memref<1x16x16x128xbf16, #tpu.memory_space<vmem>>, %arg12: memref<18x18x32xbf16, #tpu.memory_space<vmem>>) attributes {dimension_semantics = [#tpu.dimension_semantics<parallel>], iteration_bounds = array<i64: 2>, scalar_prefetch = 0 : i64, scratch_operands = 1 : i64, tpu.core_type = #tpu.core_type<tc>, window_params = [{transform_indices = @transform_0, window_bounds = array<i64: 1, 16, 16, 128>}, {pipeline_mode = #tpu.pipeline_mode<synchronous>, transform_indices = @transform_1, window_bounds = array<i64: 128, 32>}, {pipeline_mode = #tpu.pipeline_mode<synchronous>, transform_indices = @transform_2, window_bounds = array<i64: 1, 32>}, {pipeline_mode = #tpu.pipeline_mode<synchronous>, transform_indices = @transform_3, window_bounds = array<i64: 1, 32>}, {pipeline_mode = #tpu.pipeline_mode<synchronous>, transform_indices = @transform_4, window_bounds = array<i64: 9, 32, 32>}, {pipeline_mode = #tpu.pipeline_mode<synchronous>, transform_indices = @transform_5, window_bounds = array<i64: 1, 32>}, {pipeline_mode = #tpu.pipeline_mode<synchronous>, transform_indices = @transform_6, window_bounds = array<i64: 1, 32>}, {pipeline_mode = #tpu.pipeline_mode<synchronous>, transform_indices = @transform_7, window_bounds = array<i64: 32, 128>}, {pipeline_mode = #tpu.pipeline_mode<synchronous>, transform_indices = @transform_8, window_bounds = array<i64: 1, 128>}, {pipeline_mode = #tpu.pipeline_mode<synchronous>, transform_indices = @transform_9, window_bounds = array<i64: 1, 128>}, {transform_indices = @transform_10, window_bounds = array<i64: 1, 16, 16, 128>}]} {
    %c0 = arith.constant 0 : index
    %c0_0 = arith.constant 0 : index
    %c0_1 = arith.constant 0 : index
    %c0_2 = arith.constant 0 : index
    %0 = vector.load %arg1[%c0, %c0_0, %c0_1, %c0_2] : memref<1x16x16x128xbf16, #tpu.memory_space<vmem>>, vector<1x16x16x128xbf16>
    %1 = vector.shape_cast %0 : vector<1x16x16x128xbf16> to vector<256x128xbf16>
    %c0_3 = arith.constant 0 : index
    %c0_4 = arith.constant 0 : index
    %2 = vector.load %arg2[%c0_3, %c0_4] : memref<128x32xbf16, #tpu.memory_space<vmem>>, vector<128x32xbf16>
    %cst = arith.constant dense<0.000000e+00> : vector<256x32xf32>
    %3 = tpu.matmul %1, %2, %cst {dimension_numbers = #tpu.dot_dimension_numbers<[1], [0], [0], [1], [0, 0, 1, 1], [], []>} : vector<256x128xbf16>, vector<128x32xbf16>, vector<256x32xf32> -> vector<256x32xf32>
    %c0_5 = arith.constant 0 : index
    %c0_6 = arith.constant 0 : index
    %4 = vector.load %arg3[%c0_5, %c0_6] : memref<1x32xf32, #tpu.memory_space<vmem>>, vector<1x32xf32>
    %5 = vector.broadcast %4 : vector<1x32xf32> to vector<256x32xf32>
    %6 = arith.mulf %3, %5 : vector<256x32xf32>
    %c0_7 = arith.constant 0 : index
    %c0_8 = arith.constant 0 : index
    %7 = vector.load %arg4[%c0_7, %c0_8] : memref<1x32xf32, #tpu.memory_space<vmem>>, vector<1x32xf32>
    %8 = vector.broadcast %7 : vector<1x32xf32> to vector<256x32xf32>
    %9 = arith.addf %6, %8 : vector<256x32xf32>
    %cst_9 = arith.constant 0.000000e+00 : f32
    %10 = vector.broadcast %cst_9 : f32 to vector<256x32xf32>
    %11 = arith.maximumf %9, %10 : vector<256x32xf32>
    %12 = vector.shape_cast %11 : vector<256x32xf32> to vector<16x16x32xf32>
    %13 = arith.truncf %12 : vector<16x16x32xf32> to vector<16x16x32xbf16>
    %cst_10 = arith.constant 0.000000e+00 : bf16
    %14 = vector.broadcast %cst_10 : bf16 to vector<16x1x32xbf16>
    %cst_11 = arith.constant 0.000000e+00 : bf16
    %15 = vector.broadcast %cst_11 : bf16 to vector<1x18x32xbf16>
    %16 = tpu.concatenate %14, %13, %14 in 1 : vector<16x1x32xbf16>, vector<16x16x32xbf16>, vector<16x1x32xbf16> -> vector<16x18x32xbf16>
    %17 = tpu.concatenate %15, %16, %15 in 0 : vector<1x18x32xbf16>, vector<16x18x32xbf16>, vector<1x18x32xbf16> -> vector<18x18x32xbf16>
    %c0_12 = arith.constant 0 : index
    %c0_13 = arith.constant 0 : index
    %c0_14 = arith.constant 0 : index
    %18 = vector.load %arg12[%c0_12, %c0_13, %c0_14] : memref<18x18x32xbf16, #tpu.memory_space<vmem>>, vector<18x18x32xbf16>
    tpu.vector_store %arg12[%c0_12, %c0_13, %c0_14], %17 {strides = array<i32>} : memref<18x18x32xbf16, #tpu.memory_space<vmem>>, vector<18x18x32xbf16>,
    %c0_15 = arith.constant 0 : index
    %c0_16 = arith.constant 0 : index
    %c0_17 = arith.constant 0 : index
    %19 = vector.load %arg12[%c0_15, %c0_16, %c0_17] : memref<18x18x32xbf16, #tpu.memory_space<vmem>>, vector<16x16x32xbf16>
    %20 = vector.shape_cast %19 : vector<16x16x32xbf16> to vector<256x32xbf16>
    %c0_18 = arith.constant 0 : index
    %c0_19 = arith.constant 0 : index
    %c0_20 = arith.constant 0 : index
    %21 = vector.load %arg5[%c0_18, %c0_19, %c0_20] : memref<9x32x32xbf16, #tpu.memory_space<vmem>>, vector<1x32x32xbf16>
    %22 = vector.shape_cast %21 : vector<1x32x32xbf16> to vector<32x32xbf16>
    %cst_21 = arith.constant dense<0.000000e+00> : vector<256x32xf32>
    %23 = tpu.matmul %20, %22, %cst_21 {dimension_numbers = #tpu.dot_dimension_numbers<[1], [0], [0], [1], [0, 0, 1, 1], [], []>} : vector<256x32xbf16>, vector<32x32xbf16>, vector<256x32xf32> -> vector<256x32xf32>
    %c0_22 = arith.constant 0 : index
    %c1 = arith.constant 1 : index
    %c0_23 = arith.constant 0 : index
    %24 = vector.load %arg12[%c0_22, %c1, %c0_23] : memref<18x18x32xbf16, #tpu.memory_space<vmem>>, vector<16x16x32xbf16>
    %25 = vector.shape_cast %24 : vector<16x16x32xbf16> to vector<256x32xbf16>
    %c1_24 = arith.constant 1 : index
    %c0_25 = arith.constant 0 : index
    %c0_26 = arith.constant 0 : index
    %26 = vector.load %arg5[%c1_24, %c0_25, %c0_26] : memref<9x32x32xbf16, #tpu.memory_space<vmem>>, vector<1x32x32xbf16>
    %27 = vector.shape_cast %26 : vector<1x32x32xbf16> to vector<32x32xbf16>
    %cst_27 = arith.constant dense<0.000000e+00> : vector<256x32xf32>
    %28 = tpu.matmul %25, %27, %cst_27 {dimension_numbers = #tpu.dot_dimension_numbers<[1], [0], [0], [1], [0, 0, 1, 1], [], []>} : vector<256x32xbf16>, vector<32x32xbf16>, vector<256x32xf32> -> vector<256x32xf32>
    %29 = arith.addf %23, %28 : vector<256x32xf32>
    %c0_28 = arith.constant 0 : index
    %c2 = arith.constant 2 : index
    %c0_29 = arith.constant 0 : index
    %30 = vector.load %arg12[%c0_28, %c2, %c0_29] : memref<18x18x32xbf16, #tpu.memory_space<vmem>>, vector<16x16x32xbf16>
    %31 = vector.shape_cast %30 : vector<16x16x32xbf16> to vector<256x32xbf16>
    %c2_30 = arith.constant 2 : index
    %c0_31 = arith.constant 0 : index
    %c0_32 = arith.constant 0 : index
    %32 = vector.load %arg5[%c2_30, %c0_31, %c0_32] : memref<9x32x32xbf16, #tpu.memory_space<vmem>>, vector<1x32x32xbf16>
    %33 = vector.shape_cast %32 : vector<1x32x32xbf16> to vector<32x32xbf16>
    %cst_33 = arith.constant dense<0.000000e+00> : vector<256x32xf32>
    %34 = tpu.matmul %31, %33, %cst_33 {dimension_numbers = #tpu.dot_dimension_numbers<[1], [0], [0], [1], [0, 0, 1, 1], [], []>} : vector<256x32xbf16>, vector<32x32xbf16>, vector<256x32xf32> -> vector<256x32xf32>
    %35 = arith.addf %29, %34 : vector<256x32xf32>
    %c1_34 = arith.constant 1 : index
    %c0_35 = arith.constant 0 : index
    %c0_36 = arith.constant 0 : index
    %36 = vector.load %arg12[%c1_34, %c0_35, %c0_36] : memref<18x18x32xbf16, #tpu.memory_space<vmem>>, vector<16x16x32xbf16>
    %37 = vector.shape_cast %36 : vector<16x16x32xbf16> to vector<256x32xbf16>
    %c3 = arith.constant 3 : index
    %c0_37 = arith.constant 0 : index
    %c0_38 = arith.constant 0 : index
    %38 = vector.load %arg5[%c3, %c0_37, %c0_38] : memref<9x32x32xbf16, #tpu.memory_space<vmem>>, vector<1x32x32xbf16>
    %39 = vector.shape_cast %38 : vector<1x32x32xbf16> to vector<32x32xbf16>
    %cst_39 = arith.constant dense<0.000000e+00> : vector<256x32xf32>
    %40 = tpu.matmul %37, %39, %cst_39 {dimension_numbers = #tpu.dot_dimension_numbers<[1], [0], [0], [1], [0, 0, 1, 1], [], []>} : vector<256x32xbf16>, vector<32x32xbf16>, vector<256x32xf32> -> vector<256x32xf32>
    %41 = arith.addf %35, %40 : vector<256x32xf32>
    %c1_40 = arith.constant 1 : index
    %c1_41 = arith.constant 1 : index
    %c0_42 = arith.constant 0 : index
    %42 = vector.load %arg12[%c1_40, %c1_41, %c0_42] : memref<18x18x32xbf16, #tpu.memory_space<vmem>>, vector<16x16x32xbf16>
    %43 = vector.shape_cast %42 : vector<16x16x32xbf16> to vector<256x32xbf16>
    %c4 = arith.constant 4 : index
    %c0_43 = arith.constant 0 : index
    %c0_44 = arith.constant 0 : index
    %44 = vector.load %arg5[%c4, %c0_43, %c0_44] : memref<9x32x32xbf16, #tpu.memory_space<vmem>>, vector<1x32x32xbf16>
    %45 = vector.shape_cast %44 : vector<1x32x32xbf16> to vector<32x32xbf16>
    %cst_45 = arith.constant dense<0.000000e+00> : vector<256x32xf32>
    %46 = tpu.matmul %43, %45, %cst_45 {dimension_numbers = #tpu.dot_dimension_numbers<[1], [0], [0], [1], [0, 0, 1, 1], [], []>} : vector<256x32xbf16>, vector<32x32xbf16>, vector<256x32xf32> -> vector<256x32xf32>
    %47 = arith.addf %41, %46 : vector<256x32xf32>
    %c1_46 = arith.constant 1 : index
    %c2_47 = arith.constant 2 : index
    %c0_48 = arith.constant 0 : index
    %48 = vector.load %arg12[%c1_46, %c2_47, %c0_48] : memref<18x18x32xbf16, #tpu.memory_space<vmem>>, vector<16x16x32xbf16>
    %49 = vector.shape_cast %48 : vector<16x16x32xbf16> to vector<256x32xbf16>
    %c5 = arith.constant 5 : index
    %c0_49 = arith.constant 0 : index
    %c0_50 = arith.constant 0 : index
    %50 = vector.load %arg5[%c5, %c0_49, %c0_50] : memref<9x32x32xbf16, #tpu.memory_space<vmem>>, vector<1x32x32xbf16>
    %51 = vector.shape_cast %50 : vector<1x32x32xbf16> to vector<32x32xbf16>
    %cst_51 = arith.constant dense<0.000000e+00> : vector<256x32xf32>
    %52 = tpu.matmul %49, %51, %cst_51 {dimension_numbers = #tpu.dot_dimension_numbers<[1], [0], [0], [1], [0, 0, 1, 1], [], []>} : vector<256x32xbf16>, vector<32x32xbf16>, vector<256x32xf32> -> vector<256x32xf32>
    %53 = arith.addf %47, %52 : vector<256x32xf32>
    %c2_52 = arith.constant 2 : index
    %c0_53 = arith.constant 0 : index
    %c0_54 = arith.constant 0 : index
    %54 = vector.load %arg12[%c2_52, %c0_53, %c0_54] : memref<18x18x32xbf16, #tpu.memory_space<vmem>>, vector<16x16x32xbf16>
    %55 = vector.shape_cast %54 : vector<16x16x32xbf16> to vector<256x32xbf16>
    %c6 = arith.constant 6 : index
    %c0_55 = arith.constant 0 : index
    %c0_56 = arith.constant 0 : index
    %56 = vector.load %arg5[%c6, %c0_55, %c0_56] : memref<9x32x32xbf16, #tpu.memory_space<vmem>>, vector<1x32x32xbf16>
    %57 = vector.shape_cast %56 : vector<1x32x32xbf16> to vector<32x32xbf16>
    %cst_57 = arith.constant dense<0.000000e+00> : vector<256x32xf32>
    %58 = tpu.matmul %55, %57, %cst_57 {dimension_numbers = #tpu.dot_dimension_numbers<[1], [0], [0], [1], [0, 0, 1, 1], [], []>} : vector<256x32xbf16>, vector<32x32xbf16>, vector<256x32xf32> -> vector<256x32xf32>
    %59 = arith.addf %53, %58 : vector<256x32xf32>
    %c2_58 = arith.constant 2 : index
    %c1_59 = arith.constant 1 : index
    %c0_60 = arith.constant 0 : index
    %60 = vector.load %arg12[%c2_58, %c1_59, %c0_60] : memref<18x18x32xbf16, #tpu.memory_space<vmem>>, vector<16x16x32xbf16>
    %61 = vector.shape_cast %60 : vector<16x16x32xbf16> to vector<256x32xbf16>
    %c7 = arith.constant 7 : index
    %c0_61 = arith.constant 0 : index
    %c0_62 = arith.constant 0 : index
    %62 = vector.load %arg5[%c7, %c0_61, %c0_62] : memref<9x32x32xbf16, #tpu.memory_space<vmem>>, vector<1x32x32xbf16>
    %63 = vector.shape_cast %62 : vector<1x32x32xbf16> to vector<32x32xbf16>
    %cst_63 = arith.constant dense<0.000000e+00> : vector<256x32xf32>
    %64 = tpu.matmul %61, %63, %cst_63 {dimension_numbers = #tpu.dot_dimension_numbers<[1], [0], [0], [1], [0, 0, 1, 1], [], []>} : vector<256x32xbf16>, vector<32x32xbf16>, vector<256x32xf32> -> vector<256x32xf32>
    %65 = arith.addf %59, %64 : vector<256x32xf32>
    %c2_64 = arith.constant 2 : index
    %c2_65 = arith.constant 2 : index
    %c0_66 = arith.constant 0 : index
    %66 = vector.load %arg12[%c2_64, %c2_65, %c0_66] : memref<18x18x32xbf16, #tpu.memory_space<vmem>>, vector<16x16x32xbf16>
    %67 = vector.shape_cast %66 : vector<16x16x32xbf16> to vector<256x32xbf16>
    %c8 = arith.constant 8 : index
    %c0_67 = arith.constant 0 : index
    %c0_68 = arith.constant 0 : index
    %68 = vector.load %arg5[%c8, %c0_67, %c0_68] : memref<9x32x32xbf16, #tpu.memory_space<vmem>>, vector<1x32x32xbf16>
    %69 = vector.shape_cast %68 : vector<1x32x32xbf16> to vector<32x32xbf16>
    %cst_69 = arith.constant dense<0.000000e+00> : vector<256x32xf32>
    %70 = tpu.matmul %67, %69, %cst_69 {dimension_numbers = #tpu.dot_dimension_numbers<[1], [0], [0], [1], [0, 0, 1, 1], [], []>} : vector<256x32xbf16>, vector<32x32xbf16>, vector<256x32xf32> -> vector<256x32xf32>
    %71 = arith.addf %65, %70 : vector<256x32xf32>
    %c0_70 = arith.constant 0 : index
    %c0_71 = arith.constant 0 : index
    %72 = vector.load %arg6[%c0_70, %c0_71] : memref<1x32xf32, #tpu.memory_space<vmem>>, vector<1x32xf32>
    %73 = vector.broadcast %72 : vector<1x32xf32> to vector<256x32xf32>
    %74 = arith.mulf %71, %73 : vector<256x32xf32>
    %c0_72 = arith.constant 0 : index
    %c0_73 = arith.constant 0 : index
    %75 = vector.load %arg7[%c0_72, %c0_73] : memref<1x32xf32, #tpu.memory_space<vmem>>, vector<1x32xf32>
    %76 = vector.broadcast %75 : vector<1x32xf32> to vector<256x32xf32>
    %77 = arith.addf %74, %76 : vector<256x32xf32>
    %cst_74 = arith.constant 0.000000e+00 : f32
    %78 = vector.broadcast %cst_74 : f32 to vector<256x32xf32>
    %79 = arith.maximumf %77, %78 : vector<256x32xf32>
    %80 = arith.truncf %79 : vector<256x32xf32> to vector<256x32xbf16>
    %c0_75 = arith.constant 0 : index
    %c0_76 = arith.constant 0 : index
    %81 = vector.load %arg8[%c0_75, %c0_76] : memref<32x128xbf16, #tpu.memory_space<vmem>>, vector<32x128xbf16>
    %cst_77 = arith.constant dense<0.000000e+00> : vector<256x128xf32>
    %82 = tpu.matmul %80, %81, %cst_77 {dimension_numbers = #tpu.dot_dimension_numbers<[1], [0], [0], [1], [0, 0, 1, 1], [], []>} : vector<256x32xbf16>, vector<32x128xbf16>, vector<256x128xf32> -> vector<256x128xf32>
    %c0_78 = arith.constant 0 : index
    %c0_79 = arith.constant 0 : index
    %83 = vector.load %arg9[%c0_78, %c0_79] : memref<1x128xf32, #tpu.memory_space<vmem>>, vector<1x128xf32>
    %84 = vector.broadcast %83 : vector<1x128xf32> to vector<256x128xf32>
    %85 = arith.mulf %82, %84 : vector<256x128xf32>
    %c0_80 = arith.constant 0 : index
    %c0_81 = arith.constant 0 : index
    %86 = vector.load %arg10[%c0_80, %c0_81] : memref<1x128xf32, #tpu.memory_space<vmem>>, vector<1x128xf32>
    %87 = vector.broadcast %86 : vector<1x128xf32> to vector<256x128xf32>
    %88 = arith.addf %85, %87 : vector<256x128xf32>
    %c0_82 = arith.constant 0 : index
    %c0_83 = arith.constant 0 : index
    %c0_84 = arith.constant 0 : index
    %c0_85 = arith.constant 0 : index
    %89 = vector.load %arg1[%c0_82, %c0_83, %c0_84, %c0_85] : memref<1x16x16x128xbf16, #tpu.memory_space<vmem>>, vector<1x16x16x128xbf16>
    %90 = vector.shape_cast %89 : vector<1x16x16x128xbf16> to vector<256x128xbf16>
    %91 = arith.extf %90 : vector<256x128xbf16> to vector<256x128xf32>
    %92 = arith.addf %88, %91 : vector<256x128xf32>
    %cst_86 = arith.constant 0.000000e+00 : f32
    %93 = vector.broadcast %cst_86 : f32 to vector<256x128xf32>
    %94 = arith.maximumf %92, %93 : vector<256x128xf32>
    %95 = vector.shape_cast %94 : vector<256x128xf32> to vector<1x16x16x128xf32>
    %96 = arith.truncf %95 : vector<1x16x16x128xf32> to vector<1x16x16x128xbf16>
    %c0_87 = arith.constant 0 : index
    %c0_88 = arith.constant 0 : index
    %c0_89 = arith.constant 0 : index
    %c0_90 = arith.constant 0 : index
    %97 = vector.load %arg11[%c0_87, %c0_88, %c0_89, %c0_90] : memref<1x16x16x128xbf16, #tpu.memory_space<vmem>>, vector<1x16x16x128xbf16>
    tpu.vector_store %arg11[%c0_87, %c0_88, %c0_89, %c0_90], %96 {strides = array<i32>} : memref<1x16x16x128xbf16, #tpu.memory_space<vmem>>, vector<1x16x16x128xbf16>,
    return
  }
  func.func @transform_0(%arg0: i32) -> (i32, i32, i32, i32) {
    %c0_i32 = arith.constant 0 : i32
    %c0_i32_0 = arith.constant 0 : i32
    %c0_i32_1 = arith.constant 0 : i32
    %c0_i32_2 = arith.constant 0 : i32
    return %arg0, %c0_i32, %c0_i32_0, %c0_i32_1 : i32, i32, i32, i32
  }
  func.func @transform_1(%arg0: i32) -> (i32, i32) {
    %c0_i32 = arith.constant 0 : i32
    %c0_i32_0 = arith.constant 0 : i32
    %c0_i32_1 = arith.constant 0 : i32
    return %c0_i32, %c0_i32_0 : i32, i32
  }
  func.func @transform_2(%arg0: i32) -> (i32, i32) {
    %c0_i32 = arith.constant 0 : i32
    %c0_i32_0 = arith.constant 0 : i32
    %c0_i32_1 = arith.constant 0 : i32
    return %c0_i32, %c0_i32_0 : i32, i32
  }
  func.func @transform_3(%arg0: i32) -> (i32, i32) {
    %c0_i32 = arith.constant 0 : i32
    %c0_i32_0 = arith.constant 0 : i32
    %c0_i32_1 = arith.constant 0 : i32
    return %c0_i32, %c0_i32_0 : i32, i32
  }
  func.func @transform_4(%arg0: i32) -> (i32, i32, i32) {
    %c0_i32 = arith.constant 0 : i32
    %c0_i32_0 = arith.constant 0 : i32
    %c0_i32_1 = arith.constant 0 : i32
    %c0_i32_2 = arith.constant 0 : i32
    return %c0_i32, %c0_i32_0, %c0_i32_1 : i32, i32, i32
  }
  func.func @transform_5(%arg0: i32) -> (i32, i32) {
    %c0_i32 = arith.constant 0 : i32
    %c0_i32_0 = arith.constant 0 : i32
    %c0_i32_1 = arith.constant 0 : i32
    return %c0_i32, %c0_i32_0 : i32, i32
  }
  func.func @transform_6(%arg0: i32) -> (i32, i32) {
    %c0_i32 = arith.constant 0 : i32
    %c0_i32_0 = arith.constant 0 : i32
    %c0_i32_1 = arith.constant 0 : i32
    return %c0_i32, %c0_i32_0 : i32, i32
  }
  func.func @transform_7(%arg0: i32) -> (i32, i32) {
    %c0_i32 = arith.constant 0 : i32
    %c0_i32_0 = arith.constant 0 : i32
    %c0_i32_1 = arith.constant 0 : i32
    return %c0_i32, %c0_i32_0 : i32, i32
  }
  func.func @transform_8(%arg0: i32) -> (i32, i32) {
    %c0_i32 = arith.constant 0 : i32
    %c0_i32_0 = arith.constant 0 : i32
    %c0_i32_1 = arith.constant 0 : i32
    return %c0_i32, %c0_i32_0 : i32, i32
  }
  func.func @transform_9(%arg0: i32) -> (i32, i32) {
    %c0_i32 = arith.constant 0 : i32
    %c0_i32_0 = arith.constant 0 : i32
    %c0_i32_1 = arith.constant 0 : i32
    return %c0_i32, %c0_i32_0 : i32, i32
  }
  func.func @transform_10(%arg0: i32) -> (i32, i32, i32, i32) {
    %c0_i32 = arith.constant 0 : i32
    %c0_i32_0 = arith.constant 0 : i32
    %c0_i32_1 = arith.constant 0 : i32
    %c0_i32_2 = arith.constant 0 : i32
    return %arg0, %c0_i32, %c0_i32_0, %c0_i32_1 : i32, i32, i32, i32
  }
}

module attributes {stable_mosaic.version = 11 : i64} {
  func.func @_bottleneck_kernel(%arg0: i32, %arg1: memref<1x16x16x128xbf16, #tpu.memory_space<vmem>>, %arg2: memref<128x32xbf16, #tpu.memory_space<vmem>>, %arg3: memref<1x32xf32, #tpu.memory_space<vmem>>, %arg4: memref<1x32xf32, #tpu.memory_space<vmem>>, %arg5: memref<9x32x32xbf16, #tpu.memory_space<vmem>>, %arg6: memref<1x32xf32, #tpu.memory_space<vmem>>, %arg7: memref<1x32xf32, #tpu.memory_space<vmem>>, %arg8: memref<32x128xbf16, #tpu.memory_space<vmem>>, %arg9: memref<1x128xf32, #tpu.memory_space<vmem>>, %arg10: memref<1x128xf32, #tpu.memory_space<vmem>>, %arg11: memref<1x16x16x128xbf16, #tpu.memory_space<vmem>>, %arg12: memref<18x18x32xbf16, #tpu.memory_space<vmem>>) attributes {dimension_semantics = [#tpu.dimension_semantics<parallel>], iteration_bounds = array<i64: 2>, scalar_prefetch = 0 : i64, scratch_operands = 1 : i64, tpu.core_type = #tpu.core_type<tc>, window_params = [{transform_indices = @transform_0, window_bounds = array<i64: 1, 16, 16, 128>}, {pipeline_mode = #tpu.pipeline_mode<synchronous>, transform_indices = @transform_1, window_bounds = array<i64: 128, 32>}, {pipeline_mode = #tpu.pipeline_mode<synchronous>, transform_indices = @transform_2, window_bounds = array<i64: 1, 32>}, {pipeline_mode = #tpu.pipeline_mode<synchronous>, transform_indices = @transform_3, window_bounds = array<i64: 1, 32>}, {pipeline_mode = #tpu.pipeline_mode<synchronous>, transform_indices = @transform_4, window_bounds = array<i64: 9, 32, 32>}, {pipeline_mode = #tpu.pipeline_mode<synchronous>, transform_indices = @transform_5, window_bounds = array<i64: 1, 32>}, {pipeline_mode = #tpu.pipeline_mode<synchronous>, transform_indices = @transform_6, window_bounds = array<i64: 1, 32>}, {pipeline_mode = #tpu.pipeline_mode<synchronous>, transform_indices = @transform_7, window_bounds = array<i64: 32, 128>}, {pipeline_mode = #tpu.pipeline_mode<synchronous>, transform_indices = @transform_8, window_bounds = array<i64: 1, 128>}, {pipeline_mode = #tpu.pipeline_mode<synchronous>, transform_indices = @transform_9, window_bounds = array<i64: 1, 128>}, {transform_indices = @transform_10, window_bounds = array<i64: 1, 16, 16, 128>}]} {
    %c0 = arith.constant 0 : index
    %c0_0 = arith.constant 0 : index
    %c0_1 = arith.constant 0 : index
    %c0_2 = arith.constant 0 : index
    %0 = vector.load %arg1[%c0, %c0_0, %c0_1, %c0_2] : memref<1x16x16x128xbf16, #tpu.memory_space<vmem>>, vector<1x16x16x128xbf16>
    %1 = vector.shape_cast %0 : vector<1x16x16x128xbf16> to vector<256x128xbf16>
    %c0_3 = arith.constant 0 : index
    %c0_4 = arith.constant 0 : index
    %2 = vector.load %arg2[%c0_3, %c0_4] : memref<128x32xbf16, #tpu.memory_space<vmem>>, vector<128x32xbf16>
    %cst = arith.constant dense<0.000000e+00> : vector<256x32xf32>
    %3 = tpu.matmul %1, %2, %cst {dimension_numbers = #tpu.dot_dimension_numbers<[1], [0], [0], [1], [0, 0, 1, 1], [], []>} : vector<256x128xbf16>, vector<128x32xbf16>, vector<256x32xf32> -> vector<256x32xf32>
    %c0_5 = arith.constant 0 : index
    %c0_6 = arith.constant 0 : index
    %4 = vector.load %arg3[%c0_5, %c0_6] : memref<1x32xf32, #tpu.memory_space<vmem>>, vector<1x32xf32>
    %5 = vector.broadcast %4 : vector<1x32xf32> to vector<256x32xf32>
    %6 = arith.mulf %3, %5 : vector<256x32xf32>
    %c0_7 = arith.constant 0 : index
    %c0_8 = arith.constant 0 : index
    %7 = vector.load %arg4[%c0_7, %c0_8] : memref<1x32xf32, #tpu.memory_space<vmem>>, vector<1x32xf32>
    %8 = vector.broadcast %7 : vector<1x32xf32> to vector<256x32xf32>
    %9 = arith.addf %6, %8 : vector<256x32xf32>
    %cst_9 = arith.constant 0.000000e+00 : f32
    %10 = vector.broadcast %cst_9 : f32 to vector<256x32xf32>
    %11 = arith.maximumf %9, %10 : vector<256x32xf32>
    %12 = vector.shape_cast %11 : vector<256x32xf32> to vector<16x16x32xf32>
    %13 = arith.truncf %12 : vector<16x16x32xf32> to vector<16x16x32xbf16>
    %cst_10 = arith.constant 0.000000e+00 : bf16
    %14 = vector.broadcast %cst_10 : bf16 to vector<16x1x32xbf16>
    %cst_11 = arith.constant 0.000000e+00 : bf16
    %15 = vector.broadcast %cst_11 : bf16 to vector<1x18x32xbf16>
    %16 = tpu.concatenate %14, %13, %14 in 1 : vector<16x1x32xbf16>, vector<16x16x32xbf16>, vector<16x1x32xbf16> -> vector<16x18x32xbf16>
    %17 = tpu.concatenate %15, %16, %15 in 0 : vector<1x18x32xbf16>, vector<16x18x32xbf16>, vector<1x18x32xbf16> -> vector<18x18x32xbf16>
    %c0_12 = arith.constant 0 : index
    %c0_13 = arith.constant 0 : index
    %c0_14 = arith.constant 0 : index
    %18 = vector.load %arg12[%c0_12, %c0_13, %c0_14] : memref<18x18x32xbf16, #tpu.memory_space<vmem>>, vector<18x18x32xbf16>
    tpu.vector_store %arg12[%c0_12, %c0_13, %c0_14], %17 {strides = array<i32>} : memref<18x18x32xbf16, #tpu.memory_space<vmem>>, vector<18x18x32xbf16>,
    %c0_15 = arith.constant 0 : index
    %c0_16 = arith.constant 0 : index
    %c0_17 = arith.constant 0 : index
    %19 = vector.load %arg12[%c0_15, %c0_16, %c0_17] : memref<18x18x32xbf16, #tpu.memory_space<vmem>>, vector<16x16x32xbf16>
    %20 = vector.shape_cast %19 : vector<16x16x32xbf16> to vector<256x32xbf16>
    %c0_18 = arith.constant 0 : index
    %c0_19 = arith.constant 0 : index
    %c0_20 = arith.constant 0 : index
    %21 = vector.load %arg5[%c0_18, %c0_19, %c0_20] : memref<9x32x32xbf16, #tpu.memory_space<vmem>>, vector<1x32x32xbf16>
    %22 = vector.shape_cast %21 : vector<1x32x32xbf16> to vector<32x32xbf16>
    %cst_21 = arith.constant dense<0.000000e+00> : vector<256x32xf32>
    %23 = tpu.matmul %20, %22, %cst_21 {dimension_numbers = #tpu.dot_dimension_numbers<[1], [0], [0], [1], [0, 0, 1, 1], [], []>} : vector<256x32xbf16>, vector<32x32xbf16>, vector<256x32xf32> -> vector<256x32xf32>
    %c0_22 = arith.constant 0 : index
    %c1 = arith.constant 1 : index
    %c0_23 = arith.constant 0 : index
    %24 = vector.load %arg12[%c0_22, %c1, %c0_23] : memref<18x18x32xbf16, #tpu.memory_space<vmem>>, vector<16x16x32xbf16>
    %25 = vector.shape_cast %24 : vector<16x16x32xbf16> to vector<256x32xbf16>
    %c1_24 = arith.constant 1 : index
    %c0_25 = arith.constant 0 : index
    %c0_26 = arith.constant 0 : index
    %26 = vector.load %arg5[%c1_24, %c0_25, %c0_26] : memref<9x32x32xbf16, #tpu.memory_space<vmem>>, vector<1x32x32xbf16>
    %27 = vector.shape_cast %26 : vector<1x32x32xbf16> to vector<32x32xbf16>
    %cst_27 = arith.constant dense<0.000000e+00> : vector<256x32xf32>
    %28 = tpu.matmul %25, %27, %cst_27 {dimension_numbers = #tpu.dot_dimension_numbers<[1], [0], [0], [1], [0, 0, 1, 1], [], []>} : vector<256x32xbf16>, vector<32x32xbf16>, vector<256x32xf32> -> vector<256x32xf32>
    %29 = arith.addf %23, %28 : vector<256x32xf32>
    %c0_28 = arith.constant 0 : index
    %c2 = arith.constant 2 : index
    %c0_29 = arith.constant 0 : index
    %30 = vector.load %arg12[%c0_28, %c2, %c0_29] : memref<18x18x32xbf16, #tpu.memory_space<vmem>>, vector<16x16x32xbf16>
    %31 = vector.shape_cast %30 : vector<16x16x32xbf16> to vector<256x32xbf16>
    %c2_30 = arith.constant 2 : index
    %c0_31 = arith.constant 0 : index
    %c0_32 = arith.constant 0 : index
    %32 = vector.load %arg5[%c2_30, %c0_31, %c0_32] : memref<9x32x32xbf16, #tpu.memory_space<vmem>>, vector<1x32x32xbf16>
    %33 = vector.shape_cast %32 : vector<1x32x32xbf16> to vector<32x32xbf16>
    %cst_33 = arith.constant dense<0.000000e+00> : vector<256x32xf32>
    %34 = tpu.matmul %31, %33, %cst_33 {dimension_numbers = #tpu.dot_dimension_numbers<[1], [0], [0], [1], [0, 0, 1, 1], [], []>} : vector<256x32xbf16>, vector<32x32xbf16>, vector<256x32xf32> -> vector<256x32xf32>
    %35 = arith.addf %29, %34 : vector<256x32xf32>
    %c1_34 = arith.constant 1 : index
    %c0_35 = arith.constant 0 : index
    %c0_36 = arith.constant 0 : index
    %36 = vector.load %arg12[%c1_34, %c0_35, %c0_36] : memref<18x18x32xbf16, #tpu.memory_space<vmem>>, vector<16x16x32xbf16>
    %37 = vector.shape_cast %36 : vector<16x16x32xbf16> to vector<256x32xbf16>
    %c3 = arith.constant 3 : index
    %c0_37 = arith.constant 0 : index
    %c0_38 = arith.constant 0 : index
    %38 = vector.load %arg5[%c3, %c0_37, %c0_38] : memref<9x32x32xbf16, #tpu.memory_space<vmem>>, vector<1x32x32xbf16>
    %39 = vector.shape_cast %38 : vector<1x32x32xbf16> to vector<32x32xbf16>
    %cst_39 = arith.constant dense<0.000000e+00> : vector<256x32xf32>
    %40 = tpu.matmul %37, %39, %cst_39 {dimension_numbers = #tpu.dot_dimension_numbers<[1], [0], [0], [1], [0, 0, 1, 1], [], []>} : vector<256x32xbf16>, vector<32x32xbf16>, vector<256x32xf32> -> vector<256x32xf32>
    %41 = arith.addf %35, %40 : vector<256x32xf32>
    %c1_40 = arith.constant 1 : index
    %c1_41 = arith.constant 1 : index
    %c0_42 = arith.constant 0 : index
    %42 = vector.load %arg12[%c1_40, %c1_41, %c0_42] : memref<18x18x32xbf16, #tpu.memory_space<vmem>>, vector<16x16x32xbf16>
    %43 = vector.shape_cast %42 : vector<16x16x32xbf16> to vector<256x32xbf16>
    %c4 = arith.constant 4 : index
    %c0_43 = arith.constant 0 : index
    %c0_44 = arith.constant 0 : index
    %44 = vector.load %arg5[%c4, %c0_43, %c0_44] : memref<9x32x32xbf16, #tpu.memory_space<vmem>>, vector<1x32x32xbf16>
    %45 = vector.shape_cast %44 : vector<1x32x32xbf16> to vector<32x32xbf16>
    %cst_45 = arith.constant dense<0.000000e+00> : vector<256x32xf32>
    %46 = tpu.matmul %43, %45, %cst_45 {dimension_numbers = #tpu.dot_dimension_numbers<[1], [0], [0], [1], [0, 0, 1, 1], [], []>} : vector<256x32xbf16>, vector<32x32xbf16>, vector<256x32xf32> -> vector<256x32xf32>
    %47 = arith.addf %41, %46 : vector<256x32xf32>
    %c1_46 = arith.constant 1 : index
    %c2_47 = arith.constant 2 : index
    %c0_48 = arith.constant 0 : index
    %48 = vector.load %arg12[%c1_46, %c2_47, %c0_48] : memref<18x18x32xbf16, #tpu.memory_space<vmem>>, vector<16x16x32xbf16>
    %49 = vector.shape_cast %48 : vector<16x16x32xbf16> to vector<256x32xbf16>
    %c5 = arith.constant 5 : index
    %c0_49 = arith.constant 0 : index
    %c0_50 = arith.constant 0 : index
    %50 = vector.load %arg5[%c5, %c0_49, %c0_50] : memref<9x32x32xbf16, #tpu.memory_space<vmem>>, vector<1x32x32xbf16>
    %51 = vector.shape_cast %50 : vector<1x32x32xbf16> to vector<32x32xbf16>
    %cst_51 = arith.constant dense<0.000000e+00> : vector<256x32xf32>
    %52 = tpu.matmul %49, %51, %cst_51 {dimension_numbers = #tpu.dot_dimension_numbers<[1], [0], [0], [1], [0, 0, 1, 1], [], []>} : vector<256x32xbf16>, vector<32x32xbf16>, vector<256x32xf32> -> vector<256x32xf32>
    %53 = arith.addf %47, %52 : vector<256x32xf32>
    %c2_52 = arith.constant 2 : index
    %c0_53 = arith.constant 0 : index
    %c0_54 = arith.constant 0 : index
    %54 = vector.load %arg12[%c2_52, %c0_53, %c0_54] : memref<18x18x32xbf16, #tpu.memory_space<vmem>>, vector<16x16x32xbf16>
    %55 = vector.shape_cast %54 : vector<16x16x32xbf16> to vector<256x32xbf16>
    %c6 = arith.constant 6 : index
    %c0_55 = arith.constant 0 : index
    %c0_56 = arith.constant 0 : index
    %56 = vector.load %arg5[%c6, %c0_55, %c0_56] : memref<9x32x32xbf16, #tpu.memory_space<vmem>>, vector<1x32x32xbf16>
    %57 = vector.shape_cast %56 : vector<1x32x32xbf16> to vector<32x32xbf16>
    %cst_57 = arith.constant dense<0.000000e+00> : vector<256x32xf32>
    %58 = tpu.matmul %55, %57, %cst_57 {dimension_numbers = #tpu.dot_dimension_numbers<[1], [0], [0], [1], [0, 0, 1, 1], [], []>} : vector<256x32xbf16>, vector<32x32xbf16>, vector<256x32xf32> -> vector<256x32xf32>
    %59 = arith.addf %53, %58 : vector<256x32xf32>
    %c2_58 = arith.constant 2 : index
    %c1_59 = arith.constant 1 : index
    %c0_60 = arith.constant 0 : index
    %60 = vector.load %arg12[%c2_58, %c1_59, %c0_60] : memref<18x18x32xbf16, #tpu.memory_space<vmem>>, vector<16x16x32xbf16>
    %61 = vector.shape_cast %60 : vector<16x16x32xbf16> to vector<256x32xbf16>
    %c7 = arith.constant 7 : index
    %c0_61 = arith.constant 0 : index
    %c0_62 = arith.constant 0 : index
    %62 = vector.load %arg5[%c7, %c0_61, %c0_62] : memref<9x32x32xbf16, #tpu.memory_space<vmem>>, vector<1x32x32xbf16>
    %63 = vector.shape_cast %62 : vector<1x32x32xbf16> to vector<32x32xbf16>
    %cst_63 = arith.constant dense<0.000000e+00> : vector<256x32xf32>
    %64 = tpu.matmul %61, %63, %cst_63 {dimension_numbers = #tpu.dot_dimension_numbers<[1], [0], [0], [1], [0, 0, 1, 1], [], []>} : vector<256x32xbf16>, vector<32x32xbf16>, vector<256x32xf32> -> vector<256x32xf32>
    %65 = arith.addf %59, %64 : vector<256x32xf32>
    %c2_64 = arith.constant 2 : index
    %c2_65 = arith.constant 2 : index
    %c0_66 = arith.constant 0 : index
    %66 = vector.load %arg12[%c2_64, %c2_65, %c0_66] : memref<18x18x32xbf16, #tpu.memory_space<vmem>>, vector<16x16x32xbf16>
    %67 = vector.shape_cast %66 : vector<16x16x32xbf16> to vector<256x32xbf16>
    %c8 = arith.constant 8 : index
    %c0_67 = arith.constant 0 : index
    %c0_68 = arith.constant 0 : index
    %68 = vector.load %arg5[%c8, %c0_67, %c0_68] : memref<9x32x32xbf16, #tpu.memory_space<vmem>>, vector<1x32x32xbf16>
    %69 = vector.shape_cast %68 : vector<1x32x32xbf16> to vector<32x32xbf16>
    %cst_69 = arith.constant dense<0.000000e+00> : vector<256x32xf32>
    %70 = tpu.matmul %67, %69, %cst_69 {dimension_numbers = #tpu.dot_dimension_numbers<[1], [0], [0], [1], [0, 0, 1, 1], [], []>} : vector<256x32xbf16>, vector<32x32xbf16>, vector<256x32xf32> -> vector<256x32xf32>
    %71 = arith.addf %65, %70 : vector<256x32xf32>
    %c0_70 = arith.constant 0 : index
    %c0_71 = arith.constant 0 : index
    %72 = vector.load %arg6[%c0_70, %c0_71] : memref<1x32xf32, #tpu.memory_space<vmem>>, vector<1x32xf32>
    %73 = vector.broadcast %72 : vector<1x32xf32> to vector<256x32xf32>
    %74 = arith.mulf %71, %73 : vector<256x32xf32>
    %c0_72 = arith.constant 0 : index
    %c0_73 = arith.constant 0 : index
    %75 = vector.load %arg7[%c0_72, %c0_73] : memref<1x32xf32, #tpu.memory_space<vmem>>, vector<1x32xf32>
    %76 = vector.broadcast %75 : vector<1x32xf32> to vector<256x32xf32>
    %77 = arith.addf %74, %76 : vector<256x32xf32>
    %cst_74 = arith.constant 0.000000e+00 : f32
    %78 = vector.broadcast %cst_74 : f32 to vector<256x32xf32>
    %79 = arith.maximumf %77, %78 : vector<256x32xf32>
    %80 = arith.truncf %79 : vector<256x32xf32> to vector<256x32xbf16>
    %c0_75 = arith.constant 0 : index
    %c0_76 = arith.constant 0 : index
    %81 = vector.load %arg8[%c0_75, %c0_76] : memref<32x128xbf16, #tpu.memory_space<vmem>>, vector<32x128xbf16>
    %cst_77 = arith.constant dense<0.000000e+00> : vector<256x128xf32>
    %82 = tpu.matmul %80, %81, %cst_77 {dimension_numbers = #tpu.dot_dimension_numbers<[1], [0], [0], [1], [0, 0, 1, 1], [], []>} : vector<256x32xbf16>, vector<32x128xbf16>, vector<256x128xf32> -> vector<256x128xf32>
    %c0_78 = arith.constant 0 : index
    %c0_79 = arith.constant 0 : index
    %83 = vector.load %arg9[%c0_78, %c0_79] : memref<1x128xf32, #tpu.memory_space<vmem>>, vector<1x128xf32>
    %84 = vector.broadcast %83 : vector<1x128xf32> to vector<256x128xf32>
    %85 = arith.mulf %82, %84 : vector<256x128xf32>
    %c0_80 = arith.constant 0 : index
    %c0_81 = arith.constant 0 : index
    %86 = vector.load %arg10[%c0_80, %c0_81] : memref<1x128xf32, #tpu.memory_space<vmem>>, vector<1x128xf32>
    %87 = vector.broadcast %86 : vector<1x128xf32> to vector<256x128xf32>
    %88 = arith.addf %85, %87 : vector<256x128xf32>
    %c0_82 = arith.constant 0 : index
    %c0_83 = arith.constant 0 : index
    %c0_84 = arith.constant 0 : index
    %c0_85 = arith.constant 0 : index
    %89 = vector.load %arg1[%c0_82, %c0_83, %c0_84, %c0_85] : memref<1x16x16x128xbf16, #tpu.memory_space<vmem>>, vector<1x16x16x128xbf16>
    %90 = vector.shape_cast %89 : vector<1x16x16x128xbf16> to vector<256x128xbf16>
    %91 = arith.extf %90 : vector<256x128xbf16> to vector<256x128xf32>
    %92 = arith.addf %88, %91 : vector<256x128xf32>
    %cst_86 = arith.constant 0.000000e+00 : f32
    %93 = vector.broadcast %cst_86 : f32 to vector<256x128xf32>
    %94 = arith.maximumf %92, %93 : vector<256x128xf32>
    %95 = vector.shape_cast %94 : vector<256x128xf32> to vector<1x16x16x128xf32>
    %96 = arith.truncf %95 : vector<1x16x16x128xf32> to vector<1x16x16x128xbf16>
    %c0_87 = arith.constant 0 : index
    %c0_88 = arith.constant 0 : index
    %c0_89 = arith.constant 0 : index
    %c0_90 = arith.constant 0 : index
    %97 = vector.load %arg11[%c0_87, %c0_88, %c0_89, %c0_90] : memref<1x16x16x128xbf16, #tpu.memory_space<vmem>>, vector<1x16x16x128xbf16>
    tpu.vector_store %arg11[%c0_87, %c0_88, %c0_89, %c0_90], %96 {strides = array<i32>} : memref<1x16x16x128xbf16, #tpu.memory_space<vmem>>, vector<1x16x16x128xbf16>,
    return
  }
  func.func @transform_0(%arg0: i32) -> (i32, i32, i32, i32) {
    %c0_i32 = arith.constant 0 : i32
    %c0_i32_0 = arith.constant 0 : i32
    %c0_i32_1 = arith.constant 0 : i32
    %c0_i32_2 = arith.constant 0 : i32
    return %arg0, %c0_i32, %c0_i32_0, %c0_i32_1 : i32, i32, i32, i32
  }
  func.func @transform_1(%arg0: i32) -> (i32, i32) {
    %c0_i32 = arith.constant 0 : i32
    %c0_i32_0 = arith.constant 0 : i32
    %c0_i32_1 = arith.constant 0 : i32
    return %c0_i32, %c0_i32_0 : i32, i32
  }
  func.func @transform_2(%arg0: i32) -> (i32, i32) {
    %c0_i32 = arith.constant 0 : i32
    %c0_i32_0 = arith.constant 0 : i32
    %c0_i32_1 = arith.constant 0 : i32
    return %c0_i32, %c0_i32_0 : i32, i32
  }
  func.func @transform_3(%arg0: i32) -> (i32, i32) {
    %c0_i32 = arith.constant 0 : i32
    %c0_i32_0 = arith.constant 0 : i32
    %c0_i32_1 = arith.constant 0 : i32
    return %c0_i32, %c0_i32_0 : i32, i32
  }
  func.func @transform_4(%arg0: i32) -> (i32, i32, i32) {
    %c0_i32 = arith.constant 0 : i32
    %c0_i32_0 = arith.constant 0 : i32
    %c0_i32_1 = arith.constant 0 : i32
    %c0_i32_2 = arith.constant 0 : i32
    return %c0_i32, %c0_i32_0, %c0_i32_1 : i32, i32, i32
  }
  func.func @transform_5(%arg0: i32) -> (i32, i32) {
    %c0_i32 = arith.constant 0 : i32
    %c0_i32_0 = arith.constant 0 : i32
    %c0_i32_1 = arith.constant 0 : i32
    return %c0_i32, %c0_i32_0 : i32, i32
  }
  func.func @transform_6(%arg0: i32) -> (i32, i32) {
    %c0_i32 = arith.constant 0 : i32
    %c0_i32_0 = arith.constant 0 : i32
    %c0_i32_1 = arith.constant 0 : i32
    return %c0_i32, %c0_i32_0 : i32, i32
  }
  func.func @transform_7(%arg0: i32) -> (i32, i32) {
    %c0_i32 = arith.constant 0 : i32
    %c0_i32_0 = arith.constant 0 : i32
    %c0_i32_1 = arith.constant 0 : i32
    return %c0_i32, %c0_i32_0 : i32, i32
  }
  func.func @transform_8(%arg0: i32) -> (i32, i32) {
    %c0_i32 = arith.constant 0 : i32
    %c0_i32_0 = arith.constant 0 : i32
    %c0_i32_1 = arith.constant 0 : i32
    return %c0_i32, %c0_i32_0 : i32, i32
  }
  func.func @transform_9(%arg0: i32) -> (i32, i32) {
    %c0_i32 = arith.constant 0 : i32
    %c0_i32_0 = arith.constant 0 : i32
    %c0_i32_1 = arith.constant 0 : i32
    return %c0_i32, %c0_i32_0 : i32, i32
  }
  func.func @transform_10(%arg0: i32) -> (i32, i32, i32, i32) {
    %c0_i32 = arith.constant 0 : i32
    %c0_i32_0 = arith.constant 0 : i32
    %c0_i32_1 = arith.constant 0 : i32
    %c0_i32_2 = arith.constant 0 : i32
    return %arg0, %c0_i32, %c0_i32_0, %c0_i32_1 : i32, i32, i32, i32
  }
}

</mosaic_0001>

<bundles_post_ra>
// kernel: tpu_custom_call.1
= control target key start
LH: loop header
LB: loop body
LE: loop exit
PB: predicated region body
PF: predicated region fallthrough
CT: control target
= control target key end

     0   :  { %15 = vsyncpa [#allocation4], 0  ;;  %s10804_s0 = inlined_call_operand.hbm [shape: bf16[2,16,16,128], index: 0, kind: input, shape index: {}]   ;;  %s10805_s1 = inlined_call_operand.vmem [shape: bf16[128,32], index: 1, kind: input, shape index: {}]   ;;  %s10806_s2 = inlined_call_operand.vmem [shape: f32[1,32], index: 2, kind: input, shape index: {}]   ;;  %s10807_s3 = inlined_call_operand.vmem [shape: f32[1,32], index: 3, kind: input, shape index: {}]   ;;  %s10808_s4 = inlined_call_operand.hbm [shape: bf16[9,32,32], index: 4, kind: input, shape index: {}]   ;;  %s10809_s5 = inlined_call_operand.vmem [shape: f32[1,32], index: 5, kind: input, shape index: {}]   ;;  %s10810_s6 = inlined_call_operand.vmem [shape: f32[1,32], index: 6, kind: input, shape index: {}]   ;;  %s10811_s7 = inlined_call_operand.vmem [shape: bf16[32,128], index: 7, kind: input, shape index: {}]   ;;  %s10812_s8 = inlined_call_operand.vmem [shape: f32[1,128], index: 8, kind: input, shape index: {}]   ;;  %s10813_s9 = inlined_call_operand.vmem [shape: f32[1,128], index: 9, kind: input, shape index: {}]   ;;  %s10814_s10 = inlined_call_operand.hbm [shape: bf16[2,16,16,128], index: 10, kind: output, shape index: {}]  }
   0x1   :  { %17 = vsyncpa [#allocation4 + $0x1], 0 }
   0x2   :  { %18 = vsyncpa [#allocation7], 0 }
   0x3   :  { %19 = vsyncpa [#allocation5], 0 }
   0x4   :  { %21 = vsyncpa [#allocation5 + $0x1], 0  ;;  %s8733_s13 = smov 0   ;;  %s8735_s14 = smov 0  }
   0x5   :  { %s8737_s15 = smov 0   ;;  %s8739_s16 = smov 0  }
   0x6 LB: > { %10848 = sst [smem:[#allocation12_spill]] %s8656_s13  ;;  %s8754_s17 = sadd.s32 4294967295, %s8668_s16   ;;  %s8668_s16 = sphi %s8739_s16, %s10949_s16   ;;  %s8664_s15 = sphi %s8737_s15, %s10952_s15   ;;  %s8660_s14 = sphi %s8735_s14, %s10951_s14   ;;  %s8656_s13 = sphi %s8733_s13, %s10950_s13  }
   0x7   : > { %s6771_s18 = sadd.s32 4294967294, %s8668_s16   ;;  %p47_p0 = scmp.ne.s32.totalorder %s8660_s14, %s8656_s13 }
   0x8   : > { %p10817_p1 = scmp.eq.s32.totalorder %s8754_s17, 0  ;;  %p266_p3 = scmp.eq.s32.totalorder %s6771_s18, 1 }
   0x9   : > { %p6772_p5 = scmp.ge.s32.totalorder %s8668_s16, 1  ;;  %p273_p7 = scmp.lt.s32.totalorder %s8668_s16, 3 }
   0xa   : > { %p8763_p4 = por %p10817_p1, %p47_p0  ;;  %p8768_p6 = por %p266_p3, %p47_p0 }
   0xb   : > { %p8773_p8 = pnand %p6772_p5, %p273_p7  ;;  %s8670_s22 = smov [#allocation6]  }
   0xc   : > { %s10849_s19 = scalar_select %p8763_p4, 1, 0 }
   0xd   : > { %s10850_s20 = scalar_select %p8768_p6, 1, 0 }
   0xe   : > { %s10852_s21 = scalar_select %p8773_p8, 1, 0 }
   0xf   : > { %10851 = sst [smem:[#allocation13_spill]] %s10850_s20  ;;  %s294_s23 = sshll.u32 %s8670_s22, 4  ;;  %s8777_s23 = int_to_ptr.vmem [resolvable:$true] %s294_s23 }
  0x10   : > { %p8359_p9 = pneg %p8773_p8  ;;  %s8789_s25 = sadd.s32 1, %s8668_s16  }
  0x11   : > { %10854 = sst [smem:[#allocation14_spill]] %s8789_s25  ;;  %s34_s26 = sadd.s32 1, %s8664_s15 }
  0x12   : > { %p8784_p11 = pnand %p8359_p9, %p10817_p1  ;;  %s31_s27 = ssub.s32 %s8668_s16, %s8789_s25 }
  0x13   : > { %s8540_s30 = scalar_lea.hbm %s10808_s4, 2304 }
  0x14   : > { %p8541_p12 = scmp.ne.s32.totalorder %s10808_s4, %s8540_s30  ;;  %p8542_p13 = pneg %p8784_p11 }
  0x15   : > { %p8547_p5 = scmp.lt.u32.totalorder %s8540_s30, %s10808_s4 }
  0x16   : > { %p8543_p0 = pnand %p8542_p13, %p8541_p12 }
  0x18   : > { %p8544_p3 = pneg %p8543_p0 }
  0x1a   : > { %p8549_p7 = pnand %p8547_p5, %p8544_p3 }
  0x1c   : > { %8552 = shalt.err (!%p8549_p7)
}
  0x1d   : > { %s8553_s25 = scalar_lea.vmem %s8777_s23, 2304  ;;  %p8561_p2 = scmp.lt.s32.totalorder %s8777_s23, %s8777_s23 }
  0x1e   : > { %p8554_p9 = scmp.ne.s32.totalorder %s8777_s23, %s8553_s25  ;;  %p8562_p6 = scmp.lt.s32.totalorder %s8553_s25, %s8553_s25 }
  0x20   : > { %p8556_p10 = pnand %p8554_p9, %p8542_p13  ;;  %p8563_p4 = por %p8562_p6, %p8561_p2 }
  0x22   : > { %p8557_p1 = pneg %p8556_p10 }
  0x24   : > { %p8564_p8 = pnand %p8563_p4, %p8557_p1 }
  0x26   : > { %8567 = shalt.err (!%p8564_p8)
}
  0x27   : > { %s10822_s28 = smov 64   ;;  %s8672_s29 = smov 4  }
  0x28   : > { %8362 = dma.hbm_to_vmem [thread:$0]  (!%p8784_p11), %s10808_s4, 2304, %s8777_s23, [#allocation7], %s10822_s28, %s10822_s28, %s8672_s29  }
  0x29   : > { %p32_p1 = scmp.eq.s32.totalorder %s31_s27, 0  ;;  %p41_p2 = scmp.ne.s32.totalorder %s8664_s15, %s8660_s14 }
  0x2a   : > { %p42_p4 = scmp.eq.s32.totalorder %s8668_s16, 0  ;;  %p8372_p6 = scmp.lt.s32.totalorder %s8668_s16, 2 }
  0x2b   : > { %s8823_s11 = scalar_select %p32_p1, %s8664_s15, %s34_s26  }
  0x2c   : > { %p43_p8 = por %p42_p4, %p41_p2  ;;  %p10855_p10 = scmp.eq.s32.totalorder %s8754_s17, 1 }
  0x2d   : > { %s323_s24 = sand.u32 1, %s8664_s15   ;;  %s7271_s18 = sshll.u32 %s8668_s16, 11 }
  0x2e   : > { %p8827_p12 = por %p10855_p10, %p41_p2  ;;  %s6775_s22 = sshll.u32 %s323_s24, 7 }
  0x2f   : > { %s8836_s25 = scalar_lea.hbm %s10804_s0, %s7271_s18  ;;  %s327_s23 = scalar_lea.vmem [#allocation3], %s6775_s22 }
  0x30   : > { %s334_s26 = sshll.u32 %s327_s23, 4  ;;  %p8838_p11 = pnand %p8372_p6, %p43_p8  ;;  %s8842_s26 = int_to_ptr.vmem [resolvable:$true] %s334_s26 }
  0x31   : > { %s8844_s30 = scalar_lea.sflag [#allocation4], %s323_s24  ;;  %s8568_s28 = scalar_lea.hbm %s8836_s25, 2048 }
  0x32   : > { %p8569_p13 = scmp.ne.s32.totalorder %s8836_s25, %s8568_s28  ;;  %p8570_p0 = pneg %p8838_p11 }
  0x33   : > { %s8573_s18 = scalar_lea.hbm %s10804_s0, 4096  ;;  %p8574_p7 = scmp.lt.u32.totalorder %s8836_s25, %s10804_s0 }
  0x34   : > { %p8571_p3 = pnand %p8570_p0, %p8569_p13  ;;  %p8575_p9 = scmp.lt.u32.totalorder %s8573_s18, %s8568_s28 }
  0x35   : > { %p8577_p2 = scmp.lt.u32.totalorder %s8568_s28, %s8836_s25 }
  0x36   : > { %p8572_p5 = pneg %p8571_p3  ;;  %p8576_p1 = por %p8575_p9, %p8574_p7 }
  0x38   : > { %p8578_p4 = por %p8577_p2, %p8576_p1 }
  0x3a   : > { %p8579_p6 = pnand %p8578_p4, %p8572_p5 }
  0x3c   : > { %8582 = shalt.err (!%p8579_p6)
}
  0x3d   : > { %s8583_s24 = scalar_lea.vmem %s8842_s26, 2048  ;;  %s8673_s13 = smov [#allocation3]  }
  0x3e   : > { %p8584_p8 = scmp.ne.s32.totalorder %s8842_s26, %s8583_s24  ;;  %s8588_s20 = sshll.u32 %s8673_s13, 4  ;;  %s8589_s20 = int_to_ptr.vmem [resolvable:$false] %s8588_s20 }
  0x3f   : > { %s8590_s22 = scalar_lea.vmem %s8589_s20, 4096  ;;  %p8591_p3 = scmp.lt.s32.totalorder %s8842_s26, %s8589_s20 }
  0x40   : > { %p8586_p10 = pnand %p8584_p8, %p8570_p0  ;;  %p8592_p7 = scmp.lt.s32.totalorder %s8590_s22, %s8583_s24 }
  0x42   : > { %p8587_p13 = pneg %p8586_p10  ;;  %p8593_p9 = por %p8592_p7, %p8591_p3 }
  0x44   : > { %p8594_p1 = pnand %p8593_p9, %p8587_p13 }
  0x46   : > { %8597 = shalt.err (!%p8594_p1)
}
  0x47   : > { %s10858_s28 = smov 64   ;;  %p10859_p0 = scmp.ne.s32.totalorder %s10852_s21, 0 }
  0x48   : > { %8366 = dma.hbm_to_vmem [thread:$0]  (!%p8838_p11), %s8836_s25, 2048, %s8842_s26, %s8844_s30, %s10858_s28, %s10858_s28, %s8672_s29  }
  0x49   : > { %346 = sbr.rel (%p10859_p0) target bundleno = 1269 (0x4f5), region = 60 }
  0x50   : > { %s8878_s18 = sand.u32 1, %s8660_s14   ;;  %p10860_p5 = scmp.ne.s32.totalorder %s10849_s19, 0 }
  0x51   : > { %s6779_s23 = sshll.u32 %s8878_s18, 7  ;;  %s349_s24 = scalar_lea.sflag [#allocation4], %s8878_s18 }
  0x52   : > { %s8884_s27 = scalar_lea.vmem [#allocation3], %s6779_s23 }
  0x53   : > { %8643 = dma.done.wait (%p10860_p5), %s349_s24, 2048  }
  0x54   : > { %8645 = vsyncadd (%p10860_p5), %s349_s24, 4294965248  ;;  %p10861_p11 = scmp.eq.s32.totalorder %s8754_s17, 0 }
  0x56   : > { %8647 = dma.done.wait (%p10861_p11), [#allocation7], 2304   ;;  %p10862_p2 = pmov %p10861_p11 }
  0x57   : > { %v8413_v0 = vld [vmem:[%s10805_s1] sm:$0xff]   ;;  %v8414_v1 = vld [vmem:[%s10805_s1 + $0x8] sm:$0xff]   ;;  %v8415_v2 = vld [vmem:[%s10805_s1 + $0x10] sm:$0xff]   ;;  %vm1235_vm0 = vcmask 257024   ;;  %v8674_v24 = vmov 0   ;;  %vm1238_vm1 = vcmask 253952  }
  0x58   : > { %8649 = vsyncadd (%p10862_p2), [#allocation7], 4294964992  ;;  %7683 = vmatprep.subr.bf16.mxu0 %v8413_v0  ;;  %v8416_v3 = vld [vmem:[%s10805_s1 + $0x18] sm:$0xff]   ;;  %v8417_v5 = vld [vmem:[%s10805_s1 + $0x20] sm:$0xff]   ;;  %v6808_v25 = vcombine.low %v8674_v24, %v8674_v24  ;;  %v6809_v26 = vcombine.high %v8674_v24, %v8674_v24  ;;  %vm1343_vm2 = vsmask.f32 3328 }
  0x59   : > { %7684 = vmatpush3.bf16.msra.mxu0 %v8413_v0  ;;  %v8421_v4 = vld [vmem:[%s8884_s27] sm:$0xff]   ;;  %v8418_v6 = vld [vmem:[%s10805_s1 + $0x28] sm:$0xff]   ;;  %v8419_v7 = vld [vmem:[%s10805_s1 + $0x30] sm:$0xff]   ;;  %vm1344_vm3 = vsmask.f32 7440  ;;  %vm1795_vm5 = vcmask 261120  }
  0x5a   : > { %7685 = vmatprep.subr.bf16.mxu0 %v8414_v1  ;;  %7699 = vmatprep.mubr.bf16.mxu0 %v8421_v4  ;;  %v8420_v8 = vld [vmem:[%s10805_s1 + $0x38] sm:$0xff]   ;;  %v8422_v9 = vld [vmem:[%s8884_s27 + $0x8] sm:$0xff]   ;;  %v8423_v10 = vld [vmem:[%s8884_s27 + $0x10] sm:$0xff]   ;;  %1236 = vst.msk [vmem:[#allocation2] sm:$0xf] %vm1235_vm0, %v6808_v25  ;;  %vm1017_vm6 = vcmask 1040384  }
  0x5b   : > { %v8424_v11 = vld [vmem:[%s8884_s27 + $0x18] sm:$0xff]   ;;  %v8425_v12 = vld [vmem:[%s8884_s27 + $0x20] sm:$0xff]   ;;  %v8426_v13 = vld [vmem:[%s8884_s27 + $0x28] sm:$0xff]   ;;  %1237 = vst.msk [vmem:[#allocation2 + $0x4] sm:$0xf] %vm1235_vm0, %v6809_v26  ;;  %vm2354_vm9 = vcmask 1042432  }
  0x5c   : > { %v8427_v14 = vld [vmem:[%s8884_s27 + $0x30] sm:$0xff]   ;;  %v8428_v15 = vld [vmem:[%s8884_s27 + $0x38] sm:$0xff]   ;;  %v8429_v16 = vld [vmem:[%s8884_s27 + $0x40] sm:$0xff]   ;;  %1239 = vst.msk [vmem:[#allocation2 + $0x8] sm:$0x1] %vm1238_vm1, %v6808_v25  ;;  %vm2355_vm10 = vcmask 1046532  }
  0x5d   : > { %7686 = vmatpush3.bf16.msra.mxu0 %v8414_v1  ;;  %v8430_v17 = vld [vmem:[%s8884_s27 + $0x48] sm:$0xff]   ;;  %v8431_v18 = vld [vmem:[%s8884_s27 + $0x50] sm:$0xff]   ;;  %v8432_v19 = vld [vmem:[%s8884_s27 + $0x58] sm:$0xff]   ;;  %1288 = vst.msk [vmem:[#allocation2 + $0xcc] sm:$0xf] %vm1235_vm0, %v6808_v25  ;;  %s10673_s24 = scalar_lea.vmem [#allocation8], %s6779_s23 }
  0x5e   : > { %7687 = vmatprep.subr.bf16.mxu0 %v8415_v2  ;;  %v8433_v20 = vld [vmem:[%s8884_s27 + $0x60] sm:$0xff]   ;;  %v8434_v21 = vld [vmem:[%s8884_s27 + $0x68] sm:$0xff]   ;;  %v8435_v22 = vld [vmem:[%s8884_s27 + $0x70] sm:$0xff]   ;;  %1289 = vst.msk [vmem:[#allocation2 + $0xd0] sm:$0xf] %vm1235_vm0, %v6809_v26  ;;  %s7304_s23 = sshll.u32 %s8754_s17, 11 }
  0x5f   : > { %v8436_v23 = vld [vmem:[%s8884_s27 + $0x78] sm:$0xff]   ;;  %1290 = vst.msk [vmem:[#allocation2 + $0xd4] sm:$0x1] %vm1238_vm1, %v6808_v25  ;;  %v8437_v33 = vld [vmem:[#allocation6 + $0x10] sm:$0xff]   ;;  %vm8940_vm4 = vmor %vm1343_vm2, %vm1344_vm3  ;;  %vm1018_vm7 = vsmask.f32 256  ;;  %s10756_s25 = scalar_lea.hbm %s10814_s10, %s7304_s23 }
  0x60   : > { %v8438_v42 = vld [vmem:[#allocation6 + $0x18] sm:$0xff]   ;;  %v8439_v49 = vld [vmem:[#allocation6 + $0x30] sm:$0xff]   ;;  %v8949_v52 = vld [vmem:[#allocation6 + $0x40] sm:$0xff]   ;;  %s6675_s17 = scalar_lea.sflag [#allocation5], %s8878_s18  ;;  %s8675_s19 = smov [#allocation8]  }
  0x61   : > { %7688 = vmatpush3.bf16.msra.mxu0 %v8415_v2  ;;  %v1291_v27 = vld [vmem:[#allocation2] sm:$0xf]  ;;  %8091 = vmatprep.subr.bf16.mxu1 %v8439_v49  ;;  %v8440_v51 = vld [vmem:[#allocation6 + $0x38] sm:$0xff]   ;;  %vm8974_vm8 = vmand %vm1017_vm6, %vm1018_vm7  ;;  %s8602_s30 = sshll.u32 %s8675_s19, 4  ;;  %s8603_s30 = int_to_ptr.vmem [resolvable:$false] %s8602_s30 }
  0x62   : > { %7689 = vmatprep.subr.bf16.mxu0 %v8416_v3  ;;  %v1292_v28 = vld [vmem:[#allocation2 + $0x4] sm:$0xf]  ;;  %v1347_v29 = vshrl.u32 %v1291_v27, 16  ;;  %v1350_v30 = vshll.u32 %v1291_v27, 16  ;;  %8093 = vmatpush3.bf16.msra.mxu1 %v8439_v49  ;;  %v8955_v53 = vld [vmem:[%s10806_s2] ss:$0 sm:$0xff]  ;;  %vm9620_vm11 = vmor %vm2354_vm9, %vm2355_vm10 }
  0x63   : > { %v1356_v31 = vshll.u32 %v1292_v28, 16  ;;  %v1360_v32 = vshrl.u32 %v1292_v28, 16  ;;  %v1327_v38 = vld [vmem:[#allocation2 + $0x8] sm:$0x1]  ;;  %8092 = vmatprep.subr.bf16.mxu1 %v8440_v51  ;;  %v8960_v55 = vld [vmem:[%s10807_s3] ss:$0 sm:$0xff] }
  0x64   : > { %v1349_v34 = vrot.slane %v1347_v29, 4  ;;  %v1352_v35 = vrot.slane %v1350_v30, 5  ;;  %v1366_v41 = vshll.u32 %v1327_v38, 16  ;;  %s8604_s13 = scalar_lea.vmem %s8603_s30, 4096 }
  0x65   : > { %7690 = vmatpush3.bf16.msra.mxu0 %v8416_v3  ;;  %v1358_v36 = vrot.slane %v1356_v31, 5  ;;  %v1362_v37 = vrot.slane %v1360_v32, 4 }
  0x66   : > { %7691 = vmatprep.subr.bf16.mxu0 %v8417_v5  ;;  %v1353_v39 = vor.u32 %v1352_v35, %v1349_v34  ;;  %v1368_v46 = vrot.slane %v1366_v41, 5  ;;  %8094 = vmatpush3.bf16.msra.mxu1 %v8440_v51 }
  0x67   : > { %v1363_v40 = vor.u32 %v1362_v37, %v1358_v36  ;;  %7875 = vmatprep.subr.bf16.mxu1 %v8949_v52 }
  0x68   : > { %v1354_v43 = vrot.slane %v1353_v39, 4 }
  0x69   : > { %7692 = vmatpush3.bf16.msra.mxu0 %v8417_v5  ;;  %v1364_v45 = vrot.slane %v1363_v40, 4 }
  0x6a   : > { %7693 = vmatprep.subr.bf16.mxu0 %v8418_v6  ;;  %v1359_v47 = vsel %vm8940_vm4, %v1354_v43, %v1358_v36 }
  0x6b   : > { %v1369_v48 = vsel %vm8940_vm4, %v1364_v45, %v1368_v46 }
  0x6c   : > { %v6858_v50 = vcombine.low %v1359_v47, %v1369_v48 }
  0x6d   : > { %7694 = vmatpush3.bf16.msra.mxu0 %v8418_v6 }
  0x6e   : > { %7695 = vmatprep.subr.bf16.mxu0 %v8419_v7 }
  0x71   : > { %7696 = vmatpush3.bf16.msra.mxu0 %v8419_v7 }
  0x72   : > { %7697 = vmatprep.subr.bf16.mxu0 %v8420_v8 }
  0x75   : > { %7698 = vmatpush3.bf16.msra.mxu0 %v8420_v8 }
  0x76   : > { %7731 = vmatprep.subr.bf16.mxu0 %v8437_v33 }
  0x78   : > { %7700 = vmatmul.mubr.bf16.vlgmr.msra.gmra.mrb[0].mxu0 %v8422_v9 }
  0x79   : > { %7703 = vmatprep.mubr.bf16.mxu0 %v8423_v10  ;;  %7732 = vmatpush3.bf16.msra.mxu0 %v8437_v33 }
  0x7a   : > { %7733 = vmatprep.subr.bf16.mxu0 %v8438_v42 }
  0x7d   : > { %7734 = vmatpush3.bf16.msra.mxu0 %v8438_v42 }
  0x80   : > { %7704 = vmatmul.mubr.bf16.gmra.mrb[4].mxu0 %v8424_v11 }
  0x81   : > { %7707 = vmatprep.mubr.bf16.mxu0 %v8425_v12 }
  0x88   : > { %7708 = vmatmul.mubr.bf16.gmra.mrb[8].mxu0 %v8426_v13 }
  0x89   : > { %7711 = vmatprep.mubr.bf16.mxu0 %v8427_v14 }
  0x90   : > { %7712 = vmatmul.mubr.bf16.gmra.mrb[12].mxu0 %v8428_v15 }
  0x91   : > { %7715 = vmatprep.mubr.bf16.mxu0 %v8429_v16 }
  0x98   : > { %7716 = vmatmul.mubr.bf16.gmra.mrb[16].mxu0 %v8430_v17 }
  0x99   : > { %7719 = vmatprep.mubr.bf16.mxu0 %v8431_v18 }
  0xa0   : > { %7720 = vmatmul.mubr.bf16.gmra.mrb[20].mxu0 %v8432_v19 }
  0xa1   : > { %7723 = vmatprep.mubr.bf16.mxu0 %v8433_v20 }
  0xa8   : > { %7724 = vmatmul.mubr.bf16.gmra.mrb[24].mxu0 %v8434_v21 }
  0xa9   : > { %7727 = vmatprep.mubr.bf16.mxu0 %v8435_v22 }
  0xb0   : > { %7728 = vmatmul.mubr.bf16.gmra.mrb[28].mxu0 %v8436_v23 }
  0xb1   : > { %7735 = vmatprep.mubr.msk.bf16.mxu0 %vm1795_vm5, %v6858_v50 }
 0x14b   : > { %v7701_v54 = vpop.f32.mrb[0].mxu0 }
 0x14c   : > { %v756_v56 = vmul.f32 %v7701_v54, %v8955_v53  ;;  %v620_v57 = vpop.f32.mrb[1].mxu0 }
 0x14d   : > { %v754_v58 = vmul.f32 %v8955_v53, %v620_v57  ;;  %v7702_v59 = vpop.f32.mrb[2].mxu0 }
 0x14e   : > { %v795_v60 = vadd.f32 %v8960_v55, %v756_v56  ;;  %v757_v61 = vmul.f32 %v7702_v59, %v8955_v53  ;;  %v623_v62 = vpop.f32.mrb[3].mxu0  ;;  %v8993_v56 = vld [vmem:[#allocation6] sm:$0xff]  }
 0x14f   : > { %v793_v63 = vadd.f32 %v8960_v55, %v754_v58  ;;  %v755_v0 = vmul.f32 %v8955_v53, %v623_v62  ;;  %7767 = vmatprep.subr.bf16.mxu0 %v8993_v56 }
 0x150   : > { %v796_v1 = vadd.f32 %v8960_v55, %v757_v61  ;;  %v827_v3 = vmax.f32 %v795_v60, 0.0 }
 0x151   : > { %v794_v2 = vadd.f32 %v8960_v55, %v755_v0  ;;  %v825_v5 = vmax.f32 %v793_v63, 0.0 }
 0x152   : > { %v828_v4 = vmax.f32 %v796_v1, 0.0 }
 0x153   : > { %v826_v6 = vmax.f32 %v794_v2, 0.0  ;;  %v7705_v7 = vpop.f32.mrb[4].mxu0 }
 0x154   : > { %v858_v8 = vpack.c.bf16 %v828_v4, %v827_v3  ;;  %v760_v9 = vmul.f32 %v7705_v7, %v8955_v53  ;;  %v636_v10 = vpop.f32.mrb[5].mxu0 }
 0x155   : > { %v857_v11 = vpack.c.bf16 %v826_v6, %v825_v5  ;;  %v758_v12 = vmul.f32 %v8955_v53, %v636_v10  ;;  %v7706_v13 = vpop.f32.mrb[6].mxu0 }
 0x156   : > { %v881_v14 = vshrl.u32 %v858_v8, 16  ;;  %v799_v15 = vadd.f32 %v8960_v55, %v760_v9  ;;  %v761_v16 = vmul.f32 %v7706_v13, %v8955_v53  ;;  %v639_v17 = vpop.f32.mrb[7].mxu0  ;;  %v884_v23 = vshll.u32 %v858_v8, 16 }
 0x157   : > { %v874_v19 = vshrl.u32 %v857_v11, 16  ;;  %v797_v20 = vadd.f32 %v8960_v55, %v758_v12  ;;  %v759_v21 = vmul.f32 %v8955_v53, %v639_v17  ;;  %v877_v26 = vshll.u32 %v857_v11, 16 }
 0x158   : > { %v883_v22 = vrot.slane %v881_v14, 7  ;;  %v800_v24 = vadd.f32 %v8960_v55, %v761_v16  ;;  %v831_v27 = vmax.f32 %v799_v15, 0.0 }
 0x159   : > { %v876_v25 = vrot.slane %v874_v19, 7  ;;  %v798_v28 = vadd.f32 %v8960_v55, %v759_v21  ;;  %v829_v31 = vmax.f32 %v797_v20, 0.0 }
 0x15a   : > { %v886_v29 = vor.u32 %v884_v23, %v883_v22  ;;  %v1037_v30 = vsel %vm8974_vm8, %v883_v22, 0  ;;  %v832_v32 = vmax.f32 %v800_v24, 0.0 }
 0x15b   : > { %v6815_v33 = vcombine.low %v1037_v30, %v1037_v30  ;;  %v879_v34 = vor.u32 %v877_v26, %v876_v25  ;;  %v1036_v35 = vsel %vm8974_vm8, %v876_v25, 0  ;;  %v830_v36 = vmax.f32 %v798_v28, 0.0  ;;  %v7709_v37 = vpop.f32.mrb[8].mxu0 }
 0x15c   : > { %v1021_v38 = vsel %vm8974_vm8, 0, %v886_v29  ;;  %v6812_v39 = vcombine.low %v1036_v35, %v1036_v35  ;;  %v860_v40 = vpack.c.bf16 %v832_v32, %v831_v27  ;;  %v764_v41 = vmul.f32 %v7709_v37, %v8955_v53  ;;  %v652_v42 = vpop.f32.mrb[9].mxu0 }
 0x15d   : > { %v6813_v43 = vcombine.low %v1021_v38, %v1021_v38  ;;  %v6814_v45 = vcombine.high %v1021_v38, %v1021_v38  ;;  %1245 = vst.msk [vmem:[#allocation2 + $0x20] sm:$0x1] %vm1238_vm1, %v6815_v33  ;;  %v1020_v46 = vsel %vm8974_vm8, 0, %v879_v34  ;;  %v859_v47 = vpack.c.bf16 %v830_v36, %v829_v31  ;;  %v7710_v48 = vpop.f32.mrb[10].mxu0 }
 0x15e   : > { %v6810_v49 = vcombine.low %v1020_v46, %v1020_v46  ;;  %v6811_v50 = vcombine.high %v1020_v46, %v1020_v46  ;;  %1242 = vst.msk [vmem:[#allocation2 + $0x14] sm:$0x1] %vm1238_vm1, %v6812_v39  ;;  %v895_v51 = vshrl.u32 %v860_v40, 16  ;;  %v655_v54 = vpop.f32.mrb[11].mxu0  ;;  %v803_v58 = vadd.f32 %v8960_v55, %v764_v41 }
 0x15f   : > { %1243 = vst.msk [vmem:[#allocation2 + $0x18] sm:$0xf] %vm1235_vm0, %v6813_v43  ;;  %1244 = vst.msk [vmem:[#allocation2 + $0x1c] sm:$0xf] %vm1235_vm0, %v6814_v45  ;;  %v888_v57 = vshrl.u32 %v859_v47, 16  ;;  %v762_v59 = vmul.f32 %v8955_v53, %v652_v42  ;;  %v898_v61 = vshll.u32 %v860_v40, 16  ;;  %v765_v62 = vmul.f32 %v7710_v48, %v8955_v53 }
 0x160   : > { %1240 = vst.msk [vmem:[#allocation2 + $0xc] sm:$0xf] %vm1235_vm0, %v6810_v49  ;;  %1241 = vst.msk [vmem:[#allocation2 + $0x10] sm:$0xf] %vm1235_vm0, %v6811_v50  ;;  %v897_v60 = vrot.slane %v895_v51, 7  ;;  %v763_v63 = vmul.f32 %v8955_v53, %v655_v54  ;;  %v891_v1 = vshll.u32 %v859_v47, 16 }
 0x161   : > { %v890_v0 = vrot.slane %v888_v57, 7  ;;  %v835_v2 = vmax.f32 %v803_v58, 0.0  ;;  %v801_v3 = vadd.f32 %v8960_v55, %v762_v59  ;;  %v804_v6 = vadd.f32 %v8960_v55, %v765_v62 }
 0x162   : > { %v900_v4 = vor.u32 %v898_v61, %v897_v60  ;;  %v1039_v5 = vsel %vm8974_vm8, %v897_v60, 0  ;;  %v802_v7 = vadd.f32 %v8960_v55, %v763_v63 }
 0x163   : > { %v6821_v8 = vcombine.low %v1039_v5, %v1039_v5  ;;  %v893_v9 = vor.u32 %v891_v1, %v890_v0  ;;  %v1038_v10 = vsel %vm8974_vm8, %v890_v0, 0  ;;  %v833_v11 = vmax.f32 %v801_v3, 0.0  ;;  %v7713_v12 = vpop.f32.mrb[12].mxu0 }
 0x164   : > { %v1023_v13 = vsel %vm8974_vm8, 0, %v900_v4  ;;  %v6818_v14 = vcombine.low %v1038_v10, %v1038_v10  ;;  %v836_v15 = vmax.f32 %v804_v6, 0.0  ;;  %v834_v16 = vmax.f32 %v802_v7, 0.0  ;;  %v668_v17 = vpop.f32.mrb[13].mxu0 }
 0x165   : > { %v6819_v19 = vcombine.low %v1023_v13, %v1023_v13  ;;  %v6820_v20 = vcombine.high %v1023_v13, %v1023_v13  ;;  %1251 = vst.msk [vmem:[#allocation2 + $0x38] sm:$0x1] %vm1238_vm1, %v6821_v8  ;;  %v1022_v21 = vsel %vm8974_vm8, 0, %v893_v9  ;;  %v768_v22 = vmul.f32 %v7713_v12, %v8955_v53  ;;  %v7714_v23 = vpop.f32.mrb[14].mxu0 }
 0x166   : > { %v6816_v24 = vcombine.low %v1022_v21, %v1022_v21  ;;  %v6817_v25 = vcombine.high %v1022_v21, %v1022_v21  ;;  %1248 = vst.msk [vmem:[#allocation2 + $0x2c] sm:$0x1] %vm1238_vm1, %v6818_v14  ;;  %v862_v26 = vpack.c.bf16 %v836_v15, %v835_v2  ;;  %v861_v27 = vpack.c.bf16 %v834_v16, %v833_v11  ;;  %v671_v28 = vpop.f32.mrb[15].mxu0 }
 0x167   : > { %1249 = vst.msk [vmem:[#allocation2 + $0x30] sm:$0xf] %vm1235_vm0, %v6819_v19  ;;  %1250 = vst.msk [vmem:[#allocation2 + $0x34] sm:$0xf] %vm1235_vm0, %v6820_v20  ;;  %v807_v29 = vadd.f32 %v8960_v55, %v768_v22  ;;  %v766_v30 = vmul.f32 %v8955_v53, %v668_v17  ;;  %v769_v31 = vmul.f32 %v7714_v23, %v8955_v53  ;;  %v1293_v33 = vld [vmem:[#allocation2 + $0xc] sm:$0xf] }
 0x168   : > { %v767_v32 = vmul.f32 %v8955_v53, %v671_v28  ;;  %1246 = vst.msk [vmem:[#allocation2 + $0x24] sm:$0xf] %vm1235_vm0, %v6816_v24  ;;  %1247 = vst.msk [vmem:[#allocation2 + $0x28] sm:$0xf] %vm1235_vm0, %v6817_v25  ;;  %v909_v34 = vshrl.u32 %v862_v26, 16  ;;  %v912_v35 = vshll.u32 %v862_v26, 16 }
 0x169   : > { %v902_v36 = vshrl.u32 %v861_v27, 16  ;;  %v905_v37 = vshll.u32 %v861_v27, 16  ;;  %v9026_v38 = vld [vmem:[#allocation2 + $0x10] sm:$0xf]  ;;  %v839_v39 = vmax.f32 %v807_v29, 0.0  ;;  %v805_v40 = vadd.f32 %v8960_v55, %v766_v30 }
 0x16a   : > { %v808_v41 = vadd.f32 %v8960_v55, %v769_v31  ;;  %v806_v42 = vadd.f32 %v8960_v55, %v767_v32  ;;  %v911_v43 = vrot.slane %v909_v34, 7  ;;  %v1371_v46 = vshrl.u32 %v1293_v33, 16 }
 0x16b   : > { %v904_v45 = vrot.slane %v902_v36, 7  ;;  %v1374_v47 = vshll.u32 %v1293_v33, 16  ;;  %v837_v48 = vmax.f32 %v805_v40, 0.0  ;;  %v7717_v51 = vpop.f32.mrb[16].mxu0  ;;  %v1380_v54 = vshll.u32 %v9026_v38, 16 }
 0x16c   : > { %v840_v49 = vmax.f32 %v808_v41, 0.0  ;;  %v838_v50 = vmax.f32 %v806_v42, 0.0  ;;  %v914_v57 = vor.u32 %v912_v35, %v911_v43  ;;  %v1041_v58 = vsel %vm8974_vm8, %v911_v43, 0  ;;  %v684_v61 = vpop.f32.mrb[17].mxu0 }
 0x16d   : > { %v907_v59 = vor.u32 %v905_v37, %v904_v45  ;;  %v1040_v60 = vsel %vm8974_vm8, %v904_v45, 0  ;;  %v6827_v62 = vcombine.low %v1041_v58, %v1041_v58  ;;  %v7718_v2 = vpop.f32.mrb[18].mxu0  ;;  %v772_v5 = vmul.f32 %v7717_v51, %v8955_v53  ;;  %v1328_v45 = vld [vmem:[#allocation2 + $0x14] sm:$0x1]  ;;  %v8449_v58 = vld [vmem:[#allocation6 + $0x48] sm:$0xff]  }
 0x16e   : > { %v6824_v63 = vcombine.low %v1040_v60, %v1040_v60  ;;  %v864_v0 = vpack.c.bf16 %v840_v49, %v839_v39  ;;  %v863_v1 = vpack.c.bf16 %v838_v50, %v837_v48  ;;  %v1025_v3 = vsel %vm8974_vm8, 0, %v914_v57  ;;  %v687_v7 = vpop.f32.mrb[19].mxu0  ;;  %v1295_v57 = vld [vmem:[#allocation2 + $0x18] sm:$0xf] }
 0x16f   : > { %v1024_v4 = vsel %vm8974_vm8, 0, %v907_v59  ;;  %v770_v6 = vmul.f32 %v8955_v53, %v684_v61  ;;  %v6825_v8 = vcombine.low %v1025_v3, %v1025_v3  ;;  %v6826_v9 = vcombine.high %v1025_v3, %v1025_v3  ;;  %1257 = vst.msk [vmem:[#allocation2 + $0x50] sm:$0x1] %vm1238_vm1, %v6827_v62 }
 0x170   : > { %v6822_v10 = vcombine.low %v1024_v4, %v1024_v4  ;;  %v6823_v11 = vcombine.high %v1024_v4, %v1024_v4  ;;  %1254 = vst.msk [vmem:[#allocation2 + $0x44] sm:$0x1] %vm1238_vm1, %v6824_v63  ;;  %v923_v12 = vshrl.u32 %v864_v0, 16  ;;  %v926_v13 = vshll.u32 %v864_v0, 16  ;;  %v1296_v63 = vld [vmem:[#allocation2 + $0x1c] sm:$0xf] }
 0x171   : > { %v916_v14 = vshrl.u32 %v863_v1, 16  ;;  %v919_v15 = vshll.u32 %v863_v1, 16  ;;  %1255 = vst.msk [vmem:[#allocation2 + $0x48] sm:$0xf] %vm1235_vm0, %v6825_v8  ;;  %1256 = vst.msk [vmem:[#allocation2 + $0x4c] sm:$0xf] %vm1235_vm0, %v6826_v9  ;;  %v811_v16 = vadd.f32 %v8960_v55, %v772_v5  ;;  %v809_v17 = vadd.f32 %v8960_v55, %v770_v6 }
 0x172   : > { %1252 = vst.msk [vmem:[#allocation2 + $0x3c] sm:$0xf] %vm1235_vm0, %v6822_v10  ;;  %1253 = vst.msk [vmem:[#allocation2 + $0x40] sm:$0xf] %vm1235_vm0, %v6823_v11  ;;  %v773_v19 = vmul.f32 %v7718_v2, %v8955_v53  ;;  %v771_v20 = vmul.f32 %v8955_v53, %v687_v7  ;;  %v925_v21 = vrot.slane %v923_v12, 7  ;;  %v1373_v23 = vrot.slane %v1371_v46, 4 }
 0x173   : > { %v918_v22 = vrot.slane %v916_v14, 7  ;;  %v1376_v24 = vrot.slane %v1374_v47, 5  ;;  %v843_v25 = vmax.f32 %v811_v16, 0.0  ;;  %v841_v26 = vmax.f32 %v809_v17, 0.0  ;;  %v7721_v29 = vpop.f32.mrb[20].mxu0 }
 0x174   : > { %v812_v27 = vadd.f32 %v8960_v55, %v773_v19  ;;  %v810_v28 = vadd.f32 %v8960_v55, %v771_v20  ;;  %v928_v30 = vor.u32 %v926_v13, %v925_v21  ;;  %v1043_v31 = vsel %vm8974_vm8, %v925_v21, 0  ;;  %v700_v34 = vpop.f32.mrb[21].mxu0 }
 0x175   : > { %v921_v32 = vor.u32 %v919_v15, %v918_v22  ;;  %v1042_v33 = vsel %vm8974_vm8, %v918_v22, 0  ;;  %v6833_v35 = vcombine.low %v1043_v31, %v1043_v31  ;;  %v9058_v40 = vpop.f32.mrb[22].mxu0  ;;  %v776_v43 = vmul.f32 %v7721_v29, %v8955_v53 }
 0x176   : > { %v6830_v36 = vcombine.low %v1042_v33, %v1042_v33  ;;  %v844_v37 = vmax.f32 %v812_v27, 0.0  ;;  %v842_v39 = vmax.f32 %v810_v28, 0.0  ;;  %v1027_v41 = vsel %vm8974_vm8, 0, %v928_v30  ;;  %v9065_v47 = vpop.f32.mrb[23].mxu0  ;;  %v1329_v33 = vld [vmem:[#allocation2 + $0x20] sm:$0x1] }
 0x177   : > { %v1026_v42 = vsel %vm8974_vm8, 0, %v921_v32  ;;  %v1377_v46 = vor.u32 %v1376_v24, %v1373_v23  ;;  %v6831_v48 = vcombine.low %v1027_v41, %v1027_v41  ;;  %v6832_v49 = vcombine.high %v1027_v41, %v1027_v41  ;;  %1263 = vst.msk [vmem:[#allocation2 + $0x68] sm:$0x1] %vm1238_vm1, %v6833_v35  ;;  %v8455_v24 = vld [vmem:[#allocation6 + $0x50] sm:$0xff]  }
 0x178   : > { %v6828_v50 = vcombine.low %v1026_v42, %v1026_v42  ;;  %v6829_v51 = vcombine.high %v1026_v42, %v1026_v42  ;;  %1260 = vst.msk [vmem:[#allocation2 + $0x5c] sm:$0x1] %vm1238_vm1, %v6830_v36  ;;  %v866_v59 = vpack.c.bf16 %v844_v37, %v843_v25  ;;  %v865_v60 = vpack.c.bf16 %v842_v39, %v841_v26  ;;  %v8443_v5 = vld [vmem:[#allocation2 + $0x48] sm:$0xff]  }
 0x179   : > { %v9070_v61 = vadd.f32 %v8960_v55, %v776_v43  ;;  %v9072_v62 = vrot.slane %v1377_v46, 4  ;;  %v8441_v0 = vld [vmem:[#allocation2 + $0x3c] sm:$0xff]   ;;  %1261 = vst.msk [vmem:[#allocation2 + $0x60] sm:$0xf] %vm1235_vm0, %v6831_v48  ;;  %1262 = vst.msk [vmem:[#allocation2 + $0x64] sm:$0xf] %vm1235_vm0, %v6832_v49  ;;  %v774_v4 = vmul.f32 %v8955_v53, %v700_v34 }
 0x17a   : > { %1258 = vst.msk [vmem:[#allocation2 + $0x54] sm:$0xf] %vm1235_vm0, %v6828_v50  ;;  %1259 = vst.msk [vmem:[#allocation2 + $0x58] sm:$0xf] %vm1235_vm0, %v6829_v51  ;;  %v9080_v1 = vrot.slane %v1380_v54, 5  ;;  %v1384_v2 = vshrl.u32 %v9026_v38, 16  ;;  %7851 = vmatprep.mubr.msk.bf16.mxu1 %vm1795_vm5, %v8441_v0 }
 0x17b   : > { %v1390_v3 = vshll.u32 %v1328_v45, 16  ;;  %v937_v6 = vshrl.u32 %v866_v59, 16  ;;  %v940_v7 = vshll.u32 %v866_v59, 16  ;;  %v930_v8 = vshrl.u32 %v865_v60, 16  ;;  %v7725_v38 = vpop.f32.mrb[24].mxu0  ;;  %7852 = vmatmul.mubr.msk.bf16.vlgmr.msra.gmra.mrb[0].mxu1 %vm1795_vm5, %v8443_v5  ;;  %v8457_v0 = vld [vmem:[#allocation6 + $0x8] sm:$0xff]  }
 0x17c   : > { %v933_v9 = vshll.u32 %v865_v60, 16  ;;  %v847_v10 = vmax.f32 %v9070_v61, 0.0  ;;  %v1383_v54 = vsel %vm8940_vm4, %v9072_v62, %v9080_v1  ;;  %v1386_v11 = vrot.slane %v1384_v2, 4  ;;  %7876 = vmatpush3.bf16.msra.mxu1 %v8949_v52  ;;  %v9095_v17 = vpop.f32.mrb[25].mxu0  ;;  %v1297_v34 = vld [vmem:[#allocation2 + $0x24] sm:$0xf] }
 0x17d   : > { %v1392_v12 = vrot.slane %v1390_v3, 5  ;;  %v939_v13 = vrot.slane %v937_v6, 7  ;;  %v932_v14 = vrot.slane %v930_v8, 7  ;;  %v9092_v15 = vadd.f32 %v8960_v55, %v774_v4  ;;  %v9098_v23 = vpop.f32.mrb[26].mxu0  ;;  %7877 = vmatprep.subr.bf16.mxu1 %v8449_v58  ;;  %v1298_v4 = vld [vmem:[#allocation2 + $0x28] sm:$0xf] }
 0x17e   : > { %v1395_v16 = vshrl.u32 %v1295_v57, 16  ;;  %v1387_v19 = vor.u32 %v1386_v11, %v9080_v1  ;;  %v1398_v20 = vshll.u32 %v1295_v57, 16  ;;  %v1404_v21 = vshll.u32 %v1296_v63, 16  ;;  %v9104_v52 = vpop.f32.mrb[27].mxu0  ;;  %v1330_v8 = vld [vmem:[#allocation2 + $0x2c] sm:$0x1] }
 0x17f   : > { %v1408_v22 = vshrl.u32 %v1296_v63, 16  ;;  %v942_v25 = vor.u32 %v940_v7, %v939_v13  ;;  %v1045_v26 = vsel %vm8974_vm8, %v939_v13, 0  ;;  %v935_v27 = vor.u32 %v933_v9, %v932_v14 }
 0x180   : > { %v1044_v28 = vsel %vm8974_vm8, %v932_v14, 0  ;;  %v6839_v29 = vcombine.low %v1045_v26, %v1045_v26  ;;  %v1388_v31 = vrot.slane %v1387_v19, 4  ;;  %v845_v32 = vmax.f32 %v9092_v15, 0.0  ;;  %7878 = vmatpush3.bf16.msra.mxu1 %v8449_v58  ;;  %v8445_v57 = vld [vmem:[#allocation2 + $0x60] sm:$0xff]  }
 0x181   : > { %v6836_v30 = vcombine.low %v1044_v28, %v1044_v28  ;;  %v1029_v35 = vsel %vm8974_vm8, 0, %v942_v25  ;;  %v1028_v36 = vsel %vm8974_vm8, 0, %v935_v27  ;;  %v1397_v37 = vrot.slane %v1395_v16, 4  ;;  %v8444_v46 = vld [vmem:[#allocation2 + $0x54] sm:$0xff]   ;;  %7911 = vmatprep.subr.bf16.mxu1 %v8455_v24 }
 0x182   : > { %v1400_v39 = vrot.slane %v1398_v20, 5  ;;  %v6837_v41 = vcombine.low %v1029_v35, %v1029_v35  ;;  %v6838_v42 = vcombine.high %v1029_v35, %v1029_v35  ;;  %1269 = vst.msk [vmem:[#allocation2 + $0x80] sm:$0x1] %vm1238_vm1, %v6839_v29  ;;  %v6834_v43 = vcombine.low %v1028_v36, %v1028_v36  ;;  %7855 = vmatprep.mubr.msk.bf16.mxu1 %vm1795_vm5, %v8444_v46 }
 0x183   : > { %v6835_v45 = vcombine.high %v1028_v36, %v1028_v36  ;;  %1266 = vst.msk [vmem:[#allocation2 + $0x74] sm:$0x1] %vm1238_vm1, %v6836_v30  ;;  %v1393_v48 = vsel %vm8940_vm4, %v1388_v31, %v1392_v12  ;;  %v1406_v50 = vrot.slane %v1404_v21, 5  ;;  %v1410_v51 = vrot.slane %v1408_v22, 4  ;;  %v9124_v63 = vpop.f32.mrb[28].mxu0  ;;  %7856 = vmatmul.mubr.msk.bf16.gmra.mrb[4].mxu1 %vm1795_vm5, %v8445_v57 }
 0x184   : > { %v1401_v49 = vor.u32 %v1400_v39, %v1397_v37  ;;  %1267 = vst.msk [vmem:[#allocation2 + $0x78] sm:$0xf] %vm1235_vm0, %v6837_v41  ;;  %1268 = vst.msk [vmem:[#allocation2 + $0x7c] sm:$0xf] %vm1235_vm0, %v6838_v42  ;;  %v6859_v58 = vcombine.low %v1383_v54, %v1393_v48  ;;  %v1414_v59 = vshll.u32 %v1329_v33, 16  ;;  %v777_v60 = vmul.f32 %v9058_v40, %v8955_v53  ;;  %v9128_v6 = vpop.f32.mrb[29].mxu0 }
 0x185   : > { %1264 = vst.msk [vmem:[#allocation2 + $0x6c] sm:$0xf] %vm1235_vm0, %v6834_v43  ;;  %1265 = vst.msk [vmem:[#allocation2 + $0x70] sm:$0xf] %vm1235_vm0, %v6835_v45  ;;  %v775_v62 = vmul.f32 %v8955_v53, %v9065_v47  ;;  %v1411_v2 = vor.u32 %v1410_v51, %v1406_v50  ;;  %v780_v3 = vmul.f32 %v7725_v38, %v8955_v53  ;;  %v1419_v5 = vshrl.u32 %v1297_v34, 16  ;;  %v9133_v54 = vpop.f32.mrb[30].mxu0 }
 0x186   : > { %v1402_v1 = vrot.slane %v1401_v49, 4  ;;  %7736 = vmatmul.mubr.msk.bf16.vlgmr.msra.gmra.mrb[32].mxu0 %vm1795_vm5, %v6859_v58  ;;  %v1416_v40 = vrot.slane %v1414_v59, 5  ;;  %v816_v47 = vadd.f32 %v8960_v55, %v777_v60  ;;  %v1422_v9 = vshll.u32 %v1297_v34, 16  ;;  %v9140_v14 = vpop.f32.mrb[31].mxu0  ;;  %v1299_v30 = vld [vmem:[#allocation2 + $0x30] sm:$0xf] }
 0x187   : > { %v814_v7 = vadd.f32 %v8960_v55, %v775_v62  ;;  %v1412_v12 = vrot.slane %v1411_v2, 4  ;;  %v9138_v38 = vadd.f32 %v8960_v55, %v780_v3  ;;  %v1421_v13 = vrot.slane %v1419_v5, 4  ;;  %7768 = vmatpush3.bf16.msra.mxu0 %v8993_v56  ;;  %v1300_v31 = vld [vmem:[#allocation2 + $0x34] sm:$0xf] }
 0x188   : > { %v1407_v11 = vsel %vm8940_vm4, %v1402_v1, %v1406_v50  ;;  %v848_v16 = vmax.f32 %v816_v47, 0.0  ;;  %v1424_v20 = vrot.slane %v1422_v9, 5  ;;  %v1428_v21 = vshll.u32 %v1298_v4, 16  ;;  %7769 = vmatprep.subr.bf16.mxu0 %v8457_v0  ;;  %v1301_v9 = vld [vmem:[#allocation2 + $0x3c] sm:$0xf] }
 0x189   : > { %v846_v19 = vmax.f32 %v814_v7, 0.0  ;;  %v1417_v22 = vsel %vm8940_vm4, %v1412_v12, %v1416_v40  ;;  %v851_v24 = vmax.f32 %v9138_v38, 0.0  ;;  %v1432_v25 = vshrl.u32 %v1298_v4, 16  ;;  %v1331_v4 = vld [vmem:[#allocation2 + $0x38] sm:$0x1] }
 0x18a   : > { %v1438_v26 = vshll.u32 %v1330_v8, 16  ;;  %v6860_v27 = vcombine.low %v1407_v11, %v1417_v22  ;;  %v868_v28 = vpack.c.bf16 %v848_v16, %v847_v10  ;;  %v1425_v56 = vor.u32 %v1424_v20, %v1421_v13 }
 0x18b   : > { %v867_v29 = vpack.c.bf16 %v846_v19, %v845_v32  ;;  %v1430_v33 = vrot.slane %v1428_v21, 5  ;;  %v1434_v34 = vrot.slane %v1432_v25, 4  ;;  %v778_v36 = vmul.f32 %v8955_v53, %v9095_v17  ;;  %7770 = vmatpush3.bf16.msra.mxu0 %v8457_v0  ;;  %v8447_v49 = vld [vmem:[#allocation2 + $0x78] sm:$0xff]  }
 0x18c   : > { %v1440_v35 = vrot.slane %v1438_v26, 5  ;;  %v8446_v37 = vld [vmem:[#allocation2 + $0x6c] sm:$0xff]   ;;  %7739 = vmatprep.mubr.msk.bf16.mxu0 %vm1795_vm5, %v6860_v27  ;;  %v951_v39 = vshrl.u32 %v868_v28, 16  ;;  %v954_v41 = vshll.u32 %v868_v28, 16  ;;  %v1426_v42 = vrot.slane %v1425_v56, 4 }
 0x18d   : > { %v944_v61 = vshrl.u32 %v867_v29, 16  ;;  %v947_v10 = vshll.u32 %v867_v29, 16  ;;  %v1435_v15 = vor.u32 %v1434_v34, %v1430_v33  ;;  %v9154_v32 = vadd.f32 %v8960_v55, %v778_v36  ;;  %7859 = vmatprep.mubr.msk.bf16.mxu1 %vm1795_vm5, %v8446_v37  ;;  %v1302_v27 = vld [vmem:[#allocation2 + $0x40] sm:$0xf] }
 0x18e   : > { %v1443_v43 = vshrl.u32 %v1299_v30, 16  ;;  %v953_v45 = vrot.slane %v951_v39, 7  ;;  %v1446_v48 = vshll.u32 %v1299_v30, 16  ;;  %v1452_v17 = vshll.u32 %v1300_v31, 16  ;;  %7860 = vmatmul.mubr.msk.bf16.gmra.mrb[8].mxu1 %vm1795_vm5, %v8447_v49 }
 0x18f   : > { %v946_v46 = vrot.slane %v944_v61, 7  ;;  %v1431_v50 = vsel %vm8940_vm4, %v1426_v42, %v1430_v33  ;;  %v1436_v51 = vrot.slane %v1435_v15, 4  ;;  %v849_v57 = vmax.f32 %v9154_v32, 0.0 }
 0x190   : > { %v1445_v58 = vrot.slane %v1443_v43, 4  ;;  %v956_v59 = vor.u32 %v954_v41, %v953_v45  ;;  %v1047_v60 = vsel %vm8974_vm8, %v953_v45, 0  ;;  %v1448_v5 = vrot.slane %v1446_v48, 5 }
 0x191   : > { %v949_v62 = vor.u32 %v947_v10, %v946_v46  ;;  %v1046_v0 = vsel %vm8974_vm8, %v946_v46, 0  ;;  %v6845_v1 = vcombine.low %v1047_v60, %v1047_v60  ;;  %v1441_v3 = vsel %vm8940_vm4, %v1436_v51, %v1440_v35  ;;  %v1332_v35 = vld [vmem:[#allocation2 + $0x44] sm:$0x1]  ;;  %v1303_v51 = vld [vmem:[#allocation2 + $0x48] sm:$0xf] }
 0x192   : > { %v6842_v2 = vcombine.low %v1046_v0, %v1046_v0  ;;  %v1031_v40 = vsel %vm8974_vm8, 0, %v956_v59  ;;  %v6861_v7 = vcombine.low %v1431_v50, %v1441_v3  ;;  %v1454_v8 = vrot.slane %v1452_v17, 5 }
 0x193   : > { %v1030_v47 = vsel %vm8974_vm8, 0, %v949_v62  ;;  %v6843_v11 = vcombine.low %v1031_v40, %v1031_v40  ;;  %v6844_v12 = vcombine.high %v1031_v40, %v1031_v40  ;;  %1275 = vst.msk [vmem:[#allocation2 + $0x98] sm:$0x1] %vm1238_vm1, %v6845_v1  ;;  %v1449_v19 = vor.u32 %v1448_v5, %v1445_v58  ;;  %v1304_v58 = vld [vmem:[#allocation2 + $0x4c] sm:$0xf] }
 0x194   : > { %v6840_v13 = vcombine.low %v1030_v47, %v1030_v47  ;;  %v6841_v16 = vcombine.high %v1030_v47, %v1030_v47  ;;  %1272 = vst.msk [vmem:[#allocation2 + $0x8c] sm:$0x1] %vm1238_vm1, %v6842_v2  ;;  %7740 = vmatmul.mubr.msk.bf16.gmra.mrb[36].mxu0 %vm1795_vm5, %v6861_v7  ;;  %v1456_v20 = vshrl.u32 %v1300_v31, 16  ;;  %v1462_v21 = vshll.u32 %v1331_v4, 16 }
 0x195   : > { %v781_v22 = vmul.f32 %v9098_v23, %v8955_v53  ;;  %1273 = vst.msk [vmem:[#allocation2 + $0x90] sm:$0xf] %vm1235_vm0, %v6843_v11  ;;  %1274 = vst.msk [vmem:[#allocation2 + $0x94] sm:$0xf] %vm1235_vm0, %v6844_v12  ;;  %v779_v25 = vmul.f32 %v8955_v53, %v9104_v52  ;;  %v784_v26 = vmul.f32 %v9124_v63, %v8955_v53  ;;  %v1467_v28 = vshrl.u32 %v1301_v9, 16 }
 0x196   : > { %1270 = vst.msk [vmem:[#allocation2 + $0x84] sm:$0xf] %vm1235_vm0, %v6840_v13  ;;  %1271 = vst.msk [vmem:[#allocation2 + $0x88] sm:$0xf] %vm1235_vm0, %v6841_v16  ;;  %v1470_v29 = vshll.u32 %v1301_v9, 16  ;;  %v1450_v56 = vrot.slane %v1449_v19, 4  ;;  %v782_v50 = vmul.f32 %v8955_v53, %v9128_v6 }
 0x197   : > { %v1458_v30 = vrot.slane %v1456_v20, 4  ;;  %v1464_v23 = vrot.slane %v1462_v21, 5  ;;  %v820_v31 = vadd.f32 %v8960_v55, %v781_v22  ;;  %v818_v33 = vadd.f32 %v8960_v55, %v779_v25 }
 0x198   : > { %v9187_v34 = vadd.f32 %v8960_v55, %v784_v26  ;;  %v1469_v36 = vrot.slane %v1467_v28, 4  ;;  %v1472_v37 = vrot.slane %v1470_v29, 5  ;;  %v1455_v52 = vsel %vm8940_vm4, %v1450_v56, %v1454_v8  ;;  %v1333_v28 = vld [vmem:[#allocation2 + $0x50] sm:$0x1] }
 0x199   : > { %v1459_v63 = vor.u32 %v1458_v30, %v1454_v8  ;;  %v852_v39 = vmax.f32 %v820_v31, 0.0  ;;  %v1476_v41 = vshll.u32 %v1302_v27, 16  ;;  %v850_v61 = vmax.f32 %v818_v33, 0.0  ;;  %v9218_v33 = vld [vmem:[#allocation2 + $0x54] sm:$0xf] }
 0x19a   : > { %v855_v10 = vmax.f32 %v9187_v34, 0.0  ;;  %v1473_v42 = vor.u32 %v1472_v37, %v1469_v36  ;;  %v1480_v15 = vshrl.u32 %v1302_v27, 16  ;;  %v1486_v46 = vshll.u32 %v1332_v35, 16  ;;  %v9220_v35 = vld [vmem:[#allocation2 + $0x58] sm:$0xf] }
 0x19b   : > { %v1460_v32 = vrot.slane %v1459_v63, 4  ;;  %v870_v43 = vpack.c.bf16 %v852_v39, %v851_v24  ;;  %v1478_v45 = vrot.slane %v1476_v41, 5  ;;  %v869_v48 = vpack.c.bf16 %v850_v61, %v849_v57  ;;  %v9223_v39 = vld [vmem:[#allocation6 + $0x20] sm:$0xff]  }
 0x19c   : > { %v1474_v17 = vrot.slane %v1473_v42, 4  ;;  %v1482_v49 = vrot.slane %v1480_v15, 4  ;;  %v1488_v0 = vrot.slane %v1486_v46, 5  ;;  %v9201_v5 = vadd.f32 %v8960_v55, %v782_v50  ;;  %v8450_v40 = vld [vmem:[#allocation2 + $0x90] sm:$0xff]   ;;  %7803 = vmatprep.subr.bf16.mxu0 %v9223_v39 }
 0x19d   : > { %v1465_v59 = vsel %vm8940_vm4, %v1460_v32, %v1464_v23  ;;  %v965_v60 = vshrl.u32 %v870_v43, 16  ;;  %v968_v62 = vshll.u32 %v870_v43, 16  ;;  %v8448_v1 = vld [vmem:[#allocation2 + $0x84] sm:$0xff]   ;;  %v958_v38 = vshrl.u32 %v869_v48, 16  ;;  %v1334_v32 = vld [vmem:[#allocation2 + $0x5c] sm:$0x1] }
 0x19e   : > { %v6862_v2 = vcombine.low %v1455_v52, %v1465_v59  ;;  %v961_v24 = vshll.u32 %v869_v48, 16  ;;  %v1479_v57 = vsel %vm8940_vm4, %v1474_v17, %v1478_v45  ;;  %v1483_v4 = vor.u32 %v1482_v49, %v1478_v45  ;;  %7863 = vmatprep.mubr.msk.bf16.mxu1 %vm1795_vm5, %v8448_v1 }
 0x19f   : > { %v967_v3 = vrot.slane %v965_v60, 7  ;;  %v1491_v6 = vshrl.u32 %v1303_v51, 16  ;;  %v960_v47 = vrot.slane %v958_v38, 7  ;;  %v1494_v7 = vshll.u32 %v1303_v51, 16  ;;  %7864 = vmatmul.mubr.msk.bf16.gmra.mrb[12].mxu1 %vm1795_vm5, %v8450_v40  ;;  %v9251_v40 = vld [vmem:[#allocation2 + $0x64] sm:$0xf] }
 0x1a0   : > { %7743 = vmatprep.mubr.msk.bf16.mxu0 %vm1795_vm5, %v6862_v2  ;;  %v1500_v8 = vshll.u32 %v1304_v58, 16  ;;  %v1504_v9 = vshrl.u32 %v1304_v58, 16  ;;  %v1484_v13 = vrot.slane %v1483_v4, 4  ;;  %v853_v16 = vmax.f32 %v9201_v5, 0.0 }
 0x1a1   : > { %v970_v11 = vor.u32 %v968_v62, %v967_v3  ;;  %v1049_v12 = vsel %vm8974_vm8, %v967_v3, 0  ;;  %v963_v20 = vor.u32 %v961_v24, %v960_v47  ;;  %v1048_v21 = vsel %vm8974_vm8, %v960_v47, 0  ;;  %v1335_v24 = vld [vmem:[#allocation2 + $0x68] sm:$0x1]  ;;  %v9253_v47 = vld [vmem:[#allocation2 + $0x6c] sm:$0xf] }
 0x1a2   : > { %v6851_v19 = vcombine.low %v1049_v12, %v1049_v12  ;;  %v1493_v22 = vrot.slane %v1491_v6, 4  ;;  %v6848_v26 = vcombine.low %v1048_v21, %v1048_v21  ;;  %v1489_v27 = vsel %vm8940_vm4, %v1484_v13, %v1488_v0 }
 0x1a3   : > { %v1033_v25 = vsel %vm8974_vm8, 0, %v970_v11  ;;  %v1496_v29 = vrot.slane %v1494_v7, 5  ;;  %v1032_v23 = vsel %vm8974_vm8, 0, %v963_v20  ;;  %v6863_v31 = vcombine.low %v1479_v57, %v1489_v27 }
 0x1a4   : > { %v6849_v56 = vcombine.low %v1033_v25, %v1033_v25  ;;  %v6850_v30 = vcombine.high %v1033_v25, %v1033_v25  ;;  %1281 = vst.msk [vmem:[#allocation2 + $0xb0] sm:$0x1] %vm1238_vm1, %v6851_v19  ;;  %v6846_v36 = vcombine.low %v1032_v23, %v1032_v23  ;;  %v6847_v37 = vcombine.high %v1032_v23, %v1032_v23 }
 0x1a5   : > { %1278 = vst.msk [vmem:[#allocation2 + $0xa4] sm:$0x1] %vm1238_vm1, %v6848_v26  ;;  %v1497_v52 = vor.u32 %v1496_v29, %v1493_v22  ;;  %v1502_v63 = vrot.slane %v1500_v8, 5  ;;  %7744 = vmatmul.mubr.msk.bf16.gmra.mrb[40].mxu0 %vm1795_vm5, %v6863_v31  ;;  %v1506_v41 = vrot.slane %v1504_v9, 4  ;;  %v1510_v61 = vshll.u32 %v1333_v28, 16 }
 0x1a6   : > { %1279 = vst.msk [vmem:[#allocation2 + $0xa8] sm:$0xf] %vm1235_vm0, %v6849_v56  ;;  %1280 = vst.msk [vmem:[#allocation2 + $0xac] sm:$0xf] %vm1235_vm0, %v6850_v30  ;;  %v785_v42 = vmul.f32 %v9133_v54, %v8955_v53  ;;  %v783_v15 = vmul.f32 %v8955_v53, %v9140_v14  ;;  %v1515_v45 = vshrl.u32 %v9218_v33, 16  ;;  %v1518_v46 = vshll.u32 %v9218_v33, 16 }
 0x1a7   : > { %1276 = vst.msk [vmem:[#allocation2 + $0x9c] sm:$0xf] %vm1235_vm0, %v6846_v36  ;;  %1277 = vst.msk [vmem:[#allocation2 + $0xa0] sm:$0xf] %vm1235_vm0, %v6847_v37  ;;  %v1498_v43 = vrot.slane %v1497_v52, 4  ;;  %v1524_v48 = vshll.u32 %v9220_v35, 16  ;;  %v1507_v17 = vor.u32 %v1506_v41, %v1502_v63 }
 0x1a8   : > { %v1512_v49 = vrot.slane %v1510_v61, 5  ;;  %v824_v54 = vadd.f32 %v8960_v55, %v785_v42  ;;  %v822_v53 = vadd.f32 %v8960_v55, %v783_v15  ;;  %v9240_v14 = vld [vmem:[#allocation2 + $0x60] sm:$0xf]  ;;  %v1517_v51 = vrot.slane %v1515_v45, 4 }
 0x1a9   : > { %v1503_v50 = vsel %vm8940_vm4, %v1498_v43, %v1502_v63  ;;  %v1520_v58 = vrot.slane %v1518_v46, 5  ;;  %v1526_v59 = vrot.slane %v1524_v48, 5  ;;  %v1508_v60 = vrot.slane %v1507_v17, 4  ;;  %v9273_v17 = vld [vmem:[#allocation2 + $0x70] sm:$0xf] }
 0x1aa   : > { %v856_v62 = vmax.f32 %v824_v54, 0.0  ;;  %v854_v0 = vmax.f32 %v822_v53, 0.0  ;;  %v1528_v1 = vshrl.u32 %v9220_v35, 16  ;;  %v1534_v38 = vshll.u32 %v1334_v32, 16  ;;  %v1336_v32 = vld [vmem:[#allocation2 + $0x74] sm:$0x1] }
 0x1ab   : > { %v1521_v2 = vor.u32 %v1520_v58, %v1517_v51  ;;  %v1539_v57 = vshrl.u32 %v9240_v14, 16  ;;  %v1542_v55 = vshll.u32 %v9240_v14, 16  ;;  %v1513_v3 = vsel %vm8940_vm4, %v1508_v60, %v1512_v49  ;;  %v9277_v51 = vld [vmem:[#allocation2 + $0x78] sm:$0xf]  ;;  %v9279_v58 = vld [vmem:[#allocation2 + $0x7c] sm:$0xf] }
 0x1ac   : > { %v872_v4 = vpack.c.bf16 %v856_v62, %v855_v10  ;;  %v871_v5 = vpack.c.bf16 %v854_v0, %v853_v16  ;;  %v1530_v6 = vrot.slane %v1528_v1, 4  ;;  %v6864_v7 = vcombine.low %v1503_v50, %v1513_v3 }
 0x1ad   : > { %v1522_v8 = vrot.slane %v1521_v2, 4  ;;  %v1536_v9 = vrot.slane %v1534_v38, 5  ;;  %v1541_v11 = vrot.slane %v1539_v57, 4  ;;  %v1544_v16 = vrot.slane %v1542_v55, 5  ;;  %v8452_v25 = vld [vmem:[#allocation2 + $0xa8] sm:$0xff]  }
 0x1ae   : > { %v979_v12 = vshrl.u32 %v872_v4, 16  ;;  %v982_v13 = vshll.u32 %v872_v4, 16  ;;  %v972_v19 = vshrl.u32 %v871_v5, 16  ;;  %v975_v20 = vshll.u32 %v871_v5, 16  ;;  %7747 = vmatprep.mubr.msk.bf16.mxu0 %vm1795_vm5, %v6864_v7  ;;  %v8451_v22 = vld [vmem:[#allocation2 + $0x9c] sm:$0xff]  }
 0x1af   : > { %v1527_v34 = vsel %vm8940_vm4, %v1522_v8, %v1526_v59  ;;  %v1531_v10 = vor.u32 %v1530_v6, %v1526_v59  ;;  %v1548_v21 = vshll.u32 %v9251_v40, 16  ;;  %v1552_v28 = vshrl.u32 %v9251_v40, 16  ;;  %7867 = vmatprep.mubr.msk.bf16.mxu1 %vm1795_vm5, %v8451_v22  ;;  %v1337_v57 = vld [vmem:[#allocation2 + $0x80] sm:$0x1] }
 0x1b0   : > { %v981_v26 = vrot.slane %v979_v12, 7  ;;  %v974_v27 = vrot.slane %v972_v19, 7  ;;  %v1558_v29 = vshll.u32 %v1335_v24, 16  ;;  %v1545_v30 = vor.u32 %v1544_v16, %v1541_v11  ;;  %7868 = vmatmul.mubr.msk.bf16.gmra.mrb[16].mxu1 %vm1795_vm5, %v8452_v25 }
 0x1b1   : > { %v1532_v56 = vrot.slane %v1531_v10, 4  ;;  %v1550_v23 = vrot.slane %v1548_v21, 5  ;;  %v1563_v31 = vshrl.u32 %v9253_v47, 16  ;;  %v1554_v48 = vrot.slane %v1552_v28, 4 }
 0x1b2   : > { %v984_v36 = vor.u32 %v982_v13, %v981_v26  ;;  %v1051_v37 = vsel %vm8974_vm8, %v981_v26, 0  ;;  %v977_v52 = vor.u32 %v975_v20, %v974_v27  ;;  %v1050_v63 = vsel %vm8974_vm8, %v974_v27, 0  ;;  %v9298_v20 = vld [vmem:[#allocation2 + $0x88] sm:$0xf]  ;;  %v1338_v26 = vld [vmem:[#allocation2 + $0x8c] sm:$0x1] }
 0x1b3   : > { %v6857_v41 = vcombine.low %v1051_v37, %v1051_v37  ;;  %v6854_v61 = vcombine.low %v1050_v63, %v1050_v63  ;;  %v1537_v42 = vsel %vm8940_vm4, %v1532_v56, %v1536_v9  ;;  %v1546_v15 = vrot.slane %v1545_v30, 4  ;;  %v9294_v9 = vld [vmem:[#allocation2 + $0x84] sm:$0xf] }
 0x1b4   : > { %v1035_v43 = vsel %vm8974_vm8, 0, %v984_v36  ;;  %v1034_v45 = vsel %vm8974_vm8, 0, %v977_v52  ;;  %v6865_v46 = vcombine.low %v1527_v34, %v1537_v42  ;;  %v1555_v59 = vor.u32 %v1554_v48, %v1550_v23  ;;  %v9307_v36 = vld [vmem:[#allocation2 + $0x94] sm:$0xf] }
 0x1b5   : > { %v6855_v49 = vcombine.low %v1035_v43, %v1035_v43  ;;  %v6856_v54 = vcombine.high %v1035_v43, %v1035_v43  ;;  %1287 = vst.msk [vmem:[#allocation2 + $0xc8] sm:$0x1] %vm1238_vm1, %v6857_v41  ;;  %v6852_v53 = vcombine.low %v1034_v45, %v1034_v45  ;;  %v6853_v50 = vcombine.high %v1034_v45, %v1034_v45 }
 0x1b6   : > { %1284 = vst.msk [vmem:[#allocation2 + $0xbc] sm:$0x1] %vm1238_vm1, %v6854_v61  ;;  %7748 = vmatmul.mubr.msk.bf16.gmra.mrb[44].mxu0 %vm1795_vm5, %v6865_v46  ;;  %v1551_v18 = vsel %vm8940_vm4, %v1546_v15, %v1550_v23  ;;  %v1560_v60 = vrot.slane %v1558_v29, 5  ;;  %v1565_v62 = vrot.slane %v1563_v31, 4  ;;  %v1566_v0 = vshll.u32 %v9253_v47, 16 }
 0x1b7   : > { %1285 = vst.msk [vmem:[#allocation2 + $0xc0] sm:$0xf] %vm1235_vm0, %v6855_v49  ;;  %1286 = vst.msk [vmem:[#allocation2 + $0xc4] sm:$0xf] %vm1235_vm0, %v6856_v54  ;;  %v1572_v1 = vshll.u32 %v9273_v17, 16  ;;  %v1576_v2 = vshrl.u32 %v9273_v17, 16 }
 0x1b8   : > { %1282 = vst.msk [vmem:[#allocation2 + $0xb4] sm:$0xf] %vm1235_vm0, %v6852_v53  ;;  %1283 = vst.msk [vmem:[#allocation2 + $0xb8] sm:$0xf] %vm1235_vm0, %v6853_v50  ;;  %v1582_v38 = vshll.u32 %v1336_v32, 16  ;;  %v1556_v24 = vrot.slane %v1555_v59, 4 }
 0x1b9   : > { %v1587_v55 = vshrl.u32 %v9277_v51, 16  ;;  %v1590_v3 = vshll.u32 %v9277_v51, 16  ;;  %v1596_v4 = vshll.u32 %v9279_v58, 16  ;;  %v1568_v5 = vrot.slane %v1566_v0, 5  ;;  %v9303_v29 = vld [vmem:[#allocation2 + $0x90] sm:$0xf] }
 0x1ba   : > { %v1574_v6 = vrot.slane %v1572_v1, 5  ;;  %v1578_v7 = vrot.slane %v1576_v2, 4  ;;  %v1584_v8 = vrot.slane %v1582_v38, 5  ;;  %v1561_v11 = vsel %vm8940_vm4, %v1556_v24, %v1560_v60  ;;  %v9322_v38 = vld [vmem:[#allocation2 + $0x9c] sm:$0xf] }
 0x1bb   : > { %v1589_v12 = vrot.slane %v1587_v55, 4  ;;  %v1592_v13 = vrot.slane %v1590_v3, 5  ;;  %v1598_v19 = vrot.slane %v1596_v4, 5  ;;  %v6866_v34 = vcombine.low %v1551_v18, %v1561_v11  ;;  %v1339_v18 = vld [vmem:[#allocation2 + $0x98] sm:$0x1] }
 0x1bc   : > { %v1569_v10 = vor.u32 %v1568_v5, %v1565_v62  ;;  %v1579_v16 = vor.u32 %v1578_v7, %v1574_v6  ;;  %v1600_v21 = vshrl.u32 %v9279_v58, 16  ;;  %v1606_v25 = vshll.u32 %v1337_v57, 16  ;;  %v9327_v4 = vld [vmem:[#allocation2 + $0xa0] sm:$0xf] }
 0x1bd   : > { %v1593_v22 = vor.u32 %v1592_v13, %v1589_v12  ;;  %v1611_v27 = vshrl.u32 %v9294_v9, 16  ;;  %v1614_v28 = vshll.u32 %v9294_v9, 16  ;;  %7751 = vmatprep.mubr.msk.bf16.mxu0 %vm1795_vm5, %v6866_v34  ;;  %v1620_v31 = vshll.u32 %v9298_v20, 16 }
 0x1be   : > { %v1570_v56 = vrot.slane %v1569_v10, 4  ;;  %v1580_v30 = vrot.slane %v1579_v16, 4  ;;  %v1602_v23 = vrot.slane %v1600_v21, 4  ;;  %v1608_v52 = vrot.slane %v1606_v25, 5  ;;  %v8454_v54 = vld [vmem:[#allocation2 + $0xc0] sm:$0xff]  }
 0x1bf   : > { %v1594_v37 = vrot.slane %v1593_v22, 4  ;;  %v1613_v63 = vrot.slane %v1611_v27, 4  ;;  %v1616_v41 = vrot.slane %v1614_v28, 5  ;;  %v1622_v32 = vrot.slane %v1620_v31, 5  ;;  %v8453_v43 = vld [vmem:[#allocation2 + $0xb4] sm:$0xff]  }
 0x1c0   : > { %v1575_v61 = vsel %vm8940_vm4, %v1570_v56, %v1574_v6  ;;  %v1585_v42 = vsel %vm8940_vm4, %v1580_v30, %v1584_v8  ;;  %v1603_v15 = vor.u32 %v1602_v23, %v1598_v19  ;;  %v1624_v49 = vshrl.u32 %v9298_v20, 16  ;;  %7871 = vmatprep.mubr.msk.bf16.mxu1 %vm1795_vm5, %v8453_v43  ;;  %v1340_v10 = vld [vmem:[#allocation2 + $0xa4] sm:$0x1]  ;;  %v9336_v56 = vld [vmem:[#allocation2 + $0xa8] sm:$0xf] }
 0x1c1   : > { %v6867_v45 = vcombine.low %v1575_v61, %v1585_v42  ;;  %v1599_v46 = vsel %vm8940_vm4, %v1594_v37, %v1598_v19  ;;  %v1617_v48 = vor.u32 %v1616_v41, %v1613_v63  ;;  %v1630_v50 = vshll.u32 %v1338_v26, 16  ;;  %7872 = vmatmul.mubr.msk.bf16.gmra.mrb[20].mxu1 %vm1795_vm5, %v8454_v54  ;;  %v1341_v43 = vld [vmem:[#allocation2 + $0xb0] sm:$0x1] }
 0x1c2   : > { %v1604_v53 = vrot.slane %v1603_v15, 4  ;;  %v1635_v59 = vshrl.u32 %v9303_v29, 16  ;;  %v1638_v60 = vshll.u32 %v9303_v29, 16  ;;  %v1626_v0 = vrot.slane %v1624_v49, 4 }
 0x1c3   : > { %7752 = vmatmul.mubr.msk.bf16.gmra.mrb[48].mxu0 %vm1795_vm5, %v6867_v45  ;;  %v1618_v62 = vrot.slane %v1617_v48, 4  ;;  %v1644_v1 = vshll.u32 %v9307_v36, 16  ;;  %v1648_v2 = vshrl.u32 %v9307_v36, 16  ;;  %v1632_v57 = vrot.slane %v1630_v50, 5  ;;  %v3146_v50 = vld [vmem:[#allocation2 + $0xc] sm:$0xf] }
 0x1c4   : > { %v1609_v24 = vsel %vm8940_vm4, %v1604_v53, %v1608_v52  ;;  %v1637_v55 = vrot.slane %v1635_v59, 4  ;;  %v1640_v3 = vrot.slane %v1638_v60, 5  ;;  %v1627_v7 = vor.u32 %v1626_v0, %v1622_v32  ;;  %v9340_v52 = vld [vmem:[#allocation2 + $0xac] sm:$0xf]  ;;  %v9351_v0 = vld [vmem:[#allocation2 + $0x10] sm:$0xf] }
 0x1c5   : > { %v6868_v5 = vcombine.low %v1599_v46, %v1609_v24  ;;  %v1623_v6 = vsel %vm8940_vm4, %v1618_v62, %v1622_v32  ;;  %v1646_v8 = vrot.slane %v1644_v1, 5  ;;  %v1650_v12 = vrot.slane %v1648_v2, 4  ;;  %v9353_v1 = vld [vmem:[#allocation2 + $0x14] sm:$0x1] }
 0x1c6   : > { %v1641_v11 = vor.u32 %v1640_v3, %v1637_v55  ;;  %v1654_v13 = vshll.u32 %v1339_v18, 16  ;;  %v1659_v19 = vshrl.u32 %v9322_v38, 16  ;;  %v1628_v34 = vrot.slane %v1627_v7, 4  ;;  %v9355_v3 = vld [vmem:[#allocation2 + $0xb4] sm:$0xf] }
 0x1c7   : > { %7755 = vmatprep.mubr.msk.bf16.mxu0 %vm1795_vm5, %v6868_v5  ;;  %v1662_v16 = vshll.u32 %v9322_v38, 16  ;;  %v1668_v21 = vshll.u32 %v9327_v4, 16  ;;  %v1672_v22 = vshrl.u32 %v9327_v4, 16  ;;  %v1651_v26 = vor.u32 %v1650_v12, %v1646_v8 }
 0x1c8   : > { %v1642_v25 = vrot.slane %v1641_v11, 4  ;;  %v1656_v27 = vrot.slane %v1654_v13, 5  ;;  %v1661_v28 = vrot.slane %v1659_v19, 4  ;;  %v1633_v30 = vsel %vm8940_vm4, %v1628_v34, %v1632_v57 }
 0x1c9   : > { %v1664_v23 = vrot.slane %v1662_v16, 5  ;;  %v1670_v31 = vrot.slane %v1668_v21, 5  ;;  %v1674_v37 = vrot.slane %v1672_v22, 4  ;;  %v6869_v63 = vcombine.low %v1623_v6, %v1633_v30  ;;  %v3149_v22 = vld [vmem:[#allocation2 + $0x18] sm:$0xf] }
 0x1ca   : > { %v1647_v41 = vsel %vm8940_vm4, %v1642_v25, %v1646_v8  ;;  %v1652_v61 = vrot.slane %v1651_v26, 4  ;;  %v1678_v42 = vshll.u32 %v1340_v10, 16  ;;  %v1683_v45 = vshrl.u32 %v9336_v56, 16 }
 0x1cb   : > { %v1665_v15 = vor.u32 %v1664_v23, %v1661_v28  ;;  %v1675_v32 = vor.u32 %v1674_v37, %v1670_v31  ;;  %v1686_v46 = vshll.u32 %v9336_v56, 16  ;;  %7756 = vmatmul.mubr.msk.bf16.gmra.mrb[52].mxu0 %vm1795_vm5, %v6869_v63  ;;  %v1692_v54 = vshll.u32 %v9340_v52, 16  ;;  %v1342_v28 = vld [vmem:[#allocation2 + $0xbc] sm:$0x1]  ;;  %v9366_v63 = vld [vmem:[#allocation2 + $0xb8] sm:$0xf] }
 0x1cc   : > { %v1657_v48 = vsel %vm8940_vm4, %v1652_v61, %v1656_v27  ;;  %v1680_v49 = vrot.slane %v1678_v42, 5  ;;  %v1696_v53 = vshrl.u32 %v9340_v52, 16  ;;  %v1685_v62 = vrot.slane %v1683_v45, 4 }
 0x1cd   : > { %v6870_v18 = vcombine.low %v1647_v41, %v1657_v48  ;;  %v1666_v59 = vrot.slane %v1665_v15, 4  ;;  %v1676_v60 = vrot.slane %v1675_v32, 4  ;;  %v1688_v2 = vrot.slane %v1686_v46, 5 }
 0x1ce   : > { %v1694_v24 = vrot.slane %v1692_v54, 5  ;;  %v1698_v57 = vrot.slane %v1696_v53, 4  ;;  %v1702_v55 = vshll.u32 %v1341_v43, 16  ;;  %v3195_v7 = vshrl.u32 %v3146_v50, 16  ;;  %v9374_v43 = vld [vmem:[#allocation2 + $0x1c] sm:$0xf] }
 0x1cf   : > { %7759 = vmatprep.mubr.msk.bf16.mxu0 %vm1795_vm5, %v6870_v18  ;;  %v1671_v5 = vsel %vm8940_vm4, %v1666_v59, %v1670_v31  ;;  %v1681_v6 = vsel %vm8940_vm4, %v1676_v60, %v1680_v49  ;;  %v3198_v8 = vshll.u32 %v3146_v50, 16  ;;  %v1689_v12 = vor.u32 %v1688_v2, %v1685_v62  ;;  %v9376_v54 = vld [vmem:[#allocation2 + $0x20] sm:$0x1]  ;;  %v3152_v60 = vld [vmem:[#allocation2 + $0x24] sm:$0xf] }
 0x1d0   : > { %v6871_v11 = vcombine.low %v1671_v5, %v1681_v6  ;;  %v1699_v13 = vor.u32 %v1698_v57, %v1694_v24  ;;  %v1704_v19 = vrot.slane %v1702_v55, 5  ;;  %v3197_v34 = vrot.slane %v3195_v7, 4 }
 0x1d1   : > { %v3200_v10 = vrot.slane %v3198_v8, 5  ;;  %v3204_v16 = vshll.u32 %v9351_v0, 16  ;;  %v3208_v21 = vshrl.u32 %v9351_v0, 16  ;;  %v1690_v25 = vrot.slane %v1689_v12, 4 }
 0x1d2   : > { %v1700_v26 = vrot.slane %v1699_v13, 4  ;;  %v3214_v27 = vshll.u32 %v9353_v1, 16  ;;  %v1707_v30 = vshrl.u32 %v9355_v3, 16  ;;  %v1710_v41 = vshll.u32 %v9355_v3, 16 }
 0x1d3   : > { %v3201_v23 = vor.u32 %v3200_v10, %v3197_v34  ;;  %v3206_v31 = vrot.slane %v3204_v16, 5  ;;  %v3210_v37 = vrot.slane %v3208_v21, 4  ;;  %7760 = vmatmul.mubr.msk.bf16.gmra.mrb[56].mxu0 %vm1795_vm5, %v6871_v11  ;;  %v1695_v61 = vsel %vm8940_vm4, %v1690_v25, %v1694_v24  ;;  %v9388_v21 = vld [vmem:[#allocation2 + $0x28] sm:$0xf] }
 0x1d4   : > { %v1705_v42 = vsel %vm8940_vm4, %v1700_v26, %v1704_v19  ;;  %v3216_v15 = vrot.slane %v3214_v27, 5  ;;  %v1709_v32 = vrot.slane %v1707_v30, 4  ;;  %v1712_v49 = vrot.slane %v1710_v41, 5  ;;  %v9392_v27 = vld [vmem:[#allocation2 + $0x2c] sm:$0x1] }
 0x1d5   : > { %v6872_v45 = vcombine.low %v1695_v61, %v1705_v42  ;;  %v3202_v46 = vrot.slane %v3201_v23, 4  ;;  %v3211_v48 = vor.u32 %v3210_v37, %v3206_v31  ;;  %v1716_v53 = vshll.u32 %v9366_v63, 16  ;;  %v3155_v41 = vld [vmem:[#allocation2 + $0x30] sm:$0xf] }
 0x1d6   : > { %v1720_v50 = vshrl.u32 %v9366_v63, 16  ;;  %v1726_v18 = vshll.u32 %v1342_v28, 16  ;;  %v3219_v59 = vshrl.u32 %v3149_v22, 16  ;;  %v1713_v24 = vor.u32 %v1712_v49, %v1709_v32 }
 0x1d7   : > { %7763 = vmatprep.mubr.msk.bf16.mxu0 %vm1795_vm5, %v6872_v45  ;;  %v3207_v62 = vsel %vm8940_vm4, %v3202_v46, %v3206_v31  ;;  %v3212_v2 = vrot.slane %v3211_v48, 4  ;;  %v3222_v57 = vshll.u32 %v3149_v22, 16  ;;  %v1718_v55 = vrot.slane %v1716_v53, 5  ;;  %v9397_v45 = vld [vmem:[#allocation2 + $0x34] sm:$0xf] }
 0x1d8   : > { %v1722_v5 = vrot.slane %v1720_v50, 4  ;;  %v1728_v6 = vrot.slane %v1726_v18, 5  ;;  %v3221_v7 = vrot.slane %v3219_v59, 4  ;;  %v1714_v11 = vrot.slane %v1713_v24, 4 }
 0x1d9   : > { %v3217_v8 = vsel %vm8940_vm4, %v3212_v2, %v3216_v15  ;;  %v3224_v12 = vrot.slane %v3222_v57, 5  ;;  %v3228_v13 = vshll.u32 %v9374_v43, 16  ;;  %v3232_v10 = vshrl.u32 %v9374_v43, 16 }
 0x1da   : > { %v7010_v19 = vcombine.low %v3207_v62, %v3217_v8  ;;  %v1723_v34 = vor.u32 %v1722_v5, %v1718_v55  ;;  %v3238_v16 = vshll.u32 %v9376_v54, 16  ;;  %v1719_v22 = vsel %vm8940_vm4, %v1714_v11, %v1718_v55  ;;  %v9404_v62 = vld [vmem:[#allocation2 + $0x38] sm:$0x1]  ;;  %v8498_v55 = vld [vmem:[#allocation2] sm:$0xf] }
 0x1db   : > { %v3225_v25 = vor.u32 %v3224_v12, %v3221_v7  ;;  %v3230_v26 = vrot.slane %v3228_v13, 5  ;;  %v3243_v28 = vshrl.u32 %v3152_v60, 16  ;;  %v3234_v23 = vrot.slane %v3232_v10, 4  ;;  %v9406_v5 = vld [vmem:[#allocation2 + $0x4] sm:$0xf] }
 0x1dc   : > { %7879 = vmatprep.mubr.msk.bf16.mxu1 %vm1795_vm5, %v7010_v19  ;;  %v1724_v30 = vrot.slane %v1723_v34, 4  ;;  %v3240_v31 = vrot.slane %v3238_v16, 5  ;;  %v3246_v37 = vshll.u32 %v3152_v60, 16  ;;  %v3252_v15 = vshll.u32 %v9388_v21, 16  ;;  %v3158_v7 = vld [vmem:[#allocation2 + $0x3c] sm:$0xf] }
 0x1dd   : > { %v3226_v61 = vrot.slane %v3225_v25, 4  ;;  %v3245_v42 = vrot.slane %v3243_v28, 4  ;;  %v3256_v32 = vshrl.u32 %v9388_v21, 16  ;;  %v3235_v48 = vor.u32 %v3234_v23, %v3230_v26  ;;  %v8500_v11 = vld [vmem:[#allocation2 + $0xc] sm:$0xf] }
 0x1de   : > { %v1729_v46 = vsel %vm8940_vm4, %v1724_v30, %v1728_v6  ;;  %v3248_v49 = vrot.slane %v3246_v37, 5  ;;  %v3262_v53 = vshll.u32 %v9392_v27, 16  ;;  %v3254_v59 = vrot.slane %v3252_v15, 5  ;;  %v9410_v12 = vld [vmem:[#allocation2 + $0x10] sm:$0xf] }
 0x1df   : > { %v6873_v50 = vcombine.low %v1719_v22, %v1729_v46  ;;  %v3231_v18 = vsel %vm8940_vm4, %v3226_v61, %v3230_v26  ;;  %v3258_v60 = vrot.slane %v3256_v32, 4  ;;  %v3236_v2 = vrot.slane %v3235_v48, 4  ;;  %v9418_v26 = vld [vmem:[#allocation2 + $0x40] sm:$0xf]  ;;  %v9420_v61 = vld [vmem:[#allocation2 + $0x44] sm:$0x1] }
 0x1e0   : > { %v3249_v24 = vor.u32 %v3248_v49, %v3245_v42  ;;  %v3264_v57 = vrot.slane %v3262_v53, 5  ;;  %v6892_v6 = vcombine.low %v8498_v55, %v9406_v5  ;;  %v6893_v13 = vcombine.low %v8500_v11, %v9410_v12  ;;  %v8458_v42 = vld [vmem:[#allocation6 + $0x58] sm:$0xff]   ;;  %v3161_v46 = vld [vmem:[#allocation2 + $0x48] sm:$0xf]  ;;  %v8502_v53 = vld [vmem:[#allocation2 + $0x18] sm:$0xf] }
 0x1e1   : > { %7764 = vmatmul.mubr.msk.bf16.gmra.mrb[60].mxu0 %vm1795_vm5, %v6873_v50  ;;  %v3259_v8 = vor.u32 %v3258_v60, %v3254_v59  ;;  %v3267_v19 = vshrl.u32 %v3155_v41, 16  ;;  %v3270_v34 = vshll.u32 %v3155_v41, 16  ;;  %v3241_v10 = vsel %vm8940_vm4, %v3236_v2, %v3240_v31  ;;  %v9428_v50 = vld [vmem:[#allocation2 + $0x1c] sm:$0xf] }
 0x1e2   : > { %v3250_v16 = vrot.slane %v3249_v24, 4  ;;  %7771 = vmatprep.mubr.msk.bf16.mxu0 %vm1795_vm5, %v6892_v6  ;;  %v3276_v22 = vshll.u32 %v9397_v45, 16  ;;  %v3280_v25 = vshrl.u32 %v9397_v45, 16  ;;  %v7011_v28 = vcombine.low %v3231_v18, %v3241_v10  ;;  %v9431_v2 = vld [vmem:[#allocation6 + $0x60] sm:$0xff]  }
 0x1e3   : > { %v3260_v30 = vrot.slane %v3259_v8, 4  ;;  %v3269_v23 = vrot.slane %v3267_v19, 4  ;;  %v3272_v37 = vrot.slane %v3270_v34, 5  ;;  %v3286_v32 = vshll.u32 %v9404_v62, 16 }
 0x1e4   : > { %v3255_v41 = vsel %vm8940_vm4, %v3250_v16, %v3254_v59  ;;  %v3278_v31 = vrot.slane %v3276_v22, 5  ;;  %v3282_v15 = vrot.slane %v3280_v25, 4  ;;  %7880 = vmatmul.mubr.msk.bf16.vlgmr.msra.gmra.mrb[24].mxu1 %vm1795_vm5, %v7011_v28  ;;  %v6894_v18 = vcombine.low %v8502_v53, %v9428_v50  ;;  %v8504_v59 = vld [vmem:[#allocation6 + $0x50] sm:$0xff]   ;;  %v8505_v25 = vld [vmem:[#allocation2 + $0x24] sm:$0xf] }
 0x1e5   : > { %v3265_v48 = vsel %vm8940_vm4, %v3260_v30, %v3264_v57  ;;  %v3273_v49 = vor.u32 %v3272_v37, %v3269_v23  ;;  %v3291_v60 = vshrl.u32 %v3158_v7, 16  ;;  %7912 = vmatpush3.bf16.msra.mxu1 %v8504_v59  ;;  %v3288_v6 = vrot.slane %v3286_v32, 5  ;;  %v9437_v28 = vld [vmem:[#allocation2 + $0x28] sm:$0xf]  ;;  %v9440_v23 = vld [vmem:[#allocation2 + $0x4c] sm:$0xf] }
 0x1e6   : > { %v7012_v24 = vcombine.low %v3255_v41, %v3265_v48  ;;  %v3283_v55 = vor.u32 %v3282_v15, %v3278_v31  ;;  %v3294_v8 = vshll.u32 %v3158_v7, 16  ;;  %v3300_v34 = vshll.u32 %v9418_v26, 16  ;;  %7913 = vmatprep.subr.bf16.mxu1 %v8458_v42  ;;  %v8470_v7 = vld [vmem:[#allocation6 + $0x28] sm:$0xff]   ;;  %v9445_v32 = vld [vmem:[#allocation2 + $0x50] sm:$0x1] }
 0x1e7   : > { %v3274_v11 = vrot.slane %v3273_v49, 4  ;;  %v3293_v19 = vrot.slane %v3291_v60, 4  ;;  %v3304_v57 = vshrl.u32 %v9418_v26, 16  ;;  %v3310_v22 = vshll.u32 %v9420_v61, 16  ;;  %10867 = vst [vmem:[#allocation15_spill] sm:$0xff] %v9445_v32 }
 0x1e8   : > { %7883 = vmatprep.mubr.msk.bf16.mxu1 %vm1795_vm5, %v7012_v24  ;;  %v3284_v10 = vrot.slane %v3283_v55, 4  ;;  %v3296_v16 = vrot.slane %v3294_v8, 5  ;;  %v6895_v30 = vcombine.low %v8505_v25, %v9437_v28  ;;  %v3302_v41 = vrot.slane %v3300_v34, 5  ;;  %v3164_v24 = vld [vmem:[#allocation2 + $0x54] sm:$0xf] }
 0x1e9   : > { %7772 = vmatmul.mubr.msk.bf16.vlgmr.msra.gmra.mrb[32].mxu0 %vm1795_vm5, %v6893_v13  ;;  %v3279_v37 = vsel %vm8940_vm4, %v3274_v11, %v3278_v31  ;;  %v3306_v15 = vrot.slane %v3304_v57, 4  ;;  %v3315_v48 = vshrl.u32 %v3161_v46, 16  ;;  %v3312_v60 = vrot.slane %v3310_v22, 5  ;;  %7914 = vmatpush3.bf16.msra.mxu1 %v8458_v42  ;;  %v8507_v57 = vld [vmem:[#allocation2 + $0x30] sm:$0xf] }
 0x1ea   : > { %v3289_v49 = vsel %vm8940_vm4, %v3284_v10, %v3288_v6  ;;  %7775 = vmatprep.mubr.msk.bf16.mxu0 %vm1795_vm5, %v6894_v18  ;;  %v3297_v53 = vor.u32 %v3296_v16, %v3293_v19  ;;  %v3318_v59 = vshll.u32 %v3161_v46, 16  ;;  %v3324_v31 = vshll.u32 %v9440_v23, 16  ;;  %7947 = vmatprep.subr.bf16.mxu1 %v9431_v2  ;;  %v9455_v19 = vld [vmem:[#allocation2 + $0x58] sm:$0xf]  ;;  %v9458_v10 = vld [vmem:[#allocation2 + $0x34] sm:$0xf] }
 0x1eb   : > { %v7013_v55 = vcombine.low %v3279_v37, %v3289_v49  ;;  %v3307_v13 = vor.u32 %v3306_v15, %v3302_v41  ;;  %v3317_v8 = vrot.slane %v3315_v48, 4  ;;  %7804 = vmatpush3.bf16.msra.mxu0 %v9223_v39  ;;  %v3328_v6 = vshrl.u32 %v9440_v23, 16  ;;  %10868 = vst [vmem:[#allocation16_spill] sm:$0xff] %v9455_v19  ;;  %10869 = vst [vmem:[#allocation17_spill] sm:$0xff] %v9458_v10  ;;  %v9463_v48 = vld [vmem:[#allocation2 + $0x5c] sm:$0x1] }
 0x1ec   : > { %v3298_v11 = vrot.slane %v3297_v53, 4  ;;  %v3320_v34 = vrot.slane %v3318_v59, 5  ;;  %v3334_v18 = vshll.u32 %v9445_v32, 16  ;;  %7805 = vmatprep.subr.bf16.mxu0 %v8470_v7  ;;  %v3326_v46 = vrot.slane %v3324_v31, 5  ;;  %10870 = vst [vmem:[#allocation18_spill] sm:$0xff] %v9463_v48 }
 0x1ed   : > { %7884 = vmatmul.mubr.msk.bf16.gmra.mrb[28].mxu1 %vm1795_vm5, %v7013_v55  ;;  %v3308_v42 = vrot.slane %v3307_v13, 4  ;;  %v6896_v16 = vcombine.low %v8507_v57, %v9458_v10  ;;  %v3339_v22 = vshrl.u32 %v3164_v24, 16  ;;  %v3330_v37 = vrot.slane %v3328_v6, 4  ;;  %v3167_v13 = vld [vmem:[#allocation2 + $0x60] sm:$0xf] }
 0x1ee   : > { %v3303_v39 = vsel %vm8940_vm4, %v3298_v11, %v3302_v41  ;;  %v3321_v25 = vor.u32 %v3320_v34, %v3317_v8  ;;  %v3336_v15 = vrot.slane %v3334_v18, 5  ;;  %v3342_v59 = vshll.u32 %v3164_v24, 16  ;;  %v9469_v41 = vld [vmem:[#allocation2 + $0x64] sm:$0xf]  ;;  %v9471_v8 = vld [vmem:[#allocation6 + $0x30] sm:$0xff]  }
 0x1ef   : > { %v3313_v49 = vsel %vm8940_vm4, %v3308_v42, %v3312_v60  ;;  %v3341_v53 = vrot.slane %v3339_v22, 4  ;;  %v3348_v55 = vshll.u32 %v9455_v19, 16  ;;  %7806 = vmatpush3.bf16.msra.mxu0 %v8470_v7  ;;  %v3331_v10 = vor.u32 %v3330_v37, %v3326_v46  ;;  %v8510_v34 = vld [vmem:[#allocation2 + $0x3c] sm:$0xf]  ;;  %v9476_v6 = vld [vmem:[#allocation2 + $0x40] sm:$0xf] }
 0x1f0   : > { %v7014_v31 = vcombine.low %v3303_v39, %v3313_v49  ;;  %v3322_v57 = vrot.slane %v3321_v25, 4  ;;  %v3352_v32 = vshrl.u32 %v9455_v19, 16  ;;  %7839 = vmatprep.subr.bf16.mxu0 %v9471_v8  ;;  %v3344_v60 = vrot.slane %v3342_v59, 5  ;;  %10871 = vst [vmem:[#allocation19_spill] sm:$0xff] %v9476_v6  ;;  %v9483_v37 = vld [vmem:[#allocation2 + $0x68] sm:$0x1] }
 0x1f1   : > { %7776 = vmatmul.mubr.msk.bf16.gmra.mrb[36].mxu0 %vm1795_vm5, %v6895_v30  ;;  %v3350_v11 = vrot.slane %v3348_v55, 5  ;;  %v3358_v24 = vshll.u32 %v9463_v48, 16  ;;  %v6897_v7 = vcombine.low %v8510_v34, %v9476_v6  ;;  %v3332_v42 = vrot.slane %v3331_v10, 4  ;;  %10872 = vst [vmem:[#allocation20_spill] sm:$0xff] %v9483_v37  ;;  %v9489_v48 = vld [vmem:[#allocation2 + $0x70] sm:$0xf] }
 0x1f2   : > { %7887 = vmatprep.mubr.msk.bf16.mxu1 %vm1795_vm5, %v7014_v31  ;;  %v3327_v18 = vsel %vm8940_vm4, %v3322_v57, %v3326_v46  ;;  %7779 = vmatprep.mubr.msk.bf16.mxu0 %vm1795_vm5, %v6896_v16  ;;  %v3354_v22 = vrot.slane %v3352_v32, 4  ;;  %v3363_v39 = vshrl.u32 %v3167_v13, 16  ;;  %v3345_v30 = vor.u32 %v3344_v60, %v3341_v53  ;;  %v3170_v46 = vld [vmem:[#allocation2 + $0x6c] sm:$0xf] }
 0x1f3   : > { %v3360_v25 = vrot.slane %v3358_v24, 5  ;;  %v3366_v49 = vshll.u32 %v3167_v13, 16  ;;  %v3372_v59 = vshll.u32 %v9469_v41, 16  ;;  %v3337_v55 = vsel %vm8940_vm4, %v3332_v42, %v3336_v15  ;;  %v8512_v24 = vld [vmem:[#allocation2 + $0x48] sm:$0xf] }
 0x1f4   : > { %v3355_v34 = vor.u32 %v3354_v22, %v3350_v11  ;;  %v3365_v31 = vrot.slane %v3363_v39, 4  ;;  %v3376_v6 = vshrl.u32 %v9469_v41, 16  ;;  %v7015_v10 = vcombine.low %v3327_v18, %v3337_v55  ;;  %v9492_v19 = vld [vmem:[#allocation2 + $0x4c] sm:$0xf]  ;;  %v9498_v22 = vld [vmem:[#allocation2 + $0x74] sm:$0x1] }
 0x1f5   : > { %v3346_v57 = vrot.slane %v3345_v30, 4  ;;  %v3368_v16 = vrot.slane %v3366_v49, 5  ;;  %v3374_v32 = vrot.slane %v3372_v59, 5  ;;  %v3382_v13 = vshll.u32 %v9483_v37, 16  ;;  %10873 = vst [vmem:[#allocation21_spill] sm:$0xff] %v9492_v19 }
 0x1f6   : > { %v3356_v53 = vrot.slane %v3355_v34, 4  ;;  %v3378_v60 = vrot.slane %v3376_v6, 4  ;;  %v6898_v15 = vcombine.low %v8512_v24, %v9492_v19  ;;  %7888 = vmatmul.mubr.msk.bf16.gmra.mrb[0].mxu1 %vm1795_vm5, %v7015_v10  ;;  %v3387_v39 = vshrl.u32 %v3170_v46, 16  ;;  %v3173_v34 = vld [vmem:[#allocation2 + $0x78] sm:$0xf] }
 0x1f7   : > { %v3351_v42 = vsel %vm8940_vm4, %v3346_v57, %v3350_v11  ;;  %v3369_v18 = vor.u32 %v3368_v16, %v3365_v31  ;;  %v3390_v30 = vshll.u32 %v3170_v46, 16  ;;  %v3384_v59 = vrot.slane %v3382_v13, 5 }
 0x1f8   : > { %v3361_v6 = vsel %vm8940_vm4, %v3356_v53, %v3360_v25  ;;  %v3379_v49 = vor.u32 %v3378_v60, %v3374_v32  ;;  %v3396_v55 = vshll.u32 %v9489_v48, 16  ;;  %v3389_v24 = vrot.slane %v3387_v39, 4  ;;  %v9507_v25 = vld [vmem:[#allocation2 + $0x7c] sm:$0xf]  ;;  %v9514_v60 = vld [vmem:[#allocation2 + $0x80] sm:$0x1] }
 0x1f9   : > { %v7016_v37 = vcombine.low %v3351_v42, %v3361_v6  ;;  %7780 = vmatmul.mubr.msk.bf16.gmra.mrb[40].mxu0 %vm1795_vm5, %v6897_v7  ;;  %v3370_v10 = vrot.slane %v3369_v18, 4  ;;  %v3392_v19 = vrot.slane %v3390_v30, 5  ;;  %v3400_v46 = vshrl.u32 %v9489_v48, 16  ;;  %v3176_v30 = vld [vmem:[#allocation2 + $0x84] sm:$0xf] }
 0x1fa   : > { %v3380_v11 = vrot.slane %v3379_v49, 4  ;;  %7783 = vmatprep.mubr.msk.bf16.mxu0 %vm1795_vm5, %v6898_v15  ;;  %v3398_v31 = vrot.slane %v3396_v55, 5  ;;  %v3406_v57 = vshll.u32 %v9498_v22, 16  ;;  %v6899_v7 = vcombine.low %v9218_v33, %v9220_v35  ;;  %v9521_v35 = vld [vmem:[#allocation2 + $0x88] sm:$0xf] }
 0x1fb   : > { %7891 = vmatprep.mubr.msk.bf16.mxu1 %vm1795_vm5, %v7016_v37  ;;  %v3375_v16 = vsel %vm8940_vm4, %v3370_v10, %v3374_v32  ;;  %v3393_v53 = vor.u32 %v3392_v19, %v3389_v24  ;;  %v3411_v13 = vshrl.u32 %v3173_v34, 16  ;;  %v3402_v42 = vrot.slane %v3400_v46, 4 }
 0x1fc   : > { %v3385_v15 = vsel %vm8940_vm4, %v3380_v11, %v3384_v59  ;;  %v3408_v18 = vrot.slane %v3406_v57, 5  ;;  %v3414_v39 = vshll.u32 %v3173_v34, 16  ;;  %v3420_v55 = vshll.u32 %v9507_v25, 16  ;;  %v9528_v11 = vld [vmem:[#allocation2 + $0x8c] sm:$0x1] }
 0x1fd   : > { %v7017_v6 = vcombine.low %v3375_v16, %v3385_v15  ;;  %v3394_v49 = vrot.slane %v3393_v53, 4  ;;  %v3413_v37 = vrot.slane %v3411_v13, 4  ;;  %v3403_v32 = vor.u32 %v3402_v42, %v3398_v31  ;;  %10874 = vst [vmem:[#allocation22_spill] sm:$0xff] %v9528_v11 }
 0x1fe   : > { %v3416_v19 = vrot.slane %v3414_v39, 5  ;;  %v3424_v10 = vshrl.u32 %v9507_v25, 16  ;;  %v3430_v33 = vshll.u32 %v9514_v60, 16  ;;  %v3422_v34 = vrot.slane %v3420_v55, 5  ;;  %v9537_v55 = vld [vmem:[#allocation2 + $0x94] sm:$0xf] }
 0x1ff   : > { %7892 = vmatmul.mubr.msk.bf16.gmra.mrb[4].mxu1 %vm1795_vm5, %v7017_v6  ;;  %v3399_v59 = vsel %vm8940_vm4, %v3394_v49, %v3398_v31  ;;  %v6900_v24 = vcombine.low %v9240_v14, %v9251_v40  ;;  %v3435_v46 = vshrl.u32 %v3176_v30, 16  ;;  %v3404_v57 = vrot.slane %v3403_v32, 4 }
 0x200   : > { %v3417_v16 = vor.u32 %v3416_v19, %v3413_v37  ;;  %v3426_v53 = vrot.slane %v3424_v10, 4  ;;  %v3432_v13 = vrot.slane %v3430_v33, 5  ;;  %v3438_v42 = vshll.u32 %v3176_v30, 16  ;;  %v3179_v37 = vld [vmem:[#allocation2 + $0x90] sm:$0xf] }
 0x201   : > { %7784 = vmatmul.mubr.msk.bf16.gmra.mrb[44].mxu0 %vm1795_vm5, %v6899_v7  ;;  %v3437_v15 = vrot.slane %v3435_v46, 4  ;;  %v3444_v39 = vshll.u32 %v9521_v35, 16  ;;  %v3448_v6 = vshrl.u32 %v9521_v35, 16  ;;  %v3409_v31 = vsel %vm8940_vm4, %v3404_v57, %v3408_v18  ;;  %v9539_v10 = vld [vmem:[#allocation2 + $0x98] sm:$0x1] }
 0x202   : > { %v3418_v49 = vrot.slane %v3417_v16, 4  ;;  %v3427_v14 = vor.u32 %v3426_v53, %v3422_v34  ;;  %7787 = vmatprep.mubr.msk.bf16.mxu0 %vm1795_vm5, %v6900_v24  ;;  %v3454_v40 = vshll.u32 %v9528_v11, 16  ;;  %v7018_v32 = vcombine.low %v3399_v59, %v3409_v31 }
 0x203   : > { %v3440_v7 = vrot.slane %v3438_v42, 5  ;;  %v3446_v19 = vrot.slane %v3444_v39, 5  ;;  %v3450_v30 = vrot.slane %v3448_v6, 4  ;;  %v6901_v57 = vcombine.low %v9253_v47, %v9273_v17  ;;  %v3182_v6 = vld [vmem:[#allocation2 + $0x9c] sm:$0xf] }
 0x204   : > { %v3423_v33 = vsel %vm8940_vm4, %v3418_v49, %v3422_v34  ;;  %v3428_v46 = vrot.slane %v3427_v14, 4  ;;  %v3456_v18 = vrot.slane %v3454_v40, 5  ;;  %7895 = vmatprep.mubr.msk.bf16.mxu1 %vm1795_vm5, %v7018_v32  ;;  %v3459_v53 = vshrl.u32 %v3179_v37, 16  ;;  %v9551_v17 = vld [vmem:[#allocation2 + $0xa4] sm:$0x1] }
 0x205   : > { %v3441_v24 = vor.u32 %v3440_v7, %v3437_v15  ;;  %v3451_v16 = vor.u32 %v3450_v30, %v3446_v19  ;;  %v3462_v11 = vshll.u32 %v3179_v37, 16  ;;  %v3468_v42 = vshll.u32 %v9537_v55, 16  ;;  %v9553_v7 = vld [vmem:[#allocation2 + $0xa0] sm:$0xf] }
 0x206   : > { %v3433_v59 = vsel %vm8940_vm4, %v3428_v46, %v3432_v13  ;;  %v3472_v39 = vshrl.u32 %v9537_v55, 16  ;;  %v3478_v34 = vshll.u32 %v9539_v10, 16  ;;  %v3461_v47 = vrot.slane %v3459_v53, 4 }
 0x207   : > { %v7019_v31 = vcombine.low %v3423_v33, %v3433_v59  ;;  %v3442_v49 = vrot.slane %v3441_v24, 4  ;;  %v3452_v14 = vrot.slane %v3451_v16, 4  ;;  %v3464_v15 = vrot.slane %v3462_v11, 5  ;;  %v3185_v59 = vld [vmem:[#allocation2 + $0xa8] sm:$0xf] }
 0x208   : > { %v3470_v40 = vrot.slane %v3468_v42, 5  ;;  %v3474_v32 = vrot.slane %v3472_v39, 4  ;;  %v3480_v37 = vrot.slane %v3478_v34, 5  ;;  %v6902_v33 = vcombine.low %v9277_v51, %v9279_v58 }
 0x209   : > { %7896 = vmatmul.mubr.msk.bf16.gmra.mrb[8].mxu1 %vm1795_vm5, %v7019_v31  ;;  %v3447_v13 = vsel %vm8940_vm4, %v3442_v49, %v3446_v19  ;;  %v3457_v30 = vsel %vm8940_vm4, %v3452_v14, %v3456_v18  ;;  %7788 = vmatmul.mubr.msk.bf16.gmra.mrb[48].mxu0 %vm1795_vm5, %v6901_v57  ;;  %v3483_v46 = vshrl.u32 %v3182_v6, 16  ;;  %v3465_v24 = vor.u32 %v3464_v15, %v3461_v47  ;;  %v9570_v31 = vld [vmem:[#allocation2 + $0xac] sm:$0xf]  ;;  %v9572_v47 = vld [vmem:[#allocation2 + $0xb0] sm:$0x1] }
 0x20a   : > { %v7020_v11 = vcombine.low %v3447_v13, %v3457_v30  ;;  %v3475_v16 = vor.u32 %v3474_v32, %v3470_v40  ;;  %v3486_v53 = vshll.u32 %v3182_v6, 16  ;;  %7791 = vmatprep.mubr.msk.bf16.mxu0 %vm1795_vm5, %v6902_v33  ;;  %v3492_v39 = vshll.u32 %v9553_v7, 16 }
 0x20b   : > { %v3485_v42 = vrot.slane %v3483_v46, 4  ;;  %v3496_v19 = vshrl.u32 %v9553_v7, 16  ;;  %v3502_v18 = vshll.u32 %v9551_v17, 16  ;;  %v3466_v57 = vrot.slane %v3465_v24, 4  ;;  %v3188_v46 = vld [vmem:[#allocation2 + $0xb4] sm:$0xf] }
 0x20c   : > { %7899 = vmatprep.mubr.msk.bf16.mxu1 %vm1795_vm5, %v7020_v11  ;;  %v3476_v34 = vrot.slane %v3475_v16, 4  ;;  %v3488_v51 = vrot.slane %v3486_v53, 5  ;;  %v6903_v58 = vcombine.low %v9294_v9, %v9298_v20  ;;  %v3494_v6 = vrot.slane %v3492_v39, 5 }
 0x20d   : > { %v3498_v49 = vrot.slane %v3496_v19, 4  ;;  %v3504_v14 = vrot.slane %v3502_v18, 5  ;;  %v3507_v15 = vshrl.u32 %v3185_v59, 16  ;;  %v3471_v32 = vsel %vm8940_vm4, %v3466_v57, %v3470_v40  ;;  %v9581_v18 = vld [vmem:[#allocation2 + $0xb8] sm:$0xf] }
 0x20e   : > { %v3481_v13 = vsel %vm8940_vm4, %v3476_v34, %v3480_v37  ;;  %v3489_v30 = vor.u32 %v3488_v51, %v3485_v42  ;;  %v3510_v33 = vshll.u32 %v3185_v59, 16  ;;  %v3516_v20 = vshll.u32 %v9570_v31, 16 }
 0x20f   : > { %v7021_v11 = vcombine.low %v3471_v32, %v3481_v13  ;;  %v3499_v24 = vor.u32 %v3498_v49, %v3494_v6  ;;  %v3509_v9 = vrot.slane %v3507_v15, 4  ;;  %v3520_v39 = vshrl.u32 %v9570_v31, 16  ;;  %v9589_v15 = vld [vmem:[#allocation2 + $0xbc] sm:$0x1] }
 0x210   : > { %v3490_v16 = vrot.slane %v3489_v30, 4  ;;  %v3512_v53 = vrot.slane %v3510_v33, 5  ;;  %v3526_v19 = vshll.u32 %v9572_v47, 16  ;;  %v3518_v37 = vrot.slane %v3516_v20, 5  ;;  %v3191_v33 = vld [vmem:[#allocation2 + $0xc0] sm:$0xf] }
 0x211   : > { %7900 = vmatmul.mubr.msk.bf16.gmra.mrb[12].mxu1 %vm1795_vm5, %v7021_v11  ;;  %v3500_v40 = vrot.slane %v3499_v24, 4  ;;  %7792 = vmatmul.mubr.msk.bf16.gmra.mrb[52].mxu0 %vm1795_vm5, %v6903_v58  ;;  %v6904_v59 = vcombine.low %v9303_v29, %v9307_v36  ;;  %v3531_v42 = vshrl.u32 %v3188_v46, 16  ;;  %v3522_v51 = vrot.slane %v3520_v39, 4  ;;  %v9596_v24 = vld [vmem:[#allocation2 + $0xc4] sm:$0xf] }
 0x212   : > { %v3495_v57 = vsel %vm8940_vm4, %v3490_v16, %v3494_v6  ;;  %v3513_v34 = vor.u32 %v3512_v53, %v3509_v9  ;;  %v3528_v49 = vrot.slane %v3526_v19, 5  ;;  %v3534_v58 = vshll.u32 %v3188_v46, 16 }
 0x213   : > { %v3505_v32 = vsel %vm8940_vm4, %v3500_v40, %v3504_v14  ;;  %7795 = vmatprep.mubr.msk.bf16.mxu0 %vm1795_vm5, %v6904_v59  ;;  %v3533_v13 = vrot.slane %v3531_v42, 4  ;;  %v3540_v30 = vshll.u32 %v9581_v18, 16  ;;  %v3523_v11 = vor.u32 %v3522_v51, %v3518_v37  ;;  %v9604_v42 = vld [vmem:[#allocation2 + $0xc8] sm:$0x1] }
 0x214   : > { %v7022_v29 = vcombine.low %v3495_v57, %v3505_v32  ;;  %v3514_v36 = vrot.slane %v3513_v34, 4  ;;  %v3544_v6 = vshrl.u32 %v9581_v18, 16  ;;  %v3536_v9 = vrot.slane %v3534_v58, 5 }
 0x215   : > { %v3542_v20 = vrot.slane %v3540_v30, 5  ;;  %v3550_v16 = vshll.u32 %v9589_v15, 16  ;;  %v6905_v14 = vcombine.low %v9322_v38, %v9327_v4  ;;  %v3524_v53 = vrot.slane %v3523_v11, 4 }
 0x216   : > { %7903 = vmatprep.mubr.msk.bf16.mxu1 %vm1795_vm5, %v7022_v29  ;;  %v3519_v46 = vsel %vm8940_vm4, %v3514_v36, %v3518_v37  ;;  %v3546_v39 = vrot.slane %v3544_v6, 4  ;;  %v3555_v19 = vshrl.u32 %v3191_v33, 16  ;;  %v3537_v40 = vor.u32 %v3536_v9, %v3533_v13  ;;  %v3884_v13 = vld [vmem:[#allocation2 + $0xc] sm:$0xe] }
 0x217   : > { %v3552_v59 = vrot.slane %v3550_v16, 5  ;;  %v3558_v57 = vshll.u32 %v3191_v33, 16  ;;  %v3564_v34 = vshll.u32 %v9596_v24, 16  ;;  %v3529_v51 = vsel %vm8940_vm4, %v3524_v53, %v3528_v49  ;;  %v3885_v16 = vld [vmem:[#allocation2 + $0x18] sm:$0xe] }
 0x218   : > { %v3547_v32 = vor.u32 %v3546_v39, %v3542_v20  ;;  %v3557_v38 = vrot.slane %v3555_v19, 4  ;;  %v3568_v4 = vshrl.u32 %v9596_v24, 16  ;;  %v7023_v58 = vcombine.low %v3519_v46, %v3529_v51 }
 0x219   : > { %v3538_v30 = vrot.slane %v3537_v40, 4  ;;  %7796 = vmatmul.mubr.msk.bf16.gmra.mrb[56].mxu0 %vm1795_vm5, %v6905_v14  ;;  %v3560_v37 = vrot.slane %v3558_v57, 5  ;;  %v3566_v29 = vrot.slane %v3564_v34, 5  ;;  %v3574_v33 = vshll.u32 %v9604_v42, 16 }
 0x21a   : > { %v3548_v36 = vrot.slane %v3547_v32, 4  ;;  %v3570_v11 = vrot.slane %v3568_v4, 4  ;;  %v6906_v6 = vcombine.low %v9336_v56, %v9340_v52  ;;  %7904 = vmatmul.mubr.msk.bf16.gmra.mrb[16].mxu1 %vm1795_vm5, %v7023_v58  ;;  %v7044_v56 = vrot.slane %v3884_v13, 9 }
 0x21b   : > { %v3543_v49 = vsel %vm8940_vm4, %v3538_v30, %v3542_v20  ;;  %v3561_v9 = vor.u32 %v3560_v37, %v3557_v38  ;;  %v3576_v19 = vrot.slane %v3574_v33, 5  ;;  %v3950_v20 = vrot.slane %v9351_v0, 5  ;;  %v2306_v0 = vld [vmem:[#allocation2] sm:$0xe] }
 0x21c   : > { %v3553_v14 = vsel %vm8940_vm4, %v3548_v36, %v3552_v59  ;;  %v3571_v46 = vor.u32 %v3570_v11, %v3566_v29  ;;  %7799 = vmatprep.mubr.msk.bf16.mxu0 %vm1795_vm5, %v6906_v6  ;;  %v3953_v57 = vrot.slane %v9353_v1, 5  ;;  %v7045_v34 = vrot.slane %v3885_v16, 9  ;;  %v3886_v59 = vld [vmem:[#allocation2 + $0x24] sm:$0xe] }
 0x21d   : > { %v7024_v52 = vcombine.low %v3543_v49, %v3553_v14  ;;  %v3562_v39 = vrot.slane %v3561_v9, 4  ;;  %v3957_v51 = vrot.slane %v9374_v43, 5  ;;  %v3951_v38 = vsel %vm9620_vm11, %v7044_v56, %v3950_v20  ;;  %v3887_v9 = vld [vmem:[#allocation2 + $0x30] sm:$0xe] }
 0x21e   : > { %v3572_v40 = vrot.slane %v3571_v46, 4  ;;  %v3952_v4 = vrot.slane %v3950_v20, 4  ;;  %v6907_v58 = vcombine.low %v9355_v3, %v9366_v63  ;;  %v3960_v37 = vrot.slane %v9376_v54, 5  ;;  %v2307_v3 = vld [vmem:[#allocation2 + $0xc] sm:$0xe] }
 0x21f   : > { %7907 = vmatprep.mubr.msk.bf16.mxu1 %vm1795_vm5, %v7024_v52  ;;  %v3567_v32 = vsel %vm8940_vm4, %v3562_v39, %v3566_v29  ;;  %v3958_v43 = vsel %vm9620_vm11, %v7045_v34, %v3957_v51  ;;  %v3959_v30 = vrot.slane %v3957_v51, 4  ;;  %v7046_v36 = vrot.slane %v3886_v59, 9  ;;  %v8514_v46 = vld [vmem:[#allocation2 + $0x8] sm:$0x1] }
 0x220   : > { %v3577_v1 = vsel %vm8940_vm4, %v3572_v40, %v3576_v19  ;;  %v3954_v29 = vsel %vm9620_vm11, %v3952_v4, %v3953_v57  ;;  %v3964_v11 = vrot.slane %v9388_v21, 5  ;;  %v6926_v6 = vrot.slane %v2306_v0, 9  ;;  %v2308_v57 = vld [vmem:[#allocation2 + $0x18] sm:$0xe]  ;;  %v3888_v4 = vld [vmem:[#allocation2 + $0x3c] sm:$0xe] }
 0x221   : > { %v7025_v13 = vcombine.low %v3567_v32, %v3577_v1  ;;  %7800 = vmatmul.mubr.msk.bf16.gmra.mrb[60].mxu0 %vm1795_vm5, %v6907_v58  ;;  %v7060_v63 = vcombine.low %v3951_v38, %v3954_v29  ;;  %v3961_v33 = vsel %vm9620_vm11, %v3959_v30, %v3960_v37  ;;  %v2359_v49 = vrot.slane %v9406_v5, 5  ;;  %v8515_v32 = vld [vmem:[#allocation2 + $0x14] sm:$0x1] }
 0x222   : > { %v7061_v54 = vcombine.low %v3958_v43, %v3961_v33  ;;  %v3966_v16 = vrot.slane %v3964_v11, 4  ;;  %v3967_v14 = vrot.slane %v9392_v27, 5  ;;  %v2362_v56 = vrot.slane %v8514_v46, 5 }
 0x223   : > { %7908 = vmatmul.mubr.msk.bf16.gmra.mrb[20].mxu1 %vm1795_vm5, %v7025_v13  ;;  %v2360_v21 = vsel %vm9620_vm11, %v6926_v6, %v2359_v49  ;;  %v2361_v52 = vrot.slane %v2359_v49, 4  ;;  %v6927_v39 = vrot.slane %v2307_v3, 9  ;;  %v2366_v19 = vrot.slane %v9410_v12, 5  ;;  %v2309_v13 = vld [vmem:[#allocation2 + $0x24] sm:$0xe] }
 0x224   : > { %7915 = vmatprep.mubr.msk.bf16.mxu1 %vm1795_vm5, %v7060_v63  ;;  %v3965_v5 = vsel %vm9620_vm11, %v7046_v36, %v3964_v11  ;;  %v3968_v20 = vsel %vm9620_vm11, %v3966_v16, %v3967_v14  ;;  %v7047_v40 = vrot.slane %v3887_v9, 9  ;;  %v3971_v27 = vrot.slane %v9397_v45, 5  ;;  %v3889_v3 = vld [vmem:[#allocation2 + $0x48] sm:$0xe]  ;;  %v8471_v63 = vld [vmem:[#allocation6 + $0x68] sm:$0xff]  }
 0x225   : > { %v7062_v34 = vcombine.low %v3965_v5, %v3968_v20  ;;  %v2363_v51 = vsel %vm9620_vm11, %v2361_v52, %v2362_v56  ;;  %v2368_v59 = vrot.slane %v2366_v19, 4  ;;  %v2369_v38 = vrot.slane %v8515_v32, 5  ;;  %v8516_v9 = vld [vmem:[#allocation2 + $0x20] sm:$0x1] }
 0x226   : > { %v6942_v58 = vcombine.low %v2360_v21, %v2363_v51  ;;  %v2367_v12 = vsel %vm9620_vm11, %v6927_v39, %v2366_v19  ;;  %v3973_v0 = vrot.slane %v3971_v27, 4  ;;  %v3974_v1 = vrot.slane %v9404_v62, 5  ;;  %v2310_v39 = vld [vmem:[#allocation2 + $0x30] sm:$0xe] }
 0x227   : > { %v2370_v43 = vsel %vm9620_vm11, %v2368_v59, %v2369_v38  ;;  %v9666_v45 = vsel %vm9620_vm11, %v7047_v40, %v3971_v27  ;;  %v6928_v30 = vrot.slane %v2308_v57, 9  ;;  %v2373_v37 = vrot.slane %v9428_v50, 5  ;;  %v9689_v40 = vld [vmem:[#allocation6 + $0x70] sm:$0xff]   ;;  %v8518_v59 = vld [vmem:[#allocation6 + $0x38] sm:$0xff]  }
 0x228   : > { %7807 = vmatprep.mubr.msk.bf16.mxu0 %vm1795_vm5, %v6942_v58  ;;  %v6943_v29 = vcombine.low %v2367_v12, %v2370_v43  ;;  %v3975_v36 = vsel %vm9620_vm11, %v3973_v0, %v3974_v1  ;;  %v7048_v11 = vrot.slane %v3888_v4, 9  ;;  %v3978_v62 = vrot.slane %v9418_v26, 5  ;;  %v2311_v12 = vld [vmem:[#allocation2 + $0x3c] sm:$0xe]  ;;  %v8519_v1 = vld [vmem:[#allocation2 + $0x38] sm:$0x1] }
 0x229   : > { %v7063_v33 = vcombine.low %v9666_v45, %v3975_v36  ;;  %v2374_v6 = vsel %vm9620_vm11, %v6928_v30, %v2373_v37  ;;  %v2375_v49 = vrot.slane %v2373_v37, 4  ;;  %v2376_v50 = vrot.slane %v8516_v9, 5  ;;  %v10879_v30 = vld [vmem:[#allocation16_spill] sm:$0xff] }
 0x22a   : > { %7808 = vmatmul.mubr.msk.bf16.vlgmr.msra.gmra.mrb[32].mxu0 %vm1795_vm5, %v6943_v29  ;;  %v3980_v16 = vrot.slane %v3978_v62, 4  ;;  %v3981_v14 = vrot.slane %v9420_v61, 5  ;;  %v6929_v46 = vrot.slane %v2309_v13, 9  ;;  %v2380_v26 = vrot.slane %v9437_v28, 5  ;;  %v8517_v28 = vld [vmem:[#allocation2 + $0x2c] sm:$0x1] }
 0x22b   : > { %7916 = vmatmul.mubr.msk.bf16.vlgmr.msra.gmra.mrb[24].mxu1 %vm1795_vm5, %v7061_v54  ;;  %v2377_v56 = vsel %vm9620_vm11, %v2375_v49, %v2376_v50  ;;  %v3979_v21 = vsel %vm9620_vm11, %v7048_v11, %v3978_v62  ;;  %v7049_v52 = vrot.slane %v3889_v3, 9  ;;  %v3985_v54 = vrot.slane %v9440_v23, 5  ;;  %7840 = vmatpush3.bf16.msra.mxu0 %v9471_v8  ;;  %v10877_v23 = vld [vmem:[#allocation15_spill] sm:$0xff]  ;;  %v10878_v8 = vld [vmem:[#allocation17_spill] sm:$0xff]  ;;  %v3891_v13 = vld [vmem:[#allocation2 + $0x60] sm:$0xe] }
 0x22c   : > { %7948 = vmatpush3.bf16.msra.mxu1 %v9431_v2  ;;  %7919 = vmatprep.mubr.msk.bf16.mxu1 %vm1795_vm5, %v7062_v34  ;;  %v6944_v19 = vcombine.low %v2374_v6, %v2377_v56  ;;  %v3982_v61 = vsel %vm9620_vm11, %v3980_v16, %v3981_v14  ;;  %v2382_v5 = vrot.slane %v2380_v26, 4  ;;  %v2383_v20 = vrot.slane %v8517_v28, 5  ;;  %v3890_v2 = vld [vmem:[#allocation2 + $0x54] sm:$0xe]  ;;  %v10880_v6 = vld [vmem:[#allocation18_spill] sm:$0xff]  ;;  %v10881_v50 = vld [vmem:[#allocation19_spill] sm:$0xff] }
 0x22d   : > { %7949 = vmatprep.subr.bf16.mxu1 %v8471_v63  ;;  %v7064_v27 = vcombine.low %v3979_v21, %v3982_v61  ;;  %v2381_v57 = vsel %vm9620_vm11, %v6929_v46, %v2380_v26  ;;  %v3987_v34 = vrot.slane %v3985_v54, 4  ;;  %v3988_v51 = vrot.slane %v10877_v23, 5  ;;  %7841 = vmatprep.subr.bf16.mxu0 %v8518_v59  ;;  %v2312_v56 = vld [vmem:[#allocation2 + $0x48] sm:$0xe] }
 0x22e   : > { %7811 = vmatprep.mubr.msk.bf16.mxu0 %vm1795_vm5, %v6944_v19  ;;  %v2384_v32 = vsel %vm9620_vm11, %v2382_v5, %v2383_v20  ;;  %v9700_v38 = vsel %vm9620_vm11, %v7049_v52, %v3985_v54  ;;  %v6930_v4 = vrot.slane %v2310_v39, 9  ;;  %v2387_v58 = vrot.slane %v10878_v8, 5  ;;  %v3892_v19 = vld [vmem:[#allocation2 + $0x6c] sm:$0xe]  ;;  %v10882_v20 = vld [vmem:[#allocation20_spill] sm:$0xff] }
 0x22f   : > { %v3989_v0 = vsel %vm9620_vm11, %v3987_v34, %v3988_v51  ;;  %v2390_v43 = vrot.slane %v8519_v1, 5  ;;  %v7050_v45 = vrot.slane %v3890_v2, 9  ;;  %v3992_v37 = vrot.slane %v10879_v30, 5  ;;  %7842 = vmatpush3.bf16.msra.mxu0 %v8518_v59  ;;  %v10883_v34 = vld [vmem:[#allocation21_spill] sm:$0xff]  ;;  %v2313_v51 = vld [vmem:[#allocation2 + $0x54] sm:$0xe] }
 0x230   : > { %7950 = vmatpush3.bf16.msra.mxu1 %v8471_v63  ;;  %v6945_v29 = vcombine.low %v2381_v57, %v2384_v32  ;;  %v7065_v36 = vcombine.low %v9700_v38, %v3989_v0  ;;  %v2388_v11 = vsel %vm9620_vm11, %v6930_v4, %v2387_v58  ;;  %v2389_v62 = vrot.slane %v2387_v58, 4  ;;  %v8521_v32 = vld [vmem:[#allocation2 + $0x50] sm:$0x1]  ;;  %v3893_v58 = vld [vmem:[#allocation2 + $0x78] sm:$0xe] }
 0x231   : > { %7983 = vmatprep.subr.bf16.mxu1 %v9689_v40  ;;  %v3994_v3 = vrot.slane %v3992_v37, 4  ;;  %v3995_v49 = vrot.slane %v10880_v6, 5  ;;  %v6931_v9 = vrot.slane %v2311_v12, 9  ;;  %v2394_v16 = vrot.slane %v10881_v50, 5  ;;  %v2314_v6 = vld [vmem:[#allocation2 + $0x60] sm:$0xe] }
 0x232   : > { %7812 = vmatmul.mubr.msk.bf16.gmra.mrb[36].mxu0 %vm1795_vm5, %v6945_v29  ;;  %v2391_v63 = vsel %vm9620_vm11, %v2389_v62, %v2390_v43  ;;  %v3993_v14 = vsel %vm9620_vm11, %v7050_v45, %v3992_v37  ;;  %v7051_v46 = vrot.slane %v3891_v13, 9  ;;  %v3999_v26 = vrot.slane %v9469_v41, 5  ;;  %v8522_v13 = vld [vmem:[#allocation2 + $0x58] sm:$0xf] }
 0x233   : > { %7920 = vmatmul.mubr.msk.bf16.gmra.mrb[28].mxu1 %vm1795_vm5, %v7063_v33  ;;  %v6946_v21 = vcombine.low %v2388_v11, %v2391_v63  ;;  %v3996_v52 = vsel %vm9620_vm11, %v3994_v3, %v3995_v49  ;;  %v2396_v54 = vrot.slane %v2394_v16, 4  ;;  %v8520_v33 = vld [vmem:[#allocation2 + $0x44] sm:$0x1]  ;;  %v2395_v5 = vsel %vm9620_vm11, %v6931_v9, %v2394_v16  ;;  %v3894_v63 = vld [vmem:[#allocation2 + $0x84] sm:$0xe] }
 0x234   : > { %7923 = vmatprep.mubr.msk.bf16.mxu1 %vm1795_vm5, %v7064_v27  ;;  %v2397_v39 = vrot.slane %v8520_v33, 5  ;;  %v7066_v61 = vcombine.low %v3993_v14, %v3996_v52  ;;  %v4001_v28 = vrot.slane %v3999_v26, 4  ;;  %v4002_v2 = vrot.slane %v10882_v20, 5 }
 0x235   : > { %7815 = vmatprep.mubr.msk.bf16.mxu0 %vm1795_vm5, %v6946_v21  ;;  %v9730_v27 = vsel %vm9620_vm11, %v7051_v46, %v3999_v26  ;;  %v6932_v57 = vrot.slane %v2312_v56, 9  ;;  %v2401_v23 = vrot.slane %v10883_v34, 5  ;;  %v2404_v38 = vrot.slane %v8521_v32, 5  ;;  %v8524_v56 = vld [vmem:[#allocation2 + $0x64] sm:$0xf] }
 0x236   : > { %v2398_v41 = vsel %vm9620_vm11, %v2396_v54, %v2397_v39  ;;  %v9735_v59 = vsel %vm9620_vm11, %v4001_v28, %v4002_v2  ;;  %v7052_v4 = vrot.slane %v3892_v19, 9  ;;  %v4006_v8 = vrot.slane %v9489_v48, 5  ;;  %v8525_v28 = vld [vmem:[#allocation2 + $0x68] sm:$0x1]  ;;  %v2315_v34 = vld [vmem:[#allocation2 + $0x6c] sm:$0xe] }
 0x237   : > { %v6947_v12 = vcombine.low %v2395_v5, %v2398_v41  ;;  %v7067_v0 = vcombine.low %v9730_v27, %v9735_v59  ;;  %v2402_v1 = vsel %vm9620_vm11, %v6932_v57, %v2401_v23  ;;  %v2403_v43 = vrot.slane %v2401_v23, 4  ;;  %v10884_v27 = vld [vmem:[#allocation22_spill] sm:$0xff]  ;;  %v8526_v23 = vld [vmem:[#allocation2 + $0x70] sm:$0xf] }
 0x238   : > { %v4007_v45 = vsel %vm9620_vm11, %v7052_v4, %v4006_v8  ;;  %v4008_v30 = vrot.slane %v4006_v8, 4  ;;  %v4009_v37 = vrot.slane %v9498_v22, 5  ;;  %v2408_v29 = vrot.slane %v8522_v13, 5  ;;  %v8523_v22 = vld [vmem:[#allocation2 + $0x5c] sm:$0x1] }
 0x239   : > { %v2405_v48 = vsel %vm9620_vm11, %v2403_v43, %v2404_v38  ;;  %v6933_v11 = vrot.slane %v2313_v51, 9  ;;  %v7053_v62 = vrot.slane %v3893_v58, 9  ;;  %v4013_v3 = vrot.slane %v9507_v25, 5  ;;  %v2316_v4 = vld [vmem:[#allocation2 + $0x78] sm:$0xe] }
 0x23a   : > { %7816 = vmatmul.mubr.msk.bf16.gmra.mrb[40].mxu0 %vm1795_vm5, %v6947_v12  ;;  %v6948_v49 = vcombine.low %v2402_v1, %v2405_v48  ;;  %v4010_v9 = vsel %vm9620_vm11, %v4008_v30, %v4009_v37  ;;  %v2410_v50 = vrot.slane %v2408_v29, 4  ;;  %v2411_v16 = vrot.slane %v8523_v22, 5  ;;  %v3896_v43 = vld [vmem:[#allocation2 + $0x9c] sm:$0xe] }
 0x23b   : > { %7924 = vmatmul.mubr.msk.bf16.gmra.mrb[0].mxu1 %vm1795_vm5, %v7065_v36  ;;  %v7068_v14 = vcombine.low %v4007_v45, %v4010_v9  ;;  %v4015_v46 = vrot.slane %v4013_v3, 4  ;;  %v4016_v26 = vrot.slane %v9514_v60, 5  ;;  %v6934_v36 = vrot.slane %v2314_v6, 9  ;;  %v3895_v60 = vld [vmem:[#allocation2 + $0x90] sm:$0xe] }
 0x23c   : > { %7927 = vmatprep.mubr.msk.bf16.mxu1 %vm1795_vm5, %v7066_v61  ;;  %7819 = vmatprep.mubr.msk.bf16.mxu0 %vm1795_vm5, %v6948_v49  ;;  %v2412_v25 = vsel %vm9620_vm11, %v2410_v50, %v2411_v16  ;;  %v2415_v21 = vrot.slane %v8524_v56, 5  ;;  %v9759_v52 = vsel %vm9620_vm11, %v7053_v62, %v4013_v3  ;;  %v7054_v33 = vrot.slane %v3894_v63, 9  ;;  %v3897_v49 = vld [vmem:[#allocation2 + $0xa8] sm:$0xe]  ;;  %v8529_v16 = vld [vmem:[#allocation2 + $0x80] sm:$0x1] }
 0x23d   : > { %v9763_v54 = vsel %vm9620_vm11, %v4015_v46, %v4016_v26  ;;  %v4020_v39 = vrot.slane %v9521_v35, 5  ;;  %v2409_v19 = vsel %vm9620_vm11, %v6933_v11, %v2408_v29  ;;  %v2418_v20 = vrot.slane %v8525_v28, 5  ;;  %v8528_v11 = vld [vmem:[#allocation2 + $0x7c] sm:$0xf] }
 0x23e   : > { %v7069_v61 = vcombine.low %v9759_v52, %v9763_v54  ;;  %v2417_v5 = vrot.slane %v2415_v21, 4  ;;  %v6949_v2 = vcombine.low %v2409_v19, %v2412_v25  ;;  %v4023_v57 = vrot.slane %v10884_v27, 5  ;;  %v8530_v25 = vld [vmem:[#allocation2 + $0x88] sm:$0xf] }
 0x23f   : > { %v4022_v41 = vrot.slane %v4020_v39, 4  ;;  %v2422_v51 = vrot.slane %v8526_v23, 5  ;;  %v2416_v35 = vsel %vm9620_vm11, %v6934_v36, %v2415_v21  ;;  %v7055_v32 = vrot.slane %v3895_v60, 9 }
 0x240   : > { %v2419_v59 = vsel %vm9620_vm11, %v2417_v5, %v2418_v20  ;;  %v4027_v38 = vrot.slane %v9537_v55, 5  ;;  %v4021_v58 = vsel %vm9620_vm11, %v7054_v33, %v4020_v39  ;;  %v6935_v30 = vrot.slane %v2315_v34, 9  ;;  %v8527_v55 = vld [vmem:[#allocation2 + $0x74] sm:$0x1] }
 0x241   : > { %v6950_v8 = vcombine.low %v2416_v35, %v2419_v59  ;;  %v4024_v12 = vsel %vm9620_vm11, %v4022_v41, %v4023_v57  ;;  %v2424_v1 = vrot.slane %v2422_v51, 4  ;;  %v4030_v13 = vrot.slane %v9539_v10, 5  ;;  %v8532_v57 = vld [vmem:[#allocation2 + $0x8c] sm:$0x1] }
 0x242   : > { %7820 = vmatmul.mubr.msk.bf16.gmra.mrb[44].mxu0 %vm1795_vm5, %v6949_v2  ;;  %v7070_v45 = vcombine.low %v4021_v58, %v4024_v12  ;;  %v4029_v37 = vrot.slane %v4027_v38, 4  ;;  %v2425_v29 = vrot.slane %v8527_v55, 5  ;;  %v6936_v48 = vrot.slane %v2316_v4, 9  ;;  %v2318_v2 = vld [vmem:[#allocation2 + $0x90] sm:$0xe] }
 0x243   : > { %7928 = vmatmul.mubr.msk.bf16.gmra.mrb[4].mxu1 %vm1795_vm5, %v7067_v0  ;;  %7823 = vmatprep.mubr.msk.bf16.mxu0 %vm1795_vm5, %v6950_v8  ;;  %v2429_v62 = vrot.slane %v8528_v11, 5  ;;  %v9787_v3 = vsel %vm9620_vm11, %v7055_v32, %v4027_v38  ;;  %v7056_v6 = vrot.slane %v3896_v43, 9  ;;  %v4034_v10 = vrot.slane %v9553_v7, 5  ;;  %v8533_v32 = vld [vmem:[#allocation2 + $0x98] sm:$0x1] }
 0x244   : > { %7931 = vmatprep.mubr.msk.bf16.mxu1 %vm1795_vm5, %v7068_v14  ;;  %v9791_v0 = vsel %vm9620_vm11, %v4029_v37, %v4030_v13  ;;  %v2426_v9 = vsel %vm9620_vm11, %v2424_v1, %v2425_v29  ;;  %v2432_v63 = vrot.slane %v8529_v16, 5  ;;  %v2423_v14 = vsel %vm9620_vm11, %v6935_v30, %v2422_v51  ;;  %v3899_v51 = vld [vmem:[#allocation2 + $0xc0] sm:$0xe]  ;;  %v2319_v55 = vld [vmem:[#allocation2 + $0x9c] sm:$0xe] }
 0x245   : > { %v7071_v50 = vcombine.low %v9787_v3, %v9791_v0  ;;  %v2431_v22 = vrot.slane %v2429_v62, 4  ;;  %v4036_v46 = vrot.slane %v4034_v10, 4  ;;  %v4037_v26 = vrot.slane %v9551_v17, 5  ;;  %v2317_v17 = vld [vmem:[#allocation2 + $0x84] sm:$0xe] }
 0x246   : > { %v2436_v36 = vrot.slane %v8530_v25, 5  ;;  %v2430_v7 = vsel %vm9620_vm11, %v6936_v48, %v2429_v62  ;;  %v7057_v21 = vrot.slane %v3897_v49, 9  ;;  %v4041_v52 = vrot.slane %v9570_v31, 5  ;;  %v8531_v31 = vld [vmem:[#allocation2 + $0x94] sm:$0xf] }
 0x247   : > { %v2433_v56 = vsel %vm9620_vm11, %v2431_v22, %v2432_v63  ;;  %v6951_v54 = vcombine.low %v2423_v14, %v2426_v9  ;;  %v4035_v39 = vsel %vm9620_vm11, %v7056_v6, %v4034_v10  ;;  %v4038_v60 = vsel %vm9620_vm11, %v4036_v46, %v4037_v26  ;;  %v8534_v8 = vld [vmem:[#allocation2 + $0xa0] sm:$0xf]  ;;  %v3898_v62 = vld [vmem:[#allocation2 + $0xb4] sm:$0xe]  ;;  %v2320_v0 = vld [vmem:[#allocation2 + $0xa8] sm:$0xe] }
 0x248   : > { %v6952_v33 = vcombine.low %v2430_v7, %v2433_v56  ;;  %v7072_v19 = vcombine.low %v4035_v39, %v4038_v60  ;;  %v2438_v5 = vrot.slane %v2436_v36, 4  ;;  %v4043_v28 = vrot.slane %v4041_v52, 4  ;;  %v8535_v6 = vld [vmem:[#allocation2 + $0xac] sm:$0xf]  ;;  %v8536_v9 = vld [vmem:[#allocation2 + $0xa4] sm:$0x1] }
 0x249   : > { %v4044_v20 = vrot.slane %v9572_v47, 5  ;;  %v2443_v41 = vrot.slane %v8531_v31, 5  ;;  %v6937_v27 = vrot.slane %v2317_v17, 9  ;;  %v2439_v34 = vrot.slane %v8532_v57, 5  ;;  %v8537_v26 = vld [vmem:[#allocation2 + $0xb0] sm:$0x1] }
 0x24a   : > { %7824 = vmatmul.mubr.msk.bf16.gmra.mrb[48].mxu0 %vm1795_vm5, %v6951_v54  ;;  %v4042_v23 = vsel %vm9620_vm11, %v7057_v21, %v4041_v52  ;;  %v2446_v38 = vrot.slane %v8533_v32, 5  ;;  %v2450_v58 = vrot.slane %v8534_v8, 5  ;;  %v4048_v1 = vrot.slane %v9581_v18, 5  ;;  %v8538_v7 = vld [vmem:[#allocation2 + $0xb8] sm:$0xf]  ;;  %v8481_v8 = vld [vmem:[#allocation2 + $0x30] sm:$0xff]  }
 0x24b   : > { %7932 = vmatmul.mubr.msk.bf16.gmra.mrb[8].mxu1 %vm1795_vm5, %v7069_v61  ;;  %7827 = vmatprep.mubr.msk.bf16.mxu0 %vm1795_vm5, %v6952_v33  ;;  %v4045_v47 = vsel %vm9620_vm11, %v4043_v28, %v4044_v20  ;;  %v6938_v61 = vrot.slane %v2318_v2, 9  ;;  %v2445_v59 = vrot.slane %v2443_v41, 4  ;;  %v2440_v4 = vsel %vm9620_vm11, %v2438_v5, %v2439_v34  ;;  %v2321_v60 = vld [vmem:[#allocation2 + $0xb4] sm:$0xe]  ;;  %v8539_v20 = vld [vmem:[#allocation2 + $0xbc] sm:$0x1] }
 0x24c   : > { %7935 = vmatprep.mubr.msk.bf16.mxu1 %vm1795_vm5, %v7070_v45  ;;  %v7073_v35 = vcombine.low %v4042_v23, %v4045_v47  ;;  %v7059_v43 = vrot.slane %v3899_v51, 9  ;;  %v4055_v45 = vrot.slane %v9596_v24, 5  ;;  %v2437_v30 = vsel %vm9620_vm11, %v6937_v27, %v2436_v36  ;;  %v8472_v57 = vld [vmem:[#allocation2 + $0x18] sm:$0xff]   ;;  %v8475_v34 = vld [vmem:[#allocation2 + $0xc] sm:$0xff]   ;;  %v8474_v23 = vld [vmem:[#allocation2 + $0x24] sm:$0xff]  }
 0x24d   : > { %v2447_v12 = vsel %vm9620_vm11, %v2445_v59, %v2446_v38  ;;  %v6953_v37 = vcombine.low %v2437_v30, %v2440_v4  ;;  %v2444_v13 = vsel %vm9620_vm11, %v6938_v61, %v2443_v41  ;;  %v4058_v48 = vrot.slane %v9604_v42, 5  ;;  %v8477_v47 = vld [vmem:[#allocation2 + $0x18] sm:$0xff]   ;;  %v8486_v51 = vld [vmem:[#allocation6 + $0x78] sm:$0xff]   ;;  %v8479_v61 = vld [vmem:[#allocation2 + $0x24] sm:$0xff]  }
 0x24e   : > { %v4057_v29 = vrot.slane %v4055_v45, 4  ;;  %v6954_v11 = vcombine.low %v2444_v13, %v2447_v12  ;;  %v2452_v3 = vrot.slane %v2450_v58, 4  ;;  %v2457_v18 = vrot.slane %v8535_v6, 5  ;;  %v9868_v59 = vld [vmem:[#allocation6 + $0x80] sm:$0xff]   ;;  %v9878_v30 = vld [vmem:[#allocation2 + $0x28] sm:$0xf] }
 0x24f   : > { %v4050_v24 = vrot.slane %v4048_v1, 4  ;;  %v4056_v10 = vsel %vm9620_vm11, %v7059_v43, %v4055_v45  ;;  %v6939_v42 = vrot.slane %v2319_v55, 9  ;;  %v2453_v22 = vrot.slane %v8536_v9, 5  ;;  %v4737_v32 = vld [vmem:[#allocation2 + $0x18] sm:$0xf]  ;;  %v8478_v4 = vld [vmem:[#allocation2 + $0x3c] sm:$0xff]  }
 0x250   : > { %v4059_v49 = vsel %vm9620_vm11, %v4057_v29, %v4058_v48  ;;  %v2459_v63 = vrot.slane %v2457_v18, 4  ;;  %v7058_v14 = vrot.slane %v3898_v62, 9  ;;  %v6940_v46 = vrot.slane %v2320_v0, 9  ;;  %v9870_v38 = vld [vmem:[#allocation2 + $0x1c] sm:$0xf]  ;;  %v8482_v6 = vld [vmem:[#allocation2 + $0x54] sm:$0xff]  }
 0x251   : > { %v7075_v16 = vcombine.low %v4056_v10, %v4059_v49  ;;  %v2460_v25 = vrot.slane %v8537_v26, 5  ;;  %v2454_v36 = vsel %vm9620_vm11, %v2452_v3, %v2453_v22  ;;  %v2464_v56 = vrot.slane %v8538_v7, 5  ;;  %v4740_v45 = vld [vmem:[#allocation2 + $0x24] sm:$0xf]  ;;  %v9882_v62 = vld [vmem:[#allocation2 + $0x20] sm:$0x1] }
 0x252   : > { %7828 = vmatmul.mubr.msk.bf16.gmra.mrb[52].mxu0 %vm1795_vm5, %v6953_v37  ;;  %v2451_v54 = vsel %vm9620_vm11, %v6939_v42, %v2450_v58  ;;  %v2458_v39 = vsel %vm9620_vm11, %v6940_v46, %v2457_v18  ;;  %v6941_v28 = vrot.slane %v2321_v60, 9  ;;  %v2467_v2 = vrot.slane %v8539_v20, 5  ;;  %v8483_v10 = vld [vmem:[#allocation2 + $0x60] sm:$0xff]   ;;  %v4743_v22 = vld [vmem:[#allocation2 + $0x30] sm:$0xf]  ;;  %v8485_v20 = vld [vmem:[#allocation2 + $0x78] sm:$0xff]  }
 0x253   : > { %7936 = vmatmul.mubr.msk.bf16.gmra.mrb[12].mxu1 %vm1795_vm5, %v7071_v50  ;;  %7831 = vmatprep.mubr.msk.bf16.mxu0 %vm1795_vm5, %v6954_v11  ;;  %v4051_v50 = vrot.slane %v9589_v15, 5  ;;  %v2461_v52 = vsel %vm9620_vm11, %v2459_v63, %v2460_v25  ;;  %v4049_v15 = vsel %vm9620_vm11, %v7058_v14, %v4048_v1  ;;  %v6955_v33 = vcombine.low %v2451_v54, %v2454_v36  ;;  %v9891_v14 = vld [vmem:[#allocation2 + $0x34] sm:$0xf]  ;;  %v9894_v36 = vld [vmem:[#allocation2 + $0x40] sm:$0xf] }
 0x254   : > { %7939 = vmatprep.mubr.msk.bf16.mxu1 %vm1795_vm5, %v7072_v19  ;;  %v6956_v19 = vcombine.low %v2458_v39, %v2461_v52  ;;  %v2466_v5 = vrot.slane %v2464_v56, 4  ;;  %v2465_v41 = vsel %vm9620_vm11, %v6941_v28, %v2464_v56  ;;  %v4786_v58 = vshrl.u32 %v4737_v32, 16  ;;  %v9896_v56 = vld [vmem:[#allocation2 + $0x2c] sm:$0x1] }
 0x255   : > { %v4052_v21 = vsel %vm9620_vm11, %v4050_v24, %v4051_v50  ;;  %v4789_v12 = vshll.u32 %v4737_v32, 16  ;;  %v4795_v1 = vshll.u32 %v9870_v38, 16  ;;  %v4799_v43 = vshrl.u32 %v9870_v38, 16  ;;  %v4746_v50 = vld [vmem:[#allocation2 + $0x3c] sm:$0xf]  ;;  %v8484_v28 = vld [vmem:[#allocation2 + $0x6c] sm:$0xff]  }
 0x256   : > { %v7074_v17 = vcombine.low %v4049_v15, %v4052_v21  ;;  %v2468_v31 = vsel %vm9620_vm11, %v2466_v5, %v2467_v2  ;;  %v4788_v37 = vrot.slane %v4786_v58, 4  ;;  %v4810_v48 = vshrl.u32 %v4740_v45, 16  ;;  %v9922_v58 = vld [vmem:[#allocation2 + $0x44] sm:$0x1] }
 0x257   : > { %v6957_v27 = vcombine.low %v2465_v41, %v2468_v31  ;;  %v4791_v13 = vrot.slane %v4789_v12, 5  ;;  %v9880_v55 = vrot.slane %v4795_v1, 5  ;;  %v4801_v29 = vrot.slane %v4799_v43, 4 }
 0x258   : > { %v4813_v11 = vshll.u32 %v4740_v45, 16  ;;  %v4819_v3 = vshll.u32 %v9878_v30, 16  ;;  %v4823_v0 = vshrl.u32 %v9878_v30, 16  ;;  %v4805_v49 = vshll.u32 %v9882_v62, 16 }
 0x259   : > { %v4792_v18 = vor.u32 %v4791_v13, %v4788_v37  ;;  %v4802_v24 = vor.u32 %v4801_v29, %v9880_v55  ;;  %v4812_v42 = vrot.slane %v4810_v48, 4  ;;  %v4834_v25 = vshrl.u32 %v4743_v22, 16 }
 0x25a   : > { %7832 = vmatmul.mubr.msk.bf16.gmra.mrb[56].mxu0 %vm1795_vm5, %v6955_v33  ;;  %v4815_v9 = vrot.slane %v4813_v11, 5  ;;  %v4825_v63 = vrot.slane %v4823_v0, 4  ;;  %v4807_v7 = vrot.slane %v4805_v49, 5  ;;  %v4837_v52 = vshll.u32 %v4743_v22, 16  ;;  %v9900_v33 = vld [vmem:[#allocation2 + $0x38] sm:$0x1] }
 0x25b   : > { %7940 = vmatmul.mubr.msk.bf16.gmra.mrb[16].mxu1 %vm1795_vm5, %v7073_v35  ;;  %7835 = vmatprep.mubr.msk.bf16.mxu0 %vm1795_vm5, %v6956_v19  ;;  %v8476_v35 = vld [vmem:[#allocation2 + $0x30] sm:$0xff]   ;;  %v4793_v46 = vrot.slane %v4792_v18, 4  ;;  %v4803_v26 = vrot.slane %v4802_v24, 4  ;;  %v4843_v54 = vshll.u32 %v9891_v14, 16  ;;  %v4847_v39 = vshrl.u32 %v9891_v14, 16  ;;  %v8487_v49 = vld [vmem:[#allocation2 + $0x84] sm:$0xff]  }
 0x25c   : > { %7943 = vmatprep.mubr.msk.bf16.mxu1 %vm1795_vm5, %v7074_v17  ;;  %v4816_v21 = vor.u32 %v4815_v9, %v4812_v42  ;;  %v4858_v60 = vshrl.u32 %v4746_v50, 16  ;;  %v4861_v17 = vshll.u32 %v4746_v50, 16  ;;  %v4867_v19 = vshll.u32 %v9894_v36, 16  ;;  %v4752_v11 = vld [vmem:[#allocation2 + $0x54] sm:$0xf] }
 0x25d   : > { %v4871_v5 = vshrl.u32 %v9894_v36, 16  ;;  %v4798_v2 = vsel %vm8940_vm4, %v4793_v46, %v9880_v55  ;;  %v4808_v31 = vsel %vm8940_vm4, %v4803_v26, %v4807_v7  ;;  %v4829_v41 = vshll.u32 %v9896_v56, 16  ;;  %v9946_v50 = vld [vmem:[#allocation2 + $0x50] sm:$0x1] }
 0x25e   : > { %v4849_v32 = vrot.slane %v4847_v39, 4  ;;  %v9924_v12 = vrot.slane %v4867_v19, 5  ;;  %v9927_v13 = vcombine.low %v4798_v2, %v4808_v31  ;;  %v4877_v24 = vshll.u32 %v9922_v58, 16 }
 0x25f   : > { %v4873_v1 = vrot.slane %v4871_v5, 4  ;;  %v4831_v45 = vrot.slane %v4829_v41, 5  ;;  %v4906_v26 = vshrl.u32 %v4752_v11, 16  ;;  %v4901_v31 = vshll.u32 %v9946_v50, 16  ;;  %v4758_v41 = vld [vmem:[#allocation2 + $0x6c] sm:$0xf] }
 0x260   : > { %v4879_v2 = vrot.slane %v4877_v24, 5  ;;  %v8490_v24 = vld [vmem:[#allocation2 + $0xa8] sm:$0xff]  }
 0x261   : > { %v4874_v9 = vor.u32 %v4873_v1, %v9924_v12 }
 0x262   : > { %7836 = vmatmul.mubr.msk.bf16.gmra.mrb[60].mxu0 %vm1795_vm5, %v6957_v27  ;;  %v4836_v27 = vrot.slane %v4834_v25, 4  ;;  %v4909_v25 = vshll.u32 %v4752_v11, 16 }
 0x263   : > { %7944 = vmatmul.mubr.msk.bf16.gmra.mrb[20].mxu1 %vm1795_vm5, %v7075_v16  ;;  %7843 = vmatprep.mubr.msk.bf16.mxu0 %vm1795_vm5, %v8475_v34  ;;  %v9889_v16 = vrot.slane %v4819_v3, 5  ;;  %v9911_v34 = vrot.slane %v4816_v21, 4  ;;  %v9936_v3 = vld [vmem:[#allocation2 + $0x58] sm:$0xf]  ;;  %v8488_v21 = vld [vmem:[#allocation2 + $0x90] sm:$0xff]  }
 0x264   : > { %7951 = vmatprep.mubr.msk.bf16.mxu1 %vm1795_vm5, %v8472_v57  ;;  %v4749_v57 = vld [vmem:[#allocation2 + $0x48] sm:$0xf]  ;;  %v4915_v7 = vshll.u32 %v9936_v3, 16 }
 0x265   : > { %v4826_v15 = vor.u32 %v4825_v63, %v9889_v16  ;;  %v4882_v43 = vshrl.u32 %v4749_v57, 16  ;;  %v4822_v55 = vsel %vm8940_vm4, %v9911_v34, %v9889_v16  ;;  %v9944_v63 = vld [vmem:[#allocation2 + $0x64] sm:$0xf]  ;;  %v4911_v34 = vrot.slane %v4909_v25, 5  ;;  %v4761_v25 = vld [vmem:[#allocation2 + $0x78] sm:$0xf] }
 0x266   : > { %v4939_v19 = vshll.u32 %v9944_v63, 16  ;;  %v4943_v5 = vshrl.u32 %v9944_v63, 16 }
 0x267   : > { %v4884_v22 = vrot.slane %v4882_v43, 4 }
 0x268   : > { %v9962_v1 = vrot.slane %v4939_v19, 5  ;;  %v4945_v43 = vrot.slane %v4943_v5, 4  ;;  %v4981_v19 = vshll.u32 %v4761_v25, 16 }
 0x26a   : > { %7844 = vmatmul.mubr.msk.bf16.vlgmr.msra.gmra.mrb[32].mxu0 %vm1795_vm5, %v8477_v47  ;;  %v9913_v47 = vrot.slane %v4843_v54, 5  ;;  %v4919_v54 = vshrl.u32 %v9936_v3, 16 }
 0x26b   : > { %7952 = vmatmul.mubr.msk.bf16.vlgmr.msra.gmra.mrb[24].mxu1 %vm1795_vm5, %v8474_v23  ;;  %7847 = vmatprep.mubr.msk.bf16.mxu0 %vm1795_vm5, %v8479_v61  ;;  %v4839_v23 = vrot.slane %v4837_v52, 5  ;;  %v9919_v61 = vrot.slane %v4826_v15, 4 }
 0x26c   : > { %7984 = vmatpush3.bf16.msra.mxu1 %v9689_v40  ;;  %7955 = vmatprep.mubr.msk.bf16.mxu1 %vm1795_vm5, %v8476_v35  ;;  %v8480_v40 = vld [vmem:[#allocation2 + $0x48] sm:$0xff]   ;;  %v4850_v18 = vor.u32 %v4849_v32, %v9913_v47  ;;  %v4921_v32 = vrot.slane %v4919_v54, 4 }
 0x26d   : > { %7985 = vmatprep.subr.bf16.mxu1 %v8486_v51  ;;  %v9916_v35 = vld [vmem:[#allocation2 + $0x4c] sm:$0xf]  ;;  %v4832_v0 = vsel %vm8940_vm4, %v9919_v61, %v4831_v45  ;;  %v4957_v45 = vshll.u32 %v4758_v41, 16 }
 0x26e   : > { %v4891_v37 = vshll.u32 %v9916_v35, 16  ;;  %v4895_v48 = vshrl.u32 %v9916_v35, 16 }
 0x270   : > { %7986 = vmatpush3.bf16.msra.mxu1 %v8486_v51  ;;  %v4853_v51 = vshll.u32 %v9900_v33, 16  ;;  %v9948_v46 = vrot.slane %v4891_v37, 5  ;;  %v4897_v52 = vrot.slane %v4895_v48, 4  ;;  %v8489_v37 = vld [vmem:[#allocation2 + $0x9c] sm:$0xff]   ;;  %v9964_v48 = vcombine.low %v4822_v55, %v4832_v0 }
 0x271   : > { %8019 = vmatprep.subr.bf16.mxu1 %v9868_v59  ;;  %v4903_v0 = vrot.slane %v4901_v31, 5 }
 0x272   : > { %7848 = vmatmul.mubr.msk.bf16.gmra.mrb[36].mxu0 %vm1795_vm5, %v8481_v8  ;;  %v4863_v8 = vrot.slane %v4861_v17, 5  ;;  %v9933_v29 = vrot.slane %v4853_v51, 5  ;;  %v4851_v17 = vrot.slane %v4850_v18, 4  ;;  %v9959_v51 = vld [vmem:[#allocation2 + $0x70] sm:$0xf]  ;;  %v4898_v61 = vor.u32 %v4897_v52, %v9948_v46 }
 0x273   : > { %7956 = vmatmul.mubr.msk.bf16.gmra.mrb[28].mxu1 %vm1795_vm5, %v8478_v4  ;;  %v4860_v4 = vrot.slane %v4858_v60, 4  ;;  %v4967_v18 = vshrl.u32 %v9959_v51, 16  ;;  %v4959_v52 = vrot.slane %v4957_v45, 5  ;;  %v10019_v45 = vld [vmem:[#allocation2 + $0x80] sm:$0x1] }
 0x274   : > { %7959 = vmatprep.mubr.msk.bf16.mxu1 %vm1795_vm5, %v8480_v40  ;;  %v4885_v40 = vshll.u32 %v4749_v57, 16  ;;  %v4908_v57 = vrot.slane %v4906_v26, 4 }
 0x275   : > { %v4864_v42 = vor.u32 %v4863_v8, %v4860_v4 }
 0x276   : > { %v4887_v16 = vrot.slane %v4885_v40, 5  ;;  %v4954_v40 = vshrl.u32 %v4758_v41, 16 }
 0x27b   : > { %7960 = vmatmul.mubr.msk.bf16.gmra.mrb[0].mxu1 %vm1795_vm5, %v8482_v6  ;;  %v4840_v6 = vor.u32 %v4839_v23, %v4836_v27  ;;  %v4888_v27 = vor.u32 %v4887_v16, %v4884_v22  ;;  %v9957_v23 = vrot.slane %v4915_v7, 5  ;;  %v4899_v22 = vrot.slane %v4898_v61, 4  ;;  %v9984_v7 = vld [vmem:[#allocation2 + $0x7c] sm:$0xf] }
 0x27c   : > { %7963 = vmatprep.mubr.msk.bf16.mxu1 %vm1795_vm5, %v8483_v10  ;;  %v4755_v10 = vld [vmem:[#allocation2 + $0x60] sm:$0xf]  ;;  %v4912_v16 = vor.u32 %v4911_v34, %v4908_v57  ;;  %v4987_v5 = vshll.u32 %v9984_v7, 16 }
 0x27d   : > { %v4930_v15 = vshrl.u32 %v4755_v10, 16  ;;  %v4933_v39 = vshll.u32 %v4755_v10, 16  ;;  %v4841_v60 = vrot.slane %v4840_v6, 4  ;;  %v4963_v6 = vshll.u32 %v9959_v51, 16 }
 0x27e   : > { %v4856_v10 = vsel %vm8940_vm4, %v4851_v17, %v9933_v29  ;;  %v4922_v26 = vor.u32 %v4921_v32, %v9957_v23  ;;  %v4978_v17 = vshrl.u32 %v4761_v25, 16  ;;  %v10000_v31 = vrot.slane %v4912_v16, 4  ;;  %v10010_v32 = vld [vmem:[#allocation2 + $0x74] sm:$0x1]  ;;  %v10042_v16 = vld [vmem:[#allocation2 + $0x88] sm:$0xf] }
 0x27f   : > { %v4932_v4 = vrot.slane %v4930_v15, 4  ;;  %v4935_v8 = vrot.slane %v4933_v39, 5  ;;  %v4846_v11 = vsel %vm8940_vm4, %v4841_v60, %v9913_v47  ;;  %v9981_v47 = vld [vmem:[#allocation2 + $0x68] sm:$0x1]  ;;  %v9991_v39 = vrot.slane %v4963_v6, 5 }
 0x280   : > { %v4949_v15 = vshll.u32 %v9981_v47, 16  ;;  %v4969_v60 = vrot.slane %v4967_v18, 4  ;;  %v10002_v41 = vrot.slane %v4922_v26, 4  ;;  %v4904_v57 = vsel %vm8940_vm4, %v4899_v22, %v4903_v0 }
 0x281   : > { %v4936_v29 = vor.u32 %v4935_v8, %v4932_v4  ;;  %v10025_v6 = vrot.slane %v4981_v19, 5  ;;  %v10027_v18 = vrot.slane %v4987_v5, 5  ;;  %v5558_v5 = vrot.slane %v9900_v33, 5  ;;  %v8495_v33 = vld [vmem:[#allocation6 + $0x88] sm:$0xff]  }
 0x282   : > { %v5562_v26 = vrot.slane %v9894_v36, 5  ;;  %v5565_v25 = vrot.slane %v9922_v58, 5 }
 0x283   : > { %7964 = vmatmul.mubr.msk.bf16.gmra.mrb[4].mxu1 %vm1795_vm5, %v8484_v28  ;;  %v4865_v28 = vrot.slane %v4864_v42, 4  ;;  %v9979_v42 = vld [vmem:[#allocation2 + $0x5c] sm:$0x1]  ;;  %v10006_v34 = vrot.slane %v4936_v29, 4 }
 0x284   : > { %7967 = vmatprep.mubr.msk.bf16.mxu1 %vm1795_vm5, %v8485_v20  ;;  %v4875_v20 = vrot.slane %v4874_v9, 4  ;;  %v4889_v9 = vrot.slane %v4888_v27, 4  ;;  %v4925_v54 = vshll.u32 %v9979_v42, 16  ;;  %v8491_v27 = vld [vmem:[#allocation2 + $0xb4] sm:$0xff]  }
 0x286   : > { %v4880_v55 = vsel %vm8940_vm4, %v4875_v20, %v4879_v2  ;;  %v9995_v20 = vcombine.low %v4846_v11, %v4856_v10  ;;  %v4894_v2 = vsel %vm8940_vm4, %v4889_v9, %v9948_v46  ;;  %v10016_v46 = vrot.slane %v4949_v15, 5  ;;  %v5477_v10 = vld [vmem:[#allocation2 + $0x30] sm:$0xe] }
 0x287   : > { %v10023_v11 = vrot.slane %v4978_v17, 4  ;;  %v5555_v17 = vrot.slane %v9891_v14, 5  ;;  %v8493_v14 = vld [vmem:[#allocation2 + $0xcc] sm:$0xff]   ;;  %v5569_v9 = vrot.slane %v9916_v35, 5 }
 0x289   : > { %v5557_v19 = vrot.slane %v5555_v17, 4  ;;  %v5571_v58 = vrot.slane %v5569_v9, 4 }
 0x28b   : > { %7968 = vmatmul.mubr.msk.bf16.gmra.mrb[8].mxu1 %vm1795_vm5, %v8487_v49  ;;  %v4870_v49 = vsel %vm8940_vm4, %v4865_v28, %v9924_v12  ;;  %v4946_v12 = vor.u32 %v4945_v43, %v9962_v1  ;;  %v4991_v28 = vshrl.u32 %v9984_v7, 16  ;;  %v10014_v43 = vrot.slane %v4925_v54, 5 }
 0x28c   : > { %7971 = vmatprep.mubr.msk.bf16.mxu1 %vm1795_vm5, %v8488_v21  ;;  %v4956_v21 = vrot.slane %v4954_v40, 4  ;;  %v10012_v8 = vcombine.low %v4870_v49, %v4880_v55  ;;  %v4970_v40 = vor.u32 %v4969_v60, %v9991_v39  ;;  %v8492_v49 = vld [vmem:[#allocation2 + $0xc0] sm:$0xff]   ;;  %v10031_v55 = vcombine.low %v4894_v2, %v4904_v57  ;;  %v5480_v57 = vld [vmem:[#allocation2 + $0x54] sm:$0xe]  ;;  %v10153_v2 = vld [vmem:[#allocation2 + $0x98] sm:$0x1] }
 0x28d   : > { %v10008_v61 = vrot.slane %v4946_v12, 4  ;;  %v7164_v60 = vrot.slane %v5477_v10, 9  ;;  %v7167_v22 = vrot.slane %v5480_v57, 9  ;;  %v5564_v10 = vrot.slane %v5562_v26, 4  ;;  %v5483_v57 = vld [vmem:[#allocation2 + $0x78] sm:$0xe] }
 0x28e   : > { %v4960_v4 = vor.u32 %v4959_v52, %v4956_v21  ;;  %v10056_v21 = vld [vmem:[#allocation2 + $0x90] sm:$0xf]  ;;  %v5478_v52 = vld [vmem:[#allocation2 + $0x3c] sm:$0xe]  ;;  %v10059_v54 = vrot.slane %v4970_v40, 4 }
 0x28f   : > { %v10074_v12 = vsel %vm9620_vm11, %v7164_v60, %v5555_v17  ;;  %v5481_v40 = vld [vmem:[#allocation2 + $0x60] sm:$0xe]  ;;  %v5572_v60 = vrot.slane %v9946_v50, 5  ;;  %v5576_v17 = vrot.slane %v9936_v3, 5  ;;  %v10099_v50 = vsel %vm9620_vm11, %v5564_v10, %v5565_v25 }
 0x290   : > { %v10053_v29 = vrot.slane %v4960_v4, 4  ;;  %v5583_v25 = vrot.slane %v9944_v63, 5  ;;  %v5590_v10 = vrot.slane %v9959_v51, 5  ;;  %v5597_v51 = vrot.slane %v9984_v7, 5 }
 0x291   : > { %v5578_v3 = vrot.slane %v5576_v17, 4 }
 0x292   : > { %v5599_v4 = vrot.slane %v5597_v51, 4 }
 0x293   : > { %7972 = vmatmul.mubr.msk.bf16.gmra.mrb[12].mxu1 %vm1795_vm5, %v8489_v37  ;;  %v10021_v37 = vld [vmem:[#allocation2 + $0x84] sm:$0xf] }
 0x294   : > { %7975 = vmatprep.mubr.msk.bf16.mxu1 %vm1795_vm5, %v8490_v24  ;;  %v10029_v24 = vrot.slane %v4991_v28, 4 }
 0x29b   : > { %7976 = vmatmul.mubr.msk.bf16.gmra.mrb[16].mxu1 %vm1795_vm5, %v8491_v27  ;;  %v5479_v27 = vld [vmem:[#allocation2 + $0x48] sm:$0xe] }
 0x29c   : > { %7979 = vmatprep.mubr.msk.bf16.mxu1 %vm1795_vm5, %v8492_v49  ;;  %v7165_v49 = vrot.slane %v5478_v52, 9  ;;  %v7166_v0 = vrot.slane %v5479_v27, 9  ;;  %v10082_v52 = vsel %vm9620_vm11, %v5557_v19, %v5558_v5  ;;  %v5482_v27 = vld [vmem:[#allocation2 + $0x6c] sm:$0xe]  ;;  %v5579_v19 = vrot.slane %v9979_v42, 5 }
 0x29d   : > { %v7168_v5 = vrot.slane %v5481_v40, 9  ;;  %v7169_v40 = vrot.slane %v5482_v27, 9  ;;  %v5593_v27 = vrot.slane %v10010_v32, 5  ;;  %v10135_v42 = vld [vmem:[#allocation2 + $0xa0] sm:$0xf] }
 0x29e   : > { %v10090_v36 = vsel %vm9620_vm11, %v7165_v49, %v5562_v26  ;;  %v10094_v35 = vsel %vm9620_vm11, %v7166_v0, %v5569_v9  ;;  %v10108_v0 = vsel %vm9620_vm11, %v5571_v58, %v5572_v60  ;;  %v10112_v9 = vsel %vm9620_vm11, %v7167_v22, %v5576_v17  ;;  %v5484_v49 = vld [vmem:[#allocation2 + $0x84] sm:$0xe]  ;;  %v10131_v58 = vld [vmem:[#allocation2 + $0x94] sm:$0xf]  ;;  %v5485_v26 = vld [vmem:[#allocation2 + $0x90] sm:$0xe] }
 0x29f   : > { %10885 = vst [vmem:[#allocation15_spill] sm:$0xff] %v10112_v9  ;;  %v10128_v63 = vsel %vm9620_vm11, %v7168_v5, %v5583_v25  ;;  %v5585_v60 = vrot.slane %v5583_v25, 4  ;;  %v5586_v17 = vrot.slane %v9981_v47, 5  ;;  %v10143_v5 = vsel %vm9620_vm11, %v7169_v40, %v5590_v10  ;;  %v10155_v40 = vld [vmem:[#allocation2 + $0xa4] sm:$0x1] }
 0x2a0   : > { %10887 = vst [vmem:[#allocation16_spill] sm:$0xff] %v10128_v63  ;;  %10889 = vst [vmem:[#allocation19_spill] sm:$0xff] %v10143_v5  ;;  %v7171_v25 = vrot.slane %v5484_v49, 9  ;;  %v5604_v47 = vrot.slane %v10042_v16, 5  ;;  %v10220_v9 = vld [vmem:[#allocation2 + $0xc8] sm:$0x1] }
 0x2a1   : > { %v10139_v22 = vsel %vm9620_vm11, %v5585_v60, %v5586_v17  ;;  %v5600_v60 = vrot.slane %v10019_v45, 5  ;;  %v5486_v17 = vld [vmem:[#allocation2 + $0x9c] sm:$0xe] }
 0x2a2   : > { %10888 = vst [vmem:[#allocation18_spill] sm:$0xff] %v10139_v22  ;;  %v10174_v15 = vsel %vm9620_vm11, %v7171_v25, %v5604_v47  ;;  %v7173_v25 = vrot.slane %v5486_v17, 9  ;;  %v10202_v22 = vld [vmem:[#allocation2 + $0xc4] sm:$0xf] }
 0x2a3   : > { %7980 = vmatmul.mubr.msk.bf16.gmra.mrb[20].mxu1 %vm1795_vm5, %v8493_v14  ;;  %v10122_v14 = vld [vmem:[#allocation2 + $0x8c] sm:$0x1]  ;;  %10893 = vst [vmem:[#allocation23_spill] sm:$0xff] %v10174_v15  ;;  %v5489_v15 = vld [vmem:[#allocation2 + $0xc0] sm:$0xe] }
 0x2a4   : > { %7987 = vmatprep.mubr.msk.bf16.mxu1 %vm1795_vm5, %v9927_v13  ;;  %v10119_v13 = vsel %vm9620_vm11, %v5578_v3, %v5579_v19  ;;  %v5592_v3 = vrot.slane %v5590_v10, 4  ;;  %v7170_v19 = vrot.slane %v5483_v57, 9  ;;  %v5606_v57 = vrot.slane %v5604_v47, 4  ;;  %v5488_v47 = vld [vmem:[#allocation2 + $0xb4] sm:$0xe] }
 0x2a5   : > { %10886 = vst [vmem:[#allocation17_spill] sm:$0xff] %v10119_v13  ;;  %v5607_v28 = vrot.slane %v10122_v14, 5  ;;  %v7172_v10 = vrot.slane %v5485_v26, 9  ;;  %v5618_v26 = vrot.slane %v10135_v42, 5 }
 0x2a6   : > { %v10150_v7 = vsel %vm9620_vm11, %v5592_v3, %v5593_v27  ;;  %v10161_v49 = vsel %vm9620_vm11, %v7170_v19, %v5597_v51  ;;  %v10166_v3 = vld [vmem:[#allocation2 + $0xac] sm:$0xf]  ;;  %v10170_v27 = vsel %vm9620_vm11, %v5599_v4, %v5600_v60  ;;  %v5611_v19 = vrot.slane %v10131_v58, 5  ;;  %v5487_v51 = vld [vmem:[#allocation2 + $0xa8] sm:$0xe] }
 0x2a7   : > { %10890 = vst [vmem:[#allocation20_spill] sm:$0xff] %v10150_v7  ;;  %10891 = vst [vmem:[#allocation21_spill] sm:$0xff] %v10161_v49  ;;  %v10186_v4 = vsel %vm9620_vm11, %v5606_v57, %v5607_v28  ;;  %v10189_v60 = vld [vmem:[#allocation2 + $0xb0] sm:$0x1]  ;;  %v5614_v7 = vrot.slane %v10153_v2, 5  ;;  %v5620_v28 = vrot.slane %v5618_v26, 4 }
 0x2a8   : > { %10892 = vst [vmem:[#allocation22_spill] sm:$0xff] %v10170_v27  ;;  %10894 = vst [vmem:[#allocation24_spill] sm:$0xff] %v10186_v4  ;;  %v5613_v5 = vrot.slane %v5611_v19, 4  ;;  %v10198_v27 = vld [vmem:[#allocation2 + $0xbc] sm:$0x1]  ;;  %v5621_v57 = vrot.slane %v10155_v40, 5 }
 0x2a9   : > { %v7174_v17 = vrot.slane %v5487_v51, 9  ;;  %v5625_v49 = vrot.slane %v10166_v3, 5  ;;  %v10229_v51 = vld [vmem:[#allocation2 + $0xd0] sm:$0xf]  ;;  %v10919_v53 = vld [vmem:[#allocation15_spill] sm:$0xff] }
 0x2aa   : > { %v10217_v63 = vsel %vm9620_vm11, %v5620_v28, %v5621_v57 }
 0x2ab   : > { %7988 = vmatmul.mubr.msk.bf16.vlgmr.msra.gmra.mrb[24].mxu1 %vm1795_vm5, %v9964_v48  ;;  %v10180_v48 = vld [vmem:[#allocation2 + $0xb8] sm:$0xf]  ;;  %10897 = vst [vmem:[#allocation27_spill] sm:$0xff] %v10217_v63  ;;  %v5627_v13 = vrot.slane %v5625_v49, 4 }
 0x2ac   : > { %8020 = vmatpush3.bf16.msra.mxu1 %v9868_v59  ;;  %7991 = vmatprep.mubr.msk.bf16.mxu1 %vm1795_vm5, %v9995_v20  ;;  %v10195_v20 = vsel %vm9620_vm11, %v7172_v10, %v5611_v19  ;;  %v10206_v59 = vsel %vm9620_vm11, %v5613_v5, %v5614_v7  ;;  %v10210_v10 = vsel %vm9620_vm11, %v7173_v25, %v5618_v26  ;;  %v7175_v19 = vrot.slane %v5488_v47, 9  ;;  %v5490_v7 = vld [vmem:[#allocation2 + $0xcc] sm:$0xe] }
 0x2ad   : > { %8021 = vmatprep.subr.bf16.mxu1 %v8495_v33  ;;  %10895 = vst [vmem:[#allocation25_spill] sm:$0xff] %v10206_v59  ;;  %10896 = vst [vmem:[#allocation26_spill] sm:$0xff] %v10210_v10  ;;  %v5632_v4 = vrot.slane %v10180_v48, 5  ;;  %v5628_v5 = vrot.slane %v10189_v60, 5  ;;  %v10226_v26 = vsel %vm9620_vm11, %v7174_v17, %v5625_v49  ;;  %v5635_v47 = vrot.slane %v10198_v27, 5 }
 0x2ae   : > { %10898 = vst [vmem:[#allocation28_spill] sm:$0xff] %v10226_v26  ;;  %v7176_v59 = vrot.slane %v5489_v15, 9  ;;  %v5639_v25 = vrot.slane %v10202_v22, 5  ;;  %v10242_v49 = vld [vmem:[#allocation2 + $0xd4] sm:$0x1]  ;;  %v5035_v17 = vshll.u32 %v10131_v58, 16 }
 0x2af   : > { %v10233_v28 = vsel %vm9620_vm11, %v5627_v13, %v5628_v5  ;;  %v10237_v57 = vsel %vm9620_vm11, %v7175_v19, %v5632_v4  ;;  %v7177_v13 = vrot.slane %v5490_v7, 9  ;;  %v5646_v5 = vrot.slane %v10229_v51, 5 }
 0x2b0   : > { %8022 = vmatpush3.bf16.msra.mxu1 %v8495_v33  ;;  %v5634_v33 = vrot.slane %v5632_v4, 4  ;;  %10899 = vst [vmem:[#allocation29_spill] sm:$0xff] %v10233_v28  ;;  %10900 = vst [vmem:[#allocation30_spill] sm:$0xff] %v10237_v57  ;;  %v5641_v4 = vrot.slane %v5639_v25, 4  ;;  %v5649_v19 = vrot.slane %v10242_v49, 5  ;;  %v5039_v28 = vshrl.u32 %v10131_v58, 16 }
 0x2b1   : > { %v10261_v7 = vsel %vm9620_vm11, %v7177_v13, %v5646_v5  ;;  %v10903_v26 = vshll.u32 %v10021_v37, 16  ;;  %v10904_v58 = vshll.u32 %v10042_v16, 16  ;;  %v10905_v13 = vshrl.u32 %v10042_v16, 16 }
 0x2b2   : > { %v10248_v63 = vsel %vm9620_vm11, %v5634_v33, %v5635_v47  ;;  %v5648_v33 = vrot.slane %v5646_v5, 4  ;;  %v10902_v47 = vshrl.u32 %v10021_v37, 16 }
 0x2b3   : > { %7992 = vmatmul.mubr.msk.bf16.gmra.mrb[28].mxu1 %vm1795_vm5, %v10012_v8  ;;  %10901 = vst [vmem:[#allocation31_spill] sm:$0xff] %v10248_v63  ;;  %v5642_v8 = vrot.slane %v10220_v9, 5  ;;  %v5007_v15 = vrot.slane %v10903_v26, 5  ;;  %v10269_v63 = vsel %vm9620_vm11, %v7176_v59, %v5639_v25  ;;  %v10277_v10 = vrot.slane %v10904_v58, 5 }
 0x2b4   : > { %7995 = vmatprep.mubr.msk.bf16.mxu1 %vm1795_vm5, %v10031_v55  ;;  %v5004_v55 = vrot.slane %v10902_v47, 4  ;;  %v5017_v5 = vrot.slane %v10905_v13, 4  ;;  %v10285_v37 = vsel %vm9620_vm11, %v5648_v33, %v5649_v19  ;;  %v10906_v59 = vshll.u32 %v10010_v32, 16 }
 0x2b5   : > { %v10273_v57 = vsel %vm9620_vm11, %v5641_v4, %v5642_v8  ;;  %v10907_v26 = vshrl.u32 %v10056_v21, 16  ;;  %v10908_v8 = vshll.u32 %v10056_v21, 16  ;;  %v7193_v16 = vcombine.low %v10261_v7, %v10285_v37 }
 0x2b6   : > { %v7192_v47 = vcombine.low %v10269_v63, %v10273_v57  ;;  %v4975_v25 = vrot.slane %v10906_v59, 5  ;;  %v10909_v13 = vsel %vm8940_vm4, %v10002_v41, %v10014_v43  ;;  %v10910_v32 = vsel %vm8940_vm4, %v10000_v31, %v9957_v23  ;;  %v4770_v43 = vld [vmem:[#allocation2 + $0x9c] sm:$0xf] }
 0x2b7   : > { %v5028_v4 = vrot.slane %v10907_v26, 4  ;;  %v5031_v58 = vrot.slane %v10908_v8, 5  ;;  %v7133_v19 = vcombine.low %v10910_v32, %v10909_v13  ;;  %v10911_v21 = vsel %vm8940_vm4, %v10008_v61, %v10016_v46 }
 0x2b8   : > { %v10912_v33 = vsel %vm8940_vm4, %v10006_v34, %v9962_v1  ;;  %v10315_v26 = vrot.slane %v5035_v17, 5  ;;  %v5041_v41 = vrot.slane %v5039_v28, 4  ;;  %v4966_v23 = vsel %vm8940_vm4, %v10053_v29, %v9991_v39  ;;  %v4773_v17 = vld [vmem:[#allocation2 + $0xa8] sm:$0xf] }
 0x2b9   : > { %v7134_v59 = vcombine.low %v10912_v33, %v10911_v21  ;;  %v4976_v31 = vsel %vm8940_vm4, %v10059_v54, %v4975_v25  ;;  %v10913_v61 = vor.u32 %v10025_v6, %v10023_v11  ;;  %v10914_v1 = vshll.u32 %v10019_v45, 16 }
 0x2ba   : > { %v10915_v28 = vor.u32 %v10029_v24, %v10027_v18  ;;  %v5008_v13 = vor.u32 %v5007_v15, %v5004_v55  ;;  %v5018_v39 = vor.u32 %v5017_v5, %v10277_v10  ;;  %v5021_v29 = vshll.u32 %v10122_v14, 16 }
 0x2bb   : > { %v4985_v46 = vrot.slane %v10913_v61, 4  ;;  %v4999_v34 = vrot.slane %v10914_v1, 5  ;;  %7996 = vmatmul.mubr.msk.bf16.gmra.mrb[0].mxu1 %vm1795_vm5, %v7133_v19  ;;  %v5032_v54 = vor.u32 %v5031_v58, %v5028_v4  ;;  %v5050_v11 = vshrl.u32 %v4770_v43, 16 }
 0x2bc   : > { %v4995_v8 = vrot.slane %v10915_v28, 4  ;;  %7999 = vmatprep.mubr.msk.bf16.mxu1 %vm1795_vm5, %v7134_v59  ;;  %v5053_v6 = vshll.u32 %v4770_v43, 16  ;;  %v5059_v45 = vshll.u32 %v10135_v42, 16  ;;  %v5042_v25 = vor.u32 %v5041_v41, %v10315_v26  ;;  %v4776_v28 = vld [vmem:[#allocation2 + $0xb4] sm:$0xf] }
 0x2bd   : > { %v5063_v32 = vshrl.u32 %v10135_v42, 16  ;;  %v5074_v19 = vshrl.u32 %v4773_v17, 16  ;;  %v5077_v21 = vshll.u32 %v4773_v17, 16  ;;  %v7135_v24 = vcombine.low %v4966_v23, %v4976_v31 }
 0x2be   : > { %v4990_v15 = vsel %vm8940_vm4, %v4985_v46, %v10027_v18  ;;  %v5083_v14 = vshll.u32 %v10166_v3, 16  ;;  %v5087_v55 = vshrl.u32 %v10166_v3, 16  ;;  %v5000_v5 = vsel %vm8940_vm4, %v4995_v8, %v4999_v34 }
 0x2bf   : > { %v5009_v4 = vrot.slane %v5008_v13, 4  ;;  %v5019_v58 = vrot.slane %v5018_v39, 4  ;;  %v5045_v33 = vshll.u32 %v10153_v2, 16  ;;  %v5033_v59 = vrot.slane %v5032_v54, 4  ;;  %v4779_v54 = vld [vmem:[#allocation2 + $0xc0] sm:$0xf] }
 0x2c0   : > { %v5052_v42 = vrot.slane %v5050_v11, 4  ;;  %v5055_v41 = vrot.slane %v5053_v6, 5  ;;  %v10347_v43 = vrot.slane %v5059_v45, 5  ;;  %v5043_v23 = vrot.slane %v5042_v25, 4 }
 0x2c1   : > { %v5065_v31 = vrot.slane %v5063_v32, 4  ;;  %v5076_v61 = vrot.slane %v5074_v19, 4  ;;  %v5079_v18 = vrot.slane %v5077_v21, 5  ;;  %v7136_v46 = vcombine.low %v4990_v15, %v5000_v5 }
 0x2c2   : > { %v5023_v1 = vrot.slane %v5021_v29, 5  ;;  %v10349_v17 = vrot.slane %v5083_v14, 5  ;;  %v5089_v3 = vrot.slane %v5087_v55, 4  ;;  %v5014_v2 = vsel %vm8940_vm4, %v5009_v4, %v10277_v10 }
 0x2c3   : > { %8000 = vmatmul.mubr.msk.bf16.gmra.mrb[4].mxu1 %vm1795_vm5, %v7135_v24  ;;  %v5047_v34 = vrot.slane %v5045_v33, 5  ;;  %v5038_v13 = vsel %vm8940_vm4, %v5033_v59, %v10315_v26  ;;  %v5056_v39 = vor.u32 %v5055_v41, %v5052_v42  ;;  %v5069_v29 = vshll.u32 %v10155_v40, 16 }
 0x2c4   : > { %8003 = vmatprep.mubr.msk.bf16.mxu1 %vm1795_vm5, %v7136_v46  ;;  %v5024_v8 = vsel %vm8940_vm4, %v5019_v58, %v5023_v1  ;;  %v5066_v6 = vor.u32 %v5065_v31, %v10347_v43  ;;  %v5080_v10 = vor.u32 %v5079_v18, %v5076_v61  ;;  %v5098_v45 = vshrl.u32 %v4776_v28, 16  ;;  %v4782_v58 = vld [vmem:[#allocation2 + $0xcc] sm:$0xf] }
 0x2c5   : > { %v5048_v11 = vsel %vm8940_vm4, %v5043_v23, %v5047_v34  ;;  %v5090_v25 = vor.u32 %v5089_v3, %v10349_v17  ;;  %v5101_v32 = vshll.u32 %v4776_v28, 16  ;;  %v5107_v19 = vshll.u32 %v10180_v48, 16 }
 0x2c6   : > { %v5111_v21 = vshrl.u32 %v10180_v48, 16  ;;  %v5122_v24 = vshrl.u32 %v4779_v54, 16  ;;  %v5125_v26 = vshll.u32 %v4779_v54, 16  ;;  %v5131_v15 = vshll.u32 %v10202_v22, 16  ;;  %v8496_v48 = vld [vmem:[%s10811_s7] sm:$0xff]  }
 0x2c7   : > { %v5135_v40 = vshrl.u32 %v10202_v22, 16  ;;  %v7137_v14 = vcombine.low %v5014_v2, %v5024_v8  ;;  %v7138_v55 = vcombine.low %v5038_v13, %v5048_v11  ;;  %v5057_v5 = vrot.slane %v5056_v39, 4  ;;  %8055 = vmatprep.subr.bf16.mxu0 %v8496_v48 }
 0x2c8   : > { %v5071_v4 = vrot.slane %v5069_v29, 5  ;;  %v5067_v33 = vrot.slane %v5066_v6, 4  ;;  %v5081_v59 = vrot.slane %v5080_v10, 4  ;;  %v5093_v42 = vshll.u32 %v10189_v60, 16  ;;  %8056 = vmatpush3.bf16.msra.mxu0 %v8496_v48 }
 0x2c9   : > { %v5100_v41 = vrot.slane %v5098_v45, 4  ;;  %v5091_v23 = vrot.slane %v5090_v25, 4  ;;  %v5103_v31 = vrot.slane %v5101_v32, 5  ;;  %v5109_v61 = vrot.slane %v5107_v19, 5 }
 0x2ca   : > { %v5113_v18 = vrot.slane %v5111_v21, 4  ;;  %v5124_v22 = vrot.slane %v5122_v24, 4  ;;  %v5127_v46 = vrot.slane %v5125_v26, 5  ;;  %v5133_v1 = vrot.slane %v5131_v15, 5 }
 0x2cb   : > { %8004 = vmatmul.mubr.msk.bf16.gmra.mrb[8].mxu1 %vm1795_vm5, %v7137_v14  ;;  %v5137_v3 = vrot.slane %v5135_v40, 4  ;;  %v5146_v28 = vshrl.u32 %v4782_v58, 16  ;;  %v5149_v60 = vshll.u32 %v4782_v58, 16  ;;  %v5155_v2 = vshll.u32 %v10229_v51, 16 }
 0x2cc   : > { %8007 = vmatprep.mubr.msk.bf16.mxu1 %vm1795_vm5, %v7138_v55  ;;  %v5159_v34 = vshrl.u32 %v10229_v51, 16  ;;  %v5062_v8 = vsel %vm8940_vm4, %v5057_v5, %v10347_v43  ;;  %v5095_v13 = vrot.slane %v5093_v42, 5  ;;  %v5072_v39 = vsel %vm8940_vm4, %v5067_v33, %v5071_v4 }
 0x2cd   : > { %v5104_v29 = vor.u32 %v5103_v31, %v5100_v41  ;;  %v5114_v54 = vor.u32 %v5113_v18, %v5109_v61  ;;  %v5117_v11 = vshll.u32 %v10198_v27, 16  ;;  %v5086_v6 = vsel %vm8940_vm4, %v5081_v59, %v10349_v17 }
 0x2ce   : > { %v5096_v51 = vsel %vm8940_vm4, %v5091_v23, %v5095_v13  ;;  %v5128_v10 = vor.u32 %v5127_v46, %v5124_v22  ;;  %v5138_v45 = vor.u32 %v5137_v3, %v5133_v1  ;;  %v5148_v25 = vrot.slane %v5146_v28, 4  ;;  %v5475_v22 = vld [vmem:[#allocation2 + $0x18] sm:$0xe] }
 0x2cf   : > { %v5151_v32 = vrot.slane %v5149_v60, 5  ;;  %v5157_v43 = vrot.slane %v5155_v2, 5  ;;  %v5161_v19 = vrot.slane %v5159_v34, 4  ;;  %v7139_v21 = vcombine.low %v5062_v8, %v5072_v39  ;;  %v5476_v8 = vld [vmem:[#allocation2 + $0x24] sm:$0xe] }
 0x2d0   : > { %v5141_v24 = vshll.u32 %v10220_v9, 16  ;;  %v7140_v26 = vcombine.low %v5086_v6, %v5096_v51  ;;  %v5105_v15 = vrot.slane %v5104_v29, 4  ;;  %v5115_v40 = vrot.slane %v5114_v54, 4  ;;  %v10920_v51 = vld [vmem:[#allocation17_spill] sm:$0xff] }
 0x2d1   : > { %v5129_v27 = vrot.slane %v5128_v10, 4  ;;  %v5139_v14 = vrot.slane %v5138_v45, 4  ;;  %v5119_v17 = vrot.slane %v5117_v11, 5  ;;  %v5152_v55 = vor.u32 %v5151_v32, %v5148_v25  ;;  %v10922_v45 = vld [vmem:[#allocation16_spill] sm:$0xff]  ;;  %v10923_v25 = vld [vmem:[#allocation18_spill] sm:$0xff] }
 0x2d2   : > { %v5162_v5 = vor.u32 %v5161_v19, %v5157_v43  ;;  %v5165_v4 = vshll.u32 %v10242_v49, 16  ;;  %v5143_v58 = vrot.slane %v5141_v24, 5  ;;  %v5110_v33 = vsel %vm8940_vm4, %v5105_v15, %v5109_v61  ;;  %v10926_v32 = vld [vmem:[#allocation20_spill] sm:$0xff]  ;;  %v10934_v24 = vld [vmem:[#allocation25_spill] sm:$0xff] }
 0x2d3   : > { %8008 = vmatmul.mubr.msk.bf16.gmra.mrb[12].mxu1 %vm1795_vm5, %v7139_v21  ;;  %v5120_v9 = vsel %vm8940_vm4, %v5115_v40, %v5119_v17  ;;  %v5134_v59 = vsel %vm8940_vm4, %v5129_v27, %v5133_v1  ;;  %v5541_v41 = vrot.slane %v9870_v38, 5  ;;  %v5153_v48 = vrot.slane %v5152_v55, 4  ;;  %v10932_v19 = vld [vmem:[#allocation24_spill] sm:$0xff]  ;;  %v10936_v17 = vld [vmem:[#allocation26_spill] sm:$0xff]  ;;  %v10937_v55 = vld [vmem:[#allocation27_spill] sm:$0xff] }
 0x2d4   : > { %8011 = vmatprep.mubr.msk.bf16.mxu1 %vm1795_vm5, %v7140_v26  ;;  %v5144_v42 = vsel %vm8940_vm4, %v5139_v14, %v5143_v58  ;;  %v5163_v23 = vrot.slane %v5162_v5, 4  ;;  %v5167_v31 = vrot.slane %v5165_v4, 5  ;;  %v7141_v18 = vcombine.low %v5110_v33, %v5120_v9  ;;  %v10939_v4 = vld [vmem:[#allocation28_spill] sm:$0xff]  ;;  %v10940_v58 = vld [vmem:[#allocation29_spill] sm:$0xff] }
 0x2d5   : > { %v7142_v49 = vcombine.low %v5134_v59, %v5144_v42  ;;  %v5543_v61 = vrot.slane %v5541_v41, 4  ;;  %v5158_v46 = vsel %vm8940_vm4, %v5153_v48, %v5157_v43  ;;  %v7162_v3 = vrot.slane %v5475_v22, 9  ;;  %v10929_v43 = vld [vmem:[#allocation22_spill] sm:$0xff]  ;;  %v10943_v48 = vld [vmem:[#allocation31_spill] sm:$0xff] }
 0x2d6   : > { %v5168_v1 = vsel %vm8940_vm4, %v5163_v23, %v5167_v31  ;;  %v5544_v38 = vrot.slane %v9882_v62, 5  ;;  %v5548_v28 = vrot.slane %v9878_v30, 5  ;;  %v7163_v44 = vrot.slane %v5476_v8, 9 }
 0x2d7   : > { %v7143_v60 = vcombine.low %v5158_v46, %v5168_v1  ;;  %v5542_v34 = vsel %vm9620_vm11, %v7162_v3, %v5541_v41  ;;  %v5551_v29 = vrot.slane %v9896_v56, 5  ;;  %v10916_v11 = vcombine.low %v10074_v12, %v10082_v52  ;;  %v10925_v52 = vld [vmem:[#allocation19_spill] sm:$0xff]  ;;  %v10942_v41 = vld [vmem:[#allocation30_spill] sm:$0xff] }
 0x2d8   : > { %v5545_v2 = vsel %vm9620_vm11, %v5543_v61, %v5544_v38  ;;  %v5550_v39 = vrot.slane %v5548_v28, 4  ;;  %v5549_v62 = vsel %vm9620_vm11, %v7163_v44, %v5548_v28  ;;  %v10917_v6 = vcombine.low %v10090_v36, %v10099_v50  ;;  %v10928_v50 = vld [vmem:[#allocation21_spill] sm:$0xff] }
 0x2d9   : > { %v7178_v13 = vcombine.low %v5542_v34, %v5545_v2  ;;  %v10918_v56 = vcombine.low %v10094_v35, %v10108_v0  ;;  %v10921_v10 = vcombine.low %v10919_v53, %v10920_v51  ;;  %v10924_v12 = vcombine.low %v10922_v45, %v10923_v25  ;;  %v10931_v0 = vld [vmem:[#allocation23_spill] sm:$0xff] }
 0x2da   : > { %v5552_v30 = vsel %vm9620_vm11, %v5550_v39, %v5551_v29  ;;  %v10927_v36 = vcombine.low %v10925_v52, %v10926_v32  ;;  %v10930_v35 = vcombine.low %v10928_v50, %v10929_v43  ;;  %v10933_v21 = vcombine.low %v10931_v0, %v10932_v19 }
 0x2db   : > { %8012 = vmatmul.mubr.msk.bf16.gmra.mrb[16].mxu1 %vm1795_vm5, %v7141_v18  ;;  %v7179_v54 = vcombine.low %v5549_v62, %v5552_v30  ;;  %v10935_v26 = vcombine.low %v10195_v20, %v10934_v24  ;;  %v10938_v5 = vcombine.low %v10936_v17, %v10937_v55  ;;  %v10941_v33 = vcombine.low %v10939_v4, %v10940_v58  ;;  %v8497_v30 = vld [vmem:[%s10811_s7 + $0x8] sm:$0xff]  }
 0x2dc   : > { %8015 = vmatprep.mubr.msk.bf16.mxu1 %vm1795_vm5, %v7142_v49  ;;  %v10944_v23 = vcombine.low %v10942_v41, %v10943_v48  ;;  %8057 = vmatprep.subr.bf16.mxu0 %v8497_v30 }
 0x2dd   : > { %8058 = vmatpush3.bf16.msra.mxu0 %v8497_v30 }
 0x2e3   : > { %8016 = vmatmul.mubr.msk.bf16.gmra.mrb[20].mxu1 %vm1795_vm5, %v7143_v60 }
 0x2e4   : > { %8023 = vmatprep.mubr.msk.bf16.mxu1 %vm1795_vm5, %v7178_v13 }
 0x2eb   : > { %8024 = vmatmul.mubr.msk.bf16.vlgmr.msra.gmra.mrb[24].mxu1 %vm1795_vm5, %v7179_v54  ;;  %v10532_v54 = vld [vmem:[%s10809_s5] ss:$0 sm:$0xff] }
 0x2ec   : > { %8027 = vmatprep.mubr.msk.bf16.mxu1 %vm1795_vm5, %v10916_v11 }
 0x2f3   : > { %8028 = vmatmul.mubr.msk.bf16.gmra.mrb[28].mxu1 %vm1795_vm5, %v10917_v6 }
 0x2f4   : > { %8031 = vmatprep.mubr.msk.bf16.mxu1 %vm1795_vm5, %v10918_v56  ;;  %v10537_v56 = vld [vmem:[%s10810_s6] ss:$0 sm:$0xff] }
 0x2fb   : > { %8032 = vmatmul.mubr.msk.bf16.gmra.mrb[0].mxu1 %vm1795_vm5, %v10921_v10 }
 0x2fc   : > { %8035 = vmatprep.mubr.msk.bf16.mxu1 %vm1795_vm5, %v10924_v12 }
 0x303   : > { %8036 = vmatmul.mubr.msk.bf16.gmra.mrb[4].mxu1 %vm1795_vm5, %v10927_v36 }
 0x304   : > { %8039 = vmatprep.mubr.msk.bf16.mxu1 %vm1795_vm5, %v10930_v35 }
 0x30b   : > { %8040 = vmatmul.mubr.msk.bf16.gmra.mrb[8].mxu1 %vm1795_vm5, %v10933_v21 }
 0x30c   : > { %8043 = vmatprep.mubr.msk.bf16.mxu1 %vm1795_vm5, %v10935_v26 }
 0x30d   : > { %v10458_v15 = vpop.f32.mrb[40].mxu0 }
 0x30e   : > { %v10460_v40 = vpop.f32.mrb[41].mxu0 }
 0x30f   : > { %v10462_v27 = vpop.f32.mrb[42].mxu0 }
 0x310   : > { %v10464_v14 = vpop.f32.mrb[43].mxu0 }
 0x313   : > { %8044 = vmatmul.mubr.msk.bf16.gmra.mrb[12].mxu1 %vm1795_vm5, %v10938_v5 }
 0x314   : > { %8047 = vmatprep.mubr.msk.bf16.mxu1 %vm1795_vm5, %v10941_v33 }
 0x315   : > { %v10474_v20 = vpop.f32.mrb[44].mxu0 }
 0x316   : > { %v10476_v9 = vpop.f32.mrb[45].mxu0 }
 0x317   : > { %v10478_v59 = vpop.f32.mrb[46].mxu0 }
 0x318   : > { %v10480_v42 = vpop.f32.mrb[47].mxu0 }
 0x31b   : > { %8048 = vmatmul.mubr.msk.bf16.gmra.mrb[16].mxu1 %vm1795_vm5, %v10944_v23 }
 0x31c   : > { %8051 = vmatprep.mubr.msk.bf16.mxu1 %vm1795_vm5, %v7192_v47 }
 0x31d   : > { %v10490_v31 = vpop.f32.mrb[48].mxu0 }
 0x31e   : > { %v10492_v18 = vpop.f32.mrb[49].mxu0 }
 0x31f   : > { %v10494_v49 = vpop.f32.mrb[50].mxu0 }
 0x320   : > { %v10496_v22 = vpop.f32.mrb[51].mxu0 }
 0x323   : > { %8052 = vmatmul.mubr.msk.bf16.gmra.mrb[20].mxu1 %vm1795_vm5, %v7193_v16 }
 0x325   : > { %v10502_v61 = vpop.f32.mrb[52].mxu0 }
 0x326   : > { %v10504_v46 = vpop.f32.mrb[53].mxu0 }
 0x327   : > { %v10506_v63 = vpop.f32.mrb[54].mxu0 }
 0x328   : > { %v10508_v57 = vpop.f32.mrb[55].mxu0 }
 0x32d   : > { %v10510_v47 = vpop.f32.mrb[56].mxu0 }
 0x32e   : > { %v10512_v1 = vpop.f32.mrb[57].mxu0 }
 0x32f   : > { %v10514_v3 = vpop.f32.mrb[58].mxu0 }
 0x330   : > { %v10516_v38 = vpop.f32.mrb[59].mxu0 }
 0x335   : > { %v10518_v28 = vpop.f32.mrb[60].mxu0 }
 0x336   : > { %v10520_v7 = vpop.f32.mrb[61].mxu0 }
 0x337   : > { %v10522_v37 = vpop.f32.mrb[62].mxu0 }
 0x338   : > { %v10524_v16 = vpop.f32.mrb[63].mxu0 }
 0x33d   : > { %v7845_v60 = vpop.f32.mrb[32].mxu0 }
 0x33e   : > { %v2987_v2 = vpop.f32.mrb[33].mxu0 }
 0x33f   : > { %v7846_v34 = vpop.f32.mrb[34].mxu0 }
 0x340   : > { %v2990_v8 = vpop.f32.mrb[35].mxu0 }
 0x345   : > { %v7849_v13 = vpop.f32.mrb[36].mxu0 }
 0x346   : > { %v3003_v39 = vpop.f32.mrb[37].mxu0 }
 0x347   : > { %v7850_v44 = vpop.f32.mrb[38].mxu0 }
 0x348   : > { %v3006_v29 = vpop.f32.mrb[39].mxu0 }
 0x3be   : > { %v8025_v62 = vpop.f32.mrb[24].mxu1 }
 0x3bf   : > { %v8095_v11 = vadd.f32 %v8025_v62, %v7845_v60  ;;  %v5798_v6 = vpop.f32.mrb[25].mxu1 }
 0x3c0   : > { %v8096_v53 = vadd.f32 %v5798_v6, %v2987_v2  ;;  %v8026_v51 = vpop.f32.mrb[26].mxu1 }
 0x3c1   : > { %v5966_v10 = vmul.f32 %v8095_v11, %v10532_v54  ;;  %v8097_v45 = vadd.f32 %v8026_v51, %v7846_v34  ;;  %v5801_v25 = vpop.f32.mrb[27].mxu1 }
 0x3c2   : > { %v5964_v12 = vmul.f32 %v8096_v53, %v10532_v54  ;;  %v8098_v52 = vadd.f32 %v5801_v25, %v2990_v8 }
 0x3c3   : > { %v6005_v32 = vadd.f32 %v10537_v56, %v5966_v10  ;;  %v5967_v36 = vmul.f32 %v8097_v45, %v10532_v54 }
 0x3c4   : > { %v6003_v50 = vadd.f32 %v10537_v56, %v5964_v12  ;;  %v5965_v43 = vmul.f32 %v8098_v52, %v10532_v54 }
 0x3c5   : > { %v6006_v35 = vadd.f32 %v10537_v56, %v5967_v36  ;;  %v6037_v21 = vmax.f32 %v6005_v32, 0.0 }
 0x3c6   : > { %v6004_v0 = vadd.f32 %v10537_v56, %v5965_v43  ;;  %v8029_v19 = vpop.f32.mrb[28].mxu1  ;;  %v6035_v55 = vmax.f32 %v6003_v50, 0.0 }
 0x3c7   : > { %v6038_v24 = vmax.f32 %v6006_v35, 0.0  ;;  %v8099_v26 = vadd.f32 %v8029_v19, %v7849_v13  ;;  %v5814_v17 = vpop.f32.mrb[29].mxu1 }
 0x3c8   : > { %v6036_v5 = vmax.f32 %v6004_v0, 0.0  ;;  %v8100_v4 = vadd.f32 %v5814_v17, %v3003_v39  ;;  %v8030_v58 = vpop.f32.mrb[30].mxu1 }
 0x3c9   : > { %v6068_v33 = vpack.c.bf16 %v6038_v24, %v6037_v21  ;;  %v5970_v41 = vmul.f32 %v8099_v26, %v10532_v54  ;;  %v8101_v48 = vadd.f32 %v8030_v58, %v7850_v44  ;;  %v5817_v23 = vpop.f32.mrb[31].mxu1 }
 0x3ca   : > { %v6067_v60 = vpack.c.bf16 %v6036_v5, %v6035_v55  ;;  %v5968_v2 = vmul.f32 %v8100_v4, %v10532_v54  ;;  %v8102_v34 = vadd.f32 %v5817_v23, %v3006_v29 }
 0x3cb   : > { %v6009_v8 = vadd.f32 %v10537_v56, %v5970_v41  ;;  %v5971_v30 = vmul.f32 %v8101_v48, %v10532_v54 }
 0x3cc   : > { %v6007_v13 = vadd.f32 %v10537_v56, %v5968_v2  ;;  %v5969_v62 = vmul.f32 %v8102_v34, %v10532_v54  ;;  %8059 = vmatprep.mubr.msk.bf16.mxu0 %vm1795_vm5, %v6067_v60 }
 0x3cd   : > { %v6010_v39 = vadd.f32 %v10537_v56, %v5971_v30  ;;  %8060 = vmatmul.mubr.msk.bf16.vlgmr.msra.gmra.mrb[64].mxu0 %vm1795_vm5, %v6068_v33  ;;  %v6041_v6 = vmax.f32 %v6009_v8, 0.0 }
 0x3ce   : > { %v6008_v44 = vadd.f32 %v10537_v56, %v5969_v62  ;;  %v8033_v11 = vpop.f32.mrb[0].mxu1  ;;  %v6039_v10 = vmax.f32 %v6007_v13, 0.0 }
 0x3cf   : > { %v6042_v53 = vmax.f32 %v6010_v39, 0.0  ;;  %v8103_v29 = vadd.f32 %v8033_v11, %v10458_v15  ;;  %v5830_v51 = vpop.f32.mrb[1].mxu1 }
 0x3d0   : > { %v6040_v45 = vmax.f32 %v6008_v44, 0.0  ;;  %v8104_v25 = vadd.f32 %v5830_v51, %v10460_v40  ;;  %v8034_v12 = vpop.f32.mrb[2].mxu1 }
 0x3d1   : > { %v6070_v52 = vpack.c.bf16 %v6042_v53, %v6041_v6  ;;  %v5974_v32 = vmul.f32 %v8103_v29, %v10532_v54  ;;  %v8105_v36 = vadd.f32 %v8034_v12, %v10462_v27  ;;  %v5833_v50 = vpop.f32.mrb[3].mxu1 }
 0x3d2   : > { %v6069_v43 = vpack.c.bf16 %v6040_v45, %v6039_v10  ;;  %v5972_v35 = vmul.f32 %v8104_v25, %v10532_v54  ;;  %v8106_v0 = vadd.f32 %v5833_v50, %v10464_v14 }
 0x3d3   : > { %v6013_v19 = vadd.f32 %v10537_v56, %v5974_v32  ;;  %v5975_v15 = vmul.f32 %v8105_v36, %v10532_v54 }
 0x3d4   : > { %v6011_v21 = vadd.f32 %v10537_v56, %v5972_v35  ;;  %v5973_v40 = vmul.f32 %v8106_v0, %v10532_v54  ;;  %8063 = vmatprep.mubr.msk.bf16.mxu0 %vm1795_vm5, %v6069_v43 }
 0x3d5   : > { %v6014_v24 = vadd.f32 %v10537_v56, %v5975_v15  ;;  %8064 = vmatmul.mubr.msk.bf16.gmra.mrb[68].mxu0 %vm1795_vm5, %v6070_v52  ;;  %v6045_v17 = vmax.f32 %v6013_v19, 0.0 }
 0x3d6   : > { %v6012_v27 = vadd.f32 %v10537_v56, %v5973_v40  ;;  %v8037_v26 = vpop.f32.mrb[4].mxu1  ;;  %v6043_v4 = vmax.f32 %v6011_v21, 0.0 }
 0x3d7   : > { %v6046_v55 = vmax.f32 %v6014_v24, 0.0  ;;  %v8107_v14 = vadd.f32 %v8037_v26, %v10474_v20  ;;  %v5846_v5 = vpop.f32.mrb[5].mxu1 }
 0x3d8   : > { %v6044_v58 = vmax.f32 %v6012_v27, 0.0  ;;  %v8108_v33 = vadd.f32 %v5846_v5, %v10476_v9  ;;  %v8038_v41 = vpop.f32.mrb[6].mxu1 }
 0x3d9   : > { %v6072_v48 = vpack.c.bf16 %v6046_v55, %v6045_v17  ;;  %v5978_v23 = vmul.f32 %v8107_v14, %v10532_v54  ;;  %v8109_v60 = vadd.f32 %v8038_v41, %v10478_v59  ;;  %v5849_v2 = vpop.f32.mrb[7].mxu1 }
 0x3da   : > { %v6071_v34 = vpack.c.bf16 %v6044_v58, %v6043_v4  ;;  %v5976_v8 = vmul.f32 %v8108_v33, %v10532_v54  ;;  %v8110_v30 = vadd.f32 %v5849_v2, %v10480_v42 }
 0x3db   : > { %v6017_v13 = vadd.f32 %v10537_v56, %v5978_v23  ;;  %v5979_v20 = vmul.f32 %v8109_v60, %v10532_v54 }
 0x3dc   : > { %v6015_v62 = vadd.f32 %v10537_v56, %v5976_v8  ;;  %v5977_v9 = vmul.f32 %v8110_v30, %v10532_v54  ;;  %8067 = vmatprep.mubr.msk.bf16.mxu0 %vm1795_vm5, %v6071_v34 }
 0x3dd   : > { %v6018_v39 = vadd.f32 %v10537_v56, %v5979_v20  ;;  %8068 = vmatmul.mubr.msk.bf16.gmra.mrb[72].mxu0 %vm1795_vm5, %v6072_v48  ;;  %v6049_v11 = vmax.f32 %v6017_v13, 0.0 }
 0x3de   : > { %v6016_v59 = vadd.f32 %v10537_v56, %v5977_v9  ;;  %v8041_v44 = vpop.f32.mrb[8].mxu1  ;;  %v6047_v29 = vmax.f32 %v6015_v62, 0.0 }
 0x3df   : > { %v6050_v6 = vmax.f32 %v6018_v39, 0.0  ;;  %v8111_v42 = vadd.f32 %v8041_v44, %v10490_v31  ;;  %v5862_v53 = vpop.f32.mrb[9].mxu1 }
 0x3e0   : > { %v6048_v51 = vmax.f32 %v6016_v59, 0.0  ;;  %v8112_v10 = vadd.f32 %v5862_v53, %v10492_v18  ;;  %v8042_v45 = vpop.f32.mrb[10].mxu1 }
 0x3e1   : > { %v6074_v25 = vpack.c.bf16 %v6050_v6, %v6049_v11  ;;  %v5982_v12 = vmul.f32 %v8111_v42, %v10532_v54  ;;  %v8113_v52 = vadd.f32 %v8042_v45, %v10494_v49  ;;  %v5865_v32 = vpop.f32.mrb[11].mxu1 }
 0x3e2   : > { %v6073_v36 = vpack.c.bf16 %v6048_v51, %v6047_v29  ;;  %v5980_v50 = vmul.f32 %v8112_v10, %v10532_v54  ;;  %v8114_v43 = vadd.f32 %v5865_v32, %v10496_v22 }
 0x3e3   : > { %v6021_v35 = vadd.f32 %v10537_v56, %v5982_v12  ;;  %v5983_v31 = vmul.f32 %v8113_v52, %v10532_v54 }
 0x3e4   : > { %v6019_v0 = vadd.f32 %v10537_v56, %v5980_v50  ;;  %v5981_v18 = vmul.f32 %v8114_v43, %v10532_v54  ;;  %8071 = vmatprep.mubr.msk.bf16.mxu0 %vm1795_vm5, %v6073_v36 }
 0x3e5   : > { %v6022_v19 = vadd.f32 %v10537_v56, %v5983_v31  ;;  %8072 = vmatmul.mubr.msk.bf16.gmra.mrb[76].mxu0 %vm1795_vm5, %v6074_v25  ;;  %v6053_v21 = vmax.f32 %v6021_v35, 0.0 }
 0x3e6   : > { %v6020_v49 = vadd.f32 %v10537_v56, %v5981_v18  ;;  %v8045_v15 = vpop.f32.mrb[12].mxu1  ;;  %v6051_v27 = vmax.f32 %v6019_v0, 0.0 }
 0x3e7   : > { %v6054_v40 = vmax.f32 %v6022_v19, 0.0  ;;  %v8115_v22 = vadd.f32 %v8045_v15, %v10502_v61  ;;  %v5878_v24 = vpop.f32.mrb[13].mxu1 }
 0x3e8   : > { %v6052_v26 = vmax.f32 %v6020_v49, 0.0  ;;  %v8116_v17 = vadd.f32 %v5878_v24, %v10504_v46  ;;  %v8046_v55 = vpop.f32.mrb[14].mxu1 }
 0x3e9   : > { %v6076_v14 = vpack.c.bf16 %v6054_v40, %v6053_v21  ;;  %v5986_v5 = vmul.f32 %v8115_v22, %v10532_v54  ;;  %v8117_v4 = vadd.f32 %v8046_v55, %v10506_v63  ;;  %v5881_v58 = vpop.f32.mrb[15].mxu1 }
 0x3ea   : > { %v6075_v33 = vpack.c.bf16 %v6052_v26, %v6051_v27  ;;  %v5984_v41 = vmul.f32 %v8116_v17, %v10532_v54  ;;  %v8118_v48 = vadd.f32 %v5881_v58, %v10508_v57 }
 0x3eb   : > { %v6025_v23 = vadd.f32 %v10537_v56, %v5986_v5  ;;  %v5987_v61 = vmul.f32 %v8117_v4, %v10532_v54  ;;  %v7449_v5 = vld [vmem:[%s8884_s27 + $0x8] sm:$0xff]   ;;  %v7306_v4 = vld [vmem:[%s8884_s27] sm:$0xff]  }
 0x3ec   : > { %v6023_v60 = vadd.f32 %v10537_v56, %v5984_v41  ;;  %v5985_v46 = vmul.f32 %v8118_v48, %v10532_v54  ;;  %8075 = vmatprep.mubr.msk.bf16.mxu0 %vm1795_vm5, %v6075_v33  ;;  %v7311_v41 = vunpack.c.l.bf16 %v7449_v5 }
 0x3ed   : > { %v6026_v2 = vadd.f32 %v10537_v56, %v5987_v61  ;;  %8076 = vmatmul.mubr.msk.bf16.gmra.mrb[80].mxu0 %vm1795_vm5, %v6076_v14  ;;  %v6057_v8 = vmax.f32 %v6025_v23, 0.0  ;;  %v7307_v61 = vunpack.c.l.bf16 %v7306_v4 }
 0x3ee   : > { %v6024_v63 = vadd.f32 %v10537_v56, %v5985_v46  ;;  %v8049_v34 = vpop.f32.mrb[16].mxu1  ;;  %v6055_v20 = vmax.f32 %v6023_v60, 0.0 }
 0x3ef   : > { %v6058_v30 = vmax.f32 %v6026_v2, 0.0  ;;  %v8119_v57 = vadd.f32 %v8049_v34, %v10510_v47  ;;  %v5894_v13 = vpop.f32.mrb[17].mxu1 }
 0x3f0   : > { %v6056_v62 = vmax.f32 %v6024_v63, 0.0  ;;  %v8120_v9 = vadd.f32 %v5894_v13, %v10512_v1  ;;  %v8050_v39 = vpop.f32.mrb[18].mxu1  ;;  %v7312_v63 = vunpack.c.h.bf16 %v7449_v5 }
 0x3f1   : > { %v6078_v59 = vpack.c.bf16 %v6058_v30, %v6057_v8  ;;  %v5990_v44 = vmul.f32 %v8119_v57, %v10532_v54  ;;  %v8121_v11 = vadd.f32 %v8050_v39, %v10514_v3  ;;  %v5897_v6 = vpop.f32.mrb[19].mxu1  ;;  %v7308_v57 = vunpack.c.h.bf16 %v7306_v4  ;;  %v7451_v39 = vld [vmem:[%s8884_s27 + $0x18] sm:$0xff]  }
 0x3f2   : > { %v6077_v42 = vpack.c.bf16 %v6056_v62, %v6055_v20  ;;  %v5988_v53 = vmul.f32 %v8120_v9, %v10532_v54  ;;  %v8122_v29 = vadd.f32 %v5897_v6, %v10516_v38 }
 0x3f3   : > { %v6029_v51 = vadd.f32 %v10537_v56, %v5990_v44  ;;  %v5991_v47 = vmul.f32 %v8121_v11, %v10532_v54  ;;  %v7450_v44 = vld [vmem:[%s8884_s27 + $0x10] sm:$0xff]  }
 0x3f4   : > { %v6027_v10 = vadd.f32 %v10537_v56, %v5988_v53  ;;  %v5989_v1 = vmul.f32 %v8122_v29, %v10532_v54  ;;  %8079 = vmatprep.mubr.msk.bf16.mxu0 %vm1795_vm5, %v6077_v42 }
 0x3f5   : > { %v6030_v45 = vadd.f32 %v10537_v56, %v5991_v47  ;;  %8080 = vmatmul.mubr.msk.bf16.gmra.mrb[84].mxu0 %vm1795_vm5, %v6078_v59  ;;  %v6061_v12 = vmax.f32 %v6029_v51, 0.0  ;;  %v7319_v51 = vunpack.c.l.bf16 %v7451_v39 }
 0x3f6   : > { %v6028_v3 = vadd.f32 %v10537_v56, %v5989_v1  ;;  %v8053_v25 = vpop.f32.mrb[20].mxu1  ;;  %v6059_v36 = vmax.f32 %v6027_v10, 0.0 }
 0x3f7   : > { %v6062_v52 = vmax.f32 %v6030_v45, 0.0  ;;  %v8123_v38 = vadd.f32 %v8053_v25, %v10518_v28  ;;  %v5910_v32 = vpop.f32.mrb[21].mxu1 }
 0x3f8   : > { %v6060_v50 = vmax.f32 %v6028_v3, 0.0  ;;  %v8124_v43 = vadd.f32 %v5910_v32, %v10520_v7  ;;  %v8054_v35 = vpop.f32.mrb[22].mxu1  ;;  %v7315_v3 = vunpack.c.l.bf16 %v7450_v44  ;;  %v7320_v32 = vunpack.c.h.bf16 %v7451_v39 }
 0x3f9   : > { %v6080_v31 = vpack.c.bf16 %v6062_v52, %v6061_v12  ;;  %v5994_v0 = vmul.f32 %v8123_v38, %v10532_v54  ;;  %v8125_v18 = vadd.f32 %v8054_v35, %v10522_v37  ;;  %v5913_v19 = vpop.f32.mrb[23].mxu1 }
 0x3fa   : > { %v6079_v49 = vpack.c.bf16 %v6060_v50, %v6059_v36  ;;  %v5992_v15 = vmul.f32 %v8124_v43, %v10532_v54  ;;  %v8126_v21 = vadd.f32 %v5913_v19, %v10524_v16 }
 0x3fb   : > { %v6033_v40 = vadd.f32 %v10537_v56, %v5994_v0  ;;  %v5995_v28 = vmul.f32 %v8125_v18, %v10532_v54 }
 0x3fc   : > { %v6031_v22 = vadd.f32 %v10537_v56, %v5992_v15  ;;  %v5993_v7 = vmul.f32 %v8126_v21, %v10532_v54  ;;  %8083 = vmatprep.mubr.msk.bf16.mxu0 %vm1795_vm5, %v6079_v49  ;;  %v10646_v54 = vld [vmem:[%s10812_s8] ss:$0 sm:$0xff] }
 0x3fd   : > { %v6034_v37 = vadd.f32 %v10537_v56, %v5995_v28  ;;  %8084 = vmatmul.mubr.msk.bf16.gmra.mrb[88].mxu0 %vm1795_vm5, %v6080_v31  ;;  %v6065_v27 = vmax.f32 %v6033_v40, 0.0  ;;  %v7316_v31 = vunpack.c.h.bf16 %v7450_v44  ;;  %v7453_v15 = vld [vmem:[%s8884_s27 + $0x28] sm:$0xff]   ;;  %v7452_v40 = vld [vmem:[%s8884_s27 + $0x20] sm:$0xff]  }
 0x3fe   : > { %v6032_v24 = vadd.f32 %v10537_v56, %v5993_v7  ;;  %v6063_v26 = vmax.f32 %v6031_v22, 0.0  ;;  %v10653_v56 = vld [vmem:[%s10813_s9] ss:$0 sm:$0xff] }
 0x3ff   : > { %v6066_v16 = vmax.f32 %v6034_v37, 0.0 }
 0x400   : > { %v6064_v17 = vmax.f32 %v6032_v24, 0.0 }
 0x401   : > { %v6082_v55 = vpack.c.bf16 %v6066_v16, %v6065_v27  ;;  %v7327_v27 = vunpack.c.l.bf16 %v7453_v15 }
 0x402   : > { %v6081_v14 = vpack.c.bf16 %v6064_v17, %v6063_v26 }
 0x404   : > { %8087 = vmatprep.mubr.msk.bf16.mxu0 %vm1795_vm5, %v6081_v14  ;;  %v7323_v14 = vunpack.c.l.bf16 %v7452_v40 }
 0x405   : > { %8088 = vmatmul.mubr.msk.bf16.gmra.mrb[92].mxu0 %vm1795_vm5, %v6082_v55 }
 0x4a0   : > { %v8061_v58 = vpop.f32.mrb[64].mxu0 }
 0x4a1   : > { %v6317_v33 = vmul.f32 %v8061_v58, %v10646_v54  ;;  %v6181_v48 = vpop.f32.mrb[65].mxu0 }
 0x4a2   : > { %v6315_v23 = vmul.f32 %v10646_v54, %v6181_v48  ;;  %v8062_v60 = vpop.f32.mrb[66].mxu0 }
 0x4a3   : > { %v6356_v46 = vadd.f32 %v10653_v56, %v6317_v33  ;;  %v6318_v2 = vmul.f32 %v8062_v60, %v10646_v54  ;;  %v6184_v34 = vpop.f32.mrb[67].mxu0 }
 0x4a4   : > { %v6354_v8 = vadd.f32 %v10653_v56, %v6315_v23  ;;  %v6316_v30 = vmul.f32 %v10646_v54, %v6184_v34 }
 0x4a5   : > { %v6452_v13 = vadd.f32 %v7311_v41, %v6356_v46  ;;  %v6357_v20 = vadd.f32 %v10653_v56, %v6318_v2  ;;  %v7328_v41 = vunpack.c.h.bf16 %v7453_v15  ;;  %v7324_v46 = vunpack.c.h.bf16 %v7452_v40 }
 0x4a6   : > { %v6450_v62 = vadd.f32 %v7307_v61, %v6354_v8  ;;  %v6355_v9 = vadd.f32 %v10653_v56, %v6316_v30  ;;  %v7455_v30 = vld [vmem:[%s8884_s27 + $0x38] sm:$0xff]  }
 0x4a7   : > { %v6453_v59 = vadd.f32 %v7312_v63, %v6357_v20  ;;  %v6484_v42 = vmax.f32 %v6452_v13, 0.0  ;;  %v7454_v13 = vld [vmem:[%s8884_s27 + $0x30] sm:$0xff]   ;;  %v7335_v44 = vunpack.c.l.bf16 %v7455_v30 }
 0x4a8   : > { %v6451_v11 = vadd.f32 %v7308_v57, %v6355_v9  ;;  %v8065_v6 = vpop.f32.mrb[68].mxu0  ;;  %v6482_v10 = vmax.f32 %v6450_v62, 0.0 }
 0x4a9   : > { %v6485_v53 = vmax.f32 %v6453_v59, 0.0  ;;  %v6321_v29 = vmul.f32 %v8065_v6, %v10646_v54  ;;  %v6197_v47 = vpop.f32.mrb[69].mxu0 }
 0x4aa   : > { %v6483_v1 = vmax.f32 %v6451_v11, 0.0  ;;  %v6319_v45 = vmul.f32 %v10646_v54, %v6197_v47  ;;  %v8066_v25 = vpop.f32.mrb[70].mxu0 }
 0x4ab   : > { %v7377_v12 = vpack.c.bf16 %v6485_v53, %v6484_v42  ;;  %v6360_v52 = vadd.f32 %v10653_v56, %v6321_v29  ;;  %v6322_v38 = vmul.f32 %v8066_v25, %v10646_v54  ;;  %v6200_v36 = vpop.f32.mrb[71].mxu0  ;;  %v7331_v29 = vunpack.c.l.bf16 %v7454_v13 }
 0x4ac   : > { %v7372_v50 = vpack.c.bf16 %v6483_v1, %v6482_v10  ;;  %v6358_v43 = vadd.f32 %v10653_v56, %v6319_v45  ;;  %v6320_v35 = vmul.f32 %v10646_v54, %v6200_v36  ;;  %v7336_v45 = vunpack.c.h.bf16 %v7455_v30 }
 0x4ad   : > { %7464 = vst [vmem:[%s10673_s24 + $0x8] sm:$0xff] %v7377_v12   ;;  %v6456_v0 = vadd.f32 %v7319_v51, %v6360_v52  ;;  %v6361_v18 = vadd.f32 %v10653_v56, %v6322_v38  ;;  %v7332_v38 = vunpack.c.h.bf16 %v7454_v13 }
 0x4ae   : > { %7373 = vst [vmem:[%s10673_s24] sm:$0xff] %v7372_v50   ;;  %v6454_v19 = vadd.f32 %v7315_v3, %v6358_v43  ;;  %v6359_v49 = vadd.f32 %v10653_v56, %v6320_v35  ;;  %v7457_v35 = vld [vmem:[%s8884_s27 + $0x48] sm:$0xff]  }
 0x4af   : > { %v6457_v21 = vadd.f32 %v7320_v32, %v6361_v18  ;;  %v6488_v7 = vmax.f32 %v6456_v0, 0.0  ;;  %v7456_v0 = vld [vmem:[%s8884_s27 + $0x40] sm:$0xff]   ;;  %v7343_v40 = vunpack.c.l.bf16 %v7457_v35 }
 0x4b0   : > { %v6455_v28 = vadd.f32 %v7316_v31, %v6359_v49  ;;  %v8069_v22 = vpop.f32.mrb[72].mxu0  ;;  %v6486_v26 = vmax.f32 %v6454_v19, 0.0 }
 0x4b1   : > { %v6489_v37 = vmax.f32 %v6457_v21, 0.0  ;;  %v6325_v24 = vmul.f32 %v8069_v22, %v10646_v54  ;;  %v6213_v16 = vpop.f32.mrb[73].mxu0 }
 0x4b2   : > { %v6487_v17 = vmax.f32 %v6455_v28, 0.0  ;;  %v6323_v55 = vmul.f32 %v10646_v54, %v6213_v16  ;;  %v8070_v5 = vpop.f32.mrb[74].mxu0 }
 0x4b3   : > { %v7387_v4 = vpack.c.bf16 %v6489_v37, %v6488_v7  ;;  %v6364_v58 = vadd.f32 %v10653_v56, %v6325_v24  ;;  %v6326_v33 = vmul.f32 %v8070_v5, %v10646_v54  ;;  %v6216_v48 = vpop.f32.mrb[75].mxu0  ;;  %v7339_v24 = vunpack.c.l.bf16 %v7456_v0 }
 0x4b4   : > { %v7382_v23 = vpack.c.bf16 %v6487_v17, %v6486_v26  ;;  %v6362_v61 = vadd.f32 %v10653_v56, %v6323_v55  ;;  %v6324_v60 = vmul.f32 %v10646_v54, %v6216_v48  ;;  %v7344_v55 = vunpack.c.h.bf16 %v7457_v35 }
 0x4b5   : > { %7466 = vst [vmem:[%s10673_s24 + $0x18] sm:$0xff] %v7387_v4   ;;  %v6460_v2 = vadd.f32 %v7327_v27, %v6364_v58  ;;  %v6365_v63 = vadd.f32 %v10653_v56, %v6326_v33  ;;  %v7340_v33 = vunpack.c.h.bf16 %v7456_v0 }
 0x4b6   : > { %7465 = vst [vmem:[%s10673_s24 + $0x10] sm:$0xff] %v7382_v23   ;;  %v6458_v34 = vadd.f32 %v7323_v14, %v6362_v61  ;;  %v6363_v8 = vadd.f32 %v10653_v56, %v6324_v60  ;;  %v7459_v60 = vld [vmem:[%s8884_s27 + $0x58] sm:$0xff]  }
 0x4b7   : > { %v6461_v57 = vadd.f32 %v7328_v41, %v6365_v63  ;;  %v6492_v9 = vmax.f32 %v6460_v2, 0.0  ;;  %v7458_v2 = vld [vmem:[%s8884_s27 + $0x50] sm:$0xff]   ;;  %v7351_v13 = vunpack.c.l.bf16 %v7459_v60 }
 0x4b8   : > { %v6459_v20 = vadd.f32 %v7324_v46, %v6363_v8  ;;  %v8073_v62 = vpop.f32.mrb[76].mxu0  ;;  %v6490_v6 = vmax.f32 %v6458_v34, 0.0 }
 0x4b9   : > { %v6493_v39 = vmax.f32 %v6461_v57, 0.0  ;;  %v6329_v59 = vmul.f32 %v8073_v62, %v10646_v54  ;;  %v6229_v11 = vpop.f32.mrb[77].mxu0 }
 0x4ba   : > { %v6491_v42 = vmax.f32 %v6459_v20, 0.0  ;;  %v6327_v53 = vmul.f32 %v10646_v54, %v6229_v11  ;;  %v8074_v51 = vpop.f32.mrb[78].mxu0 }
 0x4bb   : > { %v7397_v47 = vpack.c.bf16 %v6493_v39, %v6492_v9  ;;  %v6368_v10 = vadd.f32 %v10653_v56, %v6329_v59  ;;  %v6330_v1 = vmul.f32 %v8074_v51, %v10646_v54  ;;  %v6232_v3 = vpop.f32.mrb[79].mxu0  ;;  %v7347_v59 = vunpack.c.l.bf16 %v7458_v2 }
 0x4bc   : > { %v7392_v25 = vpack.c.bf16 %v6491_v42, %v6490_v6  ;;  %v6366_v12 = vadd.f32 %v10653_v56, %v6327_v53  ;;  %v6328_v52 = vmul.f32 %v10646_v54, %v6232_v3  ;;  %v7352_v53 = vunpack.c.h.bf16 %v7459_v60 }
 0x4bd   : > { %7468 = vst [vmem:[%s10673_s24 + $0x28] sm:$0xff] %v7397_v47   ;;  %v6464_v32 = vadd.f32 %v7335_v44, %v6368_v10  ;;  %v6369_v36 = vadd.f32 %v10653_v56, %v6330_v1  ;;  %v7348_v1 = vunpack.c.h.bf16 %v7458_v2 }
 0x4be   : > { %7467 = vst [vmem:[%s10673_s24 + $0x20] sm:$0xff] %v7392_v25   ;;  %v6462_v50 = vadd.f32 %v7331_v29, %v6366_v12  ;;  %v6367_v43 = vadd.f32 %v10653_v56, %v6328_v52  ;;  %v7461_v52 = vld [vmem:[%s8884_s27 + $0x68] sm:$0xff]  }
 0x4bf   : > { %v6465_v31 = vadd.f32 %v7336_v45, %v6369_v36  ;;  %v6496_v49 = vmax.f32 %v6464_v32, 0.0  ;;  %v7460_v32 = vld [vmem:[%s8884_s27 + $0x60] sm:$0xff]   ;;  %v7359_v0 = vunpack.c.l.bf16 %v7461_v52 }
 0x4c0   : > { %v6463_v18 = vadd.f32 %v7332_v38, %v6367_v43  ;;  %v8077_v19 = vpop.f32.mrb[80].mxu0  ;;  %v6494_v22 = vmax.f32 %v6462_v50, 0.0 }
 0x4c1   : > { %v6497_v15 = vmax.f32 %v6465_v31, 0.0  ;;  %v6333_v21 = vmul.f32 %v8077_v19, %v10646_v54  ;;  %v6245_v28 = vpop.f32.mrb[81].mxu0 }
 0x4c2   : > { %v6495_v7 = vmax.f32 %v6463_v18, 0.0  ;;  %v6331_v37 = vmul.f32 %v10646_v54, %v6245_v28  ;;  %v8078_v27 = vpop.f32.mrb[82].mxu0 }
 0x4c3   : > { %v7407_v16 = vpack.c.bf16 %v6497_v15, %v6496_v49  ;;  %v6372_v26 = vadd.f32 %v10653_v56, %v6333_v21  ;;  %v6334_v17 = vmul.f32 %v8078_v27, %v10646_v54  ;;  %v6248_v14 = vpop.f32.mrb[83].mxu0  ;;  %v7355_v21 = vunpack.c.l.bf16 %v7460_v32 }
 0x4c4   : > { %v7402_v5 = vpack.c.bf16 %v6495_v7, %v6494_v22  ;;  %v6370_v4 = vadd.f32 %v10653_v56, %v6331_v37  ;;  %v6332_v58 = vmul.f32 %v10646_v54, %v6248_v14  ;;  %v7360_v37 = vunpack.c.h.bf16 %v7461_v52 }
 0x4c5   : > { %7470 = vst [vmem:[%s10673_s24 + $0x38] sm:$0xff] %v7407_v16   ;;  %v6468_v41 = vadd.f32 %v7343_v40, %v6372_v26  ;;  %v6373_v48 = vadd.f32 %v10653_v56, %v6334_v17  ;;  %v7356_v17 = vunpack.c.h.bf16 %v7460_v32 }
 0x4c6   : > { %7469 = vst [vmem:[%s10673_s24 + $0x30] sm:$0xff] %v7402_v5   ;;  %v6466_v23 = vadd.f32 %v7339_v24, %v6370_v4  ;;  %v6371_v61 = vadd.f32 %v10653_v56, %v6332_v58  ;;  %v7463_v58 = vld [vmem:[%s8884_s27 + $0x78] sm:$0xff]  }
 0x4c7   : > { %v6469_v46 = vadd.f32 %v7344_v55, %v6373_v48  ;;  %v6500_v8 = vmax.f32 %v6468_v41, 0.0  ;;  %v7462_v41 = vld [vmem:[%s8884_s27 + $0x70] sm:$0xff]   ;;  %v7367_v2 = vunpack.c.l.bf16 %v7463_v58  ;;  %s6688_s27 = sshll.u32 %s10673_s24, 4  ;;  %s10758_s27 = int_to_ptr.vmem [resolvable:$true] %s6688_s27 }
 0x4c8   : > { %v6467_v63 = vadd.f32 %v7340_v33, %v6371_v61  ;;  %v8081_v34 = vpop.f32.mrb[84].mxu0  ;;  %v6498_v62 = vmax.f32 %v6466_v23, 0.0  ;;  %s8598_s26 = scalar_lea.vmem %s10758_s27, 2048  ;;  %p8605_p10 = scmp.lt.s32.totalorder %s10758_s27, %s8603_s30 }
 0x4c9   : > { %v6501_v30 = vmax.f32 %v6469_v46, 0.0  ;;  %v6337_v57 = vmul.f32 %v8081_v34, %v10646_v54  ;;  %v6261_v20 = vpop.f32.mrb[85].mxu0  ;;  %p8599_p4 = scmp.ne.s32.totalorder %s10758_s27, %s8598_s26  ;;  %p8606_p13 = scmp.lt.s32.totalorder %s8604_s13, %s8598_s26 }
 0x4ca   : > { %v6499_v9 = vmax.f32 %v6467_v63, 0.0  ;;  %v6335_v39 = vmul.f32 %v10646_v54, %v6261_v20  ;;  %v8082_v44 = vpop.f32.mrb[86].mxu0 }
 0x4cb   : > { %v7417_v11 = vpack.c.bf16 %v6501_v30, %v6500_v8  ;;  %v6376_v6 = vadd.f32 %v10653_v56, %v6337_v57  ;;  %v6338_v42 = vmul.f32 %v8082_v44, %v10646_v54  ;;  %v6264_v29 = vpop.f32.mrb[87].mxu0  ;;  %v7363_v57 = vunpack.c.l.bf16 %v7462_v41  ;;  %p8600_p6 = pnand %p8599_p4, %p8827_p12  ;;  %p8607_p3 = por %p8606_p13, %p8605_p10 }
 0x4cc   : > { %v7412_v51 = vpack.c.bf16 %v6499_v9, %v6498_v62  ;;  %v6374_v47 = vadd.f32 %v10653_v56, %v6335_v39  ;;  %v6336_v10 = vmul.f32 %v10646_v54, %v6264_v29  ;;  %v7368_v39 = vunpack.c.h.bf16 %v7463_v58 }
 0x4cd   : > { %7472 = vst [vmem:[%s10673_s24 + $0x48] sm:$0xff] %v7417_v11   ;;  %v6472_v45 = vadd.f32 %v7351_v13, %v6376_v6  ;;  %v6377_v3 = vadd.f32 %v10653_v56, %v6338_v42  ;;  %v7364_v42 = vunpack.c.h.bf16 %v7462_v41  ;;  %p8601_p8 = pneg %p8600_p6 }
 0x4ce   : > { %7471 = vst [vmem:[%s10673_s24 + $0x40] sm:$0xff] %v7412_v51   ;;  %v6470_v25 = vadd.f32 %v7347_v59, %v6374_v47  ;;  %v6375_v12 = vadd.f32 %v10653_v56, %v6336_v10 }
 0x4cf   : > { %v6473_v38 = vadd.f32 %v7352_v53, %v6377_v3  ;;  %v6504_v43 = vmax.f32 %v6472_v45, 0.0  ;;  %p8608_p7 = pnand %p8607_p3, %p8601_p8 }
 0x4d0   : > { %v6471_v36 = vadd.f32 %v7348_v1, %v6375_v12  ;;  %v8085_v50 = vpop.f32.mrb[88].mxu0  ;;  %v6502_v19 = vmax.f32 %v6470_v25, 0.0 }
 0x4d1   : > { %v6505_v35 = vmax.f32 %v6473_v38, 0.0  ;;  %v6341_v31 = vmul.f32 %v8085_v50, %v10646_v54  ;;  %v6277_v18 = vpop.f32.mrb[89].mxu0 }
 0x4d2   : > { %v6503_v49 = vmax.f32 %v6471_v36, 0.0  ;;  %v6339_v15 = vmul.f32 %v10646_v54, %v6277_v18  ;;  %v8086_v40 = vpop.f32.mrb[90].mxu0 }
 0x4d3   : > { %v7427_v28 = vpack.c.bf16 %v6505_v35, %v6504_v43  ;;  %v6380_v22 = vadd.f32 %v10653_v56, %v6341_v31  ;;  %v6342_v7 = vmul.f32 %v8086_v40, %v10646_v54  ;;  %v6280_v24 = vpop.f32.mrb[91].mxu0 }
 0x4d4   : > { %v7422_v27 = vpack.c.bf16 %v6503_v49, %v6502_v19  ;;  %v6378_v16 = vadd.f32 %v10653_v56, %v6339_v15  ;;  %v6340_v26 = vmul.f32 %v10646_v54, %v6280_v24 }
 0x4d5   : > { %7474 = vst [vmem:[%s10673_s24 + $0x58] sm:$0xff] %v7427_v28   ;;  %v6476_v55 = vadd.f32 %v7359_v0, %v6380_v22  ;;  %v6381_v14 = vadd.f32 %v10653_v56, %v6342_v7 }
 0x4d6   : > { %7473 = vst [vmem:[%s10673_s24 + $0x50] sm:$0xff] %v7422_v27   ;;  %v6474_v5 = vadd.f32 %v7355_v21, %v6378_v16  ;;  %v6379_v4 = vadd.f32 %v10653_v56, %v6340_v26 }
 0x4d7   : > { %v6477_v33 = vadd.f32 %v7360_v37, %v6381_v14  ;;  %v6508_v61 = vmax.f32 %v6476_v55, 0.0 }
 0x4d8   : > { %v6475_v48 = vadd.f32 %v7356_v17, %v6379_v4  ;;  %v8089_v23 = vpop.f32.mrb[92].mxu0  ;;  %v6506_v34 = vmax.f32 %v6474_v5, 0.0 }
 0x4d9   : > { %v6509_v60 = vmax.f32 %v6477_v33, 0.0  ;;  %v6345_v46 = vmul.f32 %v8089_v23, %v10646_v54  ;;  %v6293_v63 = vpop.f32.mrb[93].mxu0 }
 0x4da   : > { %v6507_v8 = vmax.f32 %v6475_v48, 0.0  ;;  %v6343_v30 = vmul.f32 %v10646_v54, %v6293_v63  ;;  %v8090_v13 = vpop.f32.mrb[94].mxu0 }
 0x4db   : > { %v7437_v20 = vpack.c.bf16 %v6509_v60, %v6508_v61  ;;  %v6384_v62 = vadd.f32 %v10653_v56, %v6345_v46  ;;  %v6346_v9 = vmul.f32 %v8090_v13, %v10646_v54  ;;  %v6296_v59 = vpop.f32.mrb[95].mxu0 }
 0x4dc   : > { %v7432_v44 = vpack.c.bf16 %v6507_v8, %v6506_v34  ;;  %v6382_v11 = vadd.f32 %v10653_v56, %v6343_v30  ;;  %v6344_v6 = vmul.f32 %v10646_v54, %v6296_v59 }
 0x4dd   : > { %7476 = vst [vmem:[%s10673_s24 + $0x68] sm:$0xff] %v7437_v20   ;;  %v6480_v53 = vadd.f32 %v7367_v2, %v6384_v62  ;;  %v6385_v29 = vadd.f32 %v10653_v56, %v6346_v9 }
 0x4de   : > { %7475 = vst [vmem:[%s10673_s24 + $0x60] sm:$0xff] %v7432_v44   ;;  %v6478_v51 = vadd.f32 %v7363_v57, %v6382_v11  ;;  %v6383_v47 = vadd.f32 %v10653_v56, %v6344_v6 }
 0x4df   : > { %v6481_v10 = vadd.f32 %v7368_v39, %v6385_v29  ;;  %v6512_v45 = vmax.f32 %v6480_v53, 0.0 }
 0x4e0   : > { %v6479_v1 = vadd.f32 %v7364_v42, %v6383_v47  ;;  %v6510_v54 = vmax.f32 %v6478_v51, 0.0 }
 0x4e1   : > { %v6513_v3 = vmax.f32 %v6481_v10, 0.0 }
 0x4e2   : > { %v6511_v25 = vmax.f32 %v6479_v1, 0.0 }
 0x4e3   : > { %v7447_v12 = vpack.c.bf16 %v6513_v3, %v6512_v45 }
 0x4e4   : > { %v7442_v56 = vpack.c.bf16 %v6511_v25, %v6510_v54 }
 0x4e5   : > { %7478 = vst [vmem:[%s10673_s24 + $0x78] sm:$0xff] %v7447_v12  }
 0x4e6   : > { %7477 = vst [vmem:[%s10673_s24 + $0x70] sm:$0xff] %v7442_v56  }
 0x4e7   : > { %8611 = shalt.err (!%p8608_p7)
}
 0x4e8   : > { %s8612_s20 = scalar_lea.hbm %s10756_s25, 2048  ;;  %s8616_s24 = scalar_lea.hbm %s10814_s10, 4096 }
 0x4e9   : > { %p8613_p9 = scmp.ne.s32.totalorder %s10756_s25, %s8612_s20  ;;  %p8617_p5 = scmp.lt.u32.totalorder %s10756_s25, %s10814_s10 }
 0x4ea   : > { %p8618_p11 = scmp.lt.u32.totalorder %s8616_s24, %s8612_s20  ;;  %p8620_p4 = scmp.lt.u32.totalorder %s8612_s20, %s10756_s25 }
 0x4eb   : > { %p8614_p1 = pnand %p8613_p9, %p8827_p12 }
 0x4ec   : > { %p8619_p2 = por %p8618_p11, %p8617_p5 }
 0x4ed   : > { %p8615_p0 = pneg %p8614_p1 }
 0x4ee   : > { %p8621_p6 = por %p8620_p4, %p8619_p2 }
 0x4f0   : > { %p8622_p8 = pnand %p8621_p6, %p8615_p0 }
 0x4f2   : > { %8625 = shalt.err (!%p8622_p8)
}
 0x4f3   : > { %s8676_s29 = smov 64   ;;  %s8677_s26 = smov 4  }
 0x4f4   : > { %8357 = dma.vmem_to_hbm [thread:$0]  (%p8827_p12), %s10758_s27, 2048, %s10756_s25, %s6675_s17, %s8676_s29, %s8676_s29, %s8677_s26  }
 0x4f5 PF: > { %s10945_s19 = sld [smem:[#allocation12_spill]]  ;;  %s10946_s30 = sld [smem:[#allocation13_spill]] }
 0x4f6   : > { %p10948_p13 = scmp.ge.s32.totalorder %s8668_s16, 2 }
 0x4fb   : > { %s6703_s13 = sand.u32 1, %s10945_s19   ;;  %p10947_p10 = scmp.ne.s32.totalorder %s10946_s30, 0 }
 0x4fc   : > { %s6704_s20 = scalar_lea.sflag [#allocation5], %s6703_s13 }
 0x4fd   : > { %p8368_p3 = pnand %p10948_p13, %p10947_p10 }
 0x4ff   : > { %8651 = dma.done.wait (!%p8368_p3), %s6704_s20, 2048  }
 0x500   : > { %8653 = vsyncadd (!%p8368_p3), %s6704_s20, 4294965248  ;;  %s10949_s16 = sld [smem:[#allocation14_spill]]  ;;  %s10950_s13 = smov %s8660_s14 }
 0x501   : > { %s10951_s14 = smov %s8664_s15  ;;  %s10952_s15 = smov %s8823_s11 }
 0x506   : > { %p24_p7 = scmp.ge.s32.totalorder %s10949_s16, 4  }
 0x508   :  { %26 = sbr.rel (!%p24_p7) target bundleno = 6 (0x6), region = 119 }
 0x50f   :  { %6709 = vsyncpa [#allocation4], 1 }
 0x510   :  { %6711 = vsyncpa [#allocation4 + $0x1], 1 }
 0x511   :  { %6712 = vsyncpa [#allocation7], 1 }
 0x512   :  { %6713 = vsyncpa [#allocation5], 1 }
 0x513   :  { %6715 = vsyncpa [#allocation5 + $0x1], 1 }

// kernel: tpu_custom_call.1
= control target key start
LH: loop header
LB: loop body
LE: loop exit
PB: predicated region body
PF: predicated region fallthrough
CT: control target
= control target key end

     0   :  { %15 = vsyncpa [#allocation4], 0  ;;  %s10804_s0 = inlined_call_operand.hbm [shape: bf16[2,16,16,128], index: 0, kind: input, shape index: {}]   ;;  %s10805_s1 = inlined_call_operand.vmem [shape: bf16[128,32], index: 1, kind: input, shape index: {}]   ;;  %s10806_s2 = inlined_call_operand.vmem [shape: f32[1,32], index: 2, kind: input, shape index: {}]   ;;  %s10807_s3 = inlined_call_operand.vmem [shape: f32[1,32], index: 3, kind: input, shape index: {}]   ;;  %s10808_s4 = inlined_call_operand.hbm [shape: bf16[9,32,32], index: 4, kind: input, shape index: {}]   ;;  %s10809_s5 = inlined_call_operand.vmem [shape: f32[1,32], index: 5, kind: input, shape index: {}]   ;;  %s10810_s6 = inlined_call_operand.vmem [shape: f32[1,32], index: 6, kind: input, shape index: {}]   ;;  %s10811_s7 = inlined_call_operand.vmem [shape: bf16[32,128], index: 7, kind: input, shape index: {}]   ;;  %s10812_s8 = inlined_call_operand.vmem [shape: f32[1,128], index: 8, kind: input, shape index: {}]   ;;  %s10813_s9 = inlined_call_operand.vmem [shape: f32[1,128], index: 9, kind: input, shape index: {}]   ;;  %s10814_s10 = inlined_call_operand.hbm [shape: bf16[2,16,16,128], index: 10, kind: output, shape index: {}]  }
   0x1   :  { %17 = vsyncpa [#allocation4 + $0x1], 0 }
   0x2   :  { %18 = vsyncpa [#allocation7], 0 }
   0x3   :  { %19 = vsyncpa [#allocation5], 0 }
   0x4   :  { %21 = vsyncpa [#allocation5 + $0x1], 0  ;;  %s8733_s13 = smov 0   ;;  %s8735_s14 = smov 0  }
   0x5   :  { %s8737_s15 = smov 0   ;;  %s8739_s16 = smov 0  }
   0x6 LB: > { %10848 = sst [smem:[#allocation12_spill]] %s8656_s13  ;;  %s8754_s17 = sadd.s32 4294967295, %s8668_s16   ;;  %s8668_s16 = sphi %s8739_s16, %s10949_s16   ;;  %s8664_s15 = sphi %s8737_s15, %s10952_s15   ;;  %s8660_s14 = sphi %s8735_s14, %s10951_s14   ;;  %s8656_s13 = sphi %s8733_s13, %s10950_s13  }
   0x7   : > { %s6771_s18 = sadd.s32 4294967294, %s8668_s16   ;;  %p47_p0 = scmp.ne.s32.totalorder %s8660_s14, %s8656_s13 }
   0x8   : > { %p10817_p1 = scmp.eq.s32.totalorder %s8754_s17, 0  ;;  %p266_p3 = scmp.eq.s32.totalorder %s6771_s18, 1 }
   0x9   : > { %p6772_p5 = scmp.ge.s32.totalorder %s8668_s16, 1  ;;  %p273_p7 = scmp.lt.s32.totalorder %s8668_s16, 3 }
   0xa   : > { %p8763_p4 = por %p10817_p1, %p47_p0  ;;  %p8768_p6 = por %p266_p3, %p47_p0 }
   0xb   : > { %p8773_p8 = pnand %p6772_p5, %p273_p7  ;;  %s8670_s22 = smov [#allocation6]  }
   0xc   : > { %s10849_s19 = scalar_select %p8763_p4, 1, 0 }
   0xd   : > { %s10850_s20 = scalar_select %p8768_p6, 1, 0 }
   0xe   : > { %s10852_s21 = scalar_select %p8773_p8, 1, 0 }
   0xf   : > { %10851 = sst [smem:[#allocation13_spill]] %s10850_s20  ;;  %s294_s23 = sshll.u32 %s8670_s22, 4  ;;  %s8777_s23 = int_to_ptr.vmem [resolvable:$true] %s294_s23 }
  0x10   : > { %p8359_p9 = pneg %p8773_p8  ;;  %s8789_s25 = sadd.s32 1, %s8668_s16  }
  0x11   : > { %10854 = sst [smem:[#allocation14_spill]] %s8789_s25  ;;  %s34_s26 = sadd.s32 1, %s8664_s15 }
  0x12   : > { %p8784_p11 = pnand %p8359_p9, %p10817_p1  ;;  %s31_s27 = ssub.s32 %s8668_s16, %s8789_s25 }
  0x13   : > { %s8540_s30 = scalar_lea.hbm %s10808_s4, 2304 }
  0x14   : > { %p8541_p12 = scmp.ne.s32.totalorder %s10808_s4, %s8540_s30  ;;  %p8542_p13 = pneg %p8784_p11 }
  0x15   : > { %p8547_p5 = scmp.lt.u32.totalorder %s8540_s30, %s10808_s4 }
  0x16   : > { %p8543_p0 = pnand %p8542_p13, %p8541_p12 }
  0x18   : > { %p8544_p3 = pneg %p8543_p0 }
  0x1a   : > { %p8549_p7 = pnand %p8547_p5, %p8544_p3 }
  0x1c   : > { %8552 = shalt.err (!%p8549_p7)
}
  0x1d   : > { %s8553_s25 = scalar_lea.vmem %s8777_s23, 2304  ;;  %p8561_p2 = scmp.lt.s32.totalorder %s8777_s23, %s8777_s23 }
  0x1e   : > { %p8554_p9 = scmp.ne.s32.totalorder %s8777_s23, %s8553_s25  ;;  %p8562_p6 = scmp.lt.s32.totalorder %s8553_s25, %s8553_s25 }
  0x20   : > { %p8556_p10 = pnand %p8554_p9, %p8542_p13  ;;  %p8563_p4 = por %p8562_p6, %p8561_p2 }
  0x22   : > { %p8557_p1 = pneg %p8556_p10 }
  0x24   : > { %p8564_p8 = pnand %p8563_p4, %p8557_p1 }
  0x26   : > { %8567 = shalt.err (!%p8564_p8)
}
  0x27   : > { %s10822_s28 = smov 64   ;;  %s8672_s29 = smov 4  }
  0x28   : > { %8362 = dma.hbm_to_vmem [thread:$0]  (!%p8784_p11), %s10808_s4, 2304, %s8777_s23, [#allocation7], %s10822_s28, %s10822_s28, %s8672_s29  }
  0x29   : > { %p32_p1 = scmp.eq.s32.totalorder %s31_s27, 0  ;;  %p41_p2 = scmp.ne.s32.totalorder %s8664_s15, %s8660_s14 }
  0x2a   : > { %p42_p4 = scmp.eq.s32.totalorder %s8668_s16, 0  ;;  %p8372_p6 = scmp.lt.s32.totalorder %s8668_s16, 2 }
  0x2b   : > { %s8823_s11 = scalar_select %p32_p1, %s8664_s15, %s34_s26  }
  0x2c   : > { %p43_p8 = por %p42_p4, %p41_p2  ;;  %p10855_p10 = scmp.eq.s32.totalorder %s8754_s17, 1 }
  0x2d   : > { %s323_s24 = sand.u32 1, %s8664_s15   ;;  %s7271_s18 = sshll.u32 %s8668_s16, 11 }
  0x2e   : > { %p8827_p12 = por %p10855_p10, %p41_p2  ;;  %s6775_s22 = sshll.u32 %s323_s24, 7 }
  0x2f   : > { %s8836_s25 = scalar_lea.hbm %s10804_s0, %s7271_s18  ;;  %s327_s23 = scalar_lea.vmem [#allocation3], %s6775_s22 }
  0x30   : > { %s334_s26 = sshll.u32 %s327_s23, 4  ;;  %p8838_p11 = pnand %p8372_p6, %p43_p8  ;;  %s8842_s26 = int_to_ptr.vmem [resolvable:$true] %s334_s26 }
  0x31   : > { %s8844_s30 = scalar_lea.sflag [#allocation4], %s323_s24  ;;  %s8568_s28 = scalar_lea.hbm %s8836_s25, 2048 }
  0x32   : > { %p8569_p13 = scmp.ne.s32.totalorder %s8836_s25, %s8568_s28  ;;  %p8570_p0 = pneg %p8838_p11 }
  0x33   : > { %s8573_s18 = scalar_lea.hbm %s10804_s0, 4096  ;;  %p8574_p7 = scmp.lt.u32.totalorder %s8836_s25, %s10804_s0 }
  0x34   : > { %p8571_p3 = pnand %p8570_p0, %p8569_p13  ;;  %p8575_p9 = scmp.lt.u32.totalorder %s8573_s18, %s8568_s28 }
  0x35   : > { %p8577_p2 = scmp.lt.u32.totalorder %s8568_s28, %s8836_s25 }
  0x36   : > { %p8572_p5 = pneg %p8571_p3  ;;  %p8576_p1 = por %p8575_p9, %p8574_p7 }
  0x38   : > { %p8578_p4 = por %p8577_p2, %p8576_p1 }
  0x3a   : > { %p8579_p6 = pnand %p8578_p4, %p8572_p5 }
  0x3c   : > { %8582 = shalt.err (!%p8579_p6)
}
  0x3d   : > { %s8583_s24 = scalar_lea.vmem %s8842_s26, 2048  ;;  %s8673_s13 = smov [#allocation3]  }
  0x3e   : > { %p8584_p8 = scmp.ne.s32.totalorder %s8842_s26, %s8583_s24  ;;  %s8588_s20 = sshll.u32 %s8673_s13, 4  ;;  %s8589_s20 = int_to_ptr.vmem [resolvable:$false] %s8588_s20 }
  0x3f   : > { %s8590_s22 = scalar_lea.vmem %s8589_s20, 4096  ;;  %p8591_p3 = scmp.lt.s32.totalorder %s8842_s26, %s8589_s20 }
  0x40   : > { %p8586_p10 = pnand %p8584_p8, %p8570_p0  ;;  %p8592_p7 = scmp.lt.s32.totalorder %s8590_s22, %s8583_s24 }
  0x42   : > { %p8587_p13 = pneg %p8586_p10  ;;  %p8593_p9 = por %p8592_p7, %p8591_p3 }
  0x44   : > { %p8594_p1 = pnand %p8593_p9, %p8587_p13 }
  0x46   : > { %8597 = shalt.err (!%p8594_p1)
}
  0x47   : > { %s10858_s28 = smov 64   ;;  %p10859_p0 = scmp.ne.s32.totalorder %s10852_s21, 0 }
  0x48   : > { %8366 = dma.hbm_to_vmem [thread:$0]  (!%p8838_p11), %s8836_s25, 2048, %s8842_s26, %s8844_s30, %s10858_s28, %s10858_s28, %s8672_s29  }
  0x49   : > { %346 = sbr.rel (%p10859_p0) target bundleno = 1269 (0x4f5), region = 60 }
  0x50   : > { %s8878_s18 = sand.u32 1, %s8660_s14   ;;  %p10860_p5 = scmp.ne.s32.totalorder %s10849_s19, 0 }
  0x51   : > { %s6779_s23 = sshll.u32 %s8878_s18, 7  ;;  %s349_s24 = scalar_lea.sflag [#allocation4], %s8878_s18 }
  0x52   : > { %s8884_s27 = scalar_lea.vmem [#allocation3], %s6779_s23 }
  0x53   : > { %8643 = dma.done.wait (%p10860_p5), %s349_s24, 2048  }
  0x54   : > { %8645 = vsyncadd (%p10860_p5), %s349_s24, 4294965248  ;;  %p10861_p11 = scmp.eq.s32.totalorder %s8754_s17, 0 }
  0x56   : > { %8647 = dma.done.wait (%p10861_p11), [#allocation7], 2304   ;;  %p10862_p2 = pmov %p10861_p11 }
  0x57   : > { %v8413_v0 = vld [vmem:[%s10805_s1] sm:$0xff]   ;;  %v8414_v1 = vld [vmem:[%s10805_s1 + $0x8] sm:$0xff]   ;;  %v8415_v2 = vld [vmem:[%s10805_s1 + $0x10] sm:$0xff]   ;;  %vm1235_vm0 = vcmask 257024   ;;  %v8674_v24 = vmov 0   ;;  %vm1238_vm1 = vcmask 253952  }
  0x58   : > { %8649 = vsyncadd (%p10862_p2), [#allocation7], 4294964992  ;;  %7683 = vmatprep.subr.bf16.mxu0 %v8413_v0  ;;  %v8416_v3 = vld [vmem:[%s10805_s1 + $0x18] sm:$0xff]   ;;  %v8417_v5 = vld [vmem:[%s10805_s1 + $0x20] sm:$0xff]   ;;  %v6808_v25 = vcombine.low %v8674_v24, %v8674_v24  ;;  %v6809_v26 = vcombine.high %v8674_v24, %v8674_v24  ;;  %vm1343_vm2 = vsmask.f32 3328 }
  0x59   : > { %7684 = vmatpush3.bf16.msra.mxu0 %v8413_v0  ;;  %v8421_v4 = vld [vmem:[%s8884_s27] sm:$0xff]   ;;  %v8418_v6 = vld [vmem:[%s10805_s1 + $0x28] sm:$0xff]   ;;  %v8419_v7 = vld [vmem:[%s10805_s1 + $0x30] sm:$0xff]   ;;  %vm1344_vm3 = vsmask.f32 7440  ;;  %vm1795_vm5 = vcmask 261120  }
  0x5a   : > { %7685 = vmatprep.subr.bf16.mxu0 %v8414_v1  ;;  %7699 = vmatprep.mubr.bf16.mxu0 %v8421_v4  ;;  %v8420_v8 = vld [vmem:[%s10805_s1 + $0x38] sm:$0xff]   ;;  %v8422_v9 = vld [vmem:[%s8884_s27 + $0x8] sm:$0xff]   ;;  %v8423_v10 = vld [vmem:[%s8884_s27 + $0x10] sm:$0xff]   ;;  %1236 = vst.msk [vmem:[#allocation2] sm:$0xf] %vm1235_vm0, %v6808_v25  ;;  %vm1017_vm6 = vcmask 1040384  }
  0x5b   : > { %v8424_v11 = vld [vmem:[%s8884_s27 + $0x18] sm:$0xff]   ;;  %v8425_v12 = vld [vmem:[%s8884_s27 + $0x20] sm:$0xff]   ;;  %v8426_v13 = vld [vmem:[%s8884_s27 + $0x28] sm:$0xff]   ;;  %1237 = vst.msk [vmem:[#allocation2 + $0x4] sm:$0xf] %vm1235_vm0, %v6809_v26  ;;  %vm2354_vm9 = vcmask 1042432  }
  0x5c   : > { %v8427_v14 = vld [vmem:[%s8884_s27 + $0x30] sm:$0xff]   ;;  %v8428_v15 = vld [vmem:[%s8884_s27 + $0x38] sm:$0xff]   ;;  %v8429_v16 = vld [vmem:[%s8884_s27 + $0x40] sm:$0xff]   ;;  %1239 = vst.msk [vmem:[#allocation2 + $0x8] sm:$0x1] %vm1238_vm1, %v6808_v25  ;;  %vm2355_vm10 = vcmask 1046532  }
  0x5d   : > { %7686 = vmatpush3.bf16.msra.mxu0 %v8414_v1  ;;  %v8430_v17 = vld [vmem:[%s8884_s27 + $0x48] sm:$0xff]   ;;  %v8431_v18 = vld [vmem:[%s8884_s27 + $0x50] sm:$0xff]   ;;  %v8432_v19 = vld [vmem:[%s8884_s27 + $0x58] sm:$0xff]   ;;  %1288 = vst.msk [vmem:[#allocation2 + $0xcc] sm:$0xf] %vm1235_vm0, %v6808_v25  ;;  %s10673_s24 = scalar_lea.vmem [#allocation8], %s6779_s23 }
  0x5e   : > { %7687 = vmatprep.subr.bf16.mxu0 %v8415_v2  ;;  %v8433_v20 = vld [vmem:[%s8884_s27 + $0x60] sm:$0xff]   ;;  %v8434_v21 = vld [vmem:[%s8884_s27 + $0x68] sm:$0xff]   ;;  %v8435_v22 = vld [vmem:[%s8884_s27 + $0x70] sm:$0xff]   ;;  %1289 = vst.msk [vmem:[#allocation2 + $0xd0] sm:$0xf] %vm1235_vm0, %v6809_v26  ;;  %s7304_s23 = sshll.u32 %s8754_s17, 11 }
  0x5f   : > { %v8436_v23 = vld [vmem:[%s8884_s27 + $0x78] sm:$0xff]   ;;  %1290 = vst.msk [vmem:[#allocation2 + $0xd4] sm:$0x1] %vm1238_vm1, %v6808_v25  ;;  %v8437_v33 = vld [vmem:[#allocation6 + $0x10] sm:$0xff]   ;;  %vm8940_vm4 = vmor %vm1343_vm2, %vm1344_vm3  ;;  %vm1018_vm7 = vsmask.f32 256  ;;  %s10756_s25 = scalar_lea.hbm %s10814_s10, %s7304_s23 }
  0x60   : > { %v8438_v42 = vld [vmem:[#allocation6 + $0x18] sm:$0xff]   ;;  %v8439_v49 = vld [vmem:[#allocation6 + $0x30] sm:$0xff]   ;;  %v8949_v52 = vld [vmem:[#allocation6 + $0x40] sm:$0xff]   ;;  %s6675_s17 = scalar_lea.sflag [#allocation5], %s8878_s18  ;;  %s8675_s19 = smov [#allocation8]  }
  0x61   : > { %7688 = vmatpush3.bf16.msra.mxu0 %v8415_v2  ;;  %v1291_v27 = vld [vmem:[#allocation2] sm:$0xf]  ;;  %8091 = vmatprep.subr.bf16.mxu1 %v8439_v49  ;;  %v8440_v51 = vld [vmem:[#allocation6 + $0x38] sm:$0xff]   ;;  %vm8974_vm8 = vmand %vm1017_vm6, %vm1018_vm7  ;;  %s8602_s30 = sshll.u32 %s8675_s19, 4  ;;  %s8603_s30 = int_to_ptr.vmem [resolvable:$false] %s8602_s30 }
  0x62   : > { %7689 = vmatprep.subr.bf16.mxu0 %v8416_v3  ;;  %v1292_v28 = vld [vmem:[#allocation2 + $0x4] sm:$0xf]  ;;  %v1347_v29 = vshrl.u32 %v1291_v27, 16  ;;  %v1350_v30 = vshll.u32 %v1291_v27, 16  ;;  %8093 = vmatpush3.bf16.msra.mxu1 %v8439_v49  ;;  %v8955_v53 = vld [vmem:[%s10806_s2] ss:$0 sm:$0xff]  ;;  %vm9620_vm11 = vmor %vm2354_vm9, %vm2355_vm10 }
  0x63   : > { %v1356_v31 = vshll.u32 %v1292_v28, 16  ;;  %v1360_v32 = vshrl.u32 %v1292_v28, 16  ;;  %v1327_v38 = vld [vmem:[#allocation2 + $0x8] sm:$0x1]  ;;  %8092 = vmatprep.subr.bf16.mxu1 %v8440_v51  ;;  %v8960_v55 = vld [vmem:[%s10807_s3] ss:$0 sm:$0xff] }
  0x64   : > { %v1349_v34 = vrot.slane %v1347_v29, 4  ;;  %v1352_v35 = vrot.slane %v1350_v30, 5  ;;  %v1366_v41 = vshll.u32 %v1327_v38, 16  ;;  %s8604_s13 = scalar_lea.vmem %s8603_s30, 4096 }
  0x65   : > { %7690 = vmatpush3.bf16.msra.mxu0 %v8416_v3  ;;  %v1358_v36 = vrot.slane %v1356_v31, 5  ;;  %v1362_v37 = vrot.slane %v1360_v32, 4 }
  0x66   : > { %7691 = vmatprep.subr.bf16.mxu0 %v8417_v5  ;;  %v1353_v39 = vor.u32 %v1352_v35, %v1349_v34  ;;  %v1368_v46 = vrot.slane %v1366_v41, 5  ;;  %8094 = vmatpush3.bf16.msra.mxu1 %v8440_v51 }
  0x67   : > { %v1363_v40 = vor.u32 %v1362_v37, %v1358_v36  ;;  %7875 = vmatprep.subr.bf16.mxu1 %v8949_v52 }
  0x68   : > { %v1354_v43 = vrot.slane %v1353_v39, 4 }
  0x69   : > { %7692 = vmatpush3.bf16.msra.mxu0 %v8417_v5  ;;  %v1364_v45 = vrot.slane %v1363_v40, 4 }
  0x6a   : > { %7693 = vmatprep.subr.bf16.mxu0 %v8418_v6  ;;  %v1359_v47 = vsel %vm8940_vm4, %v1354_v43, %v1358_v36 }
  0x6b   : > { %v1369_v48 = vsel %vm8940_vm4, %v1364_v45, %v1368_v46 }
  0x6c   : > { %v6858_v50 = vcombine.low %v1359_v47, %v1369_v48 }
  0x6d   : > { %7694 = vmatpush3.bf16.msra.mxu0 %v8418_v6 }
  0x6e   : > { %7695 = vmatprep.subr.bf16.mxu0 %v8419_v7 }
  0x71   : > { %7696 = vmatpush3.bf16.msra.mxu0 %v8419_v7 }
  0x72   : > { %7697 = vmatprep.subr.bf16.mxu0 %v8420_v8 }
  0x75   : > { %7698 = vmatpush3.bf16.msra.mxu0 %v8420_v8 }
  0x76   : > { %7731 = vmatprep.subr.bf16.mxu0 %v8437_v33 }
  0x78   : > { %7700 = vmatmul.mubr.bf16.vlgmr.msra.gmra.mrb[0].mxu0 %v8422_v9 }
  0x79   : > { %7703 = vmatprep.mubr.bf16.mxu0 %v8423_v10  ;;  %7732 = vmatpush3.bf16.msra.mxu0 %v8437_v33 }
  0x7a   : > { %7733 = vmatprep.subr.bf16.mxu0 %v8438_v42 }
  0x7d   : > { %7734 = vmatpush3.bf16.msra.mxu0 %v8438_v42 }
  0x80   : > { %7704 = vmatmul.mubr.bf16.gmra.mrb[4].mxu0 %v8424_v11 }
  0x81   : > { %7707 = vmatprep.mubr.bf16.mxu0 %v8425_v12 }
  0x88   : > { %7708 = vmatmul.mubr.bf16.gmra.mrb[8].mxu0 %v8426_v13 }
  0x89   : > { %7711 = vmatprep.mubr.bf16.mxu0 %v8427_v14 }
  0x90   : > { %7712 = vmatmul.mubr.bf16.gmra.mrb[12].mxu0 %v8428_v15 }
  0x91   : > { %7715 = vmatprep.mubr.bf16.mxu0 %v8429_v16 }
  0x98   : > { %7716 = vmatmul.mubr.bf16.gmra.mrb[16].mxu0 %v8430_v17 }
  0x99   : > { %7719 = vmatprep.mubr.bf16.mxu0 %v8431_v18 }
  0xa0   : > { %7720 = vmatmul.mubr.bf16.gmra.mrb[20].mxu0 %v8432_v19 }
  0xa1   : > { %7723 = vmatprep.mubr.bf16.mxu0 %v8433_v20 }
  0xa8   : > { %7724 = vmatmul.mubr.bf16.gmra.mrb[24].mxu0 %v8434_v21 }
  0xa9   : > { %7727 = vmatprep.mubr.bf16.mxu0 %v8435_v22 }
  0xb0   : > { %7728 = vmatmul.mubr.bf16.gmra.mrb[28].mxu0 %v8436_v23 }
  0xb1   : > { %7735 = vmatprep.mubr.msk.bf16.mxu0 %vm1795_vm5, %v6858_v50 }
 0x14b   : > { %v7701_v54 = vpop.f32.mrb[0].mxu0 }
 0x14c   : > { %v756_v56 = vmul.f32 %v7701_v54, %v8955_v53  ;;  %v620_v57 = vpop.f32.mrb[1].mxu0 }
 0x14d   : > { %v754_v58 = vmul.f32 %v8955_v53, %v620_v57  ;;  %v7702_v59 = vpop.f32.mrb[2].mxu0 }
 0x14e   : > { %v795_v60 = vadd.f32 %v8960_v55, %v756_v56  ;;  %v757_v61 = vmul.f32 %v7702_v59, %v8955_v53  ;;  %v623_v62 = vpop.f32.mrb[3].mxu0  ;;  %v8993_v56 = vld [vmem:[#allocation6] sm:$0xff]  }
 0x14f   : > { %v793_v63 = vadd.f32 %v8960_v55, %v754_v58  ;;  %v755_v0 = vmul.f32 %v8955_v53, %v623_v62  ;;  %7767 = vmatprep.subr.bf16.mxu0 %v8993_v56 }
 0x150   : > { %v796_v1 = vadd.f32 %v8960_v55, %v757_v61  ;;  %v827_v3 = vmax.f32 %v795_v60, 0.0 }
 0x151   : > { %v794_v2 = vadd.f32 %v8960_v55, %v755_v0  ;;  %v825_v5 = vmax.f32 %v793_v63, 0.0 }
 0x152   : > { %v828_v4 = vmax.f32 %v796_v1, 0.0 }
 0x153   : > { %v826_v6 = vmax.f32 %v794_v2, 0.0  ;;  %v7705_v7 = vpop.f32.mrb[4].mxu0 }
 0x154   : > { %v858_v8 = vpack.c.bf16 %v828_v4, %v827_v3  ;;  %v760_v9 = vmul.f32 %v7705_v7, %v8955_v53  ;;  %v636_v10 = vpop.f32.mrb[5].mxu0 }
 0x155   : > { %v857_v11 = vpack.c.bf16 %v826_v6, %v825_v5  ;;  %v758_v12 = vmul.f32 %v8955_v53, %v636_v10  ;;  %v7706_v13 = vpop.f32.mrb[6].mxu0 }
 0x156   : > { %v881_v14 = vshrl.u32 %v858_v8, 16  ;;  %v799_v15 = vadd.f32 %v8960_v55, %v760_v9  ;;  %v761_v16 = vmul.f32 %v7706_v13, %v8955_v53  ;;  %v639_v17 = vpop.f32.mrb[7].mxu0  ;;  %v884_v23 = vshll.u32 %v858_v8, 16 }
 0x157   : > { %v874_v19 = vshrl.u32 %v857_v11, 16  ;;  %v797_v20 = vadd.f32 %v8960_v55, %v758_v12  ;;  %v759_v21 = vmul.f32 %v8955_v53, %v639_v17  ;;  %v877_v26 = vshll.u32 %v857_v11, 16 }
 0x158   : > { %v883_v22 = vrot.slane %v881_v14, 7  ;;  %v800_v24 = vadd.f32 %v8960_v55, %v761_v16  ;;  %v831_v27 = vmax.f32 %v799_v15, 0.0 }
 0x159   : > { %v876_v25 = vrot.slane %v874_v19, 7  ;;  %v798_v28 = vadd.f32 %v8960_v55, %v759_v21  ;;  %v829_v31 = vmax.f32 %v797_v20, 0.0 }
 0x15a   : > { %v886_v29 = vor.u32 %v884_v23, %v883_v22  ;;  %v1037_v30 = vsel %vm8974_vm8, %v883_v22, 0  ;;  %v832_v32 = vmax.f32 %v800_v24, 0.0 }
 0x15b   : > { %v6815_v33 = vcombine.low %v1037_v30, %v1037_v30  ;;  %v879_v34 = vor.u32 %v877_v26, %v876_v25  ;;  %v1036_v35 = vsel %vm8974_vm8, %v876_v25, 0  ;;  %v830_v36 = vmax.f32 %v798_v28, 0.0  ;;  %v7709_v37 = vpop.f32.mrb[8].mxu0 }
 0x15c   : > { %v1021_v38 = vsel %vm8974_vm8, 0, %v886_v29  ;;  %v6812_v39 = vcombine.low %v1036_v35, %v1036_v35  ;;  %v860_v40 = vpack.c.bf16 %v832_v32, %v831_v27  ;;  %v764_v41 = vmul.f32 %v7709_v37, %v8955_v53  ;;  %v652_v42 = vpop.f32.mrb[9].mxu0 }
 0x15d   : > { %v6813_v43 = vcombine.low %v1021_v38, %v1021_v38  ;;  %v6814_v45 = vcombine.high %v1021_v38, %v1021_v38  ;;  %1245 = vst.msk [vmem:[#allocation2 + $0x20] sm:$0x1] %vm1238_vm1, %v6815_v33  ;;  %v1020_v46 = vsel %vm8974_vm8, 0, %v879_v34  ;;  %v859_v47 = vpack.c.bf16 %v830_v36, %v829_v31  ;;  %v7710_v48 = vpop.f32.mrb[10].mxu0 }
 0x15e   : > { %v6810_v49 = vcombine.low %v1020_v46, %v1020_v46  ;;  %v6811_v50 = vcombine.high %v1020_v46, %v1020_v46  ;;  %1242 = vst.msk [vmem:[#allocation2 + $0x14] sm:$0x1] %vm1238_vm1, %v6812_v39  ;;  %v895_v51 = vshrl.u32 %v860_v40, 16  ;;  %v655_v54 = vpop.f32.mrb[11].mxu0  ;;  %v803_v58 = vadd.f32 %v8960_v55, %v764_v41 }
 0x15f   : > { %1243 = vst.msk [vmem:[#allocation2 + $0x18] sm:$0xf] %vm1235_vm0, %v6813_v43  ;;  %1244 = vst.msk [vmem:[#allocation2 + $0x1c] sm:$0xf] %vm1235_vm0, %v6814_v45  ;;  %v888_v57 = vshrl.u32 %v859_v47, 16  ;;  %v762_v59 = vmul.f32 %v8955_v53, %v652_v42  ;;  %v898_v61 = vshll.u32 %v860_v40, 16  ;;  %v765_v62 = vmul.f32 %v7710_v48, %v8955_v53 }
 0x160   : > { %1240 = vst.msk [vmem:[#allocation2 + $0xc] sm:$0xf] %vm1235_vm0, %v6810_v49  ;;  %1241 = vst.msk [vmem:[#allocation2 + $0x10] sm:$0xf] %vm1235_vm0, %v6811_v50  ;;  %v897_v60 = vrot.slane %v895_v51, 7  ;;  %v763_v63 = vmul.f32 %v8955_v53, %v655_v54  ;;  %v891_v1 = vshll.u32 %v859_v47, 16 }
 0x161   : > { %v890_v0 = vrot.slane %v888_v57, 7  ;;  %v835_v2 = vmax.f32 %v803_v58, 0.0  ;;  %v801_v3 = vadd.f32 %v8960_v55, %v762_v59  ;;  %v804_v6 = vadd.f32 %v8960_v55, %v765_v62 }
 0x162   : > { %v900_v4 = vor.u32 %v898_v61, %v897_v60  ;;  %v1039_v5 = vsel %vm8974_vm8, %v897_v60, 0  ;;  %v802_v7 = vadd.f32 %v8960_v55, %v763_v63 }
 0x163   : > { %v6821_v8 = vcombine.low %v1039_v5, %v1039_v5  ;;  %v893_v9 = vor.u32 %v891_v1, %v890_v0  ;;  %v1038_v10 = vsel %vm8974_vm8, %v890_v0, 0  ;;  %v833_v11 = vmax.f32 %v801_v3, 0.0  ;;  %v7713_v12 = vpop.f32.mrb[12].mxu0 }
 0x164   : > { %v1023_v13 = vsel %vm8974_vm8, 0, %v900_v4  ;;  %v6818_v14 = vcombine.low %v1038_v10, %v1038_v10  ;;  %v836_v15 = vmax.f32 %v804_v6, 0.0  ;;  %v834_v16 = vmax.f32 %v802_v7, 0.0  ;;  %v668_v17 = vpop.f32.mrb[13].mxu0 }
 0x165   : > { %v6819_v19 = vcombine.low %v1023_v13, %v1023_v13  ;;  %v6820_v20 = vcombine.high %v1023_v13, %v1023_v13  ;;  %1251 = vst.msk [vmem:[#allocation2 + $0x38] sm:$0x1] %vm1238_vm1, %v6821_v8  ;;  %v1022_v21 = vsel %vm8974_vm8, 0, %v893_v9  ;;  %v768_v22 = vmul.f32 %v7713_v12, %v8955_v53  ;;  %v7714_v23 = vpop.f32.mrb[14].mxu0 }
 0x166   : > { %v6816_v24 = vcombine.low %v1022_v21, %v1022_v21  ;;  %v6817_v25 = vcombine.high %v1022_v21, %v1022_v21  ;;  %1248 = vst.msk [vmem:[#allocation2 + $0x2c] sm:$0x1] %vm1238_vm1, %v6818_v14  ;;  %v862_v26 = vpack.c.bf16 %v836_v15, %v835_v2  ;;  %v861_v27 = vpack.c.bf16 %v834_v16, %v833_v11  ;;  %v671_v28 = vpop.f32.mrb[15].mxu0 }
 0x167   : > { %1249 = vst.msk [vmem:[#allocation2 + $0x30] sm:$0xf] %vm1235_vm0, %v6819_v19  ;;  %1250 = vst.msk [vmem:[#allocation2 + $0x34] sm:$0xf] %vm1235_vm0, %v6820_v20  ;;  %v807_v29 = vadd.f32 %v8960_v55, %v768_v22  ;;  %v766_v30 = vmul.f32 %v8955_v53, %v668_v17  ;;  %v769_v31 = vmul.f32 %v7714_v23, %v8955_v53  ;;  %v1293_v33 = vld [vmem:[#allocation2 + $0xc] sm:$0xf] }
 0x168   : > { %v767_v32 = vmul.f32 %v8955_v53, %v671_v28  ;;  %1246 = vst.msk [vmem:[#allocation2 + $0x24] sm:$0xf] %vm1235_vm0, %v6816_v24  ;;  %1247 = vst.msk [vmem:[#allocation2 + $0x28] sm:$0xf] %vm1235_vm0, %v6817_v25  ;;  %v909_v34 = vshrl.u32 %v862_v26, 16  ;;  %v912_v35 = vshll.u32 %v862_v26, 16 }
 0x169   : > { %v902_v36 = vshrl.u32 %v861_v27, 16  ;;  %v905_v37 = vshll.u32 %v861_v27, 16  ;;  %v9026_v38 = vld [vmem:[#allocation2 + $0x10] sm:$0xf]  ;;  %v839_v39 = vmax.f32 %v807_v29, 0.0  ;;  %v805_v40 = vadd.f32 %v8960_v55, %v766_v30 }
 0x16a   : > { %v808_v41 = vadd.f32 %v8960_v55, %v769_v31  ;;  %v806_v42 = vadd.f32 %v8960_v55, %v767_v32  ;;  %v911_v43 = vrot.slane %v909_v34, 7  ;;  %v1371_v46 = vshrl.u32 %v1293_v33, 16 }
 0x16b   : > { %v904_v45 = vrot.slane %v902_v36, 7  ;;  %v1374_v47 = vshll.u32 %v1293_v33, 16  ;;  %v837_v48 = vmax.f32 %v805_v40, 0.0  ;;  %v7717_v51 = vpop.f32.mrb[16].mxu0  ;;  %v1380_v54 = vshll.u32 %v9026_v38, 16 }
 0x16c   : > { %v840_v49 = vmax.f32 %v808_v41, 0.0  ;;  %v838_v50 = vmax.f32 %v806_v42, 0.0  ;;  %v914_v57 = vor.u32 %v912_v35, %v911_v43  ;;  %v1041_v58 = vsel %vm8974_vm8, %v911_v43, 0  ;;  %v684_v61 = vpop.f32.mrb[17].mxu0 }
 0x16d   : > { %v907_v59 = vor.u32 %v905_v37, %v904_v45  ;;  %v1040_v60 = vsel %vm8974_vm8, %v904_v45, 0  ;;  %v6827_v62 = vcombine.low %v1041_v58, %v1041_v58  ;;  %v7718_v2 = vpop.f32.mrb[18].mxu0  ;;  %v772_v5 = vmul.f32 %v7717_v51, %v8955_v53  ;;  %v1328_v45 = vld [vmem:[#allocation2 + $0x14] sm:$0x1]  ;;  %v8449_v58 = vld [vmem:[#allocation6 + $0x48] sm:$0xff]  }
 0x16e   : > { %v6824_v63 = vcombine.low %v1040_v60, %v1040_v60  ;;  %v864_v0 = vpack.c.bf16 %v840_v49, %v839_v39  ;;  %v863_v1 = vpack.c.bf16 %v838_v50, %v837_v48  ;;  %v1025_v3 = vsel %vm8974_vm8, 0, %v914_v57  ;;  %v687_v7 = vpop.f32.mrb[19].mxu0  ;;  %v1295_v57 = vld [vmem:[#allocation2 + $0x18] sm:$0xf] }
 0x16f   : > { %v1024_v4 = vsel %vm8974_vm8, 0, %v907_v59  ;;  %v770_v6 = vmul.f32 %v8955_v53, %v684_v61  ;;  %v6825_v8 = vcombine.low %v1025_v3, %v1025_v3  ;;  %v6826_v9 = vcombine.high %v1025_v3, %v1025_v3  ;;  %1257 = vst.msk [vmem:[#allocation2 + $0x50] sm:$0x1] %vm1238_vm1, %v6827_v62 }
 0x170   : > { %v6822_v10 = vcombine.low %v1024_v4, %v1024_v4  ;;  %v6823_v11 = vcombine.high %v1024_v4, %v1024_v4  ;;  %1254 = vst.msk [vmem:[#allocation2 + $0x44] sm:$0x1] %vm1238_vm1, %v6824_v63  ;;  %v923_v12 = vshrl.u32 %v864_v0, 16  ;;  %v926_v13 = vshll.u32 %v864_v0, 16  ;;  %v1296_v63 = vld [vmem:[#allocation2 + $0x1c] sm:$0xf] }
 0x171   : > { %v916_v14 = vshrl.u32 %v863_v1, 16  ;;  %v919_v15 = vshll.u32 %v863_v1, 16  ;;  %1255 = vst.msk [vmem:[#allocation2 + $0x48] sm:$0xf] %vm1235_vm0, %v6825_v8  ;;  %1256 = vst.msk [vmem:[#allocation2 + $0x4c] sm:$0xf] %vm1235_vm0, %v6826_v9  ;;  %v811_v16 = vadd.f32 %v8960_v55, %v772_v5  ;;  %v809_v17 = vadd.f32 %v8960_v55, %v770_v6 }
 0x172   : > { %1252 = vst.msk [vmem:[#allocation2 + $0x3c] sm:$0xf] %vm1235_vm0, %v6822_v10  ;;  %1253 = vst.msk [vmem:[#allocation2 + $0x40] sm:$0xf] %vm1235_vm0, %v6823_v11  ;;  %v773_v19 = vmul.f32 %v7718_v2, %v8955_v53  ;;  %v771_v20 = vmul.f32 %v8955_v53, %v687_v7  ;;  %v925_v21 = vrot.slane %v923_v12, 7  ;;  %v1373_v23 = vrot.slane %v1371_v46, 4 }
 0x173   : > { %v918_v22 = vrot.slane %v916_v14, 7  ;;  %v1376_v24 = vrot.slane %v1374_v47, 5  ;;  %v843_v25 = vmax.f32 %v811_v16, 0.0  ;;  %v841_v26 = vmax.f32 %v809_v17, 0.0  ;;  %v7721_v29 = vpop.f32.mrb[20].mxu0 }
 0x174   : > { %v812_v27 = vadd.f32 %v8960_v55, %v773_v19  ;;  %v810_v28 = vadd.f32 %v8960_v55, %v771_v20  ;;  %v928_v30 = vor.u32 %v926_v13, %v925_v21  ;;  %v1043_v31 = vsel %vm8974_vm8, %v925_v21, 0  ;;  %v700_v34 = vpop.f32.mrb[21].mxu0 }
 0x175   : > { %v921_v32 = vor.u32 %v919_v15, %v918_v22  ;;  %v1042_v33 = vsel %vm8974_vm8, %v918_v22, 0  ;;  %v6833_v35 = vcombine.low %v1043_v31, %v1043_v31  ;;  %v9058_v40 = vpop.f32.mrb[22].mxu0  ;;  %v776_v43 = vmul.f32 %v7721_v29, %v8955_v53 }
 0x176   : > { %v6830_v36 = vcombine.low %v1042_v33, %v1042_v33  ;;  %v844_v37 = vmax.f32 %v812_v27, 0.0  ;;  %v842_v39 = vmax.f32 %v810_v28, 0.0  ;;  %v1027_v41 = vsel %vm8974_vm8, 0, %v928_v30  ;;  %v9065_v47 = vpop.f32.mrb[23].mxu0  ;;  %v1329_v33 = vld [vmem:[#allocation2 + $0x20] sm:$0x1] }
 0x177   : > { %v1026_v42 = vsel %vm8974_vm8, 0, %v921_v32  ;;  %v1377_v46 = vor.u32 %v1376_v24, %v1373_v23  ;;  %v6831_v48 = vcombine.low %v1027_v41, %v1027_v41  ;;  %v6832_v49 = vcombine.high %v1027_v41, %v1027_v41  ;;  %1263 = vst.msk [vmem:[#allocation2 + $0x68] sm:$0x1] %vm1238_vm1, %v6833_v35  ;;  %v8455_v24 = vld [vmem:[#allocation6 + $0x50] sm:$0xff]  }
 0x178   : > { %v6828_v50 = vcombine.low %v1026_v42, %v1026_v42  ;;  %v6829_v51 = vcombine.high %v1026_v42, %v1026_v42  ;;  %1260 = vst.msk [vmem:[#allocation2 + $0x5c] sm:$0x1] %vm1238_vm1, %v6830_v36  ;;  %v866_v59 = vpack.c.bf16 %v844_v37, %v843_v25  ;;  %v865_v60 = vpack.c.bf16 %v842_v39, %v841_v26  ;;  %v8443_v5 = vld [vmem:[#allocation2 + $0x48] sm:$0xff]  }
 0x179   : > { %v9070_v61 = vadd.f32 %v8960_v55, %v776_v43  ;;  %v9072_v62 = vrot.slane %v1377_v46, 4  ;;  %v8441_v0 = vld [vmem:[#allocation2 + $0x3c] sm:$0xff]   ;;  %1261 = vst.msk [vmem:[#allocation2 + $0x60] sm:$0xf] %vm1235_vm0, %v6831_v48  ;;  %1262 = vst.msk [vmem:[#allocation2 + $0x64] sm:$0xf] %vm1235_vm0, %v6832_v49  ;;  %v774_v4 = vmul.f32 %v8955_v53, %v700_v34 }
 0x17a   : > { %1258 = vst.msk [vmem:[#allocation2 + $0x54] sm:$0xf] %vm1235_vm0, %v6828_v50  ;;  %1259 = vst.msk [vmem:[#allocation2 + $0x58] sm:$0xf] %vm1235_vm0, %v6829_v51  ;;  %v9080_v1 = vrot.slane %v1380_v54, 5  ;;  %v1384_v2 = vshrl.u32 %v9026_v38, 16  ;;  %7851 = vmatprep.mubr.msk.bf16.mxu1 %vm1795_vm5, %v8441_v0 }
 0x17b   : > { %v1390_v3 = vshll.u32 %v1328_v45, 16  ;;  %v937_v6 = vshrl.u32 %v866_v59, 16  ;;  %v940_v7 = vshll.u32 %v866_v59, 16  ;;  %v930_v8 = vshrl.u32 %v865_v60, 16  ;;  %v7725_v38 = vpop.f32.mrb[24].mxu0  ;;  %7852 = vmatmul.mubr.msk.bf16.vlgmr.msra.gmra.mrb[0].mxu1 %vm1795_vm5, %v8443_v5  ;;  %v8457_v0 = vld [vmem:[#allocation6 + $0x8] sm:$0xff]  }
 0x17c   : > { %v933_v9 = vshll.u32 %v865_v60, 16  ;;  %v847_v10 = vmax.f32 %v9070_v61, 0.0  ;;  %v1383_v54 = vsel %vm8940_vm4, %v9072_v62, %v9080_v1  ;;  %v1386_v11 = vrot.slane %v1384_v2, 4  ;;  %7876 = vmatpush3.bf16.msra.mxu1 %v8949_v52  ;;  %v9095_v17 = vpop.f32.mrb[25].mxu0  ;;  %v1297_v34 = vld [vmem:[#allocation2 + $0x24] sm:$0xf] }
 0x17d   : > { %v1392_v12 = vrot.slane %v1390_v3, 5  ;;  %v939_v13 = vrot.slane %v937_v6, 7  ;;  %v932_v14 = vrot.slane %v930_v8, 7  ;;  %v9092_v15 = vadd.f32 %v8960_v55, %v774_v4  ;;  %v9098_v23 = vpop.f32.mrb[26].mxu0  ;;  %7877 = vmatprep.subr.bf16.mxu1 %v8449_v58  ;;  %v1298_v4 = vld [vmem:[#allocation2 + $0x28] sm:$0xf] }
 0x17e   : > { %v1395_v16 = vshrl.u32 %v1295_v57, 16  ;;  %v1387_v19 = vor.u32 %v1386_v11, %v9080_v1  ;;  %v1398_v20 = vshll.u32 %v1295_v57, 16  ;;  %v1404_v21 = vshll.u32 %v1296_v63, 16  ;;  %v9104_v52 = vpop.f32.mrb[27].mxu0  ;;  %v1330_v8 = vld [vmem:[#allocation2 + $0x2c] sm:$0x1] }
 0x17f   : > { %v1408_v22 = vshrl.u32 %v1296_v63, 16  ;;  %v942_v25 = vor.u32 %v940_v7, %v939_v13  ;;  %v1045_v26 = vsel %vm8974_vm8, %v939_v13, 0  ;;  %v935_v27 = vor.u32 %v933_v9, %v932_v14 }
 0x180   : > { %v1044_v28 = vsel %vm8974_vm8, %v932_v14, 0  ;;  %v6839_v29 = vcombine.low %v1045_v26, %v1045_v26  ;;  %v1388_v31 = vrot.slane %v1387_v19, 4  ;;  %v845_v32 = vmax.f32 %v9092_v15, 0.0  ;;  %7878 = vmatpush3.bf16.msra.mxu1 %v8449_v58  ;;  %v8445_v57 = vld [vmem:[#allocation2 + $0x60] sm:$0xff]  }
 0x181   : > { %v6836_v30 = vcombine.low %v1044_v28, %v1044_v28  ;;  %v1029_v35 = vsel %vm8974_vm8, 0, %v942_v25  ;;  %v1028_v36 = vsel %vm8974_vm8, 0, %v935_v27  ;;  %v1397_v37 = vrot.slane %v1395_v16, 4  ;;  %v8444_v46 = vld [vmem:[#allocation2 + $0x54] sm:$0xff]   ;;  %7911 = vmatprep.subr.bf16.mxu1 %v8455_v24 }
 0x182   : > { %v1400_v39 = vrot.slane %v1398_v20, 5  ;;  %v6837_v41 = vcombine.low %v1029_v35, %v1029_v35  ;;  %v6838_v42 = vcombine.high %v1029_v35, %v1029_v35  ;;  %1269 = vst.msk [vmem:[#allocation2 + $0x80] sm:$0x1] %vm1238_vm1, %v6839_v29  ;;  %v6834_v43 = vcombine.low %v1028_v36, %v1028_v36  ;;  %7855 = vmatprep.mubr.msk.bf16.mxu1 %vm1795_vm5, %v8444_v46 }
 0x183   : > { %v6835_v45 = vcombine.high %v1028_v36, %v1028_v36  ;;  %1266 = vst.msk [vmem:[#allocation2 + $0x74] sm:$0x1] %vm1238_vm1, %v6836_v30  ;;  %v1393_v48 = vsel %vm8940_vm4, %v1388_v31, %v1392_v12  ;;  %v1406_v50 = vrot.slane %v1404_v21, 5  ;;  %v1410_v51 = vrot.slane %v1408_v22, 4  ;;  %v9124_v63 = vpop.f32.mrb[28].mxu0  ;;  %7856 = vmatmul.mubr.msk.bf16.gmra.mrb[4].mxu1 %vm1795_vm5, %v8445_v57 }
 0x184   : > { %v1401_v49 = vor.u32 %v1400_v39, %v1397_v37  ;;  %1267 = vst.msk [vmem:[#allocation2 + $0x78] sm:$0xf] %vm1235_vm0, %v6837_v41  ;;  %1268 = vst.msk [vmem:[#allocation2 + $0x7c] sm:$0xf] %vm1235_vm0, %v6838_v42  ;;  %v6859_v58 = vcombine.low %v1383_v54, %v1393_v48  ;;  %v1414_v59 = vshll.u32 %v1329_v33, 16  ;;  %v777_v60 = vmul.f32 %v9058_v40, %v8955_v53  ;;  %v9128_v6 = vpop.f32.mrb[29].mxu0 }
 0x185   : > { %1264 = vst.msk [vmem:[#allocation2 + $0x6c] sm:$0xf] %vm1235_vm0, %v6834_v43  ;;  %1265 = vst.msk [vmem:[#allocation2 + $0x70] sm:$0xf] %vm1235_vm0, %v6835_v45  ;;  %v775_v62 = vmul.f32 %v8955_v53, %v9065_v47  ;;  %v1411_v2 = vor.u32 %v1410_v51, %v1406_v50  ;;  %v780_v3 = vmul.f32 %v7725_v38, %v8955_v53  ;;  %v1419_v5 = vshrl.u32 %v1297_v34, 16  ;;  %v9133_v54 = vpop.f32.mrb[30].mxu0 }
 0x186   : > { %v1402_v1 = vrot.slane %v1401_v49, 4  ;;  %7736 = vmatmul.mubr.msk.bf16.vlgmr.msra.gmra.mrb[32].mxu0 %vm1795_vm5, %v6859_v58  ;;  %v1416_v40 = vrot.slane %v1414_v59, 5  ;;  %v816_v47 = vadd.f32 %v8960_v55, %v777_v60  ;;  %v1422_v9 = vshll.u32 %v1297_v34, 16  ;;  %v9140_v14 = vpop.f32.mrb[31].mxu0  ;;  %v1299_v30 = vld [vmem:[#allocation2 + $0x30] sm:$0xf] }
 0x187   : > { %v814_v7 = vadd.f32 %v8960_v55, %v775_v62  ;;  %v1412_v12 = vrot.slane %v1411_v2, 4  ;;  %v9138_v38 = vadd.f32 %v8960_v55, %v780_v3  ;;  %v1421_v13 = vrot.slane %v1419_v5, 4  ;;  %7768 = vmatpush3.bf16.msra.mxu0 %v8993_v56  ;;  %v1300_v31 = vld [vmem:[#allocation2 + $0x34] sm:$0xf] }
 0x188   : > { %v1407_v11 = vsel %vm8940_vm4, %v1402_v1, %v1406_v50  ;;  %v848_v16 = vmax.f32 %v816_v47, 0.0  ;;  %v1424_v20 = vrot.slane %v1422_v9, 5  ;;  %v1428_v21 = vshll.u32 %v1298_v4, 16  ;;  %7769 = vmatprep.subr.bf16.mxu0 %v8457_v0  ;;  %v1301_v9 = vld [vmem:[#allocation2 + $0x3c] sm:$0xf] }
 0x189   : > { %v846_v19 = vmax.f32 %v814_v7, 0.0  ;;  %v1417_v22 = vsel %vm8940_vm4, %v1412_v12, %v1416_v40  ;;  %v851_v24 = vmax.f32 %v9138_v38, 0.0  ;;  %v1432_v25 = vshrl.u32 %v1298_v4, 16  ;;  %v1331_v4 = vld [vmem:[#allocation2 + $0x38] sm:$0x1] }
 0x18a   : > { %v1438_v26 = vshll.u32 %v1330_v8, 16  ;;  %v6860_v27 = vcombine.low %v1407_v11, %v1417_v22  ;;  %v868_v28 = vpack.c.bf16 %v848_v16, %v847_v10  ;;  %v1425_v56 = vor.u32 %v1424_v20, %v1421_v13 }
 0x18b   : > { %v867_v29 = vpack.c.bf16 %v846_v19, %v845_v32  ;;  %v1430_v33 = vrot.slane %v1428_v21, 5  ;;  %v1434_v34 = vrot.slane %v1432_v25, 4  ;;  %v778_v36 = vmul.f32 %v8955_v53, %v9095_v17  ;;  %7770 = vmatpush3.bf16.msra.mxu0 %v8457_v0  ;;  %v8447_v49 = vld [vmem:[#allocation2 + $0x78] sm:$0xff]  }
 0x18c   : > { %v1440_v35 = vrot.slane %v1438_v26, 5  ;;  %v8446_v37 = vld [vmem:[#allocation2 + $0x6c] sm:$0xff]   ;;  %7739 = vmatprep.mubr.msk.bf16.mxu0 %vm1795_vm5, %v6860_v27  ;;  %v951_v39 = vshrl.u32 %v868_v28, 16  ;;  %v954_v41 = vshll.u32 %v868_v28, 16  ;;  %v1426_v42 = vrot.slane %v1425_v56, 4 }
 0x18d   : > { %v944_v61 = vshrl.u32 %v867_v29, 16  ;;  %v947_v10 = vshll.u32 %v867_v29, 16  ;;  %v1435_v15 = vor.u32 %v1434_v34, %v1430_v33  ;;  %v9154_v32 = vadd.f32 %v8960_v55, %v778_v36  ;;  %7859 = vmatprep.mubr.msk.bf16.mxu1 %vm1795_vm5, %v8446_v37  ;;  %v1302_v27 = vld [vmem:[#allocation2 + $0x40] sm:$0xf] }
 0x18e   : > { %v1443_v43 = vshrl.u32 %v1299_v30, 16  ;;  %v953_v45 = vrot.slane %v951_v39, 7  ;;  %v1446_v48 = vshll.u32 %v1299_v30, 16  ;;  %v1452_v17 = vshll.u32 %v1300_v31, 16  ;;  %7860 = vmatmul.mubr.msk.bf16.gmra.mrb[8].mxu1 %vm1795_vm5, %v8447_v49 }
 0x18f   : > { %v946_v46 = vrot.slane %v944_v61, 7  ;;  %v1431_v50 = vsel %vm8940_vm4, %v1426_v42, %v1430_v33  ;;  %v1436_v51 = vrot.slane %v1435_v15, 4  ;;  %v849_v57 = vmax.f32 %v9154_v32, 0.0 }
 0x190   : > { %v1445_v58 = vrot.slane %v1443_v43, 4  ;;  %v956_v59 = vor.u32 %v954_v41, %v953_v45  ;;  %v1047_v60 = vsel %vm8974_vm8, %v953_v45, 0  ;;  %v1448_v5 = vrot.slane %v1446_v48, 5 }
 0x191   : > { %v949_v62 = vor.u32 %v947_v10, %v946_v46  ;;  %v1046_v0 = vsel %vm8974_vm8, %v946_v46, 0  ;;  %v6845_v1 = vcombine.low %v1047_v60, %v1047_v60  ;;  %v1441_v3 = vsel %vm8940_vm4, %v1436_v51, %v1440_v35  ;;  %v1332_v35 = vld [vmem:[#allocation2 + $0x44] sm:$0x1]  ;;  %v1303_v51 = vld [vmem:[#allocation2 + $0x48] sm:$0xf] }
 0x192   : > { %v6842_v2 = vcombine.low %v1046_v0, %v1046_v0  ;;  %v1031_v40 = vsel %vm8974_vm8, 0, %v956_v59  ;;  %v6861_v7 = vcombine.low %v1431_v50, %v1441_v3  ;;  %v1454_v8 = vrot.slane %v1452_v17, 5 }
 0x193   : > { %v1030_v47 = vsel %vm8974_vm8, 0, %v949_v62  ;;  %v6843_v11 = vcombine.low %v1031_v40, %v1031_v40  ;;  %v6844_v12 = vcombine.high %v1031_v40, %v1031_v40  ;;  %1275 = vst.msk [vmem:[#allocation2 + $0x98] sm:$0x1] %vm1238_vm1, %v6845_v1  ;;  %v1449_v19 = vor.u32 %v1448_v5, %v1445_v58  ;;  %v1304_v58 = vld [vmem:[#allocation2 + $0x4c] sm:$0xf] }
 0x194   : > { %v6840_v13 = vcombine.low %v1030_v47, %v1030_v47  ;;  %v6841_v16 = vcombine.high %v1030_v47, %v1030_v47  ;;  %1272 = vst.msk [vmem:[#allocation2 + $0x8c] sm:$0x1] %vm1238_vm1, %v6842_v2  ;;  %7740 = vmatmul.mubr.msk.bf16.gmra.mrb[36].mxu0 %vm1795_vm5, %v6861_v7  ;;  %v1456_v20 = vshrl.u32 %v1300_v31, 16  ;;  %v1462_v21 = vshll.u32 %v1331_v4, 16 }
 0x195   : > { %v781_v22 = vmul.f32 %v9098_v23, %v8955_v53  ;;  %1273 = vst.msk [vmem:[#allocation2 + $0x90] sm:$0xf] %vm1235_vm0, %v6843_v11  ;;  %1274 = vst.msk [vmem:[#allocation2 + $0x94] sm:$0xf] %vm1235_vm0, %v6844_v12  ;;  %v779_v25 = vmul.f32 %v8955_v53, %v9104_v52  ;;  %v784_v26 = vmul.f32 %v9124_v63, %v8955_v53  ;;  %v1467_v28 = vshrl.u32 %v1301_v9, 16 }
 0x196   : > { %1270 = vst.msk [vmem:[#allocation2 + $0x84] sm:$0xf] %vm1235_vm0, %v6840_v13  ;;  %1271 = vst.msk [vmem:[#allocation2 + $0x88] sm:$0xf] %vm1235_vm0, %v6841_v16  ;;  %v1470_v29 = vshll.u32 %v1301_v9, 16  ;;  %v1450_v56 = vrot.slane %v1449_v19, 4  ;;  %v782_v50 = vmul.f32 %v8955_v53, %v9128_v6 }
 0x197   : > { %v1458_v30 = vrot.slane %v1456_v20, 4  ;;  %v1464_v23 = vrot.slane %v1462_v21, 5  ;;  %v820_v31 = vadd.f32 %v8960_v55, %v781_v22  ;;  %v818_v33 = vadd.f32 %v8960_v55, %v779_v25 }
 0x198   : > { %v9187_v34 = vadd.f32 %v8960_v55, %v784_v26  ;;  %v1469_v36 = vrot.slane %v1467_v28, 4  ;;  %v1472_v37 = vrot.slane %v1470_v29, 5  ;;  %v1455_v52 = vsel %vm8940_vm4, %v1450_v56, %v1454_v8  ;;  %v1333_v28 = vld [vmem:[#allocation2 + $0x50] sm:$0x1] }
 0x199   : > { %v1459_v63 = vor.u32 %v1458_v30, %v1454_v8  ;;  %v852_v39 = vmax.f32 %v820_v31, 0.0  ;;  %v1476_v41 = vshll.u32 %v1302_v27, 16  ;;  %v850_v61 = vmax.f32 %v818_v33, 0.0  ;;  %v9218_v33 = vld [vmem:[#allocation2 + $0x54] sm:$0xf] }
 0x19a   : > { %v855_v10 = vmax.f32 %v9187_v34, 0.0  ;;  %v1473_v42 = vor.u32 %v1472_v37, %v1469_v36  ;;  %v1480_v15 = vshrl.u32 %v1302_v27, 16  ;;  %v1486_v46 = vshll.u32 %v1332_v35, 16  ;;  %v9220_v35 = vld [vmem:[#allocation2 + $0x58] sm:$0xf] }
 0x19b   : > { %v1460_v32 = vrot.slane %v1459_v63, 4  ;;  %v870_v43 = vpack.c.bf16 %v852_v39, %v851_v24  ;;  %v1478_v45 = vrot.slane %v1476_v41, 5  ;;  %v869_v48 = vpack.c.bf16 %v850_v61, %v849_v57  ;;  %v9223_v39 = vld [vmem:[#allocation6 + $0x20] sm:$0xff]  }
 0x19c   : > { %v1474_v17 = vrot.slane %v1473_v42, 4  ;;  %v1482_v49 = vrot.slane %v1480_v15, 4  ;;  %v1488_v0 = vrot.slane %v1486_v46, 5  ;;  %v9201_v5 = vadd.f32 %v8960_v55, %v782_v50  ;;  %v8450_v40 = vld [vmem:[#allocation2 + $0x90] sm:$0xff]   ;;  %7803 = vmatprep.subr.bf16.mxu0 %v9223_v39 }
 0x19d   : > { %v1465_v59 = vsel %vm8940_vm4, %v1460_v32, %v1464_v23  ;;  %v965_v60 = vshrl.u32 %v870_v43, 16  ;;  %v968_v62 = vshll.u32 %v870_v43, 16  ;;  %v8448_v1 = vld [vmem:[#allocation2 + $0x84] sm:$0xff]   ;;  %v958_v38 = vshrl.u32 %v869_v48, 16  ;;  %v1334_v32 = vld [vmem:[#allocation2 + $0x5c] sm:$0x1] }
 0x19e   : > { %v6862_v2 = vcombine.low %v1455_v52, %v1465_v59  ;;  %v961_v24 = vshll.u32 %v869_v48, 16  ;;  %v1479_v57 = vsel %vm8940_vm4, %v1474_v17, %v1478_v45  ;;  %v1483_v4 = vor.u32 %v1482_v49, %v1478_v45  ;;  %7863 = vmatprep.mubr.msk.bf16.mxu1 %vm1795_vm5, %v8448_v1 }
 0x19f   : > { %v967_v3 = vrot.slane %v965_v60, 7  ;;  %v1491_v6 = vshrl.u32 %v1303_v51, 16  ;;  %v960_v47 = vrot.slane %v958_v38, 7  ;;  %v1494_v7 = vshll.u32 %v1303_v51, 16  ;;  %7864 = vmatmul.mubr.msk.bf16.gmra.mrb[12].mxu1 %vm1795_vm5, %v8450_v40  ;;  %v9251_v40 = vld [vmem:[#allocation2 + $0x64] sm:$0xf] }
 0x1a0   : > { %7743 = vmatprep.mubr.msk.bf16.mxu0 %vm1795_vm5, %v6862_v2  ;;  %v1500_v8 = vshll.u32 %v1304_v58, 16  ;;  %v1504_v9 = vshrl.u32 %v1304_v58, 16  ;;  %v1484_v13 = vrot.slane %v1483_v4, 4  ;;  %v853_v16 = vmax.f32 %v9201_v5, 0.0 }
 0x1a1   : > { %v970_v11 = vor.u32 %v968_v62, %v967_v3  ;;  %v1049_v12 = vsel %vm8974_vm8, %v967_v3, 0  ;;  %v963_v20 = vor.u32 %v961_v24, %v960_v47  ;;  %v1048_v21 = vsel %vm8974_vm8, %v960_v47, 0  ;;  %v1335_v24 = vld [vmem:[#allocation2 + $0x68] sm:$0x1]  ;;  %v9253_v47 = vld [vmem:[#allocation2 + $0x6c] sm:$0xf] }
 0x1a2   : > { %v6851_v19 = vcombine.low %v1049_v12, %v1049_v12  ;;  %v1493_v22 = vrot.slane %v1491_v6, 4  ;;  %v6848_v26 = vcombine.low %v1048_v21, %v1048_v21  ;;  %v1489_v27 = vsel %vm8940_vm4, %v1484_v13, %v1488_v0 }
 0x1a3   : > { %v1033_v25 = vsel %vm8974_vm8, 0, %v970_v11  ;;  %v1496_v29 = vrot.slane %v1494_v7, 5  ;;  %v1032_v23 = vsel %vm8974_vm8, 0, %v963_v20  ;;  %v6863_v31 = vcombine.low %v1479_v57, %v1489_v27 }
 0x1a4   : > { %v6849_v56 = vcombine.low %v1033_v25, %v1033_v25  ;;  %v6850_v30 = vcombine.high %v1033_v25, %v1033_v25  ;;  %1281 = vst.msk [vmem:[#allocation2 + $0xb0] sm:$0x1] %vm1238_vm1, %v6851_v19  ;;  %v6846_v36 = vcombine.low %v1032_v23, %v1032_v23  ;;  %v6847_v37 = vcombine.high %v1032_v23, %v1032_v23 }
 0x1a5   : > { %1278 = vst.msk [vmem:[#allocation2 + $0xa4] sm:$0x1] %vm1238_vm1, %v6848_v26  ;;  %v1497_v52 = vor.u32 %v1496_v29, %v1493_v22  ;;  %v1502_v63 = vrot.slane %v1500_v8, 5  ;;  %7744 = vmatmul.mubr.msk.bf16.gmra.mrb[40].mxu0 %vm1795_vm5, %v6863_v31  ;;  %v1506_v41 = vrot.slane %v1504_v9, 4  ;;  %v1510_v61 = vshll.u32 %v1333_v28, 16 }
 0x1a6   : > { %1279 = vst.msk [vmem:[#allocation2 + $0xa8] sm:$0xf] %vm1235_vm0, %v6849_v56  ;;  %1280 = vst.msk [vmem:[#allocation2 + $0xac] sm:$0xf] %vm1235_vm0, %v6850_v30  ;;  %v785_v42 = vmul.f32 %v9133_v54, %v8955_v53  ;;  %v783_v15 = vmul.f32 %v8955_v53, %v9140_v14  ;;  %v1515_v45 = vshrl.u32 %v9218_v33, 16  ;;  %v1518_v46 = vshll.u32 %v9218_v33, 16 }
 0x1a7   : > { %1276 = vst.msk [vmem:[#allocation2 + $0x9c] sm:$0xf] %vm1235_vm0, %v6846_v36  ;;  %1277 = vst.msk [vmem:[#allocation2 + $0xa0] sm:$0xf] %vm1235_vm0, %v6847_v37  ;;  %v1498_v43 = vrot.slane %v1497_v52, 4  ;;  %v1524_v48 = vshll.u32 %v9220_v35, 16  ;;  %v1507_v17 = vor.u32 %v1506_v41, %v1502_v63 }
 0x1a8   : > { %v1512_v49 = vrot.slane %v1510_v61, 5  ;;  %v824_v54 = vadd.f32 %v8960_v55, %v785_v42  ;;  %v822_v53 = vadd.f32 %v8960_v55, %v783_v15  ;;  %v9240_v14 = vld [vmem:[#allocation2 + $0x60] sm:$0xf]  ;;  %v1517_v51 = vrot.slane %v1515_v45, 4 }
 0x1a9   : > { %v1503_v50 = vsel %vm8940_vm4, %v1498_v43, %v1502_v63  ;;  %v1520_v58 = vrot.slane %v1518_v46, 5  ;;  %v1526_v59 = vrot.slane %v1524_v48, 5  ;;  %v1508_v60 = vrot.slane %v1507_v17, 4  ;;  %v9273_v17 = vld [vmem:[#allocation2 + $0x70] sm:$0xf] }
 0x1aa   : > { %v856_v62 = vmax.f32 %v824_v54, 0.0  ;;  %v854_v0 = vmax.f32 %v822_v53, 0.0  ;;  %v1528_v1 = vshrl.u32 %v9220_v35, 16  ;;  %v1534_v38 = vshll.u32 %v1334_v32, 16  ;;  %v1336_v32 = vld [vmem:[#allocation2 + $0x74] sm:$0x1] }
 0x1ab   : > { %v1521_v2 = vor.u32 %v1520_v58, %v1517_v51  ;;  %v1539_v57 = vshrl.u32 %v9240_v14, 16  ;;  %v1542_v55 = vshll.u32 %v9240_v14, 16  ;;  %v1513_v3 = vsel %vm8940_vm4, %v1508_v60, %v1512_v49  ;;  %v9277_v51 = vld [vmem:[#allocation2 + $0x78] sm:$0xf]  ;;  %v9279_v58 = vld [vmem:[#allocation2 + $0x7c] sm:$0xf] }
 0x1ac   : > { %v872_v4 = vpack.c.bf16 %v856_v62, %v855_v10  ;;  %v871_v5 = vpack.c.bf16 %v854_v0, %v853_v16  ;;  %v1530_v6 = vrot.slane %v1528_v1, 4  ;;  %v6864_v7 = vcombine.low %v1503_v50, %v1513_v3 }
 0x1ad   : > { %v1522_v8 = vrot.slane %v1521_v2, 4  ;;  %v1536_v9 = vrot.slane %v1534_v38, 5  ;;  %v1541_v11 = vrot.slane %v1539_v57, 4  ;;  %v1544_v16 = vrot.slane %v1542_v55, 5  ;;  %v8452_v25 = vld [vmem:[#allocation2 + $0xa8] sm:$0xff]  }
 0x1ae   : > { %v979_v12 = vshrl.u32 %v872_v4, 16  ;;  %v982_v13 = vshll.u32 %v872_v4, 16  ;;  %v972_v19 = vshrl.u32 %v871_v5, 16  ;;  %v975_v20 = vshll.u32 %v871_v5, 16  ;;  %7747 = vmatprep.mubr.msk.bf16.mxu0 %vm1795_vm5, %v6864_v7  ;;  %v8451_v22 = vld [vmem:[#allocation2 + $0x9c] sm:$0xff]  }
 0x1af   : > { %v1527_v34 = vsel %vm8940_vm4, %v1522_v8, %v1526_v59  ;;  %v1531_v10 = vor.u32 %v1530_v6, %v1526_v59  ;;  %v1548_v21 = vshll.u32 %v9251_v40, 16  ;;  %v1552_v28 = vshrl.u32 %v9251_v40, 16  ;;  %7867 = vmatprep.mubr.msk.bf16.mxu1 %vm1795_vm5, %v8451_v22  ;;  %v1337_v57 = vld [vmem:[#allocation2 + $0x80] sm:$0x1] }
 0x1b0   : > { %v981_v26 = vrot.slane %v979_v12, 7  ;;  %v974_v27 = vrot.slane %v972_v19, 7  ;;  %v1558_v29 = vshll.u32 %v1335_v24, 16  ;;  %v1545_v30 = vor.u32 %v1544_v16, %v1541_v11  ;;  %7868 = vmatmul.mubr.msk.bf16.gmra.mrb[16].mxu1 %vm1795_vm5, %v8452_v25 }
 0x1b1   : > { %v1532_v56 = vrot.slane %v1531_v10, 4  ;;  %v1550_v23 = vrot.slane %v1548_v21, 5  ;;  %v1563_v31 = vshrl.u32 %v9253_v47, 16  ;;  %v1554_v48 = vrot.slane %v1552_v28, 4 }
 0x1b2   : > { %v984_v36 = vor.u32 %v982_v13, %v981_v26  ;;  %v1051_v37 = vsel %vm8974_vm8, %v981_v26, 0  ;;  %v977_v52 = vor.u32 %v975_v20, %v974_v27  ;;  %v1050_v63 = vsel %vm8974_vm8, %v974_v27, 0  ;;  %v9298_v20 = vld [vmem:[#allocation2 + $0x88] sm:$0xf]  ;;  %v1338_v26 = vld [vmem:[#allocation2 + $0x8c] sm:$0x1] }
 0x1b3   : > { %v6857_v41 = vcombine.low %v1051_v37, %v1051_v37  ;;  %v6854_v61 = vcombine.low %v1050_v63, %v1050_v63  ;;  %v1537_v42 = vsel %vm8940_vm4, %v1532_v56, %v1536_v9  ;;  %v1546_v15 = vrot.slane %v1545_v30, 4  ;;  %v9294_v9 = vld [vmem:[#allocation2 + $0x84] sm:$0xf] }
 0x1b4   : > { %v1035_v43 = vsel %vm8974_vm8, 0, %v984_v36  ;;  %v1034_v45 = vsel %vm8974_vm8, 0, %v977_v52  ;;  %v6865_v46 = vcombine.low %v1527_v34, %v1537_v42  ;;  %v1555_v59 = vor.u32 %v1554_v48, %v1550_v23  ;;  %v9307_v36 = vld [vmem:[#allocation2 + $0x94] sm:$0xf] }
 0x1b5   : > { %v6855_v49 = vcombine.low %v1035_v43, %v1035_v43  ;;  %v6856_v54 = vcombine.high %v1035_v43, %v1035_v43  ;;  %1287 = vst.msk [vmem:[#allocation2 + $0xc8] sm:$0x1] %vm1238_vm1, %v6857_v41  ;;  %v6852_v53 = vcombine.low %v1034_v45, %v1034_v45  ;;  %v6853_v50 = vcombine.high %v1034_v45, %v1034_v45 }
 0x1b6   : > { %1284 = vst.msk [vmem:[#allocation2 + $0xbc] sm:$0x1] %vm1238_vm1, %v6854_v61  ;;  %7748 = vmatmul.mubr.msk.bf16.gmra.mrb[44].mxu0 %vm1795_vm5, %v6865_v46  ;;  %v1551_v18 = vsel %vm8940_vm4, %v1546_v15, %v1550_v23  ;;  %v1560_v60 = vrot.slane %v1558_v29, 5  ;;  %v1565_v62 = vrot.slane %v1563_v31, 4  ;;  %v1566_v0 = vshll.u32 %v9253_v47, 16 }
 0x1b7   : > { %1285 = vst.msk [vmem:[#allocation2 + $0xc0] sm:$0xf] %vm1235_vm0, %v6855_v49  ;;  %1286 = vst.msk [vmem:[#allocation2 + $0xc4] sm:$0xf] %vm1235_vm0, %v6856_v54  ;;  %v1572_v1 = vshll.u32 %v9273_v17, 16  ;;  %v1576_v2 = vshrl.u32 %v9273_v17, 16 }
 0x1b8   : > { %1282 = vst.msk [vmem:[#allocation2 + $0xb4] sm:$0xf] %vm1235_vm0, %v6852_v53  ;;  %1283 = vst.msk [vmem:[#allocation2 + $0xb8] sm:$0xf] %vm1235_vm0, %v6853_v50  ;;  %v1582_v38 = vshll.u32 %v1336_v32, 16  ;;  %v1556_v24 = vrot.slane %v1555_v59, 4 }
 0x1b9   : > { %v1587_v55 = vshrl.u32 %v9277_v51, 16  ;;  %v1590_v3 = vshll.u32 %v9277_v51, 16  ;;  %v1596_v4 = vshll.u32 %v9279_v58, 16  ;;  %v1568_v5 = vrot.slane %v1566_v0, 5  ;;  %v9303_v29 = vld [vmem:[#allocation2 + $0x90] sm:$0xf] }
 0x1ba   : > { %v1574_v6 = vrot.slane %v1572_v1, 5  ;;  %v1578_v7 = vrot.slane %v1576_v2, 4  ;;  %v1584_v8 = vrot.slane %v1582_v38, 5  ;;  %v1561_v11 = vsel %vm8940_vm4, %v1556_v24, %v1560_v60  ;;  %v9322_v38 = vld [vmem:[#allocation2 + $0x9c] sm:$0xf] }
 0x1bb   : > { %v1589_v12 = vrot.slane %v1587_v55, 4  ;;  %v1592_v13 = vrot.slane %v1590_v3, 5  ;;  %v1598_v19 = vrot.slane %v1596_v4, 5  ;;  %v6866_v34 = vcombine.low %v1551_v18, %v1561_v11  ;;  %v1339_v18 = vld [vmem:[#allocation2 + $0x98] sm:$0x1] }
 0x1bc   : > { %v1569_v10 = vor.u32 %v1568_v5, %v1565_v62  ;;  %v1579_v16 = vor.u32 %v1578_v7, %v1574_v6  ;;  %v1600_v21 = vshrl.u32 %v9279_v58, 16  ;;  %v1606_v25 = vshll.u32 %v1337_v57, 16  ;;  %v9327_v4 = vld [vmem:[#allocation2 + $0xa0] sm:$0xf] }
 0x1bd   : > { %v1593_v22 = vor.u32 %v1592_v13, %v1589_v12  ;;  %v1611_v27 = vshrl.u32 %v9294_v9, 16  ;;  %v1614_v28 = vshll.u32 %v9294_v9, 16  ;;  %7751 = vmatprep.mubr.msk.bf16.mxu0 %vm1795_vm5, %v6866_v34  ;;  %v1620_v31 = vshll.u32 %v9298_v20, 16 }
 0x1be   : > { %v1570_v56 = vrot.slane %v1569_v10, 4  ;;  %v1580_v30 = vrot.slane %v1579_v16, 4  ;;  %v1602_v23 = vrot.slane %v1600_v21, 4  ;;  %v1608_v52 = vrot.slane %v1606_v25, 5  ;;  %v8454_v54 = vld [vmem:[#allocation2 + $0xc0] sm:$0xff]  }
 0x1bf   : > { %v1594_v37 = vrot.slane %v1593_v22, 4  ;;  %v1613_v63 = vrot.slane %v1611_v27, 4  ;;  %v1616_v41 = vrot.slane %v1614_v28, 5  ;;  %v1622_v32 = vrot.slane %v1620_v31, 5  ;;  %v8453_v43 = vld [vmem:[#allocation2 + $0xb4] sm:$0xff]  }
 0x1c0   : > { %v1575_v61 = vsel %vm8940_vm4, %v1570_v56, %v1574_v6  ;;  %v1585_v42 = vsel %vm8940_vm4, %v1580_v30, %v1584_v8  ;;  %v1603_v15 = vor.u32 %v1602_v23, %v1598_v19  ;;  %v1624_v49 = vshrl.u32 %v9298_v20, 16  ;;  %7871 = vmatprep.mubr.msk.bf16.mxu1 %vm1795_vm5, %v8453_v43  ;;  %v1340_v10 = vld [vmem:[#allocation2 + $0xa4] sm:$0x1]  ;;  %v9336_v56 = vld [vmem:[#allocation2 + $0xa8] sm:$0xf] }
 0x1c1   : > { %v6867_v45 = vcombine.low %v1575_v61, %v1585_v42  ;;  %v1599_v46 = vsel %vm8940_vm4, %v1594_v37, %v1598_v19  ;;  %v1617_v48 = vor.u32 %v1616_v41, %v1613_v63  ;;  %v1630_v50 = vshll.u32 %v1338_v26, 16  ;;  %7872 = vmatmul.mubr.msk.bf16.gmra.mrb[20].mxu1 %vm1795_vm5, %v8454_v54  ;;  %v1341_v43 = vld [vmem:[#allocation2 + $0xb0] sm:$0x1] }
 0x1c2   : > { %v1604_v53 = vrot.slane %v1603_v15, 4  ;;  %v1635_v59 = vshrl.u32 %v9303_v29, 16  ;;  %v1638_v60 = vshll.u32 %v9303_v29, 16  ;;  %v1626_v0 = vrot.slane %v1624_v49, 4 }
 0x1c3   : > { %7752 = vmatmul.mubr.msk.bf16.gmra.mrb[48].mxu0 %vm1795_vm5, %v6867_v45  ;;  %v1618_v62 = vrot.slane %v1617_v48, 4  ;;  %v1644_v1 = vshll.u32 %v9307_v36, 16  ;;  %v1648_v2 = vshrl.u32 %v9307_v36, 16  ;;  %v1632_v57 = vrot.slane %v1630_v50, 5  ;;  %v3146_v50 = vld [vmem:[#allocation2 + $0xc] sm:$0xf] }
 0x1c4   : > { %v1609_v24 = vsel %vm8940_vm4, %v1604_v53, %v1608_v52  ;;  %v1637_v55 = vrot.slane %v1635_v59, 4  ;;  %v1640_v3 = vrot.slane %v1638_v60, 5  ;;  %v1627_v7 = vor.u32 %v1626_v0, %v1622_v32  ;;  %v9340_v52 = vld [vmem:[#allocation2 + $0xac] sm:$0xf]  ;;  %v9351_v0 = vld [vmem:[#allocation2 + $0x10] sm:$0xf] }
 0x1c5   : > { %v6868_v5 = vcombine.low %v1599_v46, %v1609_v24  ;;  %v1623_v6 = vsel %vm8940_vm4, %v1618_v62, %v1622_v32  ;;  %v1646_v8 = vrot.slane %v1644_v1, 5  ;;  %v1650_v12 = vrot.slane %v1648_v2, 4  ;;  %v9353_v1 = vld [vmem:[#allocation2 + $0x14] sm:$0x1] }
 0x1c6   : > { %v1641_v11 = vor.u32 %v1640_v3, %v1637_v55  ;;  %v1654_v13 = vshll.u32 %v1339_v18, 16  ;;  %v1659_v19 = vshrl.u32 %v9322_v38, 16  ;;  %v1628_v34 = vrot.slane %v1627_v7, 4  ;;  %v9355_v3 = vld [vmem:[#allocation2 + $0xb4] sm:$0xf] }
 0x1c7   : > { %7755 = vmatprep.mubr.msk.bf16.mxu0 %vm1795_vm5, %v6868_v5  ;;  %v1662_v16 = vshll.u32 %v9322_v38, 16  ;;  %v1668_v21 = vshll.u32 %v9327_v4, 16  ;;  %v1672_v22 = vshrl.u32 %v9327_v4, 16  ;;  %v1651_v26 = vor.u32 %v1650_v12, %v1646_v8 }
 0x1c8   : > { %v1642_v25 = vrot.slane %v1641_v11, 4  ;;  %v1656_v27 = vrot.slane %v1654_v13, 5  ;;  %v1661_v28 = vrot.slane %v1659_v19, 4  ;;  %v1633_v30 = vsel %vm8940_vm4, %v1628_v34, %v1632_v57 }
 0x1c9   : > { %v1664_v23 = vrot.slane %v1662_v16, 5  ;;  %v1670_v31 = vrot.slane %v1668_v21, 5  ;;  %v1674_v37 = vrot.slane %v1672_v22, 4  ;;  %v6869_v63 = vcombine.low %v1623_v6, %v1633_v30  ;;  %v3149_v22 = vld [vmem:[#allocation2 + $0x18] sm:$0xf] }
 0x1ca   : > { %v1647_v41 = vsel %vm8940_vm4, %v1642_v25, %v1646_v8  ;;  %v1652_v61 = vrot.slane %v1651_v26, 4  ;;  %v1678_v42 = vshll.u32 %v1340_v10, 16  ;;  %v1683_v45 = vshrl.u32 %v9336_v56, 16 }
 0x1cb   : > { %v1665_v15 = vor.u32 %v1664_v23, %v1661_v28  ;;  %v1675_v32 = vor.u32 %v1674_v37, %v1670_v31  ;;  %v1686_v46 = vshll.u32 %v9336_v56, 16  ;;  %7756 = vmatmul.mubr.msk.bf16.gmra.mrb[52].mxu0 %vm1795_vm5, %v6869_v63  ;;  %v1692_v54 = vshll.u32 %v9340_v52, 16  ;;  %v1342_v28 = vld [vmem:[#allocation2 + $0xbc] sm:$0x1]  ;;  %v9366_v63 = vld [vmem:[#allocation2 + $0xb8] sm:$0xf] }
 0x1cc   : > { %v1657_v48 = vsel %vm8940_vm4, %v1652_v61, %v1656_v27  ;;  %v1680_v49 = vrot.slane %v1678_v42, 5  ;;  %v1696_v53 = vshrl.u32 %v9340_v52, 16  ;;  %v1685_v62 = vrot.slane %v1683_v45, 4 }
 0x1cd   : > { %v6870_v18 = vcombine.low %v1647_v41, %v1657_v48  ;;  %v1666_v59 = vrot.slane %v1665_v15, 4  ;;  %v1676_v60 = vrot.slane %v1675_v32, 4  ;;  %v1688_v2 = vrot.slane %v1686_v46, 5 }
 0x1ce   : > { %v1694_v24 = vrot.slane %v1692_v54, 5  ;;  %v1698_v57 = vrot.slane %v1696_v53, 4  ;;  %v1702_v55 = vshll.u32 %v1341_v43, 16  ;;  %v3195_v7 = vshrl.u32 %v3146_v50, 16  ;;  %v9374_v43 = vld [vmem:[#allocation2 + $0x1c] sm:$0xf] }
 0x1cf   : > { %7759 = vmatprep.mubr.msk.bf16.mxu0 %vm1795_vm5, %v6870_v18  ;;  %v1671_v5 = vsel %vm8940_vm4, %v1666_v59, %v1670_v31  ;;  %v1681_v6 = vsel %vm8940_vm4, %v1676_v60, %v1680_v49  ;;  %v3198_v8 = vshll.u32 %v3146_v50, 16  ;;  %v1689_v12 = vor.u32 %v1688_v2, %v1685_v62  ;;  %v9376_v54 = vld [vmem:[#allocation2 + $0x20] sm:$0x1]  ;;  %v3152_v60 = vld [vmem:[#allocation2 + $0x24] sm:$0xf] }
 0x1d0   : > { %v6871_v11 = vcombine.low %v1671_v5, %v1681_v6  ;;  %v1699_v13 = vor.u32 %v1698_v57, %v1694_v24  ;;  %v1704_v19 = vrot.slane %v1702_v55, 5  ;;  %v3197_v34 = vrot.slane %v3195_v7, 4 }
 0x1d1   : > { %v3200_v10 = vrot.slane %v3198_v8, 5  ;;  %v3204_v16 = vshll.u32 %v9351_v0, 16  ;;  %v3208_v21 = vshrl.u32 %v9351_v0, 16  ;;  %v1690_v25 = vrot.slane %v1689_v12, 4 }
 0x1d2   : > { %v1700_v26 = vrot.slane %v1699_v13, 4  ;;  %v3214_v27 = vshll.u32 %v9353_v1, 16  ;;  %v1707_v30 = vshrl.u32 %v9355_v3, 16  ;;  %v1710_v41 = vshll.u32 %v9355_v3, 16 }
 0x1d3   : > { %v3201_v23 = vor.u32 %v3200_v10, %v3197_v34  ;;  %v3206_v31 = vrot.slane %v3204_v16, 5  ;;  %v3210_v37 = vrot.slane %v3208_v21, 4  ;;  %7760 = vmatmul.mubr.msk.bf16.gmra.mrb[56].mxu0 %vm1795_vm5, %v6871_v11  ;;  %v1695_v61 = vsel %vm8940_vm4, %v1690_v25, %v1694_v24  ;;  %v9388_v21 = vld [vmem:[#allocation2 + $0x28] sm:$0xf] }
 0x1d4   : > { %v1705_v42 = vsel %vm8940_vm4, %v1700_v26, %v1704_v19  ;;  %v3216_v15 = vrot.slane %v3214_v27, 5  ;;  %v1709_v32 = vrot.slane %v1707_v30, 4  ;;  %v1712_v49 = vrot.slane %v1710_v41, 5  ;;  %v9392_v27 = vld [vmem:[#allocation2 + $0x2c] sm:$0x1] }
 0x1d5   : > { %v6872_v45 = vcombine.low %v1695_v61, %v1705_v42  ;;  %v3202_v46 = vrot.slane %v3201_v23, 4  ;;  %v3211_v48 = vor.u32 %v3210_v37, %v3206_v31  ;;  %v1716_v53 = vshll.u32 %v9366_v63, 16  ;;  %v3155_v41 = vld [vmem:[#allocation2 + $0x30] sm:$0xf] }
 0x1d6   : > { %v1720_v50 = vshrl.u32 %v9366_v63, 16  ;;  %v1726_v18 = vshll.u32 %v1342_v28, 16  ;;  %v3219_v59 = vshrl.u32 %v3149_v22, 16  ;;  %v1713_v24 = vor.u32 %v1712_v49, %v1709_v32 }
 0x1d7   : > { %7763 = vmatprep.mubr.msk.bf16.mxu0 %vm1795_vm5, %v6872_v45  ;;  %v3207_v62 = vsel %vm8940_vm4, %v3202_v46, %v3206_v31  ;;  %v3212_v2 = vrot.slane %v3211_v48, 4  ;;  %v3222_v57 = vshll.u32 %v3149_v22, 16  ;;  %v1718_v55 = vrot.slane %v1716_v53, 5  ;;  %v9397_v45 = vld [vmem:[#allocation2 + $0x34] sm:$0xf] }
 0x1d8   : > { %v1722_v5 = vrot.slane %v1720_v50, 4  ;;  %v1728_v6 = vrot.slane %v1726_v18, 5  ;;  %v3221_v7 = vrot.slane %v3219_v59, 4  ;;  %v1714_v11 = vrot.slane %v1713_v24, 4 }
 0x1d9   : > { %v3217_v8 = vsel %vm8940_vm4, %v3212_v2, %v3216_v15  ;;  %v3224_v12 = vrot.slane %v3222_v57, 5  ;;  %v3228_v13 = vshll.u32 %v9374_v43, 16  ;;  %v3232_v10 = vshrl.u32 %v9374_v43, 16 }
 0x1da   : > { %v7010_v19 = vcombine.low %v3207_v62, %v3217_v8  ;;  %v1723_v34 = vor.u32 %v1722_v5, %v1718_v55  ;;  %v3238_v16 = vshll.u32 %v9376_v54, 16  ;;  %v1719_v22 = vsel %vm8940_vm4, %v1714_v11, %v1718_v55  ;;  %v9404_v62 = vld [vmem:[#allocation2 + $0x38] sm:$0x1]  ;;  %v8498_v55 = vld [vmem:[#allocation2] sm:$0xf] }
 0x1db   : > { %v3225_v25 = vor.u32 %v3224_v12, %v3221_v7  ;;  %v3230_v26 = vrot.slane %v3228_v13, 5  ;;  %v3243_v28 = vshrl.u32 %v3152_v60, 16  ;;  %v3234_v23 = vrot.slane %v3232_v10, 4  ;;  %v9406_v5 = vld [vmem:[#allocation2 + $0x4] sm:$0xf] }
 0x1dc   : > { %7879 = vmatprep.mubr.msk.bf16.mxu1 %vm1795_vm5, %v7010_v19  ;;  %v1724_v30 = vrot.slane %v1723_v34, 4  ;;  %v3240_v31 = vrot.slane %v3238_v16, 5  ;;  %v3246_v37 = vshll.u32 %v3152_v60, 16  ;;  %v3252_v15 = vshll.u32 %v9388_v21, 16  ;;  %v3158_v7 = vld [vmem:[#allocation2 + $0x3c] sm:$0xf] }
 0x1dd   : > { %v3226_v61 = vrot.slane %v3225_v25, 4  ;;  %v3245_v42 = vrot.slane %v3243_v28, 4  ;;  %v3256_v32 = vshrl.u32 %v9388_v21, 16  ;;  %v3235_v48 = vor.u32 %v3234_v23, %v3230_v26  ;;  %v8500_v11 = vld [vmem:[#allocation2 + $0xc] sm:$0xf] }
 0x1de   : > { %v1729_v46 = vsel %vm8940_vm4, %v1724_v30, %v1728_v6  ;;  %v3248_v49 = vrot.slane %v3246_v37, 5  ;;  %v3262_v53 = vshll.u32 %v9392_v27, 16  ;;  %v3254_v59 = vrot.slane %v3252_v15, 5  ;;  %v9410_v12 = vld [vmem:[#allocation2 + $0x10] sm:$0xf] }
 0x1df   : > { %v6873_v50 = vcombine.low %v1719_v22, %v1729_v46  ;;  %v3231_v18 = vsel %vm8940_vm4, %v3226_v61, %v3230_v26  ;;  %v3258_v60 = vrot.slane %v3256_v32, 4  ;;  %v3236_v2 = vrot.slane %v3235_v48, 4  ;;  %v9418_v26 = vld [vmem:[#allocation2 + $0x40] sm:$0xf]  ;;  %v9420_v61 = vld [vmem:[#allocation2 + $0x44] sm:$0x1] }
 0x1e0   : > { %v3249_v24 = vor.u32 %v3248_v49, %v3245_v42  ;;  %v3264_v57 = vrot.slane %v3262_v53, 5  ;;  %v6892_v6 = vcombine.low %v8498_v55, %v9406_v5  ;;  %v6893_v13 = vcombine.low %v8500_v11, %v9410_v12  ;;  %v8458_v42 = vld [vmem:[#allocation6 + $0x58] sm:$0xff]   ;;  %v3161_v46 = vld [vmem:[#allocation2 + $0x48] sm:$0xf]  ;;  %v8502_v53 = vld [vmem:[#allocation2 + $0x18] sm:$0xf] }
 0x1e1   : > { %7764 = vmatmul.mubr.msk.bf16.gmra.mrb[60].mxu0 %vm1795_vm5, %v6873_v50  ;;  %v3259_v8 = vor.u32 %v3258_v60, %v3254_v59  ;;  %v3267_v19 = vshrl.u32 %v3155_v41, 16  ;;  %v3270_v34 = vshll.u32 %v3155_v41, 16  ;;  %v3241_v10 = vsel %vm8940_vm4, %v3236_v2, %v3240_v31  ;;  %v9428_v50 = vld [vmem:[#allocation2 + $0x1c] sm:$0xf] }
 0x1e2   : > { %v3250_v16 = vrot.slane %v3249_v24, 4  ;;  %7771 = vmatprep.mubr.msk.bf16.mxu0 %vm1795_vm5, %v6892_v6  ;;  %v3276_v22 = vshll.u32 %v9397_v45, 16  ;;  %v3280_v25 = vshrl.u32 %v9397_v45, 16  ;;  %v7011_v28 = vcombine.low %v3231_v18, %v3241_v10  ;;  %v9431_v2 = vld [vmem:[#allocation6 + $0x60] sm:$0xff]  }
 0x1e3   : > { %v3260_v30 = vrot.slane %v3259_v8, 4  ;;  %v3269_v23 = vrot.slane %v3267_v19, 4  ;;  %v3272_v37 = vrot.slane %v3270_v34, 5  ;;  %v3286_v32 = vshll.u32 %v9404_v62, 16 }
 0x1e4   : > { %v3255_v41 = vsel %vm8940_vm4, %v3250_v16, %v3254_v59  ;;  %v3278_v31 = vrot.slane %v3276_v22, 5  ;;  %v3282_v15 = vrot.slane %v3280_v25, 4  ;;  %7880 = vmatmul.mubr.msk.bf16.vlgmr.msra.gmra.mrb[24].mxu1 %vm1795_vm5, %v7011_v28  ;;  %v6894_v18 = vcombine.low %v8502_v53, %v9428_v50  ;;  %v8504_v59 = vld [vmem:[#allocation6 + $0x50] sm:$0xff]   ;;  %v8505_v25 = vld [vmem:[#allocation2 + $0x24] sm:$0xf] }
 0x1e5   : > { %v3265_v48 = vsel %vm8940_vm4, %v3260_v30, %v3264_v57  ;;  %v3273_v49 = vor.u32 %v3272_v37, %v3269_v23  ;;  %v3291_v60 = vshrl.u32 %v3158_v7, 16  ;;  %7912 = vmatpush3.bf16.msra.mxu1 %v8504_v59  ;;  %v3288_v6 = vrot.slane %v3286_v32, 5  ;;  %v9437_v28 = vld [vmem:[#allocation2 + $0x28] sm:$0xf]  ;;  %v9440_v23 = vld [vmem:[#allocation2 + $0x4c] sm:$0xf] }
 0x1e6   : > { %v7012_v24 = vcombine.low %v3255_v41, %v3265_v48  ;;  %v3283_v55 = vor.u32 %v3282_v15, %v3278_v31  ;;  %v3294_v8 = vshll.u32 %v3158_v7, 16  ;;  %v3300_v34 = vshll.u32 %v9418_v26, 16  ;;  %7913 = vmatprep.subr.bf16.mxu1 %v8458_v42  ;;  %v8470_v7 = vld [vmem:[#allocation6 + $0x28] sm:$0xff]   ;;  %v9445_v32 = vld [vmem:[#allocation2 + $0x50] sm:$0x1] }
 0x1e7   : > { %v3274_v11 = vrot.slane %v3273_v49, 4  ;;  %v3293_v19 = vrot.slane %v3291_v60, 4  ;;  %v3304_v57 = vshrl.u32 %v9418_v26, 16  ;;  %v3310_v22 = vshll.u32 %v9420_v61, 16  ;;  %10867 = vst [vmem:[#allocation15_spill] sm:$0xff] %v9445_v32 }
 0x1e8   : > { %7883 = vmatprep.mubr.msk.bf16.mxu1 %vm1795_vm5, %v7012_v24  ;;  %v3284_v10 = vrot.slane %v3283_v55, 4  ;;  %v3296_v16 = vrot.slane %v3294_v8, 5  ;;  %v6895_v30 = vcombine.low %v8505_v25, %v9437_v28  ;;  %v3302_v41 = vrot.slane %v3300_v34, 5  ;;  %v3164_v24 = vld [vmem:[#allocation2 + $0x54] sm:$0xf] }
 0x1e9   : > { %7772 = vmatmul.mubr.msk.bf16.vlgmr.msra.gmra.mrb[32].mxu0 %vm1795_vm5, %v6893_v13  ;;  %v3279_v37 = vsel %vm8940_vm4, %v3274_v11, %v3278_v31  ;;  %v3306_v15 = vrot.slane %v3304_v57, 4  ;;  %v3315_v48 = vshrl.u32 %v3161_v46, 16  ;;  %v3312_v60 = vrot.slane %v3310_v22, 5  ;;  %7914 = vmatpush3.bf16.msra.mxu1 %v8458_v42  ;;  %v8507_v57 = vld [vmem:[#allocation2 + $0x30] sm:$0xf] }
 0x1ea   : > { %v3289_v49 = vsel %vm8940_vm4, %v3284_v10, %v3288_v6  ;;  %7775 = vmatprep.mubr.msk.bf16.mxu0 %vm1795_vm5, %v6894_v18  ;;  %v3297_v53 = vor.u32 %v3296_v16, %v3293_v19  ;;  %v3318_v59 = vshll.u32 %v3161_v46, 16  ;;  %v3324_v31 = vshll.u32 %v9440_v23, 16  ;;  %7947 = vmatprep.subr.bf16.mxu1 %v9431_v2  ;;  %v9455_v19 = vld [vmem:[#allocation2 + $0x58] sm:$0xf]  ;;  %v9458_v10 = vld [vmem:[#allocation2 + $0x34] sm:$0xf] }
 0x1eb   : > { %v7013_v55 = vcombine.low %v3279_v37, %v3289_v49  ;;  %v3307_v13 = vor.u32 %v3306_v15, %v3302_v41  ;;  %v3317_v8 = vrot.slane %v3315_v48, 4  ;;  %7804 = vmatpush3.bf16.msra.mxu0 %v9223_v39  ;;  %v3328_v6 = vshrl.u32 %v9440_v23, 16  ;;  %10868 = vst [vmem:[#allocation16_spill] sm:$0xff] %v9455_v19  ;;  %10869 = vst [vmem:[#allocation17_spill] sm:$0xff] %v9458_v10  ;;  %v9463_v48 = vld [vmem:[#allocation2 + $0x5c] sm:$0x1] }
 0x1ec   : > { %v3298_v11 = vrot.slane %v3297_v53, 4  ;;  %v3320_v34 = vrot.slane %v3318_v59, 5  ;;  %v3334_v18 = vshll.u32 %v9445_v32, 16  ;;  %7805 = vmatprep.subr.bf16.mxu0 %v8470_v7  ;;  %v3326_v46 = vrot.slane %v3324_v31, 5  ;;  %10870 = vst [vmem:[#allocation18_spill] sm:$0xff] %v9463_v48 }
 0x1ed   : > { %7884 = vmatmul.mubr.msk.bf16.gmra.mrb[28].mxu1 %vm1795_vm5, %v7013_v55  ;;  %v3308_v42 = vrot.slane %v3307_v13, 4  ;;  %v6896_v16 = vcombine.low %v8507_v57, %v9458_v10  ;;  %v3339_v22 = vshrl.u32 %v3164_v24, 16  ;;  %v3330_v37 = vrot.slane %v3328_v6, 4  ;;  %v3167_v13 = vld [vmem:[#allocation2 + $0x60] sm:$0xf] }
 0x1ee   : > { %v3303_v39 = vsel %vm8940_vm4, %v3298_v11, %v3302_v41  ;;  %v3321_v25 = vor.u32 %v3320_v34, %v3317_v8  ;;  %v3336_v15 = vrot.slane %v3334_v18, 5  ;;  %v3342_v59 = vshll.u32 %v3164_v24, 16  ;;  %v9469_v41 = vld [vmem:[#allocation2 + $0x64] sm:$0xf]  ;;  %v9471_v8 = vld [vmem:[#allocation6 + $0x30] sm:$0xff]  }
 0x1ef   : > { %v3313_v49 = vsel %vm8940_vm4, %v3308_v42, %v3312_v60  ;;  %v3341_v53 = vrot.slane %v3339_v22, 4  ;;  %v3348_v55 = vshll.u32 %v9455_v19, 16  ;;  %7806 = vmatpush3.bf16.msra.mxu0 %v8470_v7  ;;  %v3331_v10 = vor.u32 %v3330_v37, %v3326_v46  ;;  %v8510_v34 = vld [vmem:[#allocation2 + $0x3c] sm:$0xf]  ;;  %v9476_v6 = vld [vmem:[#allocation2 + $0x40] sm:$0xf] }
 0x1f0   : > { %v7014_v31 = vcombine.low %v3303_v39, %v3313_v49  ;;  %v3322_v57 = vrot.slane %v3321_v25, 4  ;;  %v3352_v32 = vshrl.u32 %v9455_v19, 16  ;;  %7839 = vmatprep.subr.bf16.mxu0 %v9471_v8  ;;  %v3344_v60 = vrot.slane %v3342_v59, 5  ;;  %10871 = vst [vmem:[#allocation19_spill] sm:$0xff] %v9476_v6  ;;  %v9483_v37 = vld [vmem:[#allocation2 + $0x68] sm:$0x1] }
 0x1f1   : > { %7776 = vmatmul.mubr.msk.bf16.gmra.mrb[36].mxu0 %vm1795_vm5, %v6895_v30  ;;  %v3350_v11 = vrot.slane %v3348_v55, 5  ;;  %v3358_v24 = vshll.u32 %v9463_v48, 16  ;;  %v6897_v7 = vcombine.low %v8510_v34, %v9476_v6  ;;  %v3332_v42 = vrot.slane %v3331_v10, 4  ;;  %10872 = vst [vmem:[#allocation20_spill] sm:$0xff] %v9483_v37  ;;  %v9489_v48 = vld [vmem:[#allocation2 + $0x70] sm:$0xf] }
 0x1f2   : > { %7887 = vmatprep.mubr.msk.bf16.mxu1 %vm1795_vm5, %v7014_v31  ;;  %v3327_v18 = vsel %vm8940_vm4, %v3322_v57, %v3326_v46  ;;  %7779 = vmatprep.mubr.msk.bf16.mxu0 %vm1795_vm5, %v6896_v16  ;;  %v3354_v22 = vrot.slane %v3352_v32, 4  ;;  %v3363_v39 = vshrl.u32 %v3167_v13, 16  ;;  %v3345_v30 = vor.u32 %v3344_v60, %v3341_v53  ;;  %v3170_v46 = vld [vmem:[#allocation2 + $0x6c] sm:$0xf] }
 0x1f3   : > { %v3360_v25 = vrot.slane %v3358_v24, 5  ;;  %v3366_v49 = vshll.u32 %v3167_v13, 16  ;;  %v3372_v59 = vshll.u32 %v9469_v41, 16  ;;  %v3337_v55 = vsel %vm8940_vm4, %v3332_v42, %v3336_v15  ;;  %v8512_v24 = vld [vmem:[#allocation2 + $0x48] sm:$0xf] }
 0x1f4   : > { %v3355_v34 = vor.u32 %v3354_v22, %v3350_v11  ;;  %v3365_v31 = vrot.slane %v3363_v39, 4  ;;  %v3376_v6 = vshrl.u32 %v9469_v41, 16  ;;  %v7015_v10 = vcombine.low %v3327_v18, %v3337_v55  ;;  %v9492_v19 = vld [vmem:[#allocation2 + $0x4c] sm:$0xf]  ;;  %v9498_v22 = vld [vmem:[#allocation2 + $0x74] sm:$0x1] }
 0x1f5   : > { %v3346_v57 = vrot.slane %v3345_v30, 4  ;;  %v3368_v16 = vrot.slane %v3366_v49, 5  ;;  %v3374_v32 = vrot.slane %v3372_v59, 5  ;;  %v3382_v13 = vshll.u32 %v9483_v37, 16  ;;  %10873 = vst [vmem:[#allocation21_spill] sm:$0xff] %v9492_v19 }
 0x1f6   : > { %v3356_v53 = vrot.slane %v3355_v34, 4  ;;  %v3378_v60 = vrot.slane %v3376_v6, 4  ;;  %v6898_v15 = vcombine.low %v8512_v24, %v9492_v19  ;;  %7888 = vmatmul.mubr.msk.bf16.gmra.mrb[0].mxu1 %vm1795_vm5, %v7015_v10  ;;  %v3387_v39 = vshrl.u32 %v3170_v46, 16  ;;  %v3173_v34 = vld [vmem:[#allocation2 + $0x78] sm:$0xf] }
 0x1f7   : > { %v3351_v42 = vsel %vm8940_vm4, %v3346_v57, %v3350_v11  ;;  %v3369_v18 = vor.u32 %v3368_v16, %v3365_v31  ;;  %v3390_v30 = vshll.u32 %v3170_v46, 16  ;;  %v3384_v59 = vrot.slane %v3382_v13, 5 }
 0x1f8   : > { %v3361_v6 = vsel %vm8940_vm4, %v3356_v53, %v3360_v25  ;;  %v3379_v49 = vor.u32 %v3378_v60, %v3374_v32  ;;  %v3396_v55 = vshll.u32 %v9489_v48, 16  ;;  %v3389_v24 = vrot.slane %v3387_v39, 4  ;;  %v9507_v25 = vld [vmem:[#allocation2 + $0x7c] sm:$0xf]  ;;  %v9514_v60 = vld [vmem:[#allocation2 + $0x80] sm:$0x1] }
 0x1f9   : > { %v7016_v37 = vcombine.low %v3351_v42, %v3361_v6  ;;  %7780 = vmatmul.mubr.msk.bf16.gmra.mrb[40].mxu0 %vm1795_vm5, %v6897_v7  ;;  %v3370_v10 = vrot.slane %v3369_v18, 4  ;;  %v3392_v19 = vrot.slane %v3390_v30, 5  ;;  %v3400_v46 = vshrl.u32 %v9489_v48, 16  ;;  %v3176_v30 = vld [vmem:[#allocation2 + $0x84] sm:$0xf] }
 0x1fa   : > { %v3380_v11 = vrot.slane %v3379_v49, 4  ;;  %7783 = vmatprep.mubr.msk.bf16.mxu0 %vm1795_vm5, %v6898_v15  ;;  %v3398_v31 = vrot.slane %v3396_v55, 5  ;;  %v3406_v57 = vshll.u32 %v9498_v22, 16  ;;  %v6899_v7 = vcombine.low %v9218_v33, %v9220_v35  ;;  %v9521_v35 = vld [vmem:[#allocation2 + $0x88] sm:$0xf] }
 0x1fb   : > { %7891 = vmatprep.mubr.msk.bf16.mxu1 %vm1795_vm5, %v7016_v37  ;;  %v3375_v16 = vsel %vm8940_vm4, %v3370_v10, %v3374_v32  ;;  %v3393_v53 = vor.u32 %v3392_v19, %v3389_v24  ;;  %v3411_v13 = vshrl.u32 %v3173_v34, 16  ;;  %v3402_v42 = vrot.slane %v3400_v46, 4 }
 0x1fc   : > { %v3385_v15 = vsel %vm8940_vm4, %v3380_v11, %v3384_v59  ;;  %v3408_v18 = vrot.slane %v3406_v57, 5  ;;  %v3414_v39 = vshll.u32 %v3173_v34, 16  ;;  %v3420_v55 = vshll.u32 %v9507_v25, 16  ;;  %v9528_v11 = vld [vmem:[#allocation2 + $0x8c] sm:$0x1] }
 0x1fd   : > { %v7017_v6 = vcombine.low %v3375_v16, %v3385_v15  ;;  %v3394_v49 = vrot.slane %v3393_v53, 4  ;;  %v3413_v37 = vrot.slane %v3411_v13, 4  ;;  %v3403_v32 = vor.u32 %v3402_v42, %v3398_v31  ;;  %10874 = vst [vmem:[#allocation22_spill] sm:$0xff] %v9528_v11 }
 0x1fe   : > { %v3416_v19 = vrot.slane %v3414_v39, 5  ;;  %v3424_v10 = vshrl.u32 %v9507_v25, 16  ;;  %v3430_v33 = vshll.u32 %v9514_v60, 16  ;;  %v3422_v34 = vrot.slane %v3420_v55, 5  ;;  %v9537_v55 = vld [vmem:[#allocation2 + $0x94] sm:$0xf] }
 0x1ff   : > { %7892 = vmatmul.mubr.msk.bf16.gmra.mrb[4].mxu1 %vm1795_vm5, %v7017_v6  ;;  %v3399_v59 = vsel %vm8940_vm4, %v3394_v49, %v3398_v31  ;;  %v6900_v24 = vcombine.low %v9240_v14, %v9251_v40  ;;  %v3435_v46 = vshrl.u32 %v3176_v30, 16  ;;  %v3404_v57 = vrot.slane %v3403_v32, 4 }
 0x200   : > { %v3417_v16 = vor.u32 %v3416_v19, %v3413_v37  ;;  %v3426_v53 = vrot.slane %v3424_v10, 4  ;;  %v3432_v13 = vrot.slane %v3430_v33, 5  ;;  %v3438_v42 = vshll.u32 %v3176_v30, 16  ;;  %v3179_v37 = vld [vmem:[#allocation2 + $0x90] sm:$0xf] }
 0x201   : > { %7784 = vmatmul.mubr.msk.bf16.gmra.mrb[44].mxu0 %vm1795_vm5, %v6899_v7  ;;  %v3437_v15 = vrot.slane %v3435_v46, 4  ;;  %v3444_v39 = vshll.u32 %v9521_v35, 16  ;;  %v3448_v6 = vshrl.u32 %v9521_v35, 16  ;;  %v3409_v31 = vsel %vm8940_vm4, %v3404_v57, %v3408_v18  ;;  %v9539_v10 = vld [vmem:[#allocation2 + $0x98] sm:$0x1] }
 0x202   : > { %v3418_v49 = vrot.slane %v3417_v16, 4  ;;  %v3427_v14 = vor.u32 %v3426_v53, %v3422_v34  ;;  %7787 = vmatprep.mubr.msk.bf16.mxu0 %vm1795_vm5, %v6900_v24  ;;  %v3454_v40 = vshll.u32 %v9528_v11, 16  ;;  %v7018_v32 = vcombine.low %v3399_v59, %v3409_v31 }
 0x203   : > { %v3440_v7 = vrot.slane %v3438_v42, 5  ;;  %v3446_v19 = vrot.slane %v3444_v39, 5  ;;  %v3450_v30 = vrot.slane %v3448_v6, 4  ;;  %v6901_v57 = vcombine.low %v9253_v47, %v9273_v17  ;;  %v3182_v6 = vld [vmem:[#allocation2 + $0x9c] sm:$0xf] }
 0x204   : > { %v3423_v33 = vsel %vm8940_vm4, %v3418_v49, %v3422_v34  ;;  %v3428_v46 = vrot.slane %v3427_v14, 4  ;;  %v3456_v18 = vrot.slane %v3454_v40, 5  ;;  %7895 = vmatprep.mubr.msk.bf16.mxu1 %vm1795_vm5, %v7018_v32  ;;  %v3459_v53 = vshrl.u32 %v3179_v37, 16  ;;  %v9551_v17 = vld [vmem:[#allocation2 + $0xa4] sm:$0x1] }
 0x205   : > { %v3441_v24 = vor.u32 %v3440_v7, %v3437_v15  ;;  %v3451_v16 = vor.u32 %v3450_v30, %v3446_v19  ;;  %v3462_v11 = vshll.u32 %v3179_v37, 16  ;;  %v3468_v42 = vshll.u32 %v9537_v55, 16  ;;  %v9553_v7 = vld [vmem:[#allocation2 + $0xa0] sm:$0xf] }
 0x206   : > { %v3433_v59 = vsel %vm8940_vm4, %v3428_v46, %v3432_v13  ;;  %v3472_v39 = vshrl.u32 %v9537_v55, 16  ;;  %v3478_v34 = vshll.u32 %v9539_v10, 16  ;;  %v3461_v47 = vrot.slane %v3459_v53, 4 }
 0x207   : > { %v7019_v31 = vcombine.low %v3423_v33, %v3433_v59  ;;  %v3442_v49 = vrot.slane %v3441_v24, 4  ;;  %v3452_v14 = vrot.slane %v3451_v16, 4  ;;  %v3464_v15 = vrot.slane %v3462_v11, 5  ;;  %v3185_v59 = vld [vmem:[#allocation2 + $0xa8] sm:$0xf] }
 0x208   : > { %v3470_v40 = vrot.slane %v3468_v42, 5  ;;  %v3474_v32 = vrot.slane %v3472_v39, 4  ;;  %v3480_v37 = vrot.slane %v3478_v34, 5  ;;  %v6902_v33 = vcombine.low %v9277_v51, %v9279_v58 }
 0x209   : > { %7896 = vmatmul.mubr.msk.bf16.gmra.mrb[8].mxu1 %vm1795_vm5, %v7019_v31  ;;  %v3447_v13 = vsel %vm8940_vm4, %v3442_v49, %v3446_v19  ;;  %v3457_v30 = vsel %vm8940_vm4, %v3452_v14, %v3456_v18  ;;  %7788 = vmatmul.mubr.msk.bf16.gmra.mrb[48].mxu0 %vm1795_vm5, %v6901_v57  ;;  %v3483_v46 = vshrl.u32 %v3182_v6, 16  ;;  %v3465_v24 = vor.u32 %v3464_v15, %v3461_v47  ;;  %v9570_v31 = vld [vmem:[#allocation2 + $0xac] sm:$0xf]  ;;  %v9572_v47 = vld [vmem:[#allocation2 + $0xb0] sm:$0x1] }
 0x20a   : > { %v7020_v11 = vcombine.low %v3447_v13, %v3457_v30  ;;  %v3475_v16 = vor.u32 %v3474_v32, %v3470_v40  ;;  %v3486_v53 = vshll.u32 %v3182_v6, 16  ;;  %7791 = vmatprep.mubr.msk.bf16.mxu0 %vm1795_vm5, %v6902_v33  ;;  %v3492_v39 = vshll.u32 %v9553_v7, 16 }
 0x20b   : > { %v3485_v42 = vrot.slane %v3483_v46, 4  ;;  %v3496_v19 = vshrl.u32 %v9553_v7, 16  ;;  %v3502_v18 = vshll.u32 %v9551_v17, 16  ;;  %v3466_v57 = vrot.slane %v3465_v24, 4  ;;  %v3188_v46 = vld [vmem:[#allocation2 + $0xb4] sm:$0xf] }
 0x20c   : > { %7899 = vmatprep.mubr.msk.bf16.mxu1 %vm1795_vm5, %v7020_v11  ;;  %v3476_v34 = vrot.slane %v3475_v16, 4  ;;  %v3488_v51 = vrot.slane %v3486_v53, 5  ;;  %v6903_v58 = vcombine.low %v9294_v9, %v9298_v20  ;;  %v3494_v6 = vrot.slane %v3492_v39, 5 }
 0x20d   : > { %v3498_v49 = vrot.slane %v3496_v19, 4  ;;  %v3504_v14 = vrot.slane %v3502_v18, 5  ;;  %v3507_v15 = vshrl.u32 %v3185_v59, 16  ;;  %v3471_v32 = vsel %vm8940_vm4, %v3466_v57, %v3470_v40  ;;  %v9581_v18 = vld [vmem:[#allocation2 + $0xb8] sm:$0xf] }
 0x20e   : > { %v3481_v13 = vsel %vm8940_vm4, %v3476_v34, %v3480_v37  ;;  %v3489_v30 = vor.u32 %v3488_v51, %v3485_v42  ;;  %v3510_v33 = vshll.u32 %v3185_v59, 16  ;;  %v3516_v20 = vshll.u32 %v9570_v31, 16 }
 0x20f   : > { %v7021_v11 = vcombine.low %v3471_v32, %v3481_v13  ;;  %v3499_v24 = vor.u32 %v3498_v49, %v3494_v6  ;;  %v3509_v9 = vrot.slane %v3507_v15, 4  ;;  %v3520_v39 = vshrl.u32 %v9570_v31, 16  ;;  %v9589_v15 = vld [vmem:[#allocation2 + $0xbc] sm:$0x1] }
 0x210   : > { %v3490_v16 = vrot.slane %v3489_v30, 4  ;;  %v3512_v53 = vrot.slane %v3510_v33, 5  ;;  %v3526_v19 = vshll.u32 %v9572_v47, 16  ;;  %v3518_v37 = vrot.slane %v3516_v20, 5  ;;  %v3191_v33 = vld [vmem:[#allocation2 + $0xc0] sm:$0xf] }
 0x211   : > { %7900 = vmatmul.mubr.msk.bf16.gmra.mrb[12].mxu1 %vm1795_vm5, %v7021_v11  ;;  %v3500_v40 = vrot.slane %v3499_v24, 4  ;;  %7792 = vmatmul.mubr.msk.bf16.gmra.mrb[52].mxu0 %vm1795_vm5, %v6903_v58  ;;  %v6904_v59 = vcombine.low %v9303_v29, %v9307_v36  ;;  %v3531_v42 = vshrl.u32 %v3188_v46, 16  ;;  %v3522_v51 = vrot.slane %v3520_v39, 4  ;;  %v9596_v24 = vld [vmem:[#allocation2 + $0xc4] sm:$0xf] }
 0x212   : > { %v3495_v57 = vsel %vm8940_vm4, %v3490_v16, %v3494_v6  ;;  %v3513_v34 = vor.u32 %v3512_v53, %v3509_v9  ;;  %v3528_v49 = vrot.slane %v3526_v19, 5  ;;  %v3534_v58 = vshll.u32 %v3188_v46, 16 }
 0x213   : > { %v3505_v32 = vsel %vm8940_vm4, %v3500_v40, %v3504_v14  ;;  %7795 = vmatprep.mubr.msk.bf16.mxu0 %vm1795_vm5, %v6904_v59  ;;  %v3533_v13 = vrot.slane %v3531_v42, 4  ;;  %v3540_v30 = vshll.u32 %v9581_v18, 16  ;;  %v3523_v11 = vor.u32 %v3522_v51, %v3518_v37  ;;  %v9604_v42 = vld [vmem:[#allocation2 + $0xc8] sm:$0x1] }
 0x214   : > { %v7022_v29 = vcombine.low %v3495_v57, %v3505_v32  ;;  %v3514_v36 = vrot.slane %v3513_v34, 4  ;;  %v3544_v6 = vshrl.u32 %v9581_v18, 16  ;;  %v3536_v9 = vrot.slane %v3534_v58, 5 }
 0x215   : > { %v3542_v20 = vrot.slane %v3540_v30, 5  ;;  %v3550_v16 = vshll.u32 %v9589_v15, 16  ;;  %v6905_v14 = vcombine.low %v9322_v38, %v9327_v4  ;;  %v3524_v53 = vrot.slane %v3523_v11, 4 }
 0x216   : > { %7903 = vmatprep.mubr.msk.bf16.mxu1 %vm1795_vm5, %v7022_v29  ;;  %v3519_v46 = vsel %vm8940_vm4, %v3514_v36, %v3518_v37  ;;  %v3546_v39 = vrot.slane %v3544_v6, 4  ;;  %v3555_v19 = vshrl.u32 %v3191_v33, 16  ;;  %v3537_v40 = vor.u32 %v3536_v9, %v3533_v13  ;;  %v3884_v13 = vld [vmem:[#allocation2 + $0xc] sm:$0xe] }
 0x217   : > { %v3552_v59 = vrot.slane %v3550_v16, 5  ;;  %v3558_v57 = vshll.u32 %v3191_v33, 16  ;;  %v3564_v34 = vshll.u32 %v9596_v24, 16  ;;  %v3529_v51 = vsel %vm8940_vm4, %v3524_v53, %v3528_v49  ;;  %v3885_v16 = vld [vmem:[#allocation2 + $0x18] sm:$0xe] }
 0x218   : > { %v3547_v32 = vor.u32 %v3546_v39, %v3542_v20  ;;  %v3557_v38 = vrot.slane %v3555_v19, 4  ;;  %v3568_v4 = vshrl.u32 %v9596_v24, 16  ;;  %v7023_v58 = vcombine.low %v3519_v46, %v3529_v51 }
 0x219   : > { %v3538_v30 = vrot.slane %v3537_v40, 4  ;;  %7796 = vmatmul.mubr.msk.bf16.gmra.mrb[56].mxu0 %vm1795_vm5, %v6905_v14  ;;  %v3560_v37 = vrot.slane %v3558_v57, 5  ;;  %v3566_v29 = vrot.slane %v3564_v34, 5  ;;  %v3574_v33 = vshll.u32 %v9604_v42, 16 }
 0x21a   : > { %v3548_v36 = vrot.slane %v3547_v32, 4  ;;  %v3570_v11 = vrot.slane %v3568_v4, 4  ;;  %v6906_v6 = vcombine.low %v9336_v56, %v9340_v52  ;;  %7904 = vmatmul.mubr.msk.bf16.gmra.mrb[16].mxu1 %vm1795_vm5, %v7023_v58  ;;  %v7044_v56 = vrot.slane %v3884_v13, 9 }
 0x21b   : > { %v3543_v49 = vsel %vm8940_vm4, %v3538_v30, %v3542_v20  ;;  %v3561_v9 = vor.u32 %v3560_v37, %v3557_v38  ;;  %v3576_v19 = vrot.slane %v3574_v33, 5  ;;  %v3950_v20 = vrot.slane %v9351_v0, 5  ;;  %v2306_v0 = vld [vmem:[#allocation2] sm:$0xe] }
 0x21c   : > { %v3553_v14 = vsel %vm8940_vm4, %v3548_v36, %v3552_v59  ;;  %v3571_v46 = vor.u32 %v3570_v11, %v3566_v29  ;;  %7799 = vmatprep.mubr.msk.bf16.mxu0 %vm1795_vm5, %v6906_v6  ;;  %v3953_v57 = vrot.slane %v9353_v1, 5  ;;  %v7045_v34 = vrot.slane %v3885_v16, 9  ;;  %v3886_v59 = vld [vmem:[#allocation2 + $0x24] sm:$0xe] }
 0x21d   : > { %v7024_v52 = vcombine.low %v3543_v49, %v3553_v14  ;;  %v3562_v39 = vrot.slane %v3561_v9, 4  ;;  %v3957_v51 = vrot.slane %v9374_v43, 5  ;;  %v3951_v38 = vsel %vm9620_vm11, %v7044_v56, %v3950_v20  ;;  %v3887_v9 = vld [vmem:[#allocation2 + $0x30] sm:$0xe] }
 0x21e   : > { %v3572_v40 = vrot.slane %v3571_v46, 4  ;;  %v3952_v4 = vrot.slane %v3950_v20, 4  ;;  %v6907_v58 = vcombine.low %v9355_v3, %v9366_v63  ;;  %v3960_v37 = vrot.slane %v9376_v54, 5  ;;  %v2307_v3 = vld [vmem:[#allocation2 + $0xc] sm:$0xe] }
 0x21f   : > { %7907 = vmatprep.mubr.msk.bf16.mxu1 %vm1795_vm5, %v7024_v52  ;;  %v3567_v32 = vsel %vm8940_vm4, %v3562_v39, %v3566_v29  ;;  %v3958_v43 = vsel %vm9620_vm11, %v7045_v34, %v3957_v51  ;;  %v3959_v30 = vrot.slane %v3957_v51, 4  ;;  %v7046_v36 = vrot.slane %v3886_v59, 9  ;;  %v8514_v46 = vld [vmem:[#allocation2 + $0x8] sm:$0x1] }
 0x220   : > { %v3577_v1 = vsel %vm8940_vm4, %v3572_v40, %v3576_v19  ;;  %v3954_v29 = vsel %vm9620_vm11, %v3952_v4, %v3953_v57  ;;  %v3964_v11 = vrot.slane %v9388_v21, 5  ;;  %v6926_v6 = vrot.slane %v2306_v0, 9  ;;  %v2308_v57 = vld [vmem:[#allocation2 + $0x18] sm:$0xe]  ;;  %v3888_v4 = vld [vmem:[#allocation2 + $0x3c] sm:$0xe] }
 0x221   : > { %v7025_v13 = vcombine.low %v3567_v32, %v3577_v1  ;;  %7800 = vmatmul.mubr.msk.bf16.gmra.mrb[60].mxu0 %vm1795_vm5, %v6907_v58  ;;  %v7060_v63 = vcombine.low %v3951_v38, %v3954_v29  ;;  %v3961_v33 = vsel %vm9620_vm11, %v3959_v30, %v3960_v37  ;;  %v2359_v49 = vrot.slane %v9406_v5, 5  ;;  %v8515_v32 = vld [vmem:[#allocation2 + $0x14] sm:$0x1] }
 0x222   : > { %v7061_v54 = vcombine.low %v3958_v43, %v3961_v33  ;;  %v3966_v16 = vrot.slane %v3964_v11, 4  ;;  %v3967_v14 = vrot.slane %v9392_v27, 5  ;;  %v2362_v56 = vrot.slane %v8514_v46, 5 }
 0x223   : > { %7908 = vmatmul.mubr.msk.bf16.gmra.mrb[20].mxu1 %vm1795_vm5, %v7025_v13  ;;  %v2360_v21 = vsel %vm9620_vm11, %v6926_v6, %v2359_v49  ;;  %v2361_v52 = vrot.slane %v2359_v49, 4  ;;  %v6927_v39 = vrot.slane %v2307_v3, 9  ;;  %v2366_v19 = vrot.slane %v9410_v12, 5  ;;  %v2309_v13 = vld [vmem:[#allocation2 + $0x24] sm:$0xe] }
 0x224   : > { %7915 = vmatprep.mubr.msk.bf16.mxu1 %vm1795_vm5, %v7060_v63  ;;  %v3965_v5 = vsel %vm9620_vm11, %v7046_v36, %v3964_v11  ;;  %v3968_v20 = vsel %vm9620_vm11, %v3966_v16, %v3967_v14  ;;  %v7047_v40 = vrot.slane %v3887_v9, 9  ;;  %v3971_v27 = vrot.slane %v9397_v45, 5  ;;  %v3889_v3 = vld [vmem:[#allocation2 + $0x48] sm:$0xe]  ;;  %v8471_v63 = vld [vmem:[#allocation6 + $0x68] sm:$0xff]  }
 0x225   : > { %v7062_v34 = vcombine.low %v3965_v5, %v3968_v20  ;;  %v2363_v51 = vsel %vm9620_vm11, %v2361_v52, %v2362_v56  ;;  %v2368_v59 = vrot.slane %v2366_v19, 4  ;;  %v2369_v38 = vrot.slane %v8515_v32, 5  ;;  %v8516_v9 = vld [vmem:[#allocation2 + $0x20] sm:$0x1] }
 0x226   : > { %v6942_v58 = vcombine.low %v2360_v21, %v2363_v51  ;;  %v2367_v12 = vsel %vm9620_vm11, %v6927_v39, %v2366_v19  ;;  %v3973_v0 = vrot.slane %v3971_v27, 4  ;;  %v3974_v1 = vrot.slane %v9404_v62, 5  ;;  %v2310_v39 = vld [vmem:[#allocation2 + $0x30] sm:$0xe] }
 0x227   : > { %v2370_v43 = vsel %vm9620_vm11, %v2368_v59, %v2369_v38  ;;  %v9666_v45 = vsel %vm9620_vm11, %v7047_v40, %v3971_v27  ;;  %v6928_v30 = vrot.slane %v2308_v57, 9  ;;  %v2373_v37 = vrot.slane %v9428_v50, 5  ;;  %v9689_v40 = vld [vmem:[#allocation6 + $0x70] sm:$0xff]   ;;  %v8518_v59 = vld [vmem:[#allocation6 + $0x38] sm:$0xff]  }
 0x228   : > { %7807 = vmatprep.mubr.msk.bf16.mxu0 %vm1795_vm5, %v6942_v58  ;;  %v6943_v29 = vcombine.low %v2367_v12, %v2370_v43  ;;  %v3975_v36 = vsel %vm9620_vm11, %v3973_v0, %v3974_v1  ;;  %v7048_v11 = vrot.slane %v3888_v4, 9  ;;  %v3978_v62 = vrot.slane %v9418_v26, 5  ;;  %v2311_v12 = vld [vmem:[#allocation2 + $0x3c] sm:$0xe]  ;;  %v8519_v1 = vld [vmem:[#allocation2 + $0x38] sm:$0x1] }
 0x229   : > { %v7063_v33 = vcombine.low %v9666_v45, %v3975_v36  ;;  %v2374_v6 = vsel %vm9620_vm11, %v6928_v30, %v2373_v37  ;;  %v2375_v49 = vrot.slane %v2373_v37, 4  ;;  %v2376_v50 = vrot.slane %v8516_v9, 5  ;;  %v10879_v30 = vld [vmem:[#allocation16_spill] sm:$0xff] }
 0x22a   : > { %7808 = vmatmul.mubr.msk.bf16.vlgmr.msra.gmra.mrb[32].mxu0 %vm1795_vm5, %v6943_v29  ;;  %v3980_v16 = vrot.slane %v3978_v62, 4  ;;  %v3981_v14 = vrot.slane %v9420_v61, 5  ;;  %v6929_v46 = vrot.slane %v2309_v13, 9  ;;  %v2380_v26 = vrot.slane %v9437_v28, 5  ;;  %v8517_v28 = vld [vmem:[#allocation2 + $0x2c] sm:$0x1] }
 0x22b   : > { %7916 = vmatmul.mubr.msk.bf16.vlgmr.msra.gmra.mrb[24].mxu1 %vm1795_vm5, %v7061_v54  ;;  %v2377_v56 = vsel %vm9620_vm11, %v2375_v49, %v2376_v50  ;;  %v3979_v21 = vsel %vm9620_vm11, %v7048_v11, %v3978_v62  ;;  %v7049_v52 = vrot.slane %v3889_v3, 9  ;;  %v3985_v54 = vrot.slane %v9440_v23, 5  ;;  %7840 = vmatpush3.bf16.msra.mxu0 %v9471_v8  ;;  %v10877_v23 = vld [vmem:[#allocation15_spill] sm:$0xff]  ;;  %v10878_v8 = vld [vmem:[#allocation17_spill] sm:$0xff]  ;;  %v3891_v13 = vld [vmem:[#allocation2 + $0x60] sm:$0xe] }
 0x22c   : > { %7948 = vmatpush3.bf16.msra.mxu1 %v9431_v2  ;;  %7919 = vmatprep.mubr.msk.bf16.mxu1 %vm1795_vm5, %v7062_v34  ;;  %v6944_v19 = vcombine.low %v2374_v6, %v2377_v56  ;;  %v3982_v61 = vsel %vm9620_vm11, %v3980_v16, %v3981_v14  ;;  %v2382_v5 = vrot.slane %v2380_v26, 4  ;;  %v2383_v20 = vrot.slane %v8517_v28, 5  ;;  %v3890_v2 = vld [vmem:[#allocation2 + $0x54] sm:$0xe]  ;;  %v10880_v6 = vld [vmem:[#allocation18_spill] sm:$0xff]  ;;  %v10881_v50 = vld [vmem:[#allocation19_spill] sm:$0xff] }
 0x22d   : > { %7949 = vmatprep.subr.bf16.mxu1 %v8471_v63  ;;  %v7064_v27 = vcombine.low %v3979_v21, %v3982_v61  ;;  %v2381_v57 = vsel %vm9620_vm11, %v6929_v46, %v2380_v26  ;;  %v3987_v34 = vrot.slane %v3985_v54, 4  ;;  %v3988_v51 = vrot.slane %v10877_v23, 5  ;;  %7841 = vmatprep.subr.bf16.mxu0 %v8518_v59  ;;  %v2312_v56 = vld [vmem:[#allocation2 + $0x48] sm:$0xe] }
 0x22e   : > { %7811 = vmatprep.mubr.msk.bf16.mxu0 %vm1795_vm5, %v6944_v19  ;;  %v2384_v32 = vsel %vm9620_vm11, %v2382_v5, %v2383_v20  ;;  %v9700_v38 = vsel %vm9620_vm11, %v7049_v52, %v3985_v54  ;;  %v6930_v4 = vrot.slane %v2310_v39, 9  ;;  %v2387_v58 = vrot.slane %v10878_v8, 5  ;;  %v3892_v19 = vld [vmem:[#allocation2 + $0x6c] sm:$0xe]  ;;  %v10882_v20 = vld [vmem:[#allocation20_spill] sm:$0xff] }
 0x22f   : > { %v3989_v0 = vsel %vm9620_vm11, %v3987_v34, %v3988_v51  ;;  %v2390_v43 = vrot.slane %v8519_v1, 5  ;;  %v7050_v45 = vrot.slane %v3890_v2, 9  ;;  %v3992_v37 = vrot.slane %v10879_v30, 5  ;;  %7842 = vmatpush3.bf16.msra.mxu0 %v8518_v59  ;;  %v10883_v34 = vld [vmem:[#allocation21_spill] sm:$0xff]  ;;  %v2313_v51 = vld [vmem:[#allocation2 + $0x54] sm:$0xe] }
 0x230   : > { %7950 = vmatpush3.bf16.msra.mxu1 %v8471_v63  ;;  %v6945_v29 = vcombine.low %v2381_v57, %v2384_v32  ;;  %v7065_v36 = vcombine.low %v9700_v38, %v3989_v0  ;;  %v2388_v11 = vsel %vm9620_vm11, %v6930_v4, %v2387_v58  ;;  %v2389_v62 = vrot.slane %v2387_v58, 4  ;;  %v8521_v32 = vld [vmem:[#allocation2 + $0x50] sm:$0x1]  ;;  %v3893_v58 = vld [vmem:[#allocation2 + $0x78] sm:$0xe] }
 0x231   : > { %7983 = vmatprep.subr.bf16.mxu1 %v9689_v40  ;;  %v3994_v3 = vrot.slane %v3992_v37, 4  ;;  %v3995_v49 = vrot.slane %v10880_v6, 5  ;;  %v6931_v9 = vrot.slane %v2311_v12, 9  ;;  %v2394_v16 = vrot.slane %v10881_v50, 5  ;;  %v2314_v6 = vld [vmem:[#allocation2 + $0x60] sm:$0xe] }
 0x232   : > { %7812 = vmatmul.mubr.msk.bf16.gmra.mrb[36].mxu0 %vm1795_vm5, %v6945_v29  ;;  %v2391_v63 = vsel %vm9620_vm11, %v2389_v62, %v2390_v43  ;;  %v3993_v14 = vsel %vm9620_vm11, %v7050_v45, %v3992_v37  ;;  %v7051_v46 = vrot.slane %v3891_v13, 9  ;;  %v3999_v26 = vrot.slane %v9469_v41, 5  ;;  %v8522_v13 = vld [vmem:[#allocation2 + $0x58] sm:$0xf] }
 0x233   : > { %7920 = vmatmul.mubr.msk.bf16.gmra.mrb[28].mxu1 %vm1795_vm5, %v7063_v33  ;;  %v6946_v21 = vcombine.low %v2388_v11, %v2391_v63  ;;  %v3996_v52 = vsel %vm9620_vm11, %v3994_v3, %v3995_v49  ;;  %v2396_v54 = vrot.slane %v2394_v16, 4  ;;  %v8520_v33 = vld [vmem:[#allocation2 + $0x44] sm:$0x1]  ;;  %v2395_v5 = vsel %vm9620_vm11, %v6931_v9, %v2394_v16  ;;  %v3894_v63 = vld [vmem:[#allocation2 + $0x84] sm:$0xe] }
 0x234   : > { %7923 = vmatprep.mubr.msk.bf16.mxu1 %vm1795_vm5, %v7064_v27  ;;  %v2397_v39 = vrot.slane %v8520_v33, 5  ;;  %v7066_v61 = vcombine.low %v3993_v14, %v3996_v52  ;;  %v4001_v28 = vrot.slane %v3999_v26, 4  ;;  %v4002_v2 = vrot.slane %v10882_v20, 5 }
 0x235   : > { %7815 = vmatprep.mubr.msk.bf16.mxu0 %vm1795_vm5, %v6946_v21  ;;  %v9730_v27 = vsel %vm9620_vm11, %v7051_v46, %v3999_v26  ;;  %v6932_v57 = vrot.slane %v2312_v56, 9  ;;  %v2401_v23 = vrot.slane %v10883_v34, 5  ;;  %v2404_v38 = vrot.slane %v8521_v32, 5  ;;  %v8524_v56 = vld [vmem:[#allocation2 + $0x64] sm:$0xf] }
 0x236   : > { %v2398_v41 = vsel %vm9620_vm11, %v2396_v54, %v2397_v39  ;;  %v9735_v59 = vsel %vm9620_vm11, %v4001_v28, %v4002_v2  ;;  %v7052_v4 = vrot.slane %v3892_v19, 9  ;;  %v4006_v8 = vrot.slane %v9489_v48, 5  ;;  %v8525_v28 = vld [vmem:[#allocation2 + $0x68] sm:$0x1]  ;;  %v2315_v34 = vld [vmem:[#allocation2 + $0x6c] sm:$0xe] }
 0x237   : > { %v6947_v12 = vcombine.low %v2395_v5, %v2398_v41  ;;  %v7067_v0 = vcombine.low %v9730_v27, %v9735_v59  ;;  %v2402_v1 = vsel %vm9620_vm11, %v6932_v57, %v2401_v23  ;;  %v2403_v43 = vrot.slane %v2401_v23, 4  ;;  %v10884_v27 = vld [vmem:[#allocation22_spill] sm:$0xff]  ;;  %v8526_v23 = vld [vmem:[#allocation2 + $0x70] sm:$0xf] }
 0x238   : > { %v4007_v45 = vsel %vm9620_vm11, %v7052_v4, %v4006_v8  ;;  %v4008_v30 = vrot.slane %v4006_v8, 4  ;;  %v4009_v37 = vrot.slane %v9498_v22, 5  ;;  %v2408_v29 = vrot.slane %v8522_v13, 5  ;;  %v8523_v22 = vld [vmem:[#allocation2 + $0x5c] sm:$0x1] }
 0x239   : > { %v2405_v48 = vsel %vm9620_vm11, %v2403_v43, %v2404_v38  ;;  %v6933_v11 = vrot.slane %v2313_v51, 9  ;;  %v7053_v62 = vrot.slane %v3893_v58, 9  ;;  %v4013_v3 = vrot.slane %v9507_v25, 5  ;;  %v2316_v4 = vld [vmem:[#allocation2 + $0x78] sm:$0xe] }
 0x23a   : > { %7816 = vmatmul.mubr.msk.bf16.gmra.mrb[40].mxu0 %vm1795_vm5, %v6947_v12  ;;  %v6948_v49 = vcombine.low %v2402_v1, %v2405_v48  ;;  %v4010_v9 = vsel %vm9620_vm11, %v4008_v30, %v4009_v37  ;;  %v2410_v50 = vrot.slane %v2408_v29, 4  ;;  %v2411_v16 = vrot.slane %v8523_v22, 5  ;;  %v3896_v43 = vld [vmem:[#allocation2 + $0x9c] sm:$0xe] }
 0x23b   : > { %7924 = vmatmul.mubr.msk.bf16.gmra.mrb[0].mxu1 %vm1795_vm5, %v7065_v36  ;;  %v7068_v14 = vcombine.low %v4007_v45, %v4010_v9  ;;  %v4015_v46 = vrot.slane %v4013_v3, 4  ;;  %v4016_v26 = vrot.slane %v9514_v60, 5  ;;  %v6934_v36 = vrot.slane %v2314_v6, 9  ;;  %v3895_v60 = vld [vmem:[#allocation2 + $0x90] sm:$0xe] }
 0x23c   : > { %7927 = vmatprep.mubr.msk.bf16.mxu1 %vm1795_vm5, %v7066_v61  ;;  %7819 = vmatprep.mubr.msk.bf16.mxu0 %vm1795_vm5, %v6948_v49  ;;  %v2412_v25 = vsel %vm9620_vm11, %v2410_v50, %v2411_v16  ;;  %v2415_v21 = vrot.slane %v8524_v56, 5  ;;  %v9759_v52 = vsel %vm9620_vm11, %v7053_v62, %v4013_v3  ;;  %v7054_v33 = vrot.slane %v3894_v63, 9  ;;  %v3897_v49 = vld [vmem:[#allocation2 + $0xa8] sm:$0xe]  ;;  %v8529_v16 = vld [vmem:[#allocation2 + $0x80] sm:$0x1] }
 0x23d   : > { %v9763_v54 = vsel %vm9620_vm11, %v4015_v46, %v4016_v26  ;;  %v4020_v39 = vrot.slane %v9521_v35, 5  ;;  %v2409_v19 = vsel %vm9620_vm11, %v6933_v11, %v2408_v29  ;;  %v2418_v20 = vrot.slane %v8525_v28, 5  ;;  %v8528_v11 = vld [vmem:[#allocation2 + $0x7c] sm:$0xf] }
 0x23e   : > { %v7069_v61 = vcombine.low %v9759_v52, %v9763_v54  ;;  %v2417_v5 = vrot.slane %v2415_v21, 4  ;;  %v6949_v2 = vcombine.low %v2409_v19, %v2412_v25  ;;  %v4023_v57 = vrot.slane %v10884_v27, 5  ;;  %v8530_v25 = vld [vmem:[#allocation2 + $0x88] sm:$0xf] }
 0x23f   : > { %v4022_v41 = vrot.slane %v4020_v39, 4  ;;  %v2422_v51 = vrot.slane %v8526_v23, 5  ;;  %v2416_v35 = vsel %vm9620_vm11, %v6934_v36, %v2415_v21  ;;  %v7055_v32 = vrot.slane %v3895_v60, 9 }
 0x240   : > { %v2419_v59 = vsel %vm9620_vm11, %v2417_v5, %v2418_v20  ;;  %v4027_v38 = vrot.slane %v9537_v55, 5  ;;  %v4021_v58 = vsel %vm9620_vm11, %v7054_v33, %v4020_v39  ;;  %v6935_v30 = vrot.slane %v2315_v34, 9  ;;  %v8527_v55 = vld [vmem:[#allocation2 + $0x74] sm:$0x1] }
 0x241   : > { %v6950_v8 = vcombine.low %v2416_v35, %v2419_v59  ;;  %v4024_v12 = vsel %vm9620_vm11, %v4022_v41, %v4023_v57  ;;  %v2424_v1 = vrot.slane %v2422_v51, 4  ;;  %v4030_v13 = vrot.slane %v9539_v10, 5  ;;  %v8532_v57 = vld [vmem:[#allocation2 + $0x8c] sm:$0x1] }
 0x242   : > { %7820 = vmatmul.mubr.msk.bf16.gmra.mrb[44].mxu0 %vm1795_vm5, %v6949_v2  ;;  %v7070_v45 = vcombine.low %v4021_v58, %v4024_v12  ;;  %v4029_v37 = vrot.slane %v4027_v38, 4  ;;  %v2425_v29 = vrot.slane %v8527_v55, 5  ;;  %v6936_v48 = vrot.slane %v2316_v4, 9  ;;  %v2318_v2 = vld [vmem:[#allocation2 + $0x90] sm:$0xe] }
 0x243   : > { %7928 = vmatmul.mubr.msk.bf16.gmra.mrb[4].mxu1 %vm1795_vm5, %v7067_v0  ;;  %7823 = vmatprep.mubr.msk.bf16.mxu0 %vm1795_vm5, %v6950_v8  ;;  %v2429_v62 = vrot.slane %v8528_v11, 5  ;;  %v9787_v3 = vsel %vm9620_vm11, %v7055_v32, %v4027_v38  ;;  %v7056_v6 = vrot.slane %v3896_v43, 9  ;;  %v4034_v10 = vrot.slane %v9553_v7, 5  ;;  %v8533_v32 = vld [vmem:[#allocation2 + $0x98] sm:$0x1] }
 0x244   : > { %7931 = vmatprep.mubr.msk.bf16.mxu1 %vm1795_vm5, %v7068_v14  ;;  %v9791_v0 = vsel %vm9620_vm11, %v4029_v37, %v4030_v13  ;;  %v2426_v9 = vsel %vm9620_vm11, %v2424_v1, %v2425_v29  ;;  %v2432_v63 = vrot.slane %v8529_v16, 5  ;;  %v2423_v14 = vsel %vm9620_vm11, %v6935_v30, %v2422_v51  ;;  %v3899_v51 = vld [vmem:[#allocation2 + $0xc0] sm:$0xe]  ;;  %v2319_v55 = vld [vmem:[#allocation2 + $0x9c] sm:$0xe] }
 0x245   : > { %v7071_v50 = vcombine.low %v9787_v3, %v9791_v0  ;;  %v2431_v22 = vrot.slane %v2429_v62, 4  ;;  %v4036_v46 = vrot.slane %v4034_v10, 4  ;;  %v4037_v26 = vrot.slane %v9551_v17, 5  ;;  %v2317_v17 = vld [vmem:[#allocation2 + $0x84] sm:$0xe] }
 0x246   : > { %v2436_v36 = vrot.slane %v8530_v25, 5  ;;  %v2430_v7 = vsel %vm9620_vm11, %v6936_v48, %v2429_v62  ;;  %v7057_v21 = vrot.slane %v3897_v49, 9  ;;  %v4041_v52 = vrot.slane %v9570_v31, 5  ;;  %v8531_v31 = vld [vmem:[#allocation2 + $0x94] sm:$0xf] }
 0x247   : > { %v2433_v56 = vsel %vm9620_vm11, %v2431_v22, %v2432_v63  ;;  %v6951_v54 = vcombine.low %v2423_v14, %v2426_v9  ;;  %v4035_v39 = vsel %vm9620_vm11, %v7056_v6, %v4034_v10  ;;  %v4038_v60 = vsel %vm9620_vm11, %v4036_v46, %v4037_v26  ;;  %v8534_v8 = vld [vmem:[#allocation2 + $0xa0] sm:$0xf]  ;;  %v3898_v62 = vld [vmem:[#allocation2 + $0xb4] sm:$0xe]  ;;  %v2320_v0 = vld [vmem:[#allocation2 + $0xa8] sm:$0xe] }
 0x248   : > { %v6952_v33 = vcombine.low %v2430_v7, %v2433_v56  ;;  %v7072_v19 = vcombine.low %v4035_v39, %v4038_v60  ;;  %v2438_v5 = vrot.slane %v2436_v36, 4  ;;  %v4043_v28 = vrot.slane %v4041_v52, 4  ;;  %v8535_v6 = vld [vmem:[#allocation2 + $0xac] sm:$0xf]  ;;  %v8536_v9 = vld [vmem:[#allocation2 + $0xa4] sm:$0x1] }
 0x249   : > { %v4044_v20 = vrot.slane %v9572_v47, 5  ;;  %v2443_v41 = vrot.slane %v8531_v31, 5  ;;  %v6937_v27 = vrot.slane %v2317_v17, 9  ;;  %v2439_v34 = vrot.slane %v8532_v57, 5  ;;  %v8537_v26 = vld [vmem:[#allocation2 + $0xb0] sm:$0x1] }
 0x24a   : > { %7824 = vmatmul.mubr.msk.bf16.gmra.mrb[48].mxu0 %vm1795_vm5, %v6951_v54  ;;  %v4042_v23 = vsel %vm9620_vm11, %v7057_v21, %v4041_v52  ;;  %v2446_v38 = vrot.slane %v8533_v32, 5  ;;  %v2450_v58 = vrot.slane %v8534_v8, 5  ;;  %v4048_v1 = vrot.slane %v9581_v18, 5  ;;  %v8538_v7 = vld [vmem:[#allocation2 + $0xb8] sm:$0xf]  ;;  %v8481_v8 = vld [vmem:[#allocation2 + $0x30] sm:$0xff]  }
 0x24b   : > { %7932 = vmatmul.mubr.msk.bf16.gmra.mrb[8].mxu1 %vm1795_vm5, %v7069_v61  ;;  %7827 = vmatprep.mubr.msk.bf16.mxu0 %vm1795_vm5, %v6952_v33  ;;  %v4045_v47 = vsel %vm9620_vm11, %v4043_v28, %v4044_v20  ;;  %v6938_v61 = vrot.slane %v2318_v2, 9  ;;  %v2445_v59 = vrot.slane %v2443_v41, 4  ;;  %v2440_v4 = vsel %vm9620_vm11, %v2438_v5, %v2439_v34  ;;  %v2321_v60 = vld [vmem:[#allocation2 + $0xb4] sm:$0xe]  ;;  %v8539_v20 = vld [vmem:[#allocation2 + $0xbc] sm:$0x1] }
 0x24c   : > { %7935 = vmatprep.mubr.msk.bf16.mxu1 %vm1795_vm5, %v7070_v45  ;;  %v7073_v35 = vcombine.low %v4042_v23, %v4045_v47  ;;  %v7059_v43 = vrot.slane %v3899_v51, 9  ;;  %v4055_v45 = vrot.slane %v9596_v24, 5  ;;  %v2437_v30 = vsel %vm9620_vm11, %v6937_v27, %v2436_v36  ;;  %v8472_v57 = vld [vmem:[#allocation2 + $0x18] sm:$0xff]   ;;  %v8475_v34 = vld [vmem:[#allocation2 + $0xc] sm:$0xff]   ;;  %v8474_v23 = vld [vmem:[#allocation2 + $0x24] sm:$0xff]  }
 0x24d   : > { %v2447_v12 = vsel %vm9620_vm11, %v2445_v59, %v2446_v38  ;;  %v6953_v37 = vcombine.low %v2437_v30, %v2440_v4  ;;  %v2444_v13 = vsel %vm9620_vm11, %v6938_v61, %v2443_v41  ;;  %v4058_v48 = vrot.slane %v9604_v42, 5  ;;  %v8477_v47 = vld [vmem:[#allocation2 + $0x18] sm:$0xff]   ;;  %v8486_v51 = vld [vmem:[#allocation6 + $0x78] sm:$0xff]   ;;  %v8479_v61 = vld [vmem:[#allocation2 + $0x24] sm:$0xff]  }
 0x24e   : > { %v4057_v29 = vrot.slane %v4055_v45, 4  ;;  %v6954_v11 = vcombine.low %v2444_v13, %v2447_v12  ;;  %v2452_v3 = vrot.slane %v2450_v58, 4  ;;  %v2457_v18 = vrot.slane %v8535_v6, 5  ;;  %v9868_v59 = vld [vmem:[#allocation6 + $0x80] sm:$0xff]   ;;  %v9878_v30 = vld [vmem:[#allocation2 + $0x28] sm:$0xf] }
 0x24f   : > { %v4050_v24 = vrot.slane %v4048_v1, 4  ;;  %v4056_v10 = vsel %vm9620_vm11, %v7059_v43, %v4055_v45  ;;  %v6939_v42 = vrot.slane %v2319_v55, 9  ;;  %v2453_v22 = vrot.slane %v8536_v9, 5  ;;  %v4737_v32 = vld [vmem:[#allocation2 + $0x18] sm:$0xf]  ;;  %v8478_v4 = vld [vmem:[#allocation2 + $0x3c] sm:$0xff]  }
 0x250   : > { %v4059_v49 = vsel %vm9620_vm11, %v4057_v29, %v4058_v48  ;;  %v2459_v63 = vrot.slane %v2457_v18, 4  ;;  %v7058_v14 = vrot.slane %v3898_v62, 9  ;;  %v6940_v46 = vrot.slane %v2320_v0, 9  ;;  %v9870_v38 = vld [vmem:[#allocation2 + $0x1c] sm:$0xf]  ;;  %v8482_v6 = vld [vmem:[#allocation2 + $0x54] sm:$0xff]  }
 0x251   : > { %v7075_v16 = vcombine.low %v4056_v10, %v4059_v49  ;;  %v2460_v25 = vrot.slane %v8537_v26, 5  ;;  %v2454_v36 = vsel %vm9620_vm11, %v2452_v3, %v2453_v22  ;;  %v2464_v56 = vrot.slane %v8538_v7, 5  ;;  %v4740_v45 = vld [vmem:[#allocation2 + $0x24] sm:$0xf]  ;;  %v9882_v62 = vld [vmem:[#allocation2 + $0x20] sm:$0x1] }
 0x252   : > { %7828 = vmatmul.mubr.msk.bf16.gmra.mrb[52].mxu0 %vm1795_vm5, %v6953_v37  ;;  %v2451_v54 = vsel %vm9620_vm11, %v6939_v42, %v2450_v58  ;;  %v2458_v39 = vsel %vm9620_vm11, %v6940_v46, %v2457_v18  ;;  %v6941_v28 = vrot.slane %v2321_v60, 9  ;;  %v2467_v2 = vrot.slane %v8539_v20, 5  ;;  %v8483_v10 = vld [vmem:[#allocation2 + $0x60] sm:$0xff]   ;;  %v4743_v22 = vld [vmem:[#allocation2 + $0x30] sm:$0xf]  ;;  %v8485_v20 = vld [vmem:[#allocation2 + $0x78] sm:$0xff]  }
 0x253   : > { %7936 = vmatmul.mubr.msk.bf16.gmra.mrb[12].mxu1 %vm1795_vm5, %v7071_v50  ;;  %7831 = vmatprep.mubr.msk.bf16.mxu0 %vm1795_vm5, %v6954_v11  ;;  %v4051_v50 = vrot.slane %v9589_v15, 5  ;;  %v2461_v52 = vsel %vm9620_vm11, %v2459_v63, %v2460_v25  ;;  %v4049_v15 = vsel %vm9620_vm11, %v7058_v14, %v4048_v1  ;;  %v6955_v33 = vcombine.low %v2451_v54, %v2454_v36  ;;  %v9891_v14 = vld [vmem:[#allocation2 + $0x34] sm:$0xf]  ;;  %v9894_v36 = vld [vmem:[#allocation2 + $0x40] sm:$0xf] }
 0x254   : > { %7939 = vmatprep.mubr.msk.bf16.mxu1 %vm1795_vm5, %v7072_v19  ;;  %v6956_v19 = vcombine.low %v2458_v39, %v2461_v52  ;;  %v2466_v5 = vrot.slane %v2464_v56, 4  ;;  %v2465_v41 = vsel %vm9620_vm11, %v6941_v28, %v2464_v56  ;;  %v4786_v58 = vshrl.u32 %v4737_v32, 16  ;;  %v9896_v56 = vld [vmem:[#allocation2 + $0x2c] sm:$0x1] }
 0x255   : > { %v4052_v21 = vsel %vm9620_vm11, %v4050_v24, %v4051_v50  ;;  %v4789_v12 = vshll.u32 %v4737_v32, 16  ;;  %v4795_v1 = vshll.u32 %v9870_v38, 16  ;;  %v4799_v43 = vshrl.u32 %v9870_v38, 16  ;;  %v4746_v50 = vld [vmem:[#allocation2 + $0x3c] sm:$0xf]  ;;  %v8484_v28 = vld [vmem:[#allocation2 + $0x6c] sm:$0xff]  }
 0x256   : > { %v7074_v17 = vcombine.low %v4049_v15, %v4052_v21  ;;  %v2468_v31 = vsel %vm9620_vm11, %v2466_v5, %v2467_v2  ;;  %v4788_v37 = vrot.slane %v4786_v58, 4  ;;  %v4810_v48 = vshrl.u32 %v4740_v45, 16  ;;  %v9922_v58 = vld [vmem:[#allocation2 + $0x44] sm:$0x1] }
 0x257   : > { %v6957_v27 = vcombine.low %v2465_v41, %v2468_v31  ;;  %v4791_v13 = vrot.slane %v4789_v12, 5  ;;  %v9880_v55 = vrot.slane %v4795_v1, 5  ;;  %v4801_v29 = vrot.slane %v4799_v43, 4 }
 0x258   : > { %v4813_v11 = vshll.u32 %v4740_v45, 16  ;;  %v4819_v3 = vshll.u32 %v9878_v30, 16  ;;  %v4823_v0 = vshrl.u32 %v9878_v30, 16  ;;  %v4805_v49 = vshll.u32 %v9882_v62, 16 }
 0x259   : > { %v4792_v18 = vor.u32 %v4791_v13, %v4788_v37  ;;  %v4802_v24 = vor.u32 %v4801_v29, %v9880_v55  ;;  %v4812_v42 = vrot.slane %v4810_v48, 4  ;;  %v4834_v25 = vshrl.u32 %v4743_v22, 16 }
 0x25a   : > { %7832 = vmatmul.mubr.msk.bf16.gmra.mrb[56].mxu0 %vm1795_vm5, %v6955_v33  ;;  %v4815_v9 = vrot.slane %v4813_v11, 5  ;;  %v4825_v63 = vrot.slane %v4823_v0, 4  ;;  %v4807_v7 = vrot.slane %v4805_v49, 5  ;;  %v4837_v52 = vshll.u32 %v4743_v22, 16  ;;  %v9900_v33 = vld [vmem:[#allocation2 + $0x38] sm:$0x1] }
 0x25b   : > { %7940 = vmatmul.mubr.msk.bf16.gmra.mrb[16].mxu1 %vm1795_vm5, %v7073_v35  ;;  %7835 = vmatprep.mubr.msk.bf16.mxu0 %vm1795_vm5, %v6956_v19  ;;  %v8476_v35 = vld [vmem:[#allocation2 + $0x30] sm:$0xff]   ;;  %v4793_v46 = vrot.slane %v4792_v18, 4  ;;  %v4803_v26 = vrot.slane %v4802_v24, 4  ;;  %v4843_v54 = vshll.u32 %v9891_v14, 16  ;;  %v4847_v39 = vshrl.u32 %v9891_v14, 16  ;;  %v8487_v49 = vld [vmem:[#allocation2 + $0x84] sm:$0xff]  }
 0x25c   : > { %7943 = vmatprep.mubr.msk.bf16.mxu1 %vm1795_vm5, %v7074_v17  ;;  %v4816_v21 = vor.u32 %v4815_v9, %v4812_v42  ;;  %v4858_v60 = vshrl.u32 %v4746_v50, 16  ;;  %v4861_v17 = vshll.u32 %v4746_v50, 16  ;;  %v4867_v19 = vshll.u32 %v9894_v36, 16  ;;  %v4752_v11 = vld [vmem:[#allocation2 + $0x54] sm:$0xf] }
 0x25d   : > { %v4871_v5 = vshrl.u32 %v9894_v36, 16  ;;  %v4798_v2 = vsel %vm8940_vm4, %v4793_v46, %v9880_v55  ;;  %v4808_v31 = vsel %vm8940_vm4, %v4803_v26, %v4807_v7  ;;  %v4829_v41 = vshll.u32 %v9896_v56, 16  ;;  %v9946_v50 = vld [vmem:[#allocation2 + $0x50] sm:$0x1] }
 0x25e   : > { %v4849_v32 = vrot.slane %v4847_v39, 4  ;;  %v9924_v12 = vrot.slane %v4867_v19, 5  ;;  %v9927_v13 = vcombine.low %v4798_v2, %v4808_v31  ;;  %v4877_v24 = vshll.u32 %v9922_v58, 16 }
 0x25f   : > { %v4873_v1 = vrot.slane %v4871_v5, 4  ;;  %v4831_v45 = vrot.slane %v4829_v41, 5  ;;  %v4906_v26 = vshrl.u32 %v4752_v11, 16  ;;  %v4901_v31 = vshll.u32 %v9946_v50, 16  ;;  %v4758_v41 = vld [vmem:[#allocation2 + $0x6c] sm:$0xf] }
 0x260   : > { %v4879_v2 = vrot.slane %v4877_v24, 5  ;;  %v8490_v24 = vld [vmem:[#allocation2 + $0xa8] sm:$0xff]  }
 0x261   : > { %v4874_v9 = vor.u32 %v4873_v1, %v9924_v12 }
 0x262   : > { %7836 = vmatmul.mubr.msk.bf16.gmra.mrb[60].mxu0 %vm1795_vm5, %v6957_v27  ;;  %v4836_v27 = vrot.slane %v4834_v25, 4  ;;  %v4909_v25 = vshll.u32 %v4752_v11, 16 }
 0x263   : > { %7944 = vmatmul.mubr.msk.bf16.gmra.mrb[20].mxu1 %vm1795_vm5, %v7075_v16  ;;  %7843 = vmatprep.mubr.msk.bf16.mxu0 %vm1795_vm5, %v8475_v34  ;;  %v9889_v16 = vrot.slane %v4819_v3, 5  ;;  %v9911_v34 = vrot.slane %v4816_v21, 4  ;;  %v9936_v3 = vld [vmem:[#allocation2 + $0x58] sm:$0xf]  ;;  %v8488_v21 = vld [vmem:[#allocation2 + $0x90] sm:$0xff]  }
 0x264   : > { %7951 = vmatprep.mubr.msk.bf16.mxu1 %vm1795_vm5, %v8472_v57  ;;  %v4749_v57 = vld [vmem:[#allocation2 + $0x48] sm:$0xf]  ;;  %v4915_v7 = vshll.u32 %v9936_v3, 16 }
 0x265   : > { %v4826_v15 = vor.u32 %v4825_v63, %v9889_v16  ;;  %v4882_v43 = vshrl.u32 %v4749_v57, 16  ;;  %v4822_v55 = vsel %vm8940_vm4, %v9911_v34, %v9889_v16  ;;  %v9944_v63 = vld [vmem:[#allocation2 + $0x64] sm:$0xf]  ;;  %v4911_v34 = vrot.slane %v4909_v25, 5  ;;  %v4761_v25 = vld [vmem:[#allocation2 + $0x78] sm:$0xf] }
 0x266   : > { %v4939_v19 = vshll.u32 %v9944_v63, 16  ;;  %v4943_v5 = vshrl.u32 %v9944_v63, 16 }
 0x267   : > { %v4884_v22 = vrot.slane %v4882_v43, 4 }
 0x268   : > { %v9962_v1 = vrot.slane %v4939_v19, 5  ;;  %v4945_v43 = vrot.slane %v4943_v5, 4  ;;  %v4981_v19 = vshll.u32 %v4761_v25, 16 }
 0x26a   : > { %7844 = vmatmul.mubr.msk.bf16.vlgmr.msra.gmra.mrb[32].mxu0 %vm1795_vm5, %v8477_v47  ;;  %v9913_v47 = vrot.slane %v4843_v54, 5  ;;  %v4919_v54 = vshrl.u32 %v9936_v3, 16 }
 0x26b   : > { %7952 = vmatmul.mubr.msk.bf16.vlgmr.msra.gmra.mrb[24].mxu1 %vm1795_vm5, %v8474_v23  ;;  %7847 = vmatprep.mubr.msk.bf16.mxu0 %vm1795_vm5, %v8479_v61  ;;  %v4839_v23 = vrot.slane %v4837_v52, 5  ;;  %v9919_v61 = vrot.slane %v4826_v15, 4 }
 0x26c   : > { %7984 = vmatpush3.bf16.msra.mxu1 %v9689_v40  ;;  %7955 = vmatprep.mubr.msk.bf16.mxu1 %vm1795_vm5, %v8476_v35  ;;  %v8480_v40 = vld [vmem:[#allocation2 + $0x48] sm:$0xff]   ;;  %v4850_v18 = vor.u32 %v4849_v32, %v9913_v47  ;;  %v4921_v32 = vrot.slane %v4919_v54, 4 }
 0x26d   : > { %7985 = vmatprep.subr.bf16.mxu1 %v8486_v51  ;;  %v9916_v35 = vld [vmem:[#allocation2 + $0x4c] sm:$0xf]  ;;  %v4832_v0 = vsel %vm8940_vm4, %v9919_v61, %v4831_v45  ;;  %v4957_v45 = vshll.u32 %v4758_v41, 16 }
 0x26e   : > { %v4891_v37 = vshll.u32 %v9916_v35, 16  ;;  %v4895_v48 = vshrl.u32 %v9916_v35, 16 }
 0x270   : > { %7986 = vmatpush3.bf16.msra.mxu1 %v8486_v51  ;;  %v4853_v51 = vshll.u32 %v9900_v33, 16  ;;  %v9948_v46 = vrot.slane %v4891_v37, 5  ;;  %v4897_v52 = vrot.slane %v4895_v48, 4  ;;  %v8489_v37 = vld [vmem:[#allocation2 + $0x9c] sm:$0xff]   ;;  %v9964_v48 = vcombine.low %v4822_v55, %v4832_v0 }
 0x271   : > { %8019 = vmatprep.subr.bf16.mxu1 %v9868_v59  ;;  %v4903_v0 = vrot.slane %v4901_v31, 5 }
 0x272   : > { %7848 = vmatmul.mubr.msk.bf16.gmra.mrb[36].mxu0 %vm1795_vm5, %v8481_v8  ;;  %v4863_v8 = vrot.slane %v4861_v17, 5  ;;  %v9933_v29 = vrot.slane %v4853_v51, 5  ;;  %v4851_v17 = vrot.slane %v4850_v18, 4  ;;  %v9959_v51 = vld [vmem:[#allocation2 + $0x70] sm:$0xf]  ;;  %v4898_v61 = vor.u32 %v4897_v52, %v9948_v46 }
 0x273   : > { %7956 = vmatmul.mubr.msk.bf16.gmra.mrb[28].mxu1 %vm1795_vm5, %v8478_v4  ;;  %v4860_v4 = vrot.slane %v4858_v60, 4  ;;  %v4967_v18 = vshrl.u32 %v9959_v51, 16  ;;  %v4959_v52 = vrot.slane %v4957_v45, 5  ;;  %v10019_v45 = vld [vmem:[#allocation2 + $0x80] sm:$0x1] }
 0x274   : > { %7959 = vmatprep.mubr.msk.bf16.mxu1 %vm1795_vm5, %v8480_v40  ;;  %v4885_v40 = vshll.u32 %v4749_v57, 16  ;;  %v4908_v57 = vrot.slane %v4906_v26, 4 }
 0x275   : > { %v4864_v42 = vor.u32 %v4863_v8, %v4860_v4 }
 0x276   : > { %v4887_v16 = vrot.slane %v4885_v40, 5  ;;  %v4954_v40 = vshrl.u32 %v4758_v41, 16 }
 0x27b   : > { %7960 = vmatmul.mubr.msk.bf16.gmra.mrb[0].mxu1 %vm1795_vm5, %v8482_v6  ;;  %v4840_v6 = vor.u32 %v4839_v23, %v4836_v27  ;;  %v4888_v27 = vor.u32 %v4887_v16, %v4884_v22  ;;  %v9957_v23 = vrot.slane %v4915_v7, 5  ;;  %v4899_v22 = vrot.slane %v4898_v61, 4  ;;  %v9984_v7 = vld [vmem:[#allocation2 + $0x7c] sm:$0xf] }
 0x27c   : > { %7963 = vmatprep.mubr.msk.bf16.mxu1 %vm1795_vm5, %v8483_v10  ;;  %v4755_v10 = vld [vmem:[#allocation2 + $0x60] sm:$0xf]  ;;  %v4912_v16 = vor.u32 %v4911_v34, %v4908_v57  ;;  %v4987_v5 = vshll.u32 %v9984_v7, 16 }
 0x27d   : > { %v4930_v15 = vshrl.u32 %v4755_v10, 16  ;;  %v4933_v39 = vshll.u32 %v4755_v10, 16  ;;  %v4841_v60 = vrot.slane %v4840_v6, 4  ;;  %v4963_v6 = vshll.u32 %v9959_v51, 16 }
 0x27e   : > { %v4856_v10 = vsel %vm8940_vm4, %v4851_v17, %v9933_v29  ;;  %v4922_v26 = vor.u32 %v4921_v32, %v9957_v23  ;;  %v4978_v17 = vshrl.u32 %v4761_v25, 16  ;;  %v10000_v31 = vrot.slane %v4912_v16, 4  ;;  %v10010_v32 = vld [vmem:[#allocation2 + $0x74] sm:$0x1]  ;;  %v10042_v16 = vld [vmem:[#allocation2 + $0x88] sm:$0xf] }
 0x27f   : > { %v4932_v4 = vrot.slane %v4930_v15, 4  ;;  %v4935_v8 = vrot.slane %v4933_v39, 5  ;;  %v4846_v11 = vsel %vm8940_vm4, %v4841_v60, %v9913_v47  ;;  %v9981_v47 = vld [vmem:[#allocation2 + $0x68] sm:$0x1]  ;;  %v9991_v39 = vrot.slane %v4963_v6, 5 }
 0x280   : > { %v4949_v15 = vshll.u32 %v9981_v47, 16  ;;  %v4969_v60 = vrot.slane %v4967_v18, 4  ;;  %v10002_v41 = vrot.slane %v4922_v26, 4  ;;  %v4904_v57 = vsel %vm8940_vm4, %v4899_v22, %v4903_v0 }
 0x281   : > { %v4936_v29 = vor.u32 %v4935_v8, %v4932_v4  ;;  %v10025_v6 = vrot.slane %v4981_v19, 5  ;;  %v10027_v18 = vrot.slane %v4987_v5, 5  ;;  %v5558_v5 = vrot.slane %v9900_v33, 5  ;;  %v8495_v33 = vld [vmem:[#allocation6 + $0x88] sm:$0xff]  }
 0x282   : > { %v5562_v26 = vrot.slane %v9894_v36, 5  ;;  %v5565_v25 = vrot.slane %v9922_v58, 5 }
 0x283   : > { %7964 = vmatmul.mubr.msk.bf16.gmra.mrb[4].mxu1 %vm1795_vm5, %v8484_v28  ;;  %v4865_v28 = vrot.slane %v4864_v42, 4  ;;  %v9979_v42 = vld [vmem:[#allocation2 + $0x5c] sm:$0x1]  ;;  %v10006_v34 = vrot.slane %v4936_v29, 4 }
 0x284   : > { %7967 = vmatprep.mubr.msk.bf16.mxu1 %vm1795_vm5, %v8485_v20  ;;  %v4875_v20 = vrot.slane %v4874_v9, 4  ;;  %v4889_v9 = vrot.slane %v4888_v27, 4  ;;  %v4925_v54 = vshll.u32 %v9979_v42, 16  ;;  %v8491_v27 = vld [vmem:[#allocation2 + $0xb4] sm:$0xff]  }
 0x286   : > { %v4880_v55 = vsel %vm8940_vm4, %v4875_v20, %v4879_v2  ;;  %v9995_v20 = vcombine.low %v4846_v11, %v4856_v10  ;;  %v4894_v2 = vsel %vm8940_vm4, %v4889_v9, %v9948_v46  ;;  %v10016_v46 = vrot.slane %v4949_v15, 5  ;;  %v5477_v10 = vld [vmem:[#allocation2 + $0x30] sm:$0xe] }
 0x287   : > { %v10023_v11 = vrot.slane %v4978_v17, 4  ;;  %v5555_v17 = vrot.slane %v9891_v14, 5  ;;  %v8493_v14 = vld [vmem:[#allocation2 + $0xcc] sm:$0xff]   ;;  %v5569_v9 = vrot.slane %v9916_v35, 5 }
 0x289   : > { %v5557_v19 = vrot.slane %v5555_v17, 4  ;;  %v5571_v58 = vrot.slane %v5569_v9, 4 }
 0x28b   : > { %7968 = vmatmul.mubr.msk.bf16.gmra.mrb[8].mxu1 %vm1795_vm5, %v8487_v49  ;;  %v4870_v49 = vsel %vm8940_vm4, %v4865_v28, %v9924_v12  ;;  %v4946_v12 = vor.u32 %v4945_v43, %v9962_v1  ;;  %v4991_v28 = vshrl.u32 %v9984_v7, 16  ;;  %v10014_v43 = vrot.slane %v4925_v54, 5 }
 0x28c   : > { %7971 = vmatprep.mubr.msk.bf16.mxu1 %vm1795_vm5, %v8488_v21  ;;  %v4956_v21 = vrot.slane %v4954_v40, 4  ;;  %v10012_v8 = vcombine.low %v4870_v49, %v4880_v55  ;;  %v4970_v40 = vor.u32 %v4969_v60, %v9991_v39  ;;  %v8492_v49 = vld [vmem:[#allocation2 + $0xc0] sm:$0xff]   ;;  %v10031_v55 = vcombine.low %v4894_v2, %v4904_v57  ;;  %v5480_v57 = vld [vmem:[#allocation2 + $0x54] sm:$0xe]  ;;  %v10153_v2 = vld [vmem:[#allocation2 + $0x98] sm:$0x1] }
 0x28d   : > { %v10008_v61 = vrot.slane %v4946_v12, 4  ;;  %v7164_v60 = vrot.slane %v5477_v10, 9  ;;  %v7167_v22 = vrot.slane %v5480_v57, 9  ;;  %v5564_v10 = vrot.slane %v5562_v26, 4  ;;  %v5483_v57 = vld [vmem:[#allocation2 + $0x78] sm:$0xe] }
 0x28e   : > { %v4960_v4 = vor.u32 %v4959_v52, %v4956_v21  ;;  %v10056_v21 = vld [vmem:[#allocation2 + $0x90] sm:$0xf]  ;;  %v5478_v52 = vld [vmem:[#allocation2 + $0x3c] sm:$0xe]  ;;  %v10059_v54 = vrot.slane %v4970_v40, 4 }
 0x28f   : > { %v10074_v12 = vsel %vm9620_vm11, %v7164_v60, %v5555_v17  ;;  %v5481_v40 = vld [vmem:[#allocation2 + $0x60] sm:$0xe]  ;;  %v5572_v60 = vrot.slane %v9946_v50, 5  ;;  %v5576_v17 = vrot.slane %v9936_v3, 5  ;;  %v10099_v50 = vsel %vm9620_vm11, %v5564_v10, %v5565_v25 }
 0x290   : > { %v10053_v29 = vrot.slane %v4960_v4, 4  ;;  %v5583_v25 = vrot.slane %v9944_v63, 5  ;;  %v5590_v10 = vrot.slane %v9959_v51, 5  ;;  %v5597_v51 = vrot.slane %v9984_v7, 5 }
 0x291   : > { %v5578_v3 = vrot.slane %v5576_v17, 4 }
 0x292   : > { %v5599_v4 = vrot.slane %v5597_v51, 4 }
 0x293   : > { %7972 = vmatmul.mubr.msk.bf16.gmra.mrb[12].mxu1 %vm1795_vm5, %v8489_v37  ;;  %v10021_v37 = vld [vmem:[#allocation2 + $0x84] sm:$0xf] }
 0x294   : > { %7975 = vmatprep.mubr.msk.bf16.mxu1 %vm1795_vm5, %v8490_v24  ;;  %v10029_v24 = vrot.slane %v4991_v28, 4 }
 0x29b   : > { %7976 = vmatmul.mubr.msk.bf16.gmra.mrb[16].mxu1 %vm1795_vm5, %v8491_v27  ;;  %v5479_v27 = vld [vmem:[#allocation2 + $0x48] sm:$0xe] }
 0x29c   : > { %7979 = vmatprep.mubr.msk.bf16.mxu1 %vm1795_vm5, %v8492_v49  ;;  %v7165_v49 = vrot.slane %v5478_v52, 9  ;;  %v7166_v0 = vrot.slane %v5479_v27, 9  ;;  %v10082_v52 = vsel %vm9620_vm11, %v5557_v19, %v5558_v5  ;;  %v5482_v27 = vld [vmem:[#allocation2 + $0x6c] sm:$0xe]  ;;  %v5579_v19 = vrot.slane %v9979_v42, 5 }
 0x29d   : > { %v7168_v5 = vrot.slane %v5481_v40, 9  ;;  %v7169_v40 = vrot.slane %v5482_v27, 9  ;;  %v5593_v27 = vrot.slane %v10010_v32, 5  ;;  %v10135_v42 = vld [vmem:[#allocation2 + $0xa0] sm:$0xf] }
 0x29e   : > { %v10090_v36 = vsel %vm9620_vm11, %v7165_v49, %v5562_v26  ;;  %v10094_v35 = vsel %vm9620_vm11, %v7166_v0, %v5569_v9  ;;  %v10108_v0 = vsel %vm9620_vm11, %v5571_v58, %v5572_v60  ;;  %v10112_v9 = vsel %vm9620_vm11, %v7167_v22, %v5576_v17  ;;  %v5484_v49 = vld [vmem:[#allocation2 + $0x84] sm:$0xe]  ;;  %v10131_v58 = vld [vmem:[#allocation2 + $0x94] sm:$0xf]  ;;  %v5485_v26 = vld [vmem:[#allocation2 + $0x90] sm:$0xe] }
 0x29f   : > { %10885 = vst [vmem:[#allocation15_spill] sm:$0xff] %v10112_v9  ;;  %v10128_v63 = vsel %vm9620_vm11, %v7168_v5, %v5583_v25  ;;  %v5585_v60 = vrot.slane %v5583_v25, 4  ;;  %v5586_v17 = vrot.slane %v9981_v47, 5  ;;  %v10143_v5 = vsel %vm9620_vm11, %v7169_v40, %v5590_v10  ;;  %v10155_v40 = vld [vmem:[#allocation2 + $0xa4] sm:$0x1] }
 0x2a0   : > { %10887 = vst [vmem:[#allocation16_spill] sm:$0xff] %v10128_v63  ;;  %10889 = vst [vmem:[#allocation19_spill] sm:$0xff] %v10143_v5  ;;  %v7171_v25 = vrot.slane %v5484_v49, 9  ;;  %v5604_v47 = vrot.slane %v10042_v16, 5  ;;  %v10220_v9 = vld [vmem:[#allocation2 + $0xc8] sm:$0x1] }
 0x2a1   : > { %v10139_v22 = vsel %vm9620_vm11, %v5585_v60, %v5586_v17  ;;  %v5600_v60 = vrot.slane %v10019_v45, 5  ;;  %v5486_v17 = vld [vmem:[#allocation2 + $0x9c] sm:$0xe] }
 0x2a2   : > { %10888 = vst [vmem:[#allocation18_spill] sm:$0xff] %v10139_v22  ;;  %v10174_v15 = vsel %vm9620_vm11, %v7171_v25, %v5604_v47  ;;  %v7173_v25 = vrot.slane %v5486_v17, 9  ;;  %v10202_v22 = vld [vmem:[#allocation2 + $0xc4] sm:$0xf] }
 0x2a3   : > { %7980 = vmatmul.mubr.msk.bf16.gmra.mrb[20].mxu1 %vm1795_vm5, %v8493_v14  ;;  %v10122_v14 = vld [vmem:[#allocation2 + $0x8c] sm:$0x1]  ;;  %10893 = vst [vmem:[#allocation23_spill] sm:$0xff] %v10174_v15  ;;  %v5489_v15 = vld [vmem:[#allocation2 + $0xc0] sm:$0xe] }
 0x2a4   : > { %7987 = vmatprep.mubr.msk.bf16.mxu1 %vm1795_vm5, %v9927_v13  ;;  %v10119_v13 = vsel %vm9620_vm11, %v5578_v3, %v5579_v19  ;;  %v5592_v3 = vrot.slane %v5590_v10, 4  ;;  %v7170_v19 = vrot.slane %v5483_v57, 9  ;;  %v5606_v57 = vrot.slane %v5604_v47, 4  ;;  %v5488_v47 = vld [vmem:[#allocation2 + $0xb4] sm:$0xe] }
 0x2a5   : > { %10886 = vst [vmem:[#allocation17_spill] sm:$0xff] %v10119_v13  ;;  %v5607_v28 = vrot.slane %v10122_v14, 5  ;;  %v7172_v10 = vrot.slane %v5485_v26, 9  ;;  %v5618_v26 = vrot.slane %v10135_v42, 5 }
 0x2a6   : > { %v10150_v7 = vsel %vm9620_vm11, %v5592_v3, %v5593_v27  ;;  %v10161_v49 = vsel %vm9620_vm11, %v7170_v19, %v5597_v51  ;;  %v10166_v3 = vld [vmem:[#allocation2 + $0xac] sm:$0xf]  ;;  %v10170_v27 = vsel %vm9620_vm11, %v5599_v4, %v5600_v60  ;;  %v5611_v19 = vrot.slane %v10131_v58, 5  ;;  %v5487_v51 = vld [vmem:[#allocation2 + $0xa8] sm:$0xe] }
 0x2a7   : > { %10890 = vst [vmem:[#allocation20_spill] sm:$0xff] %v10150_v7  ;;  %10891 = vst [vmem:[#allocation21_spill] sm:$0xff] %v10161_v49  ;;  %v10186_v4 = vsel %vm9620_vm11, %v5606_v57, %v5607_v28  ;;  %v10189_v60 = vld [vmem:[#allocation2 + $0xb0] sm:$0x1]  ;;  %v5614_v7 = vrot.slane %v10153_v2, 5  ;;  %v5620_v28 = vrot.slane %v5618_v26, 4 }
 0x2a8   : > { %10892 = vst [vmem:[#allocation22_spill] sm:$0xff] %v10170_v27  ;;  %10894 = vst [vmem:[#allocation24_spill] sm:$0xff] %v10186_v4  ;;  %v5613_v5 = vrot.slane %v5611_v19, 4  ;;  %v10198_v27 = vld [vmem:[#allocation2 + $0xbc] sm:$0x1]  ;;  %v5621_v57 = vrot.slane %v10155_v40, 5 }
 0x2a9   : > { %v7174_v17 = vrot.slane %v5487_v51, 9  ;;  %v5625_v49 = vrot.slane %v10166_v3, 5  ;;  %v10229_v51 = vld [vmem:[#allocation2 + $0xd0] sm:$0xf]  ;;  %v10919_v53 = vld [vmem:[#allocation15_spill] sm:$0xff] }
 0x2aa   : > { %v10217_v63 = vsel %vm9620_vm11, %v5620_v28, %v5621_v57 }
 0x2ab   : > { %7988 = vmatmul.mubr.msk.bf16.vlgmr.msra.gmra.mrb[24].mxu1 %vm1795_vm5, %v9964_v48  ;;  %v10180_v48 = vld [vmem:[#allocation2 + $0xb8] sm:$0xf]  ;;  %10897 = vst [vmem:[#allocation27_spill] sm:$0xff] %v10217_v63  ;;  %v5627_v13 = vrot.slane %v5625_v49, 4 }
 0x2ac   : > { %8020 = vmatpush3.bf16.msra.mxu1 %v9868_v59  ;;  %7991 = vmatprep.mubr.msk.bf16.mxu1 %vm1795_vm5, %v9995_v20  ;;  %v10195_v20 = vsel %vm9620_vm11, %v7172_v10, %v5611_v19  ;;  %v10206_v59 = vsel %vm9620_vm11, %v5613_v5, %v5614_v7  ;;  %v10210_v10 = vsel %vm9620_vm11, %v7173_v25, %v5618_v26  ;;  %v7175_v19 = vrot.slane %v5488_v47, 9  ;;  %v5490_v7 = vld [vmem:[#allocation2 + $0xcc] sm:$0xe] }
 0x2ad   : > { %8021 = vmatprep.subr.bf16.mxu1 %v8495_v33  ;;  %10895 = vst [vmem:[#allocation25_spill] sm:$0xff] %v10206_v59  ;;  %10896 = vst [vmem:[#allocation26_spill] sm:$0xff] %v10210_v10  ;;  %v5632_v4 = vrot.slane %v10180_v48, 5  ;;  %v5628_v5 = vrot.slane %v10189_v60, 5  ;;  %v10226_v26 = vsel %vm9620_vm11, %v7174_v17, %v5625_v49  ;;  %v5635_v47 = vrot.slane %v10198_v27, 5 }
 0x2ae   : > { %10898 = vst [vmem:[#allocation28_spill] sm:$0xff] %v10226_v26  ;;  %v7176_v59 = vrot.slane %v5489_v15, 9  ;;  %v5639_v25 = vrot.slane %v10202_v22, 5  ;;  %v10242_v49 = vld [vmem:[#allocation2 + $0xd4] sm:$0x1]  ;;  %v5035_v17 = vshll.u32 %v10131_v58, 16 }
 0x2af   : > { %v10233_v28 = vsel %vm9620_vm11, %v5627_v13, %v5628_v5  ;;  %v10237_v57 = vsel %vm9620_vm11, %v7175_v19, %v5632_v4  ;;  %v7177_v13 = vrot.slane %v5490_v7, 9  ;;  %v5646_v5 = vrot.slane %v10229_v51, 5 }
 0x2b0   : > { %8022 = vmatpush3.bf16.msra.mxu1 %v8495_v33  ;;  %v5634_v33 = vrot.slane %v5632_v4, 4  ;;  %10899 = vst [vmem:[#allocation29_spill] sm:$0xff] %v10233_v28  ;;  %10900 = vst [vmem:[#allocation30_spill] sm:$0xff] %v10237_v57  ;;  %v5641_v4 = vrot.slane %v5639_v25, 4  ;;  %v5649_v19 = vrot.slane %v10242_v49, 5  ;;  %v5039_v28 = vshrl.u32 %v10131_v58, 16 }
 0x2b1   : > { %v10261_v7 = vsel %vm9620_vm11, %v7177_v13, %v5646_v5  ;;  %v10903_v26 = vshll.u32 %v10021_v37, 16  ;;  %v10904_v58 = vshll.u32 %v10042_v16, 16  ;;  %v10905_v13 = vshrl.u32 %v10042_v16, 16 }
 0x2b2   : > { %v10248_v63 = vsel %vm9620_vm11, %v5634_v33, %v5635_v47  ;;  %v5648_v33 = vrot.slane %v5646_v5, 4  ;;  %v10902_v47 = vshrl.u32 %v10021_v37, 16 }
 0x2b3   : > { %7992 = vmatmul.mubr.msk.bf16.gmra.mrb[28].mxu1 %vm1795_vm5, %v10012_v8  ;;  %10901 = vst [vmem:[#allocation31_spill] sm:$0xff] %v10248_v63  ;;  %v5642_v8 = vrot.slane %v10220_v9, 5  ;;  %v5007_v15 = vrot.slane %v10903_v26, 5  ;;  %v10269_v63 = vsel %vm9620_vm11, %v7176_v59, %v5639_v25  ;;  %v10277_v10 = vrot.slane %v10904_v58, 5 }
 0x2b4   : > { %7995 = vmatprep.mubr.msk.bf16.mxu1 %vm1795_vm5, %v10031_v55  ;;  %v5004_v55 = vrot.slane %v10902_v47, 4  ;;  %v5017_v5 = vrot.slane %v10905_v13, 4  ;;  %v10285_v37 = vsel %vm9620_vm11, %v5648_v33, %v5649_v19  ;;  %v10906_v59 = vshll.u32 %v10010_v32, 16 }
 0x2b5   : > { %v10273_v57 = vsel %vm9620_vm11, %v5641_v4, %v5642_v8  ;;  %v10907_v26 = vshrl.u32 %v10056_v21, 16  ;;  %v10908_v8 = vshll.u32 %v10056_v21, 16  ;;  %v7193_v16 = vcombine.low %v10261_v7, %v10285_v37 }
 0x2b6   : > { %v7192_v47 = vcombine.low %v10269_v63, %v10273_v57  ;;  %v4975_v25 = vrot.slane %v10906_v59, 5  ;;  %v10909_v13 = vsel %vm8940_vm4, %v10002_v41, %v10014_v43  ;;  %v10910_v32 = vsel %vm8940_vm4, %v10000_v31, %v9957_v23  ;;  %v4770_v43 = vld [vmem:[#allocation2 + $0x9c] sm:$0xf] }
 0x2b7   : > { %v5028_v4 = vrot.slane %v10907_v26, 4  ;;  %v5031_v58 = vrot.slane %v10908_v8, 5  ;;  %v7133_v19 = vcombine.low %v10910_v32, %v10909_v13  ;;  %v10911_v21 = vsel %vm8940_vm4, %v10008_v61, %v10016_v46 }
 0x2b8   : > { %v10912_v33 = vsel %vm8940_vm4, %v10006_v34, %v9962_v1  ;;  %v10315_v26 = vrot.slane %v5035_v17, 5  ;;  %v5041_v41 = vrot.slane %v5039_v28, 4  ;;  %v4966_v23 = vsel %vm8940_vm4, %v10053_v29, %v9991_v39  ;;  %v4773_v17 = vld [vmem:[#allocation2 + $0xa8] sm:$0xf] }
 0x2b9   : > { %v7134_v59 = vcombine.low %v10912_v33, %v10911_v21  ;;  %v4976_v31 = vsel %vm8940_vm4, %v10059_v54, %v4975_v25  ;;  %v10913_v61 = vor.u32 %v10025_v6, %v10023_v11  ;;  %v10914_v1 = vshll.u32 %v10019_v45, 16 }
 0x2ba   : > { %v10915_v28 = vor.u32 %v10029_v24, %v10027_v18  ;;  %v5008_v13 = vor.u32 %v5007_v15, %v5004_v55  ;;  %v5018_v39 = vor.u32 %v5017_v5, %v10277_v10  ;;  %v5021_v29 = vshll.u32 %v10122_v14, 16 }
 0x2bb   : > { %v4985_v46 = vrot.slane %v10913_v61, 4  ;;  %v4999_v34 = vrot.slane %v10914_v1, 5  ;;  %7996 = vmatmul.mubr.msk.bf16.gmra.mrb[0].mxu1 %vm1795_vm5, %v7133_v19  ;;  %v5032_v54 = vor.u32 %v5031_v58, %v5028_v4  ;;  %v5050_v11 = vshrl.u32 %v4770_v43, 16 }
 0x2bc   : > { %v4995_v8 = vrot.slane %v10915_v28, 4  ;;  %7999 = vmatprep.mubr.msk.bf16.mxu1 %vm1795_vm5, %v7134_v59  ;;  %v5053_v6 = vshll.u32 %v4770_v43, 16  ;;  %v5059_v45 = vshll.u32 %v10135_v42, 16  ;;  %v5042_v25 = vor.u32 %v5041_v41, %v10315_v26  ;;  %v4776_v28 = vld [vmem:[#allocation2 + $0xb4] sm:$0xf] }
 0x2bd   : > { %v5063_v32 = vshrl.u32 %v10135_v42, 16  ;;  %v5074_v19 = vshrl.u32 %v4773_v17, 16  ;;  %v5077_v21 = vshll.u32 %v4773_v17, 16  ;;  %v7135_v24 = vcombine.low %v4966_v23, %v4976_v31 }
 0x2be   : > { %v4990_v15 = vsel %vm8940_vm4, %v4985_v46, %v10027_v18  ;;  %v5083_v14 = vshll.u32 %v10166_v3, 16  ;;  %v5087_v55 = vshrl.u32 %v10166_v3, 16  ;;  %v5000_v5 = vsel %vm8940_vm4, %v4995_v8, %v4999_v34 }
 0x2bf   : > { %v5009_v4 = vrot.slane %v5008_v13, 4  ;;  %v5019_v58 = vrot.slane %v5018_v39, 4  ;;  %v5045_v33 = vshll.u32 %v10153_v2, 16  ;;  %v5033_v59 = vrot.slane %v5032_v54, 4  ;;  %v4779_v54 = vld [vmem:[#allocation2 + $0xc0] sm:$0xf] }
 0x2c0   : > { %v5052_v42 = vrot.slane %v5050_v11, 4  ;;  %v5055_v41 = vrot.slane %v5053_v6, 5  ;;  %v10347_v43 = vrot.slane %v5059_v45, 5  ;;  %v5043_v23 = vrot.slane %v5042_v25, 4 }
 0x2c1   : > { %v5065_v31 = vrot.slane %v5063_v32, 4  ;;  %v5076_v61 = vrot.slane %v5074_v19, 4  ;;  %v5079_v18 = vrot.slane %v5077_v21, 5  ;;  %v7136_v46 = vcombine.low %v4990_v15, %v5000_v5 }
 0x2c2   : > { %v5023_v1 = vrot.slane %v5021_v29, 5  ;;  %v10349_v17 = vrot.slane %v5083_v14, 5  ;;  %v5089_v3 = vrot.slane %v5087_v55, 4  ;;  %v5014_v2 = vsel %vm8940_vm4, %v5009_v4, %v10277_v10 }
 0x2c3   : > { %8000 = vmatmul.mubr.msk.bf16.gmra.mrb[4].mxu1 %vm1795_vm5, %v7135_v24  ;;  %v5047_v34 = vrot.slane %v5045_v33, 5  ;;  %v5038_v13 = vsel %vm8940_vm4, %v5033_v59, %v10315_v26  ;;  %v5056_v39 = vor.u32 %v5055_v41, %v5052_v42  ;;  %v5069_v29 = vshll.u32 %v10155_v40, 16 }
 0x2c4   : > { %8003 = vmatprep.mubr.msk.bf16.mxu1 %vm1795_vm5, %v7136_v46  ;;  %v5024_v8 = vsel %vm8940_vm4, %v5019_v58, %v5023_v1  ;;  %v5066_v6 = vor.u32 %v5065_v31, %v10347_v43  ;;  %v5080_v10 = vor.u32 %v5079_v18, %v5076_v61  ;;  %v5098_v45 = vshrl.u32 %v4776_v28, 16  ;;  %v4782_v58 = vld [vmem:[#allocation2 + $0xcc] sm:$0xf] }
 0x2c5   : > { %v5048_v11 = vsel %vm8940_vm4, %v5043_v23, %v5047_v34  ;;  %v5090_v25 = vor.u32 %v5089_v3, %v10349_v17  ;;  %v5101_v32 = vshll.u32 %v4776_v28, 16  ;;  %v5107_v19 = vshll.u32 %v10180_v48, 16 }
 0x2c6   : > { %v5111_v21 = vshrl.u32 %v10180_v48, 16  ;;  %v5122_v24 = vshrl.u32 %v4779_v54, 16  ;;  %v5125_v26 = vshll.u32 %v4779_v54, 16  ;;  %v5131_v15 = vshll.u32 %v10202_v22, 16  ;;  %v8496_v48 = vld [vmem:[%s10811_s7] sm:$0xff]  }
 0x2c7   : > { %v5135_v40 = vshrl.u32 %v10202_v22, 16  ;;  %v7137_v14 = vcombine.low %v5014_v2, %v5024_v8  ;;  %v7138_v55 = vcombine.low %v5038_v13, %v5048_v11  ;;  %v5057_v5 = vrot.slane %v5056_v39, 4  ;;  %8055 = vmatprep.subr.bf16.mxu0 %v8496_v48 }
 0x2c8   : > { %v5071_v4 = vrot.slane %v5069_v29, 5  ;;  %v5067_v33 = vrot.slane %v5066_v6, 4  ;;  %v5081_v59 = vrot.slane %v5080_v10, 4  ;;  %v5093_v42 = vshll.u32 %v10189_v60, 16  ;;  %8056 = vmatpush3.bf16.msra.mxu0 %v8496_v48 }
 0x2c9   : > { %v5100_v41 = vrot.slane %v5098_v45, 4  ;;  %v5091_v23 = vrot.slane %v5090_v25, 4  ;;  %v5103_v31 = vrot.slane %v5101_v32, 5  ;;  %v5109_v61 = vrot.slane %v5107_v19, 5 }
 0x2ca   : > { %v5113_v18 = vrot.slane %v5111_v21, 4  ;;  %v5124_v22 = vrot.slane %v5122_v24, 4  ;;  %v5127_v46 = vrot.slane %v5125_v26, 5  ;;  %v5133_v1 = vrot.slane %v5131_v15, 5 }
 0x2cb   : > { %8004 = vmatmul.mubr.msk.bf16.gmra.mrb[8].mxu1 %vm1795_vm5, %v7137_v14  ;;  %v5137_v3 = vrot.slane %v5135_v40, 4  ;;  %v5146_v28 = vshrl.u32 %v4782_v58, 16  ;;  %v5149_v60 = vshll.u32 %v4782_v58, 16  ;;  %v5155_v2 = vshll.u32 %v10229_v51, 16 }
 0x2cc   : > { %8007 = vmatprep.mubr.msk.bf16.mxu1 %vm1795_vm5, %v7138_v55  ;;  %v5159_v34 = vshrl.u32 %v10229_v51, 16  ;;  %v5062_v8 = vsel %vm8940_vm4, %v5057_v5, %v10347_v43  ;;  %v5095_v13 = vrot.slane %v5093_v42, 5  ;;  %v5072_v39 = vsel %vm8940_vm4, %v5067_v33, %v5071_v4 }
 0x2cd   : > { %v5104_v29 = vor.u32 %v5103_v31, %v5100_v41  ;;  %v5114_v54 = vor.u32 %v5113_v18, %v5109_v61  ;;  %v5117_v11 = vshll.u32 %v10198_v27, 16  ;;  %v5086_v6 = vsel %vm8940_vm4, %v5081_v59, %v10349_v17 }
 0x2ce   : > { %v5096_v51 = vsel %vm8940_vm4, %v5091_v23, %v5095_v13  ;;  %v5128_v10 = vor.u32 %v5127_v46, %v5124_v22  ;;  %v5138_v45 = vor.u32 %v5137_v3, %v5133_v1  ;;  %v5148_v25 = vrot.slane %v5146_v28, 4  ;;  %v5475_v22 = vld [vmem:[#allocation2 + $0x18] sm:$0xe] }
 0x2cf   : > { %v5151_v32 = vrot.slane %v5149_v60, 5  ;;  %v5157_v43 = vrot.slane %v5155_v2, 5  ;;  %v5161_v19 = vrot.slane %v5159_v34, 4  ;;  %v7139_v21 = vcombine.low %v5062_v8, %v5072_v39  ;;  %v5476_v8 = vld [vmem:[#allocation2 + $0x24] sm:$0xe] }
 0x2d0   : > { %v5141_v24 = vshll.u32 %v10220_v9, 16  ;;  %v7140_v26 = vcombine.low %v5086_v6, %v5096_v51  ;;  %v5105_v15 = vrot.slane %v5104_v29, 4  ;;  %v5115_v40 = vrot.slane %v5114_v54, 4  ;;  %v10920_v51 = vld [vmem:[#allocation17_spill] sm:$0xff] }
 0x2d1   : > { %v5129_v27 = vrot.slane %v5128_v10, 4  ;;  %v5139_v14 = vrot.slane %v5138_v45, 4  ;;  %v5119_v17 = vrot.slane %v5117_v11, 5  ;;  %v5152_v55 = vor.u32 %v5151_v32, %v5148_v25  ;;  %v10922_v45 = vld [vmem:[#allocation16_spill] sm:$0xff]  ;;  %v10923_v25 = vld [vmem:[#allocation18_spill] sm:$0xff] }
 0x2d2   : > { %v5162_v5 = vor.u32 %v5161_v19, %v5157_v43  ;;  %v5165_v4 = vshll.u32 %v10242_v49, 16  ;;  %v5143_v58 = vrot.slane %v5141_v24, 5  ;;  %v5110_v33 = vsel %vm8940_vm4, %v5105_v15, %v5109_v61  ;;  %v10926_v32 = vld [vmem:[#allocation20_spill] sm:$0xff]  ;;  %v10934_v24 = vld [vmem:[#allocation25_spill] sm:$0xff] }
 0x2d3   : > { %8008 = vmatmul.mubr.msk.bf16.gmra.mrb[12].mxu1 %vm1795_vm5, %v7139_v21  ;;  %v5120_v9 = vsel %vm8940_vm4, %v5115_v40, %v5119_v17  ;;  %v5134_v59 = vsel %vm8940_vm4, %v5129_v27, %v5133_v1  ;;  %v5541_v41 = vrot.slane %v9870_v38, 5  ;;  %v5153_v48 = vrot.slane %v5152_v55, 4  ;;  %v10932_v19 = vld [vmem:[#allocation24_spill] sm:$0xff]  ;;  %v10936_v17 = vld [vmem:[#allocation26_spill] sm:$0xff]  ;;  %v10937_v55 = vld [vmem:[#allocation27_spill] sm:$0xff] }
 0x2d4   : > { %8011 = vmatprep.mubr.msk.bf16.mxu1 %vm1795_vm5, %v7140_v26  ;;  %v5144_v42 = vsel %vm8940_vm4, %v5139_v14, %v5143_v58  ;;  %v5163_v23 = vrot.slane %v5162_v5, 4  ;;  %v5167_v31 = vrot.slane %v5165_v4, 5  ;;  %v7141_v18 = vcombine.low %v5110_v33, %v5120_v9  ;;  %v10939_v4 = vld [vmem:[#allocation28_spill] sm:$0xff]  ;;  %v10940_v58 = vld [vmem:[#allocation29_spill] sm:$0xff] }
 0x2d5   : > { %v7142_v49 = vcombine.low %v5134_v59, %v5144_v42  ;;  %v5543_v61 = vrot.slane %v5541_v41, 4  ;;  %v5158_v46 = vsel %vm8940_vm4, %v5153_v48, %v5157_v43  ;;  %v7162_v3 = vrot.slane %v5475_v22, 9  ;;  %v10929_v43 = vld [vmem:[#allocation22_spill] sm:$0xff]  ;;  %v10943_v48 = vld [vmem:[#allocation31_spill] sm:$0xff] }
 0x2d6   : > { %v5168_v1 = vsel %vm8940_vm4, %v5163_v23, %v5167_v31  ;;  %v5544_v38 = vrot.slane %v9882_v62, 5  ;;  %v5548_v28 = vrot.slane %v9878_v30, 5  ;;  %v7163_v44 = vrot.slane %v5476_v8, 9 }
 0x2d7   : > { %v7143_v60 = vcombine.low %v5158_v46, %v5168_v1  ;;  %v5542_v34 = vsel %vm9620_vm11, %v7162_v3, %v5541_v41  ;;  %v5551_v29 = vrot.slane %v9896_v56, 5  ;;  %v10916_v11 = vcombine.low %v10074_v12, %v10082_v52  ;;  %v10925_v52 = vld [vmem:[#allocation19_spill] sm:$0xff]  ;;  %v10942_v41 = vld [vmem:[#allocation30_spill] sm:$0xff] }
 0x2d8   : > { %v5545_v2 = vsel %vm9620_vm11, %v5543_v61, %v5544_v38  ;;  %v5550_v39 = vrot.slane %v5548_v28, 4  ;;  %v5549_v62 = vsel %vm9620_vm11, %v7163_v44, %v5548_v28  ;;  %v10917_v6 = vcombine.low %v10090_v36, %v10099_v50  ;;  %v10928_v50 = vld [vmem:[#allocation21_spill] sm:$0xff] }
 0x2d9   : > { %v7178_v13 = vcombine.low %v5542_v34, %v5545_v2  ;;  %v10918_v56 = vcombine.low %v10094_v35, %v10108_v0  ;;  %v10921_v10 = vcombine.low %v10919_v53, %v10920_v51  ;;  %v10924_v12 = vcombine.low %v10922_v45, %v10923_v25  ;;  %v10931_v0 = vld [vmem:[#allocation23_spill] sm:$0xff] }
 0x2da   : > { %v5552_v30 = vsel %vm9620_vm11, %v5550_v39, %v5551_v29  ;;  %v10927_v36 = vcombine.low %v10925_v52, %v10926_v32  ;;  %v10930_v35 = vcombine.low %v10928_v50, %v10929_v43  ;;  %v10933_v21 = vcombine.low %v10931_v0, %v10932_v19 }
 0x2db   : > { %8012 = vmatmul.mubr.msk.bf16.gmra.mrb[16].mxu1 %vm1795_vm5, %v7141_v18  ;;  %v7179_v54 = vcombine.low %v5549_v62, %v5552_v30  ;;  %v10935_v26 = vcombine.low %v10195_v20, %v10934_v24  ;;  %v10938_v5 = vcombine.low %v10936_v17, %v10937_v55  ;;  %v10941_v33 = vcombine.low %v10939_v4, %v10940_v58  ;;  %v8497_v30 = vld [vmem:[%s10811_s7 + $0x8] sm:$0xff]  }
 0x2dc   : > { %8015 = vmatprep.mubr.msk.bf16.mxu1 %vm1795_vm5, %v7142_v49  ;;  %v10944_v23 = vcombine.low %v10942_v41, %v10943_v48  ;;  %8057 = vmatprep.subr.bf16.mxu0 %v8497_v30 }
 0x2dd   : > { %8058 = vmatpush3.bf16.msra.mxu0 %v8497_v30 }
 0x2e3   : > { %8016 = vmatmul.mubr.msk.bf16.gmra.mrb[20].mxu1 %vm1795_vm5, %v7143_v60 }
 0x2e4   : > { %8023 = vmatprep.mubr.msk.bf16.mxu1 %vm1795_vm5, %v7178_v13 }
 0x2eb   : > { %8024 = vmatmul.mubr.msk.bf16.vlgmr.msra.gmra.mrb[24].mxu1 %vm1795_vm5, %v7179_v54  ;;  %v10532_v54 = vld [vmem:[%s10809_s5] ss:$0 sm:$0xff] }
 0x2ec   : > { %8027 = vmatprep.mubr.msk.bf16.mxu1 %vm1795_vm5, %v10916_v11 }
 0x2f3   : > { %8028 = vmatmul.mubr.msk.bf16.gmra.mrb[28].mxu1 %vm1795_vm5, %v10917_v6 }
 0x2f4   : > { %8031 = vmatprep.mubr.msk.bf16.mxu1 %vm1795_vm5, %v10918_v56  ;;  %v10537_v56 = vld [vmem:[%s10810_s6] ss:$0 sm:$0xff] }
 0x2fb   : > { %8032 = vmatmul.mubr.msk.bf16.gmra.mrb[0].mxu1 %vm1795_vm5, %v10921_v10 }
 0x2fc   : > { %8035 = vmatprep.mubr.msk.bf16.mxu1 %vm1795_vm5, %v10924_v12 }
 0x303   : > { %8036 = vmatmul.mubr.msk.bf16.gmra.mrb[4].mxu1 %vm1795_vm5, %v10927_v36 }
 0x304   : > { %8039 = vmatprep.mubr.msk.bf16.mxu1 %vm1795_vm5, %v10930_v35 }
 0x30b   : > { %8040 = vmatmul.mubr.msk.bf16.gmra.mrb[8].mxu1 %vm1795_vm5, %v10933_v21 }
 0x30c   : > { %8043 = vmatprep.mubr.msk.bf16.mxu1 %vm1795_vm5, %v10935_v26 }
 0x30d   : > { %v10458_v15 = vpop.f32.mrb[40].mxu0 }
 0x30e   : > { %v10460_v40 = vpop.f32.mrb[41].mxu0 }
 0x30f   : > { %v10462_v27 = vpop.f32.mrb[42].mxu0 }
 0x310   : > { %v10464_v14 = vpop.f32.mrb[43].mxu0 }
 0x313   : > { %8044 = vmatmul.mubr.msk.bf16.gmra.mrb[12].mxu1 %vm1795_vm5, %v10938_v5 }
 0x314   : > { %8047 = vmatprep.mubr.msk.bf16.mxu1 %vm1795_vm5, %v10941_v33 }
 0x315   : > { %v10474_v20 = vpop.f32.mrb[44].mxu0 }
 0x316   : > { %v10476_v9 = vpop.f32.mrb[45].mxu0 }
 0x317   : > { %v10478_v59 = vpop.f32.mrb[46].mxu0 }
 0x318   : > { %v10480_v42 = vpop.f32.mrb[47].mxu0 }
 0x31b   : > { %8048 = vmatmul.mubr.msk.bf16.gmra.mrb[16].mxu1 %vm1795_vm5, %v10944_v23 }
 0x31c   : > { %8051 = vmatprep.mubr.msk.bf16.mxu1 %vm1795_vm5, %v7192_v47 }
 0x31d   : > { %v10490_v31 = vpop.f32.mrb[48].mxu0 }
 0x31e   : > { %v10492_v18 = vpop.f32.mrb[49].mxu0 }
 0x31f   : > { %v10494_v49 = vpop.f32.mrb[50].mxu0 }
 0x320   : > { %v10496_v22 = vpop.f32.mrb[51].mxu0 }
 0x323   : > { %8052 = vmatmul.mubr.msk.bf16.gmra.mrb[20].mxu1 %vm1795_vm5, %v7193_v16 }
 0x325   : > { %v10502_v61 = vpop.f32.mrb[52].mxu0 }
 0x326   : > { %v10504_v46 = vpop.f32.mrb[53].mxu0 }
 0x327   : > { %v10506_v63 = vpop.f32.mrb[54].mxu0 }
 0x328   : > { %v10508_v57 = vpop.f32.mrb[55].mxu0 }
 0x32d   : > { %v10510_v47 = vpop.f32.mrb[56].mxu0 }
 0x32e   : > { %v10512_v1 = vpop.f32.mrb[57].mxu0 }
 0x32f   : > { %v10514_v3 = vpop.f32.mrb[58].mxu0 }
 0x330   : > { %v10516_v38 = vpop.f32.mrb[59].mxu0 }
 0x335   : > { %v10518_v28 = vpop.f32.mrb[60].mxu0 }
 0x336   : > { %v10520_v7 = vpop.f32.mrb[61].mxu0 }
 0x337   : > { %v10522_v37 = vpop.f32.mrb[62].mxu0 }
 0x338   : > { %v10524_v16 = vpop.f32.mrb[63].mxu0 }
 0x33d   : > { %v7845_v60 = vpop.f32.mrb[32].mxu0 }
 0x33e   : > { %v2987_v2 = vpop.f32.mrb[33].mxu0 }
 0x33f   : > { %v7846_v34 = vpop.f32.mrb[34].mxu0 }
 0x340   : > { %v2990_v8 = vpop.f32.mrb[35].mxu0 }
 0x345   : > { %v7849_v13 = vpop.f32.mrb[36].mxu0 }
 0x346   : > { %v3003_v39 = vpop.f32.mrb[37].mxu0 }
 0x347   : > { %v7850_v44 = vpop.f32.mrb[38].mxu0 }
 0x348   : > { %v3006_v29 = vpop.f32.mrb[39].mxu0 }
 0x3be   : > { %v8025_v62 = vpop.f32.mrb[24].mxu1 }
 0x3bf   : > { %v8095_v11 = vadd.f32 %v8025_v62, %v7845_v60  ;;  %v5798_v6 = vpop.f32.mrb[25].mxu1 }
 0x3c0   : > { %v8096_v53 = vadd.f32 %v5798_v6, %v2987_v2  ;;  %v8026_v51 = vpop.f32.mrb[26].mxu1 }
 0x3c1   : > { %v5966_v10 = vmul.f32 %v8095_v11, %v10532_v54  ;;  %v8097_v45 = vadd.f32 %v8026_v51, %v7846_v34  ;;  %v5801_v25 = vpop.f32.mrb[27].mxu1 }
 0x3c2   : > { %v5964_v12 = vmul.f32 %v8096_v53, %v10532_v54  ;;  %v8098_v52 = vadd.f32 %v5801_v25, %v2990_v8 }
 0x3c3   : > { %v6005_v32 = vadd.f32 %v10537_v56, %v5966_v10  ;;  %v5967_v36 = vmul.f32 %v8097_v45, %v10532_v54 }
 0x3c4   : > { %v6003_v50 = vadd.f32 %v10537_v56, %v5964_v12  ;;  %v5965_v43 = vmul.f32 %v8098_v52, %v10532_v54 }
 0x3c5   : > { %v6006_v35 = vadd.f32 %v10537_v56, %v5967_v36  ;;  %v6037_v21 = vmax.f32 %v6005_v32, 0.0 }
 0x3c6   : > { %v6004_v0 = vadd.f32 %v10537_v56, %v5965_v43  ;;  %v8029_v19 = vpop.f32.mrb[28].mxu1  ;;  %v6035_v55 = vmax.f32 %v6003_v50, 0.0 }
 0x3c7   : > { %v6038_v24 = vmax.f32 %v6006_v35, 0.0  ;;  %v8099_v26 = vadd.f32 %v8029_v19, %v7849_v13  ;;  %v5814_v17 = vpop.f32.mrb[29].mxu1 }
 0x3c8   : > { %v6036_v5 = vmax.f32 %v6004_v0, 0.0  ;;  %v8100_v4 = vadd.f32 %v5814_v17, %v3003_v39  ;;  %v8030_v58 = vpop.f32.mrb[30].mxu1 }
 0x3c9   : > { %v6068_v33 = vpack.c.bf16 %v6038_v24, %v6037_v21  ;;  %v5970_v41 = vmul.f32 %v8099_v26, %v10532_v54  ;;  %v8101_v48 = vadd.f32 %v8030_v58, %v7850_v44  ;;  %v5817_v23 = vpop.f32.mrb[31].mxu1 }
 0x3ca   : > { %v6067_v60 = vpack.c.bf16 %v6036_v5, %v6035_v55  ;;  %v5968_v2 = vmul.f32 %v8100_v4, %v10532_v54  ;;  %v8102_v34 = vadd.f32 %v5817_v23, %v3006_v29 }
 0x3cb   : > { %v6009_v8 = vadd.f32 %v10537_v56, %v5970_v41  ;;  %v5971_v30 = vmul.f32 %v8101_v48, %v10532_v54 }
 0x3cc   : > { %v6007_v13 = vadd.f32 %v10537_v56, %v5968_v2  ;;  %v5969_v62 = vmul.f32 %v8102_v34, %v10532_v54  ;;  %8059 = vmatprep.mubr.msk.bf16.mxu0 %vm1795_vm5, %v6067_v60 }
 0x3cd   : > { %v6010_v39 = vadd.f32 %v10537_v56, %v5971_v30  ;;  %8060 = vmatmul.mubr.msk.bf16.vlgmr.msra.gmra.mrb[64].mxu0 %vm1795_vm5, %v6068_v33  ;;  %v6041_v6 = vmax.f32 %v6009_v8, 0.0 }
 0x3ce   : > { %v6008_v44 = vadd.f32 %v10537_v56, %v5969_v62  ;;  %v8033_v11 = vpop.f32.mrb[0].mxu1  ;;  %v6039_v10 = vmax.f32 %v6007_v13, 0.0 }
 0x3cf   : > { %v6042_v53 = vmax.f32 %v6010_v39, 0.0  ;;  %v8103_v29 = vadd.f32 %v8033_v11, %v10458_v15  ;;  %v5830_v51 = vpop.f32.mrb[1].mxu1 }
 0x3d0   : > { %v6040_v45 = vmax.f32 %v6008_v44, 0.0  ;;  %v8104_v25 = vadd.f32 %v5830_v51, %v10460_v40  ;;  %v8034_v12 = vpop.f32.mrb[2].mxu1 }
 0x3d1   : > { %v6070_v52 = vpack.c.bf16 %v6042_v53, %v6041_v6  ;;  %v5974_v32 = vmul.f32 %v8103_v29, %v10532_v54  ;;  %v8105_v36 = vadd.f32 %v8034_v12, %v10462_v27  ;;  %v5833_v50 = vpop.f32.mrb[3].mxu1 }
 0x3d2   : > { %v6069_v43 = vpack.c.bf16 %v6040_v45, %v6039_v10  ;;  %v5972_v35 = vmul.f32 %v8104_v25, %v10532_v54  ;;  %v8106_v0 = vadd.f32 %v5833_v50, %v10464_v14 }
 0x3d3   : > { %v6013_v19 = vadd.f32 %v10537_v56, %v5974_v32  ;;  %v5975_v15 = vmul.f32 %v8105_v36, %v10532_v54 }
 0x3d4   : > { %v6011_v21 = vadd.f32 %v10537_v56, %v5972_v35  ;;  %v5973_v40 = vmul.f32 %v8106_v0, %v10532_v54  ;;  %8063 = vmatprep.mubr.msk.bf16.mxu0 %vm1795_vm5, %v6069_v43 }
 0x3d5   : > { %v6014_v24 = vadd.f32 %v10537_v56, %v5975_v15  ;;  %8064 = vmatmul.mubr.msk.bf16.gmra.mrb[68].mxu0 %vm1795_vm5, %v6070_v52  ;;  %v6045_v17 = vmax.f32 %v6013_v19, 0.0 }
 0x3d6   : > { %v6012_v27 = vadd.f32 %v10537_v56, %v5973_v40  ;;  %v8037_v26 = vpop.f32.mrb[4].mxu1  ;;  %v6043_v4 = vmax.f32 %v6011_v21, 0.0 }
 0x3d7   : > { %v6046_v55 = vmax.f32 %v6014_v24, 0.0  ;;  %v8107_v14 = vadd.f32 %v8037_v26, %v10474_v20  ;;  %v5846_v5 = vpop.f32.mrb[5].mxu1 }
 0x3d8   : > { %v6044_v58 = vmax.f32 %v6012_v27, 0.0  ;;  %v8108_v33 = vadd.f32 %v5846_v5, %v10476_v9  ;;  %v8038_v41 = vpop.f32.mrb[6].mxu1 }
 0x3d9   : > { %v6072_v48 = vpack.c.bf16 %v6046_v55, %v6045_v17  ;;  %v5978_v23 = vmul.f32 %v8107_v14, %v10532_v54  ;;  %v8109_v60 = vadd.f32 %v8038_v41, %v10478_v59  ;;  %v5849_v2 = vpop.f32.mrb[7].mxu1 }
 0x3da   : > { %v6071_v34 = vpack.c.bf16 %v6044_v58, %v6043_v4  ;;  %v5976_v8 = vmul.f32 %v8108_v33, %v10532_v54  ;;  %v8110_v30 = vadd.f32 %v5849_v2, %v10480_v42 }
 0x3db   : > { %v6017_v13 = vadd.f32 %v10537_v56, %v5978_v23  ;;  %v5979_v20 = vmul.f32 %v8109_v60, %v10532_v54 }
 0x3dc   : > { %v6015_v62 = vadd.f32 %v10537_v56, %v5976_v8  ;;  %v5977_v9 = vmul.f32 %v8110_v30, %v10532_v54  ;;  %8067 = vmatprep.mubr.msk.bf16.mxu0 %vm1795_vm5, %v6071_v34 }
 0x3dd   : > { %v6018_v39 = vadd.f32 %v10537_v56, %v5979_v20  ;;  %8068 = vmatmul.mubr.msk.bf16.gmra.mrb[72].mxu0 %vm1795_vm5, %v6072_v48  ;;  %v6049_v11 = vmax.f32 %v6017_v13, 0.0 }
 0x3de   : > { %v6016_v59 = vadd.f32 %v10537_v56, %v5977_v9  ;;  %v8041_v44 = vpop.f32.mrb[8].mxu1  ;;  %v6047_v29 = vmax.f32 %v6015_v62, 0.0 }
 0x3df   : > { %v6050_v6 = vmax.f32 %v6018_v39, 0.0  ;;  %v8111_v42 = vadd.f32 %v8041_v44, %v10490_v31  ;;  %v5862_v53 = vpop.f32.mrb[9].mxu1 }
 0x3e0   : > { %v6048_v51 = vmax.f32 %v6016_v59, 0.0  ;;  %v8112_v10 = vadd.f32 %v5862_v53, %v10492_v18  ;;  %v8042_v45 = vpop.f32.mrb[10].mxu1 }
 0x3e1   : > { %v6074_v25 = vpack.c.bf16 %v6050_v6, %v6049_v11  ;;  %v5982_v12 = vmul.f32 %v8111_v42, %v10532_v54  ;;  %v8113_v52 = vadd.f32 %v8042_v45, %v10494_v49  ;;  %v5865_v32 = vpop.f32.mrb[11].mxu1 }
 0x3e2   : > { %v6073_v36 = vpack.c.bf16 %v6048_v51, %v6047_v29  ;;  %v5980_v50 = vmul.f32 %v8112_v10, %v10532_v54  ;;  %v8114_v43 = vadd.f32 %v5865_v32, %v10496_v22 }
 0x3e3   : > { %v6021_v35 = vadd.f32 %v10537_v56, %v5982_v12  ;;  %v5983_v31 = vmul.f32 %v8113_v52, %v10532_v54 }
 0x3e4   : > { %v6019_v0 = vadd.f32 %v10537_v56, %v5980_v50  ;;  %v5981_v18 = vmul.f32 %v8114_v43, %v10532_v54  ;;  %8071 = vmatprep.mubr.msk.bf16.mxu0 %vm1795_vm5, %v6073_v36 }
 0x3e5   : > { %v6022_v19 = vadd.f32 %v10537_v56, %v5983_v31  ;;  %8072 = vmatmul.mubr.msk.bf16.gmra.mrb[76].mxu0 %vm1795_vm5, %v6074_v25  ;;  %v6053_v21 = vmax.f32 %v6021_v35, 0.0 }
 0x3e6   : > { %v6020_v49 = vadd.f32 %v10537_v56, %v5981_v18  ;;  %v8045_v15 = vpop.f32.mrb[12].mxu1  ;;  %v6051_v27 = vmax.f32 %v6019_v0, 0.0 }
 0x3e7   : > { %v6054_v40 = vmax.f32 %v6022_v19, 0.0  ;;  %v8115_v22 = vadd.f32 %v8045_v15, %v10502_v61  ;;  %v5878_v24 = vpop.f32.mrb[13].mxu1 }
 0x3e8   : > { %v6052_v26 = vmax.f32 %v6020_v49, 0.0  ;;  %v8116_v17 = vadd.f32 %v5878_v24, %v10504_v46  ;;  %v8046_v55 = vpop.f32.mrb[14].mxu1 }
 0x3e9   : > { %v6076_v14 = vpack.c.bf16 %v6054_v40, %v6053_v21  ;;  %v5986_v5 = vmul.f32 %v8115_v22, %v10532_v54  ;;  %v8117_v4 = vadd.f32 %v8046_v55, %v10506_v63  ;;  %v5881_v58 = vpop.f32.mrb[15].mxu1 }
 0x3ea   : > { %v6075_v33 = vpack.c.bf16 %v6052_v26, %v6051_v27  ;;  %v5984_v41 = vmul.f32 %v8116_v17, %v10532_v54  ;;  %v8118_v48 = vadd.f32 %v5881_v58, %v10508_v57 }
 0x3eb   : > { %v6025_v23 = vadd.f32 %v10537_v56, %v5986_v5  ;;  %v5987_v61 = vmul.f32 %v8117_v4, %v10532_v54  ;;  %v7449_v5 = vld [vmem:[%s8884_s27 + $0x8] sm:$0xff]   ;;  %v7306_v4 = vld [vmem:[%s8884_s27] sm:$0xff]  }
 0x3ec   : > { %v6023_v60 = vadd.f32 %v10537_v56, %v5984_v41  ;;  %v5985_v46 = vmul.f32 %v8118_v48, %v10532_v54  ;;  %8075 = vmatprep.mubr.msk.bf16.mxu0 %vm1795_vm5, %v6075_v33  ;;  %v7311_v41 = vunpack.c.l.bf16 %v7449_v5 }
 0x3ed   : > { %v6026_v2 = vadd.f32 %v10537_v56, %v5987_v61  ;;  %8076 = vmatmul.mubr.msk.bf16.gmra.mrb[80].mxu0 %vm1795_vm5, %v6076_v14  ;;  %v6057_v8 = vmax.f32 %v6025_v23, 0.0  ;;  %v7307_v61 = vunpack.c.l.bf16 %v7306_v4 }
 0x3ee   : > { %v6024_v63 = vadd.f32 %v10537_v56, %v5985_v46  ;;  %v8049_v34 = vpop.f32.mrb[16].mxu1  ;;  %v6055_v20 = vmax.f32 %v6023_v60, 0.0 }
 0x3ef   : > { %v6058_v30 = vmax.f32 %v6026_v2, 0.0  ;;  %v8119_v57 = vadd.f32 %v8049_v34, %v10510_v47  ;;  %v5894_v13 = vpop.f32.mrb[17].mxu1 }
 0x3f0   : > { %v6056_v62 = vmax.f32 %v6024_v63, 0.0  ;;  %v8120_v9 = vadd.f32 %v5894_v13, %v10512_v1  ;;  %v8050_v39 = vpop.f32.mrb[18].mxu1  ;;  %v7312_v63 = vunpack.c.h.bf16 %v7449_v5 }
 0x3f1   : > { %v6078_v59 = vpack.c.bf16 %v6058_v30, %v6057_v8  ;;  %v5990_v44 = vmul.f32 %v8119_v57, %v10532_v54  ;;  %v8121_v11 = vadd.f32 %v8050_v39, %v10514_v3  ;;  %v5897_v6 = vpop.f32.mrb[19].mxu1  ;;  %v7308_v57 = vunpack.c.h.bf16 %v7306_v4  ;;  %v7451_v39 = vld [vmem:[%s8884_s27 + $0x18] sm:$0xff]  }
 0x3f2   : > { %v6077_v42 = vpack.c.bf16 %v6056_v62, %v6055_v20  ;;  %v5988_v53 = vmul.f32 %v8120_v9, %v10532_v54  ;;  %v8122_v29 = vadd.f32 %v5897_v6, %v10516_v38 }
 0x3f3   : > { %v6029_v51 = vadd.f32 %v10537_v56, %v5990_v44  ;;  %v5991_v47 = vmul.f32 %v8121_v11, %v10532_v54  ;;  %v7450_v44 = vld [vmem:[%s8884_s27 + $0x10] sm:$0xff]  }
 0x3f4   : > { %v6027_v10 = vadd.f32 %v10537_v56, %v5988_v53  ;;  %v5989_v1 = vmul.f32 %v8122_v29, %v10532_v54  ;;  %8079 = vmatprep.mubr.msk.bf16.mxu0 %vm1795_vm5, %v6077_v42 }
 0x3f5   : > { %v6030_v45 = vadd.f32 %v10537_v56, %v5991_v47  ;;  %8080 = vmatmul.mubr.msk.bf16.gmra.mrb[84].mxu0 %vm1795_vm5, %v6078_v59  ;;  %v6061_v12 = vmax.f32 %v6029_v51, 0.0  ;;  %v7319_v51 = vunpack.c.l.bf16 %v7451_v39 }
 0x3f6   : > { %v6028_v3 = vadd.f32 %v10537_v56, %v5989_v1  ;;  %v8053_v25 = vpop.f32.mrb[20].mxu1  ;;  %v6059_v36 = vmax.f32 %v6027_v10, 0.0 }
 0x3f7   : > { %v6062_v52 = vmax.f32 %v6030_v45, 0.0  ;;  %v8123_v38 = vadd.f32 %v8053_v25, %v10518_v28  ;;  %v5910_v32 = vpop.f32.mrb[21].mxu1 }
 0x3f8   : > { %v6060_v50 = vmax.f32 %v6028_v3, 0.0  ;;  %v8124_v43 = vadd.f32 %v5910_v32, %v10520_v7  ;;  %v8054_v35 = vpop.f32.mrb[22].mxu1  ;;  %v7315_v3 = vunpack.c.l.bf16 %v7450_v44  ;;  %v7320_v32 = vunpack.c.h.bf16 %v7451_v39 }
 0x3f9   : > { %v6080_v31 = vpack.c.bf16 %v6062_v52, %v6061_v12  ;;  %v5994_v0 = vmul.f32 %v8123_v38, %v10532_v54  ;;  %v8125_v18 = vadd.f32 %v8054_v35, %v10522_v37  ;;  %v5913_v19 = vpop.f32.mrb[23].mxu1 }
 0x3fa   : > { %v6079_v49 = vpack.c.bf16 %v6060_v50, %v6059_v36  ;;  %v5992_v15 = vmul.f32 %v8124_v43, %v10532_v54  ;;  %v8126_v21 = vadd.f32 %v5913_v19, %v10524_v16 }
 0x3fb   : > { %v6033_v40 = vadd.f32 %v10537_v56, %v5994_v0  ;;  %v5995_v28 = vmul.f32 %v8125_v18, %v10532_v54 }
 0x3fc   : > { %v6031_v22 = vadd.f32 %v10537_v56, %v5992_v15  ;;  %v5993_v7 = vmul.f32 %v8126_v21, %v10532_v54  ;;  %8083 = vmatprep.mubr.msk.bf16.mxu0 %vm1795_vm5, %v6079_v49  ;;  %v10646_v54 = vld [vmem:[%s10812_s8] ss:$0 sm:$0xff] }
 0x3fd   : > { %v6034_v37 = vadd.f32 %v10537_v56, %v5995_v28  ;;  %8084 = vmatmul.mubr.msk.bf16.gmra.mrb[88].mxu0 %vm1795_vm5, %v6080_v31  ;;  %v6065_v27 = vmax.f32 %v6033_v40, 0.0  ;;  %v7316_v31 = vunpack.c.h.bf16 %v7450_v44  ;;  %v7453_v15 = vld [vmem:[%s8884_s27 + $0x28] sm:$0xff]   ;;  %v7452_v40 = vld [vmem:[%s8884_s27 + $0x20] sm:$0xff]  }
 0x3fe   : > { %v6032_v24 = vadd.f32 %v10537_v56, %v5993_v7  ;;  %v6063_v26 = vmax.f32 %v6031_v22, 0.0  ;;  %v10653_v56 = vld [vmem:[%s10813_s9] ss:$0 sm:$0xff] }
 0x3ff   : > { %v6066_v16 = vmax.f32 %v6034_v37, 0.0 }
 0x400   : > { %v6064_v17 = vmax.f32 %v6032_v24, 0.0 }
 0x401   : > { %v6082_v55 = vpack.c.bf16 %v6066_v16, %v6065_v27  ;;  %v7327_v27 = vunpack.c.l.bf16 %v7453_v15 }
 0x402   : > { %v6081_v14 = vpack.c.bf16 %v6064_v17, %v6063_v26 }
 0x404   : > { %8087 = vmatprep.mubr.msk.bf16.mxu0 %vm1795_vm5, %v6081_v14  ;;  %v7323_v14 = vunpack.c.l.bf16 %v7452_v40 }
 0x405   : > { %8088 = vmatmul.mubr.msk.bf16.gmra.mrb[92].mxu0 %vm1795_vm5, %v6082_v55 }
 0x4a0   : > { %v8061_v58 = vpop.f32.mrb[64].mxu0 }
 0x4a1   : > { %v6317_v33 = vmul.f32 %v8061_v58, %v10646_v54  ;;  %v6181_v48 = vpop.f32.mrb[65].mxu0 }
 0x4a2   : > { %v6315_v23 = vmul.f32 %v10646_v54, %v6181_v48  ;;  %v8062_v60 = vpop.f32.mrb[66].mxu0 }
 0x4a3   : > { %v6356_v46 = vadd.f32 %v10653_v56, %v6317_v33  ;;  %v6318_v2 = vmul.f32 %v8062_v60, %v10646_v54  ;;  %v6184_v34 = vpop.f32.mrb[67].mxu0 }
 0x4a4   : > { %v6354_v8 = vadd.f32 %v10653_v56, %v6315_v23  ;;  %v6316_v30 = vmul.f32 %v10646_v54, %v6184_v34 }
 0x4a5   : > { %v6452_v13 = vadd.f32 %v7311_v41, %v6356_v46  ;;  %v6357_v20 = vadd.f32 %v10653_v56, %v6318_v2  ;;  %v7328_v41 = vunpack.c.h.bf16 %v7453_v15  ;;  %v7324_v46 = vunpack.c.h.bf16 %v7452_v40 }
 0x4a6   : > { %v6450_v62 = vadd.f32 %v7307_v61, %v6354_v8  ;;  %v6355_v9 = vadd.f32 %v10653_v56, %v6316_v30  ;;  %v7455_v30 = vld [vmem:[%s8884_s27 + $0x38] sm:$0xff]  }
 0x4a7   : > { %v6453_v59 = vadd.f32 %v7312_v63, %v6357_v20  ;;  %v6484_v42 = vmax.f32 %v6452_v13, 0.0  ;;  %v7454_v13 = vld [vmem:[%s8884_s27 + $0x30] sm:$0xff]   ;;  %v7335_v44 = vunpack.c.l.bf16 %v7455_v30 }
 0x4a8   : > { %v6451_v11 = vadd.f32 %v7308_v57, %v6355_v9  ;;  %v8065_v6 = vpop.f32.mrb[68].mxu0  ;;  %v6482_v10 = vmax.f32 %v6450_v62, 0.0 }
 0x4a9   : > { %v6485_v53 = vmax.f32 %v6453_v59, 0.0  ;;  %v6321_v29 = vmul.f32 %v8065_v6, %v10646_v54  ;;  %v6197_v47 = vpop.f32.mrb[69].mxu0 }
 0x4aa   : > { %v6483_v1 = vmax.f32 %v6451_v11, 0.0  ;;  %v6319_v45 = vmul.f32 %v10646_v54, %v6197_v47  ;;  %v8066_v25 = vpop.f32.mrb[70].mxu0 }
 0x4ab   : > { %v7377_v12 = vpack.c.bf16 %v6485_v53, %v6484_v42  ;;  %v6360_v52 = vadd.f32 %v10653_v56, %v6321_v29  ;;  %v6322_v38 = vmul.f32 %v8066_v25, %v10646_v54  ;;  %v6200_v36 = vpop.f32.mrb[71].mxu0  ;;  %v7331_v29 = vunpack.c.l.bf16 %v7454_v13 }
 0x4ac   : > { %v7372_v50 = vpack.c.bf16 %v6483_v1, %v6482_v10  ;;  %v6358_v43 = vadd.f32 %v10653_v56, %v6319_v45  ;;  %v6320_v35 = vmul.f32 %v10646_v54, %v6200_v36  ;;  %v7336_v45 = vunpack.c.h.bf16 %v7455_v30 }
 0x4ad   : > { %7464 = vst [vmem:[%s10673_s24 + $0x8] sm:$0xff] %v7377_v12   ;;  %v6456_v0 = vadd.f32 %v7319_v51, %v6360_v52  ;;  %v6361_v18 = vadd.f32 %v10653_v56, %v6322_v38  ;;  %v7332_v38 = vunpack.c.h.bf16 %v7454_v13 }
 0x4ae   : > { %7373 = vst [vmem:[%s10673_s24] sm:$0xff] %v7372_v50   ;;  %v6454_v19 = vadd.f32 %v7315_v3, %v6358_v43  ;;  %v6359_v49 = vadd.f32 %v10653_v56, %v6320_v35  ;;  %v7457_v35 = vld [vmem:[%s8884_s27 + $0x48] sm:$0xff]  }
 0x4af   : > { %v6457_v21 = vadd.f32 %v7320_v32, %v6361_v18  ;;  %v6488_v7 = vmax.f32 %v6456_v0, 0.0  ;;  %v7456_v0 = vld [vmem:[%s8884_s27 + $0x40] sm:$0xff]   ;;  %v7343_v40 = vunpack.c.l.bf16 %v7457_v35 }
 0x4b0   : > { %v6455_v28 = vadd.f32 %v7316_v31, %v6359_v49  ;;  %v8069_v22 = vpop.f32.mrb[72].mxu0  ;;  %v6486_v26 = vmax.f32 %v6454_v19, 0.0 }
 0x4b1   : > { %v6489_v37 = vmax.f32 %v6457_v21, 0.0  ;;  %v6325_v24 = vmul.f32 %v8069_v22, %v10646_v54  ;;  %v6213_v16 = vpop.f32.mrb[73].mxu0 }
 0x4b2   : > { %v6487_v17 = vmax.f32 %v6455_v28, 0.0  ;;  %v6323_v55 = vmul.f32 %v10646_v54, %v6213_v16  ;;  %v8070_v5 = vpop.f32.mrb[74].mxu0 }
 0x4b3   : > { %v7387_v4 = vpack.c.bf16 %v6489_v37, %v6488_v7  ;;  %v6364_v58 = vadd.f32 %v10653_v56, %v6325_v24  ;;  %v6326_v33 = vmul.f32 %v8070_v5, %v10646_v54  ;;  %v6216_v48 = vpop.f32.mrb[75].mxu0  ;;  %v7339_v24 = vunpack.c.l.bf16 %v7456_v0 }
 0x4b4   : > { %v7382_v23 = vpack.c.bf16 %v6487_v17, %v6486_v26  ;;  %v6362_v61 = vadd.f32 %v10653_v56, %v6323_v55  ;;  %v6324_v60 = vmul.f32 %v10646_v54, %v6216_v48  ;;  %v7344_v55 = vunpack.c.h.bf16 %v7457_v35 }
 0x4b5   : > { %7466 = vst [vmem:[%s10673_s24 + $0x18] sm:$0xff] %v7387_v4   ;;  %v6460_v2 = vadd.f32 %v7327_v27, %v6364_v58  ;;  %v6365_v63 = vadd.f32 %v10653_v56, %v6326_v33  ;;  %v7340_v33 = vunpack.c.h.bf16 %v7456_v0 }
 0x4b6   : > { %7465 = vst [vmem:[%s10673_s24 + $0x10] sm:$0xff] %v7382_v23   ;;  %v6458_v34 = vadd.f32 %v7323_v14, %v6362_v61  ;;  %v6363_v8 = vadd.f32 %v10653_v56, %v6324_v60  ;;  %v7459_v60 = vld [vmem:[%s8884_s27 + $0x58] sm:$0xff]  }
 0x4b7   : > { %v6461_v57 = vadd.f32 %v7328_v41, %v6365_v63  ;;  %v6492_v9 = vmax.f32 %v6460_v2, 0.0  ;;  %v7458_v2 = vld [vmem:[%s8884_s27 + $0x50] sm:$0xff]   ;;  %v7351_v13 = vunpack.c.l.bf16 %v7459_v60 }
 0x4b8   : > { %v6459_v20 = vadd.f32 %v7324_v46, %v6363_v8  ;;  %v8073_v62 = vpop.f32.mrb[76].mxu0  ;;  %v6490_v6 = vmax.f32 %v6458_v34, 0.0 }
 0x4b9   : > { %v6493_v39 = vmax.f32 %v6461_v57, 0.0  ;;  %v6329_v59 = vmul.f32 %v8073_v62, %v10646_v54  ;;  %v6229_v11 = vpop.f32.mrb[77].mxu0 }
 0x4ba   : > { %v6491_v42 = vmax.f32 %v6459_v20, 0.0  ;;  %v6327_v53 = vmul.f32 %v10646_v54, %v6229_v11  ;;  %v8074_v51 = vpop.f32.mrb[78].mxu0 }
 0x4bb   : > { %v7397_v47 = vpack.c.bf16 %v6493_v39, %v6492_v9  ;;  %v6368_v10 = vadd.f32 %v10653_v56, %v6329_v59  ;;  %v6330_v1 = vmul.f32 %v8074_v51, %v10646_v54  ;;  %v6232_v3 = vpop.f32.mrb[79].mxu0  ;;  %v7347_v59 = vunpack.c.l.bf16 %v7458_v2 }
 0x4bc   : > { %v7392_v25 = vpack.c.bf16 %v6491_v42, %v6490_v6  ;;  %v6366_v12 = vadd.f32 %v10653_v56, %v6327_v53  ;;  %v6328_v52 = vmul.f32 %v10646_v54, %v6232_v3  ;;  %v7352_v53 = vunpack.c.h.bf16 %v7459_v60 }
 0x4bd   : > { %7468 = vst [vmem:[%s10673_s24 + $0x28] sm:$0xff] %v7397_v47   ;;  %v6464_v32 = vadd.f32 %v7335_v44, %v6368_v10  ;;  %v6369_v36 = vadd.f32 %v10653_v56, %v6330_v1  ;;  %v7348_v1 = vunpack.c.h.bf16 %v7458_v2 }
 0x4be   : > { %7467 = vst [vmem:[%s10673_s24 + $0x20] sm:$0xff] %v7392_v25   ;;  %v6462_v50 = vadd.f32 %v7331_v29, %v6366_v12  ;;  %v6367_v43 = vadd.f32 %v10653_v56, %v6328_v52  ;;  %v7461_v52 = vld [vmem:[%s8884_s27 + $0x68] sm:$0xff]  }
 0x4bf   : > { %v6465_v31 = vadd.f32 %v7336_v45, %v6369_v36  ;;  %v6496_v49 = vmax.f32 %v6464_v32, 0.0  ;;  %v7460_v32 = vld [vmem:[%s8884_s27 + $0x60] sm:$0xff]   ;;  %v7359_v0 = vunpack.c.l.bf16 %v7461_v52 }
 0x4c0   : > { %v6463_v18 = vadd.f32 %v7332_v38, %v6367_v43  ;;  %v8077_v19 = vpop.f32.mrb[80].mxu0  ;;  %v6494_v22 = vmax.f32 %v6462_v50, 0.0 }
 0x4c1   : > { %v6497_v15 = vmax.f32 %v6465_v31, 0.0  ;;  %v6333_v21 = vmul.f32 %v8077_v19, %v10646_v54  ;;  %v6245_v28 = vpop.f32.mrb[81].mxu0 }
 0x4c2   : > { %v6495_v7 = vmax.f32 %v6463_v18, 0.0  ;;  %v6331_v37 = vmul.f32 %v10646_v54, %v6245_v28  ;;  %v8078_v27 = vpop.f32.mrb[82].mxu0 }
 0x4c3   : > { %v7407_v16 = vpack.c.bf16 %v6497_v15, %v6496_v49  ;;  %v6372_v26 = vadd.f32 %v10653_v56, %v6333_v21  ;;  %v6334_v17 = vmul.f32 %v8078_v27, %v10646_v54  ;;  %v6248_v14 = vpop.f32.mrb[83].mxu0  ;;  %v7355_v21 = vunpack.c.l.bf16 %v7460_v32 }
 0x4c4   : > { %v7402_v5 = vpack.c.bf16 %v6495_v7, %v6494_v22  ;;  %v6370_v4 = vadd.f32 %v10653_v56, %v6331_v37  ;;  %v6332_v58 = vmul.f32 %v10646_v54, %v6248_v14  ;;  %v7360_v37 = vunpack.c.h.bf16 %v7461_v52 }
 0x4c5   : > { %7470 = vst [vmem:[%s10673_s24 + $0x38] sm:$0xff] %v7407_v16   ;;  %v6468_v41 = vadd.f32 %v7343_v40, %v6372_v26  ;;  %v6373_v48 = vadd.f32 %v10653_v56, %v6334_v17  ;;  %v7356_v17 = vunpack.c.h.bf16 %v7460_v32 }
 0x4c6   : > { %7469 = vst [vmem:[%s10673_s24 + $0x30] sm:$0xff] %v7402_v5   ;;  %v6466_v23 = vadd.f32 %v7339_v24, %v6370_v4  ;;  %v6371_v61 = vadd.f32 %v10653_v56, %v6332_v58  ;;  %v7463_v58 = vld [vmem:[%s8884_s27 + $0x78] sm:$0xff]  }
 0x4c7   : > { %v6469_v46 = vadd.f32 %v7344_v55, %v6373_v48  ;;  %v6500_v8 = vmax.f32 %v6468_v41, 0.0  ;;  %v7462_v41 = vld [vmem:[%s8884_s27 + $0x70] sm:$0xff]   ;;  %v7367_v2 = vunpack.c.l.bf16 %v7463_v58  ;;  %s6688_s27 = sshll.u32 %s10673_s24, 4  ;;  %s10758_s27 = int_to_ptr.vmem [resolvable:$true] %s6688_s27 }
 0x4c8   : > { %v6467_v63 = vadd.f32 %v7340_v33, %v6371_v61  ;;  %v8081_v34 = vpop.f32.mrb[84].mxu0  ;;  %v6498_v62 = vmax.f32 %v6466_v23, 0.0  ;;  %s8598_s26 = scalar_lea.vmem %s10758_s27, 2048  ;;  %p8605_p10 = scmp.lt.s32.totalorder %s10758_s27, %s8603_s30 }
 0x4c9   : > { %v6501_v30 = vmax.f32 %v6469_v46, 0.0  ;;  %v6337_v57 = vmul.f32 %v8081_v34, %v10646_v54  ;;  %v6261_v20 = vpop.f32.mrb[85].mxu0  ;;  %p8599_p4 = scmp.ne.s32.totalorder %s10758_s27, %s8598_s26  ;;  %p8606_p13 = scmp.lt.s32.totalorder %s8604_s13, %s8598_s26 }
 0x4ca   : > { %v6499_v9 = vmax.f32 %v6467_v63, 0.0  ;;  %v6335_v39 = vmul.f32 %v10646_v54, %v6261_v20  ;;  %v8082_v44 = vpop.f32.mrb[86].mxu0 }
 0x4cb   : > { %v7417_v11 = vpack.c.bf16 %v6501_v30, %v6500_v8  ;;  %v6376_v6 = vadd.f32 %v10653_v56, %v6337_v57  ;;  %v6338_v42 = vmul.f32 %v8082_v44, %v10646_v54  ;;  %v6264_v29 = vpop.f32.mrb[87].mxu0  ;;  %v7363_v57 = vunpack.c.l.bf16 %v7462_v41  ;;  %p8600_p6 = pnand %p8599_p4, %p8827_p12  ;;  %p8607_p3 = por %p8606_p13, %p8605_p10 }
 0x4cc   : > { %v7412_v51 = vpack.c.bf16 %v6499_v9, %v6498_v62  ;;  %v6374_v47 = vadd.f32 %v10653_v56, %v6335_v39  ;;  %v6336_v10 = vmul.f32 %v10646_v54, %v6264_v29  ;;  %v7368_v39 = vunpack.c.h.bf16 %v7463_v58 }
 0x4cd   : > { %7472 = vst [vmem:[%s10673_s24 + $0x48] sm:$0xff] %v7417_v11   ;;  %v6472_v45 = vadd.f32 %v7351_v13, %v6376_v6  ;;  %v6377_v3 = vadd.f32 %v10653_v56, %v6338_v42  ;;  %v7364_v42 = vunpack.c.h.bf16 %v7462_v41  ;;  %p8601_p8 = pneg %p8600_p6 }
 0x4ce   : > { %7471 = vst [vmem:[%s10673_s24 + $0x40] sm:$0xff] %v7412_v51   ;;  %v6470_v25 = vadd.f32 %v7347_v59, %v6374_v47  ;;  %v6375_v12 = vadd.f32 %v10653_v56, %v6336_v10 }
 0x4cf   : > { %v6473_v38 = vadd.f32 %v7352_v53, %v6377_v3  ;;  %v6504_v43 = vmax.f32 %v6472_v45, 0.0  ;;  %p8608_p7 = pnand %p8607_p3, %p8601_p8 }
 0x4d0   : > { %v6471_v36 = vadd.f32 %v7348_v1, %v6375_v12  ;;  %v8085_v50 = vpop.f32.mrb[88].mxu0  ;;  %v6502_v19 = vmax.f32 %v6470_v25, 0.0 }
 0x4d1   : > { %v6505_v35 = vmax.f32 %v6473_v38, 0.0  ;;  %v6341_v31 = vmul.f32 %v8085_v50, %v10646_v54  ;;  %v6277_v18 = vpop.f32.mrb[89].mxu0 }
 0x4d2   : > { %v6503_v49 = vmax.f32 %v6471_v36, 0.0  ;;  %v6339_v15 = vmul.f32 %v10646_v54, %v6277_v18  ;;  %v8086_v40 = vpop.f32.mrb[90].mxu0 }
 0x4d3   : > { %v7427_v28 = vpack.c.bf16 %v6505_v35, %v6504_v43  ;;  %v6380_v22 = vadd.f32 %v10653_v56, %v6341_v31  ;;  %v6342_v7 = vmul.f32 %v8086_v40, %v10646_v54  ;;  %v6280_v24 = vpop.f32.mrb[91].mxu0 }
 0x4d4   : > { %v7422_v27 = vpack.c.bf16 %v6503_v49, %v6502_v19  ;;  %v6378_v16 = vadd.f32 %v10653_v56, %v6339_v15  ;;  %v6340_v26 = vmul.f32 %v10646_v54, %v6280_v24 }
 0x4d5   : > { %7474 = vst [vmem:[%s10673_s24 + $0x58] sm:$0xff] %v7427_v28   ;;  %v6476_v55 = vadd.f32 %v7359_v0, %v6380_v22  ;;  %v6381_v14 = vadd.f32 %v10653_v56, %v6342_v7 }
 0x4d6   : > { %7473 = vst [vmem:[%s10673_s24 + $0x50] sm:$0xff] %v7422_v27   ;;  %v6474_v5 = vadd.f32 %v7355_v21, %v6378_v16  ;;  %v6379_v4 = vadd.f32 %v10653_v56, %v6340_v26 }
 0x4d7   : > { %v6477_v33 = vadd.f32 %v7360_v37, %v6381_v14  ;;  %v6508_v61 = vmax.f32 %v6476_v55, 0.0 }
 0x4d8   : > { %v6475_v48 = vadd.f32 %v7356_v17, %v6379_v4  ;;  %v8089_v23 = vpop.f32.mrb[92].mxu0  ;;  %v6506_v34 = vmax.f32 %v6474_v5, 0.0 }
 0x4d9   : > { %v6509_v60 = vmax.f32 %v6477_v33, 0.0  ;;  %v6345_v46 = vmul.f32 %v8089_v23, %v10646_v54  ;;  %v6293_v63 = vpop.f32.mrb[93].mxu0 }
 0x4da   : > { %v6507_v8 = vmax.f32 %v6475_v48, 0.0  ;;  %v6343_v30 = vmul.f32 %v10646_v54, %v6293_v63  ;;  %v8090_v13 = vpop.f32.mrb[94].mxu0 }
 0x4db   : > { %v7437_v20 = vpack.c.bf16 %v6509_v60, %v6508_v61  ;;  %v6384_v62 = vadd.f32 %v10653_v56, %v6345_v46  ;;  %v6346_v9 = vmul.f32 %v8090_v13, %v10646_v54  ;;  %v6296_v59 = vpop.f32.mrb[95].mxu0 }
 0x4dc   : > { %v7432_v44 = vpack.c.bf16 %v6507_v8, %v6506_v34  ;;  %v6382_v11 = vadd.f32 %v10653_v56, %v6343_v30  ;;  %v6344_v6 = vmul.f32 %v10646_v54, %v6296_v59 }
 0x4dd   : > { %7476 = vst [vmem:[%s10673_s24 + $0x68] sm:$0xff] %v7437_v20   ;;  %v6480_v53 = vadd.f32 %v7367_v2, %v6384_v62  ;;  %v6385_v29 = vadd.f32 %v10653_v56, %v6346_v9 }
 0x4de   : > { %7475 = vst [vmem:[%s10673_s24 + $0x60] sm:$0xff] %v7432_v44   ;;  %v6478_v51 = vadd.f32 %v7363_v57, %v6382_v11  ;;  %v6383_v47 = vadd.f32 %v10653_v56, %v6344_v6 }
 0x4df   : > { %v6481_v10 = vadd.f32 %v7368_v39, %v6385_v29  ;;  %v6512_v45 = vmax.f32 %v6480_v53, 0.0 }
 0x4e0   : > { %v6479_v1 = vadd.f32 %v7364_v42, %v6383_v47  ;;  %v6510_v54 = vmax.f32 %v6478_v51, 0.0 }
 0x4e1   : > { %v6513_v3 = vmax.f32 %v6481_v10, 0.0 }
 0x4e2   : > { %v6511_v25 = vmax.f32 %v6479_v1, 0.0 }
 0x4e3   : > { %v7447_v12 = vpack.c.bf16 %v6513_v3, %v6512_v45 }
 0x4e4   : > { %v7442_v56 = vpack.c.bf16 %v6511_v25, %v6510_v54 }
 0x4e5   : > { %7478 = vst [vmem:[%s10673_s24 + $0x78] sm:$0xff] %v7447_v12  }
 0x4e6   : > { %7477 = vst [vmem:[%s10673_s24 + $0x70] sm:$0xff] %v7442_v56  }
 0x4e7   : > { %8611 = shalt.err (!%p8608_p7)
}
 0x4e8   : > { %s8612_s20 = scalar_lea.hbm %s10756_s25, 2048  ;;  %s8616_s24 = scalar_lea.hbm %s10814_s10, 4096 }
 0x4e9   : > { %p8613_p9 = scmp.ne.s32.totalorder %s10756_s25, %s8612_s20  ;;  %p8617_p5 = scmp.lt.u32.totalorder %s10756_s25, %s10814_s10 }
 0x4ea   : > { %p8618_p11 = scmp.lt.u32.totalorder %s8616_s24, %s8612_s20  ;;  %p8620_p4 = scmp.lt.u32.totalorder %s8612_s20, %s10756_s25 }
 0x4eb   : > { %p8614_p1 = pnand %p8613_p9, %p8827_p12 }
 0x4ec   : > { %p8619_p2 = por %p8618_p11, %p8617_p5 }
 0x4ed   : > { %p8615_p0 = pneg %p8614_p1 }
 0x4ee   : > { %p8621_p6 = por %p8620_p4, %p8619_p2 }
 0x4f0   : > { %p8622_p8 = pnand %p8621_p6, %p8615_p0 }
 0x4f2   : > { %8625 = shalt.err (!%p8622_p8)
}
 0x4f3   : > { %s8676_s29 = smov 64   ;;  %s8677_s26 = smov 4  }
 0x4f4   : > { %8357 = dma.vmem_to_hbm [thread:$0]  (%p8827_p12), %s10758_s27, 2048, %s10756_s25, %s6675_s17, %s8676_s29, %s8676_s29, %s8677_s26  }
 0x4f5 PF: > { %s10945_s19 = sld [smem:[#allocation12_spill]]  ;;  %s10946_s30 = sld [smem:[#allocation13_spill]] }
 0x4f6   : > { %p10948_p13 = scmp.ge.s32.totalorder %s8668_s16, 2 }
 0x4fb   : > { %s6703_s13 = sand.u32 1, %s10945_s19   ;;  %p10947_p10 = scmp.ne.s32.totalorder %s10946_s30, 0 }
 0x4fc   : > { %s6704_s20 = scalar_lea.sflag [#allocation5], %s6703_s13 }
 0x4fd   : > { %p8368_p3 = pnand %p10948_p13, %p10947_p10 }
 0x4ff   : > { %8651 = dma.done.wait (!%p8368_p3), %s6704_s20, 2048  }
 0x500   : > { %8653 = vsyncadd (!%p8368_p3), %s6704_s20, 4294965248  ;;  %s10949_s16 = sld [smem:[#allocation14_spill]]  ;;  %s10950_s13 = smov %s8660_s14 }
 0x501   : > { %s10951_s14 = smov %s8664_s15  ;;  %s10952_s15 = smov %s8823_s11 }
 0x506   : > { %p24_p7 = scmp.ge.s32.totalorder %s10949_s16, 4  }
 0x508   :  { %26 = sbr.rel (!%p24_p7) target bundleno = 6 (0x6), region = 119 }
 0x50f   :  { %6709 = vsyncpa [#allocation4], 1 }
 0x510   :  { %6711 = vsyncpa [#allocation4 + $0x1], 1 }
 0x511   :  { %6712 = vsyncpa [#allocation7], 1 }
 0x512   :  { %6713 = vsyncpa [#allocation5], 1 }
 0x513   :  { %6715 = vsyncpa [#allocation5 + $0x1], 1 }

</bundles_post_ra>
